<compile_context>
chip_gen: v6e
topology: v6e:2x2x1
jax: 0.10.0
libtpu: 0.0.40
codegen_flags: <defaults>
</compile_context>

<pallas_src>
import functools

import numpy as np
import jax
import jax.numpy as jnp
from jax.experimental import pallas as pl
from jax.experimental.pallas import tpu as pltpu

N_ETYPES = 7  # {'onset','consecutive','during','rests','consecutive_rev','during_rev','rests_rev'}


def _round_up(x, m):
    return ((x + m - 1) // m) * m


def _node_tiling(n):
    """Padded node count and (dst, src) tile sizes.

    Chosen so one adjacency block (all 7 etypes, int8) is a few MiB (per-step
    DMA >> grid-step overhead) while the full working set stays under v7x's
    64 MiB VMEM; v5e/v6e (128 MiB) fit trivially.
    """
    n_pad = _round_up(max(n, 1), 128)
    if n_pad <= 128:
        return 128, 128, 128
    if n_pad <= 1024:
        n_pad = _round_up(n_pad, 256)
        return n_pad, n_pad // 2, n_pad       # >=2 dst tiles so v7x megacore splits
    n_pad = _round_up(n_pad, 1024)
    return n_pad, 512, 1024


# ---------------------------------------------------------------------------
# Optional single-buffering of constant-index operands (saves VMEM on v7x).
# ---------------------------------------------------------------------------
_USE_BUFFERED = False


def probe_buffered_specs():
    """Enable pipeline_mode=pl.Buffered(1) for constant-index operands if this
    jax/Mosaic build supports it.  Must be called outside jit (runs a tiny
    probe kernel); falls back silently to default double-buffering."""
    global _USE_BUFFERED
    try:
        def _k(x_ref, o_ref):
            o_ref[...] = x_ref[...]

        y = pl.pallas_call(
            _k,
            out_shape=jax.ShapeDtypeStruct((8, 128), jnp.float32),
            grid=(1,),
            in_specs=[pl.BlockSpec((8, 128), lambda i: (0, 0),
                                   pipeline_mode=pl.Buffered(1))],
            out_specs=pl.BlockSpec((8, 128), lambda i: (0, 0)),
        )(jnp.zeros((8, 128), jnp.float32))
        jax.block_until_ready(y)
        _USE_BUFFERED = True
    except Exception:
        _USE_BUFFERED = False
    return _USE_BUFFERED


def _const_spec(block_shape, index_map):
    if _USE_BUFFERED:
        return pl.BlockSpec(block_shape, index_map, pipeline_mode=pl.Buffered(1))
    return pl.BlockSpec(block_shape, index_map)


# ---------------------------------------------------------------------------
# Kernel
# ---------------------------------------------------------------------------
def hetero_sage_layer_kernel(lst_ref, cnt_ref,                 # scalar-prefetch (SMEM)
                             x_dst_ref, x_src_ref, a_ref, scale_ref,
                             wn_ref, ws_ref, b_ref,            # inputs
                             o_ref,                            # output
                             acc_ref,                          # f32 VMEM accumulator
                             *, n_etypes, apply_act_norm, xw_first):
    """One HeteroSageConvLayer.

    Grid = (dst_tile ["parallel"], compacted nonzero src tile ["arbitrary"]).
    All 7 edge types are unrolled in the body; acc_ref holds the f32 running
    sum; the output block is written once in the epilogue.
    """
    i = pl.program_id(0)
    s = pl.program_id(1)

    @pl.when(s == 0)
    def _init():
        # Hoisted self term + bias: x_dst @ mean_t(W_self) + mean_t(b).
        acc_ref[...] = (
            jnp.dot(x_dst_ref[...], ws_ref[...],
                    preferred_element_type=jnp.float32) + b_ref[...])

    # Neighbor aggregation over this (dst tile, src tile) block, all etypes.
    # Steps past this dst tile's nonzero-block count are schedule padding that
    # re-points at the previous block (no new DMA) and must not accumulate.
    @pl.when(s < cnt_ref[i])
    def _accumulate():
        x_src = x_src_ref[...]                           # [tile_src, Fin_p] bf16
        acc = acc_ref[...]
        for t in range(n_etypes):                        # statically unrolled
            a_t = a_ref[t].astype(jnp.bfloat16)          # exact 0/1 (int8 in HBM)
            if xw_first:
                # contract the big NxN matmul over Fout (only when n_dst == 1,
                # otherwise x_src @ Wn would be recomputed per dst tile)
                xw = jnp.dot(x_src, wn_ref[t],
                             preferred_element_type=jnp.float32)
                contrib = jnp.dot(a_t, xw.astype(jnp.bfloat16),
                                  preferred_element_type=jnp.float32)
            else:
                agg = jnp.dot(a_t, x_src, preferred_element_type=jnp.float32)
                contrib = jnp.dot(agg.astype(jnp.bfloat16), wn_ref[t],
                                  preferred_element_type=jnp.float32)
            acc = acc + scale_ref[t] * contrib           # exact f32 1/deg row scale
        acc_ref[...] = acc

    @pl.when(s == pl.num_programs(1) - 1)
    def _epilogue():
        h = acc_ref[...]
        if apply_act_norm:
            h = jnp.maximum(h, 0.0)                                   # F.relu
            nrm = jnp.sqrt(jnp.sum(h * h, axis=-1, keepdims=True))
            h = h / jnp.maximum(nrm, 1e-12)                           # F.normalize(p=2, dim=1)
        o_ref[...] = h.astype(o_ref.dtype)


def hetero_sage_layer(x_pad, graph, w_neigh, w_self_mean, b_mean, *,
                      apply_act_norm, out_dtype):
    """x_pad: [Np, Fin_p] bf16; graph: prepared graph dict;
    w_neigh: [T, Fin_p, Fout_p] bf16 (pre-scaled by 1/T);
    w_self_mean: [Fin_p, Fout_p] bf16; b_mean: [1, Fout_p] f32."""
    n_pad, fin_p = x_pad.shape
    n_etypes, wfin, fout_p = w_neigh.shape
    assert wfin == fin_p
    tile_dst, tile_src = graph["tile_dst"], graph["tile_src"]
    n_dst = n_pad // tile_dst
    max_cnt = graph["max_cnt"]
    xw_first = (fout_p <= fin_p) and (n_dst == 1)

    kernel = functools.partial(
        hetero_sage_layer_kernel, n_etypes=n_etypes,
        apply_act_norm=apply_act_norm, xw_first=xw_first)

    return pl.pallas_call(
        kernel,
        out_shape=jax.ShapeDtypeStruct((n_pad, fout_p), out_dtype),
        grid_spec=pltpu.PrefetchScalarGridSpec(
            num_scalar_prefetch=2,              # tile_list, tile_cnt -> SMEM
            grid=(n_dst, max_cnt),
            in_specs=[
                # x rows at the dst tile (hoisted self term)
                pl.BlockSpec((tile_dst, fin_p),
                             lambda i, s, lst, cnt: (i, 0)),
                # x rows at the data-dependent nonzero src tile
                pl.BlockSpec((tile_src, fin_p),
                             lambda i, s, lst, cnt: (lst[i, s], 0)),
                # 0/1 int8 adjacency block, all 7 etypes -- the dominant HBM
                # stream; all-zero blocks are never fetched (compacted schedule)
                pl.BlockSpec((n_etypes, tile_dst, tile_src),
                             lambda i, s, lst, cnt: (0, i, lst[i, s])),
                # exact 1/deg row scale for this dst tile
                pl.BlockSpec((n_etypes, tile_dst, 1),
                             lambda i, s, lst, cnt: (0, i, 0)),
                # per-edge-type neighbor weights, loaded once (VMEM-resident)
                _const_spec((n_etypes, fin_p, fout_p),
                            lambda i, s, lst, cnt: (0, 0, 0)),
                # hoisted mean self weight / bias, VMEM-resident
                _const_spec((fin_p, fout_p), lambda i, s, lst, cnt: (0, 0)),
                _const_spec((1, fout_p), lambda i, s, lst, cnt: (0, 0)),
            ],
            out_specs=pl.BlockSpec((tile_dst, fout_p),
                                   lambda i, s, lst, cnt: (i, 0)),
            scratch_shapes=[pltpu.VMEM((tile_dst, fout_p), jnp.float32)],
        ),
        compiler_params=pltpu.CompilerParams(
            dimension_semantics=("parallel", "arbitrary"),
            # fits v7x's 64 MiB VMEM with margin; v5e/v6e have 128 MiB
            vmem_limit_bytes=52 * 1024 * 1024,
        ),
    )(graph["tile_list"], graph["tile_cnt"], x_pad, x_pad,
      graph["a01"], graph["inv_deg"], w_neigh, w_self_mean, b_mean)


# ---------------------------------------------------------------------------
# Graph preparation (host side, outside jit: the block-sparse tile schedule
# determines a static grid extent).
# ---------------------------------------------------------------------------
def prepare_graph(edge_index, edge_type, num_nodes, num_etypes=N_ETYPES):
    n_pad, tile_dst, tile_src = _node_tiling(num_nodes)
    src = np.asarray(edge_index[0])
    dst = np.asarray(edge_index[1])
    et = np.asarray(edge_type)

    a01 = np.zeros((num_etypes, n_pad, n_pad), np.int8)    # A[t, dst, src] in {0,1}
    a01[et, dst, src] = 1                                  # dedups parallel edges
    deg = a01.sum(axis=-1, keepdims=True).astype(np.float32)
    inv_deg = 1.0 / np.maximum(deg, 1.0)                   # isolated nodes -> zero agg

    # Block-sparse schedule: nonzero (dst_tile, src_tile) adjacency blocks.
    n_dst, n_src = n_pad // tile_dst, n_pad // tile_src
    occ = a01.reshape(num_etypes, n_dst, tile_dst, n_src, tile_src).any(axis=(0, 2, 4))
    cnt = occ.sum(axis=1).astype(np.int32)
    max_cnt = max(int(cnt.max()) if cnt.size else 0, 1)
    lst = np.zeros((n_dst, max_cnt), np.int32)
    for i in range(n_dst):
        nz = np.nonzero(occ[i])[0]
        k = len(nz)
        if k:
            lst[i, :k] = nz
            lst[i, k:] = nz[-1]        # padding repeats last index -> no new DMA

    return dict(
        a01=jnp.asarray(a01),
        inv_deg=jnp.asarray(inv_deg),
        tile_list=jnp.asarray(lst),
        tile_cnt=jnp.asarray(cnt),
        n_pad=n_pad, tile_dst=tile_dst, tile_src=tile_src, max_cnt=max_cnt,
        num_nodes=num_nodes, num_etypes=num_etypes)


# ---------------------------------------------------------------------------
# Model
# ---------------------------------------------------------------------------
def xavier_uniform(key, fan_in, fan_out, shape):
    gain = jnp.sqrt(2.0)                                   # calculate_gain('relu')
    bound = gain * jnp.sqrt(6.0 / (fan_in + fan_out))
    return jax.random.uniform(key, shape, jnp.float32, -bound, bound)


def init_hgcn_params(key, in_feats, n_hidden, out_feats, n_layers, n_etypes=N_ETYPES):
    dims = [(in_feats, n_hidden)] + [(n_hidden, n_hidden)] * (n_layers - 1) + [(n_hidden, out_feats)]
    params = []
    for (fi, fo) in dims:
        key, ks, kn = jax.random.split(key, 3)
        params.append(dict(
            w_self=xavier_uniform(ks, fi, fo, (n_etypes, fi, fo)),
            w_neigh=xavier_uniform(kn, fi, fo, (n_etypes, fi, fo)),
            bias=jnp.zeros((n_etypes, 1, fo), jnp.float32),
        ))
    return params


def hgcn_forward(x, graph, params):
    n = graph["num_nodes"]
    n_pad = graph["n_pad"]
    assert x.shape[0] == n
    in_feats = x.shape[1]
    fin_p = _round_up(in_feats, 128)
    # Single bf16 cast + pad of the input; intermediate layers emit bf16 directly.
    h = jnp.pad(x, ((0, n_pad - n), (0, fin_p - in_feats))).astype(jnp.bfloat16)

    last = len(params) - 1
    for idx, p in enumerate(params):
        n_etypes, fi, fo = p["w_self"].shape
        fi_p, fo_p = _round_up(fi, 128), _round_up(fo, 128)
        ws_mean = jnp.pad(p["w_self"].mean(axis=0),
                          ((0, fi_p - fi), (0, fo_p - fo))).astype(jnp.bfloat16)
        wn = jnp.pad(p["w_neigh"] / n_etypes,
                     ((0, 0), (0, fi_p - fi), (0, fo_p - fo))).astype(jnp.bfloat16)
        b_mean = jnp.pad(p["bias"].mean(axis=0), ((0, 0), (0, fo_p - fo)))
        h = hetero_sage_layer(
            h, graph, wn, ws_mean, b_mean,
            apply_act_norm=(idx != last),
            out_dtype=jnp.float32 if idx == last else jnp.bfloat16)
        # dropout: identity (eval mode)
    out_feats = params[-1]["w_self"].shape[-1]
    return h[:n, :out_feats].astype(jnp.float32)


# ---------------------------------------------------------------------------
# Pure-JAX reference (same math, unpadded, f32)
# ---------------------------------------------------------------------------
def build_norm_adj(edge_index, edge_type, num_nodes, num_etypes):
    src, dst = edge_index[0], edge_index[1]
    a = jnp.zeros((num_etypes, num_nodes, num_nodes), jnp.float32)
    a = a.at[edge_type, dst, src].add(1.0)
    a = (a > 0).astype(jnp.float32)
    deg = a.sum(axis=-1, keepdims=True)
    return a / jnp.maximum(deg, 1.0)


def hgcn_reference(x, a_norm, params):
    h = x
    last = len(params) - 1
    n_etypes = a_norm.shape[0]
    for idx, p in enumerate(params):
        outs = []
        for t in range(n_etypes):
            agg = a_norm[t] @ h
            outs.append(h @ p["w_self"][t] + agg @ p["w_neigh"][t] + p["bias"][t])
        h = jnp.stack(outs).mean(axis=0)
        if idx != last:
            h = jnp.maximum(h, 0.0)
            nrm = jnp.sqrt(jnp.sum(h * h, axis=-1, keepdims=True))
            h = h / jnp.maximum(nrm, 1e-12)
    return h


def _run_case(key, n_nodes, n_edges, in_feats, n_hidden, out_feats, n_layers):
    k_x, k_src, k_dst, k_et, k_p = jax.random.split(key, 5)
    x = jax.random.normal(k_x, (n_nodes, in_feats), jnp.float32)
    edge_index = jnp.stack([jax.random.randint(k_src, (n_edges,), 0, n_nodes),
                            jax.random.randint(k_dst, (n_edges,), 0, n_nodes)], axis=0)
    edge_type = jax.random.randint(k_et, (n_edges,), 0, N_ETYPES)
    params = init_hgcn_params(k_p, in_feats, n_hidden, out_feats, n_layers)

    graph = prepare_graph(edge_index, edge_type, n_nodes)
    fwd = jax.jit(lambda xv, pv: hgcn_forward(xv, graph, pv))
    out = fwd(x, params)
    jax.block_until_ready(out)
    assert out.shape == (n_nodes, out_feats) and out.dtype == jnp.float32

    a_norm = build_norm_adj(edge_index, edge_type, n_nodes, N_ETYPES)
    ref = hgcn_reference(x, a_norm, params)
    err = float(jnp.max(jnp.abs(out - ref)) / (jnp.max(jnp.abs(ref)) + 1e-6))
    assert err < 5e-2, f"max relative error vs f32 reference too large: {err}"
    return err


if __name__ == "__main__":
    probe_buffered_specs()   # enable single-buffered weight specs if supported

    key = jax.random.PRNGKey(0)
    k1, k2 = jax.random.split(key)

    # Case 1: tiny graph -> single tile, xw-first path.
    _run_case(k1, n_nodes=16, n_edges=64,
              in_feats=16, n_hidden=32, out_feats=8, n_layers=2)

    # Case 2: multi-tile graph -> parallel dst tiles, compacted src-tile
    # schedule, count-gated skip of all-padding tiles, agg-first path.
    _run_case(k2, n_nodes=1200, n_edges=6000,
              in_feats=24, n_hidden=48, out_feats=10, n_layers=2)

    print("KERNEL_OK")
</pallas_src>

<mosaic_0001>
module attributes {stable_mosaic.version = 11 : i64} {
  func.func @_k(%arg0: i32, %arg1: memref<8x128xf32, #tpu.memory_space<vmem>>, %arg2: memref<8x128xf32, #tpu.memory_space<vmem>>) attributes {dimension_semantics = [#tpu.dimension_semantics<arbitrary>], iteration_bounds = array<i64: 1>, scalar_prefetch = 0 : i64, scratch_operands = 0 : i64, tpu.core_type = #tpu.core_type<tc>, window_params = [{pipeline_mode = #tpu.pipeline_mode<synchronous>, transform_indices = @transform_0, window_bounds = array<i64: 8, 128>}, {pipeline_mode = #tpu.pipeline_mode<synchronous>, transform_indices = @transform_1, window_bounds = array<i64: 8, 128>}]} {
    %c0 = arith.constant 0 : index
    %c0_0 = arith.constant 0 : index
    %0 = vector.load %arg1[%c0, %c0_0] : memref<8x128xf32, #tpu.memory_space<vmem>>, vector<8x128xf32>
    %c0_1 = arith.constant 0 : index
    %c0_2 = arith.constant 0 : index
    %1 = vector.load %arg2[%c0_1, %c0_2] : memref<8x128xf32, #tpu.memory_space<vmem>>, vector<8x128xf32>
    tpu.vector_store %arg2[%c0_1, %c0_2], %0 {strides = array<i32>} : memref<8x128xf32, #tpu.memory_space<vmem>>, vector<8x128xf32>,
    return
  }
  func.func @transform_0(%arg0: i32) -> (i32, i32) {
    %c0_i32 = arith.constant 0 : i32
    %c0_i32_0 = arith.constant 0 : i32
    %c0_i32_1 = arith.constant 0 : i32
    return %c0_i32, %c0_i32_0 : i32, i32
  }
  func.func @transform_1(%arg0: i32) -> (i32, i32) {
    %c0_i32 = arith.constant 0 : i32
    %c0_i32_0 = arith.constant 0 : i32
    %c0_i32_1 = arith.constant 0 : i32
    return %c0_i32, %c0_i32_0 : i32, i32
  }
}

module attributes {stable_mosaic.version = 11 : i64} {
  func.func @hetero_sage_layer_kernel(%arg0: i32, %arg1: i32, %arg2: memref<1x1xi32, #tpu.memory_space<smem>>, %arg3: memref<1xi32, #tpu.memory_space<smem>>, %arg4: memref<128x128xbf16, #tpu.memory_space<vmem>>, %arg5: memref<128x128xbf16, #tpu.memory_space<vmem>>, %arg6: memref<7x128x128xi8, #tpu.memory_space<vmem>>, %arg7: memref<7x128x1xf32, #tpu.memory_space<vmem>>, %arg8: memref<7x128x128xbf16, #tpu.memory_space<vmem>>, %arg9: memref<128x128xbf16, #tpu.memory_space<vmem>>, %arg10: memref<1x128xf32, #tpu.memory_space<vmem>>, %arg11: memref<128x128xbf16, #tpu.memory_space<vmem>>, %arg12: memref<128x128xf32, #tpu.memory_space<vmem>>) attributes {dimension_semantics = [#tpu.dimension_semantics<parallel>, #tpu.dimension_semantics<arbitrary>], iteration_bounds = array<i64: 1, 1>, scalar_prefetch = 2 : i64, scratch_operands = 1 : i64, tpu.core_type = #tpu.core_type<tc>, window_params = [{transform_indices = @transform_0, window_bounds = array<i64: 128, 128>}, {transform_indices = @transform_1, window_bounds = array<i64: 128, 128>}, {transform_indices = @transform_2, window_bounds = array<i64: 7, 128, 128>}, {transform_indices = @transform_3, window_bounds = array<i64: 7, 128, 1>}, {pipeline_mode = #tpu.pipeline_mode<synchronous>, transform_indices = @transform_4, window_bounds = array<i64: 7, 128, 128>}, {pipeline_mode = #tpu.pipeline_mode<synchronous>, transform_indices = @transform_5, window_bounds = array<i64: 128, 128>}, {pipeline_mode = #tpu.pipeline_mode<synchronous>, transform_indices = @transform_6, window_bounds = array<i64: 1, 128>}, {transform_indices = @transform_7, window_bounds = array<i64: 128, 128>}]} {
    %c0_i32 = arith.constant 0 : i32
    %0 = arith.cmpi eq, %arg1, %c0_i32 : i32
    %1 = arith.extui %0 : i1 to i32
    %c0_i32_0 = arith.constant 0 : i32
    %2 = arith.cmpi ne, %1, %c0_i32_0 : i32
    scf.if %2 {
      %c0 = arith.constant 0 : index
      %c0_4 = arith.constant 0 : index
      %11 = vector.load %arg4[%c0, %c0_4] : memref<128x128xbf16, #tpu.memory_space<vmem>>, vector<128x128xbf16>
      %c0_5 = arith.constant 0 : index
      %c0_6 = arith.constant 0 : index
      %12 = vector.load %arg9[%c0_5, %c0_6] : memref<128x128xbf16, #tpu.memory_space<vmem>>, vector<128x128xbf16>
      %cst = arith.constant dense<0.000000e+00> : vector<128x128xf32>
      %13 = tpu.matmul %11, %12, %cst {dimension_numbers = #tpu.dot_dimension_numbers<[1], [0], [0], [1], [0, 0, 1, 1], [], []>} : vector<128x128xbf16>, vector<128x128xbf16>, vector<128x128xf32> -> vector<128x128xf32>
      %c0_7 = arith.constant 0 : index
      %c0_8 = arith.constant 0 : index
      %14 = vector.load %arg10[%c0_7, %c0_8] : memref<1x128xf32, #tpu.memory_space<vmem>>, vector<1x128xf32>
      %15 = vector.broadcast %14 : vector<1x128xf32> to vector<128x128xf32>
      %16 = arith.addf %13, %15 : vector<128x128xf32>
      %c0_9 = arith.constant 0 : index
      %c0_10 = arith.constant 0 : index
      %17 = vector.load %arg12[%c0_9, %c0_10] : memref<128x128xf32, #tpu.memory_space<vmem>>, vector<128x128xf32>
      tpu.vector_store %arg12[%c0_9, %c0_10], %16 {strides = array<i32>} : memref<128x128xf32, #tpu.memory_space<vmem>>, vector<128x128xf32>,
    } else {
    }
    %3 = arith.index_cast %arg0 : i32 to index
    %4 = memref.load %arg3[%3] : memref<1xi32, #tpu.memory_space<smem>>
    %5 = arith.cmpi slt, %arg1, %4 : i32
    %6 = arith.extui %5 : i1 to i32
    %c0_i32_1 = arith.constant 0 : i32
    %7 = arith.cmpi ne, %6, %c0_i32_1 : i32
    scf.if %7 {
      %c0 = arith.constant 0 : index
      %c0_4 = arith.constant 0 : index
      %11 = vector.load %arg5[%c0, %c0_4] : memref<128x128xbf16, #tpu.memory_space<vmem>>, vector<128x128xbf16>
      %c0_5 = arith.constant 0 : index
      %c0_6 = arith.constant 0 : index
      %12 = vector.load %arg12[%c0_5, %c0_6] : memref<128x128xf32, #tpu.memory_space<vmem>>, vector<128x128xf32>
      %c0_7 = arith.constant 0 : index
      %c0_8 = arith.constant 0 : index
      %c0_9 = arith.constant 0 : index
      %13 = vector.load %arg6[%c0_7, %c0_8, %c0_9] : memref<7x128x128xi8, #tpu.memory_space<vmem>>, vector<1x128x128xi8>
      %14 = vector.shape_cast %13 : vector<1x128x128xi8> to vector<128x128xi8>
      %15 = arith.sitofp %14 : vector<128x128xi8> to vector<128x128xbf16>
      %c0_10 = arith.constant 0 : index
      %c0_11 = arith.constant 0 : index
      %c0_12 = arith.constant 0 : index
      %16 = vector.load %arg8[%c0_10, %c0_11, %c0_12] : memref<7x128x128xbf16, #tpu.memory_space<vmem>>, vector<1x128x128xbf16>
      %17 = vector.shape_cast %16 : vector<1x128x128xbf16> to vector<128x128xbf16>
      %cst = arith.constant dense<0.000000e+00> : vector<128x128xf32>
      %18 = tpu.matmul %11, %17, %cst {dimension_numbers = #tpu.dot_dimension_numbers<[1], [0], [0], [1], [0, 0, 1, 1], [], []>} : vector<128x128xbf16>, vector<128x128xbf16>, vector<128x128xf32> -> vector<128x128xf32>
      %19 = arith.truncf %18 : vector<128x128xf32> to vector<128x128xbf16>
      %cst_13 = arith.constant dense<0.000000e+00> : vector<128x128xf32>
      %20 = tpu.matmul %15, %19, %cst_13 {dimension_numbers = #tpu.dot_dimension_numbers<[1], [0], [0], [1], [0, 0, 1, 1], [], []>} : vector<128x128xbf16>, vector<128x128xbf16>, vector<128x128xf32> -> vector<128x128xf32>
      %c0_14 = arith.constant 0 : index
      %c0_15 = arith.constant 0 : index
      %c0_16 = arith.constant 0 : index
      %21 = vector.load %arg7[%c0_14, %c0_15, %c0_16] : memref<7x128x1xf32, #tpu.memory_space<vmem>>, vector<1x128x1xf32>
      %22 = vector.shape_cast %21 : vector<1x128x1xf32> to vector<128x1xf32>
      %23 = vector.broadcast %22 : vector<128x1xf32> to vector<128x128xf32>
      %24 = arith.mulf %23, %20 : vector<128x128xf32>
      %25 = arith.addf %12, %24 : vector<128x128xf32>
      %c1 = arith.constant 1 : index
      %c0_17 = arith.constant 0 : index
      %c0_18 = arith.constant 0 : index
      %26 = vector.load %arg6[%c1, %c0_17, %c0_18] : memref<7x128x128xi8, #tpu.memory_space<vmem>>, vector<1x128x128xi8>
      %27 = vector.shape_cast %26 : vector<1x128x128xi8> to vector<128x128xi8>
      %28 = arith.sitofp %27 : vector<128x128xi8> to vector<128x128xbf16>
      %c1_19 = arith.constant 1 : index
      %c0_20 = arith.constant 0 : index
      %c0_21 = arith.constant 0 : index
      %29 = vector.load %arg8[%c1_19, %c0_20, %c0_21] : memref<7x128x128xbf16, #tpu.memory_space<vmem>>, vector<1x128x128xbf16>
      %30 = vector.shape_cast %29 : vector<1x128x128xbf16> to vector<128x128xbf16>
      %cst_22 = arith.constant dense<0.000000e+00> : vector<128x128xf32>
      %31 = tpu.matmul %11, %30, %cst_22 {dimension_numbers = #tpu.dot_dimension_numbers<[1], [0], [0], [1], [0, 0, 1, 1], [], []>} : vector<128x128xbf16>, vector<128x128xbf16>, vector<128x128xf32> -> vector<128x128xf32>
      %32 = arith.truncf %31 : vector<128x128xf32> to vector<128x128xbf16>
      %cst_23 = arith.constant dense<0.000000e+00> : vector<128x128xf32>
      %33 = tpu.matmul %28, %32, %cst_23 {dimension_numbers = #tpu.dot_dimension_numbers<[1], [0], [0], [1], [0, 0, 1, 1], [], []>} : vector<128x128xbf16>, vector<128x128xbf16>, vector<128x128xf32> -> vector<128x128xf32>
      %c1_24 = arith.constant 1 : index
      %c0_25 = arith.constant 0 : index
      %c0_26 = arith.constant 0 : index
      %34 = vector.load %arg7[%c1_24, %c0_25, %c0_26] : memref<7x128x1xf32, #tpu.memory_space<vmem>>, vector<1x128x1xf32>
      %35 = vector.shape_cast %34 : vector<1x128x1xf32> to vector<128x1xf32>
      %36 = vector.broadcast %35 : vector<128x1xf32> to vector<128x128xf32>
      %37 = arith.mulf %36, %33 : vector<128x128xf32>
      %38 = arith.addf %25, %37 : vector<128x128xf32>
      %c2 = arith.constant 2 : index
      %c0_27 = arith.constant 0 : index
      %c0_28 = arith.constant 0 : index
      %39 = vector.load %arg6[%c2, %c0_27, %c0_28] : memref<7x128x128xi8, #tpu.memory_space<vmem>>, vector<1x128x128xi8>
      %40 = vector.shape_cast %39 : vector<1x128x128xi8> to vector<128x128xi8>
      %41 = arith.sitofp %40 : vector<128x128xi8> to vector<128x128xbf16>
      %c2_29 = arith.constant 2 : index
      %c0_30 = arith.constant 0 : index
      %c0_31 = arith.constant 0 : index
      %42 = vector.load %arg8[%c2_29, %c0_30, %c0_31] : memref<7x128x128xbf16, #tpu.memory_space<vmem>>, vector<1x128x128xbf16>
      %43 = vector.shape_cast %42 : vector<1x128x128xbf16> to vector<128x128xbf16>
      %cst_32 = arith.constant dense<0.000000e+00> : vector<128x128xf32>
      %44 = tpu.matmul %11, %43, %cst_32 {dimension_numbers = #tpu.dot_dimension_numbers<[1], [0], [0], [1], [0, 0, 1, 1], [], []>} : vector<128x128xbf16>, vector<128x128xbf16>, vector<128x128xf32> -> vector<128x128xf32>
      %45 = arith.truncf %44 : vector<128x128xf32> to vector<128x128xbf16>
      %cst_33 = arith.constant dense<0.000000e+00> : vector<128x128xf32>
      %46 = tpu.matmul %41, %45, %cst_33 {dimension_numbers = #tpu.dot_dimension_numbers<[1], [0], [0], [1], [0, 0, 1, 1], [], []>} : vector<128x128xbf16>, vector<128x128xbf16>, vector<128x128xf32> -> vector<128x128xf32>
      %c2_34 = arith.constant 2 : index
      %c0_35 = arith.constant 0 : index
      %c0_36 = arith.constant 0 : index
      %47 = vector.load %arg7[%c2_34, %c0_35, %c0_36] : memref<7x128x1xf32, #tpu.memory_space<vmem>>, vector<1x128x1xf32>
      %48 = vector.shape_cast %47 : vector<1x128x1xf32> to vector<128x1xf32>
      %49 = vector.broadcast %48 : vector<128x1xf32> to vector<128x128xf32>
      %50 = arith.mulf %49, %46 : vector<128x128xf32>
      %51 = arith.addf %38, %50 : vector<128x128xf32>
      %c3 = arith.constant 3 : index
      %c0_37 = arith.constant 0 : index
      %c0_38 = arith.constant 0 : index
      %52 = vector.load %arg6[%c3, %c0_37, %c0_38] : memref<7x128x128xi8, #tpu.memory_space<vmem>>, vector<1x128x128xi8>
      %53 = vector.shape_cast %52 : vector<1x128x128xi8> to vector<128x128xi8>
      %54 = arith.sitofp %53 : vector<128x128xi8> to vector<128x128xbf16>
      %c3_39 = arith.constant 3 : index
      %c0_40 = arith.constant 0 : index
      %c0_41 = arith.constant 0 : index
      %55 = vector.load %arg8[%c3_39, %c0_40, %c0_41] : memref<7x128x128xbf16, #tpu.memory_space<vmem>>, vector<1x128x128xbf16>
      %56 = vector.shape_cast %55 : vector<1x128x128xbf16> to vector<128x128xbf16>
      %cst_42 = arith.constant dense<0.000000e+00> : vector<128x128xf32>
      %57 = tpu.matmul %11, %56, %cst_42 {dimension_numbers = #tpu.dot_dimension_numbers<[1], [0], [0], [1], [0, 0, 1, 1], [], []>} : vector<128x128xbf16>, vector<128x128xbf16>, vector<128x128xf32> -> vector<128x128xf32>
      %58 = arith.truncf %57 : vector<128x128xf32> to vector<128x128xbf16>
      %cst_43 = arith.constant dense<0.000000e+00> : vector<128x128xf32>
      %59 = tpu.matmul %54, %58, %cst_43 {dimension_numbers = #tpu.dot_dimension_numbers<[1], [0], [0], [1], [0, 0, 1, 1], [], []>} : vector<128x128xbf16>, vector<128x128xbf16>, vector<128x128xf32> -> vector<128x128xf32>
      %c3_44 = arith.constant 3 : index
      %c0_45 = arith.constant 0 : index
      %c0_46 = arith.constant 0 : index
      %60 = vector.load %arg7[%c3_44, %c0_45, %c0_46] : memref<7x128x1xf32, #tpu.memory_space<vmem>>, vector<1x128x1xf32>
      %61 = vector.shape_cast %60 : vector<1x128x1xf32> to vector<128x1xf32>
      %62 = vector.broadcast %61 : vector<128x1xf32> to vector<128x128xf32>
      %63 = arith.mulf %62, %59 : vector<128x128xf32>
      %64 = arith.addf %51, %63 : vector<128x128xf32>
      %c4 = arith.constant 4 : index
      %c0_47 = arith.constant 0 : index
      %c0_48 = arith.constant 0 : index
      %65 = vector.load %arg6[%c4, %c0_47, %c0_48] : memref<7x128x128xi8, #tpu.memory_space<vmem>>, vector<1x128x128xi8>
      %66 = vector.shape_cast %65 : vector<1x128x128xi8> to vector<128x128xi8>
      %67 = arith.sitofp %66 : vector<128x128xi8> to vector<128x128xbf16>
      %c4_49 = arith.constant 4 : index
      %c0_50 = arith.constant 0 : index
      %c0_51 = arith.constant 0 : index
      %68 = vector.load %arg8[%c4_49, %c0_50, %c0_51] : memref<7x128x128xbf16, #tpu.memory_space<vmem>>, vector<1x128x128xbf16>
      %69 = vector.shape_cast %68 : vector<1x128x128xbf16> to vector<128x128xbf16>
      %cst_52 = arith.constant dense<0.000000e+00> : vector<128x128xf32>
      %70 = tpu.matmul %11, %69, %cst_52 {dimension_numbers = #tpu.dot_dimension_numbers<[1], [0], [0], [1], [0, 0, 1, 1], [], []>} : vector<128x128xbf16>, vector<128x128xbf16>, vector<128x128xf32> -> vector<128x128xf32>
      %71 = arith.truncf %70 : vector<128x128xf32> to vector<128x128xbf16>
      %cst_53 = arith.constant dense<0.000000e+00> : vector<128x128xf32>
      %72 = tpu.matmul %67, %71, %cst_53 {dimension_numbers = #tpu.dot_dimension_numbers<[1], [0], [0], [1], [0, 0, 1, 1], [], []>} : vector<128x128xbf16>, vector<128x128xbf16>, vector<128x128xf32> -> vector<128x128xf32>
      %c4_54 = arith.constant 4 : index
      %c0_55 = arith.constant 0 : index
      %c0_56 = arith.constant 0 : index
      %73 = vector.load %arg7[%c4_54, %c0_55, %c0_56] : memref<7x128x1xf32, #tpu.memory_space<vmem>>, vector<1x128x1xf32>
      %74 = vector.shape_cast %73 : vector<1x128x1xf32> to vector<128x1xf32>
      %75 = vector.broadcast %74 : vector<128x1xf32> to vector<128x128xf32>
      %76 = arith.mulf %75, %72 : vector<128x128xf32>
      %77 = arith.addf %64, %76 : vector<128x128xf32>
      %c5 = arith.constant 5 : index
      %c0_57 = arith.constant 0 : index
      %c0_58 = arith.constant 0 : index
      %78 = vector.load %arg6[%c5, %c0_57, %c0_58] : memref<7x128x128xi8, #tpu.memory_space<vmem>>, vector<1x128x128xi8>
      %79 = vector.shape_cast %78 : vector<1x128x128xi8> to vector<128x128xi8>
      %80 = arith.sitofp %79 : vector<128x128xi8> to vector<128x128xbf16>
      %c5_59 = arith.constant 5 : index
      %c0_60 = arith.constant 0 : index
      %c0_61 = arith.constant 0 : index
      %81 = vector.load %arg8[%c5_59, %c0_60, %c0_61] : memref<7x128x128xbf16, #tpu.memory_space<vmem>>, vector<1x128x128xbf16>
      %82 = vector.shape_cast %81 : vector<1x128x128xbf16> to vector<128x128xbf16>
      %cst_62 = arith.constant dense<0.000000e+00> : vector<128x128xf32>
      %83 = tpu.matmul %11, %82, %cst_62 {dimension_numbers = #tpu.dot_dimension_numbers<[1], [0], [0], [1], [0, 0, 1, 1], [], []>} : vector<128x128xbf16>, vector<128x128xbf16>, vector<128x128xf32> -> vector<128x128xf32>
      %84 = arith.truncf %83 : vector<128x128xf32> to vector<128x128xbf16>
      %cst_63 = arith.constant dense<0.000000e+00> : vector<128x128xf32>
      %85 = tpu.matmul %80, %84, %cst_63 {dimension_numbers = #tpu.dot_dimension_numbers<[1], [0], [0], [1], [0, 0, 1, 1], [], []>} : vector<128x128xbf16>, vector<128x128xbf16>, vector<128x128xf32> -> vector<128x128xf32>
      %c5_64 = arith.constant 5 : index
      %c0_65 = arith.constant 0 : index
      %c0_66 = arith.constant 0 : index
      %86 = vector.load %arg7[%c5_64, %c0_65, %c0_66] : memref<7x128x1xf32, #tpu.memory_space<vmem>>, vector<1x128x1xf32>
      %87 = vector.shape_cast %86 : vector<1x128x1xf32> to vector<128x1xf32>
      %88 = vector.broadcast %87 : vector<128x1xf32> to vector<128x128xf32>
      %89 = arith.mulf %88, %85 : vector<128x128xf32>
      %90 = arith.addf %77, %89 : vector<128x128xf32>
      %c6 = arith.constant 6 : index
      %c0_67 = arith.constant 0 : index
      %c0_68 = arith.constant 0 : index
      %91 = vector.load %arg6[%c6, %c0_67, %c0_68] : memref<7x128x128xi8, #tpu.memory_space<vmem>>, vector<1x128x128xi8>
      %92 = vector.shape_cast %91 : vector<1x128x128xi8> to vector<128x128xi8>
      %93 = arith.sitofp %92 : vector<128x128xi8> to vector<128x128xbf16>
      %c6_69 = arith.constant 6 : index
      %c0_70 = arith.constant 0 : index
      %c0_71 = arith.constant 0 : index
      %94 = vector.load %arg8[%c6_69, %c0_70, %c0_71] : memref<7x128x128xbf16, #tpu.memory_space<vmem>>, vector<1x128x128xbf16>
      %95 = vector.shape_cast %94 : vector<1x128x128xbf16> to vector<128x128xbf16>
      %cst_72 = arith.constant dense<0.000000e+00> : vector<128x128xf32>
      %96 = tpu.matmul %11, %95, %cst_72 {dimension_numbers = #tpu.dot_dimension_numbers<[1], [0], [0], [1], [0, 0, 1, 1], [], []>} : vector<128x128xbf16>, vector<128x128xbf16>, vector<128x128xf32> -> vector<128x128xf32>
      %97 = arith.truncf %96 : vector<128x128xf32> to vector<128x128xbf16>
      %cst_73 = arith.constant dense<0.000000e+00> : vector<128x128xf32>
      %98 = tpu.matmul %93, %97, %cst_73 {dimension_numbers = #tpu.dot_dimension_numbers<[1], [0], [0], [1], [0, 0, 1, 1], [], []>} : vector<128x128xbf16>, vector<128x128xbf16>, vector<128x128xf32> -> vector<128x128xf32>
      %c6_74 = arith.constant 6 : index
      %c0_75 = arith.constant 0 : index
      %c0_76 = arith.constant 0 : index
      %99 = vector.load %arg7[%c6_74, %c0_75, %c0_76] : memref<7x128x1xf32, #tpu.memory_space<vmem>>, vector<1x128x1xf32>
      %100 = vector.shape_cast %99 : vector<1x128x1xf32> to vector<128x1xf32>
      %101 = vector.broadcast %100 : vector<128x1xf32> to vector<128x128xf32>
      %102 = arith.mulf %101, %98 : vector<128x128xf32>
      %103 = arith.addf %90, %102 : vector<128x128xf32>
      %c0_77 = arith.constant 0 : index
      %c0_78 = arith.constant 0 : index
      %104 = vector.load %arg12[%c0_77, %c0_78] : memref<128x128xf32, #tpu.memory_space<vmem>>, vector<128x128xf32>
      tpu.vector_store %arg12[%c0_77, %c0_78], %103 {strides = array<i32>} : memref<128x128xf32, #tpu.memory_space<vmem>>, vector<128x128xf32>,
    } else {
    }
    %c0_i32_2 = arith.constant 0 : i32
    %8 = arith.cmpi eq, %arg1, %c0_i32_2 : i32
    %9 = arith.extui %8 : i1 to i32
    %c0_i32_3 = arith.constant 0 : i32
    %10 = arith.cmpi ne, %9, %c0_i32_3 : i32
    scf.if %10 {
      %c0 = arith.constant 0 : index
      %c0_4 = arith.constant 0 : index
      %11 = vector.load %arg12[%c0, %c0_4] : memref<128x128xf32, #tpu.memory_space<vmem>>, vector<128x128xf32>
      %cst = arith.constant 0.000000e+00 : f32
      %12 = vector.broadcast %cst : f32 to vector<128x128xf32>
      %13 = arith.maximumf %11, %12 : vector<128x128xf32>
      %14 = arith.mulf %13, %13 : vector<128x128xf32>
      %cst_5 = arith.constant dense<0.000000e+00> : vector<128xf32>
      %15 = vector.multi_reduction <add>, %14, %cst_5 [1] : vector<128x128xf32> to vector<128xf32>
      %16 = vector.shape_cast %15 : vector<128xf32> to vector<128x1xf32>
      %17 = math.sqrt %16 : vector<128x1xf32>
      %cst_6 = arith.constant 9.99999996E-13 : f32
      %18 = vector.broadcast %cst_6 : f32 to vector<128x1xf32>
      %19 = arith.maximumf %17, %18 : vector<128x1xf32>
      %20 = vector.broadcast %19 : vector<128x1xf32> to vector<128x128xf32>
      %21 = arith.divf %13, %20 : vector<128x128xf32>
      %22 = arith.truncf %21 : vector<128x128xf32> to vector<128x128xbf16>
      %c0_7 = arith.constant 0 : index
      %c0_8 = arith.constant 0 : index
      %23 = vector.load %arg11[%c0_7, %c0_8] : memref<128x128xbf16, #tpu.memory_space<vmem>>, vector<128x128xbf16>
      tpu.vector_store %arg11[%c0_7, %c0_8], %22 {strides = array<i32>} : memref<128x128xbf16, #tpu.memory_space<vmem>>, vector<128x128xbf16>,
    } else {
    }
    return
  }
  func.func @transform_0(%arg0: i32, %arg1: i32, %arg2: memref<1x1xi32, #tpu.memory_space<smem>>, %arg3: memref<1xi32, #tpu.memory_space<smem>>) -> (i32, i32) {
    %c0_i32 = arith.constant 0 : i32
    %c0_i32_0 = arith.constant 0 : i32
    return %arg0, %c0_i32 : i32, i32
  }
  func.func @transform_1(%arg0: i32, %arg1: i32, %arg2: memref<1x1xi32, #tpu.memory_space<smem>>, %arg3: memref<1xi32, #tpu.memory_space<smem>>) -> (i32, i32) {
    %0 = arith.index_cast %arg0 : i32 to index
    %1 = arith.index_cast %arg1 : i32 to index
    %2 = memref.load %arg2[%0, %1] : memref<1x1xi32, #tpu.memory_space<smem>>
    %c0_i32 = arith.constant 0 : i32
    %c0_i32_0 = arith.constant 0 : i32
    return %2, %c0_i32 : i32, i32
  }
  func.func @transform_2(%arg0: i32, %arg1: i32, %arg2: memref<1x1xi32, #tpu.memory_space<smem>>, %arg3: memref<1xi32, #tpu.memory_space<smem>>) -> (i32, i32, i32) {
    %0 = arith.index_cast %arg0 : i32 to index
    %1 = arith.index_cast %arg1 : i32 to index
    %2 = memref.load %arg2[%0, %1] : memref<1x1xi32, #tpu.memory_space<smem>>
    %c0_i32 = arith.constant 0 : i32
    %c0_i32_0 = arith.constant 0 : i32
    return %c0_i32, %arg0, %2 : i32, i32, i32
  }
  func.func @transform_3(%arg0: i32, %arg1: i32, %arg2: memref<1x1xi32, #tpu.memory_space<smem>>, %arg3: memref<1xi32, #tpu.memory_space<smem>>) -> (i32, i32, i32) {
    %c0_i32 = arith.constant 0 : i32
    %c0_i32_0 = arith.constant 0 : i32
    %c0_i32_1 = arith.constant 0 : i32
    return %c0_i32, %arg0, %c0_i32_0 : i32, i32, i32
  }
  func.func @transform_4(%arg0: i32, %arg1: i32, %arg2: memref<1x1xi32, #tpu.memory_space<smem>>, %arg3: memref<1xi32, #tpu.memory_space<smem>>) -> (i32, i32, i32) {
    %c0_i32 = arith.constant 0 : i32
    %c0_i32_0 = arith.constant 0 : i32
    %c0_i32_1 = arith.constant 0 : i32
    %c0_i32_2 = arith.constant 0 : i32
    return %c0_i32, %c0_i32_0, %c0_i32_1 : i32, i32, i32
  }
  func.func @transform_5(%arg0: i32, %arg1: i32, %arg2: memref<1x1xi32, #tpu.memory_space<smem>>, %arg3: memref<1xi32, #tpu.memory_space<smem>>) -> (i32, i32) {
    %c0_i32 = arith.constant 0 : i32
    %c0_i32_0 = arith.constant 0 : i32
    %c0_i32_1 = arith.constant 0 : i32
    return %c0_i32, %c0_i32_0 : i32, i32
  }
  func.func @transform_6(%arg0: i32, %arg1: i32, %arg2: memref<1x1xi32, #tpu.memory_space<smem>>, %arg3: memref<1xi32, #tpu.memory_space<smem>>) -> (i32, i32) {
    %c0_i32 = arith.constant 0 : i32
    %c0_i32_0 = arith.constant 0 : i32
    %c0_i32_1 = arith.constant 0 : i32
    return %c0_i32, %c0_i32_0 : i32, i32
  }
  func.func @transform_7(%arg0: i32, %arg1: i32, %arg2: memref<1x1xi32, #tpu.memory_space<smem>>, %arg3: memref<1xi32, #tpu.memory_space<smem>>) -> (i32, i32) {
    %c0_i32 = arith.constant 0 : i32
    %c0_i32_0 = arith.constant 0 : i32
    return %arg0, %c0_i32 : i32, i32
  }
}

module attributes {stable_mosaic.version = 11 : i64} {
  func.func @hetero_sage_layer_kernel(%arg0: i32, %arg1: i32, %arg2: memref<1x1xi32, #tpu.memory_space<smem>>, %arg3: memref<1xi32, #tpu.memory_space<smem>>, %arg4: memref<128x128xbf16, #tpu.memory_space<vmem>>, %arg5: memref<128x128xbf16, #tpu.memory_space<vmem>>, %arg6: memref<7x128x128xi8, #tpu.memory_space<vmem>>, %arg7: memref<7x128x1xf32, #tpu.memory_space<vmem>>, %arg8: memref<7x128x128xbf16, #tpu.memory_space<vmem>>, %arg9: memref<128x128xbf16, #tpu.memory_space<vmem>>, %arg10: memref<1x128xf32, #tpu.memory_space<vmem>>, %arg11: memref<128x128xbf16, #tpu.memory_space<vmem>>, %arg12: memref<128x128xf32, #tpu.memory_space<vmem>>) attributes {dimension_semantics = [#tpu.dimension_semantics<parallel>, #tpu.dimension_semantics<arbitrary>], iteration_bounds = array<i64: 1, 1>, scalar_prefetch = 2 : i64, scratch_operands = 1 : i64, tpu.core_type = #tpu.core_type<tc>, window_params = [{transform_indices = @transform_0, window_bounds = array<i64: 128, 128>}, {transform_indices = @transform_1, window_bounds = array<i64: 128, 128>}, {transform_indices = @transform_2, window_bounds = array<i64: 7, 128, 128>}, {transform_indices = @transform_3, window_bounds = array<i64: 7, 128, 1>}, {pipeline_mode = #tpu.pipeline_mode<synchronous>, transform_indices = @transform_4, window_bounds = array<i64: 7, 128, 128>}, {pipeline_mode = #tpu.pipeline_mode<synchronous>, transform_indices = @transform_5, window_bounds = array<i64: 128, 128>}, {pipeline_mode = #tpu.pipeline_mode<synchronous>, transform_indices = @transform_6, window_bounds = array<i64: 1, 128>}, {transform_indices = @transform_7, window_bounds = array<i64: 128, 128>}]} {
    %c0_i32 = arith.constant 0 : i32
    %0 = arith.cmpi eq, %arg1, %c0_i32 : i32
    %1 = arith.extui %0 : i1 to i32
    %c0_i32_0 = arith.constant 0 : i32
    %2 = arith.cmpi ne, %1, %c0_i32_0 : i32
    scf.if %2 {
      %c0 = arith.constant 0 : index
      %c0_4 = arith.constant 0 : index
      %11 = vector.load %arg4[%c0, %c0_4] : memref<128x128xbf16, #tpu.memory_space<vmem>>, vector<128x128xbf16>
      %c0_5 = arith.constant 0 : index
      %c0_6 = arith.constant 0 : index
      %12 = vector.load %arg9[%c0_5, %c0_6] : memref<128x128xbf16, #tpu.memory_space<vmem>>, vector<128x128xbf16>
      %cst = arith.constant dense<0.000000e+00> : vector<128x128xf32>
      %13 = tpu.matmul %11, %12, %cst {dimension_numbers = #tpu.dot_dimension_numbers<[1], [0], [0], [1], [0, 0, 1, 1], [], []>} : vector<128x128xbf16>, vector<128x128xbf16>, vector<128x128xf32> -> vector<128x128xf32>
      %c0_7 = arith.constant 0 : index
      %c0_8 = arith.constant 0 : index
      %14 = vector.load %arg10[%c0_7, %c0_8] : memref<1x128xf32, #tpu.memory_space<vmem>>, vector<1x128xf32>
      %15 = vector.broadcast %14 : vector<1x128xf32> to vector<128x128xf32>
      %16 = arith.addf %13, %15 : vector<128x128xf32>
      %c0_9 = arith.constant 0 : index
      %c0_10 = arith.constant 0 : index
      %17 = vector.load %arg12[%c0_9, %c0_10] : memref<128x128xf32, #tpu.memory_space<vmem>>, vector<128x128xf32>
      tpu.vector_store %arg12[%c0_9, %c0_10], %16 {strides = array<i32>} : memref<128x128xf32, #tpu.memory_space<vmem>>, vector<128x128xf32>,
    } else {
    }
    %3 = arith.index_cast %arg0 : i32 to index
    %4 = memref.load %arg3[%3] : memref<1xi32, #tpu.memory_space<smem>>
    %5 = arith.cmpi slt, %arg1, %4 : i32
    %6 = arith.extui %5 : i1 to i32
    %c0_i32_1 = arith.constant 0 : i32
    %7 = arith.cmpi ne, %6, %c0_i32_1 : i32
    scf.if %7 {
      %c0 = arith.constant 0 : index
      %c0_4 = arith.constant 0 : index
      %11 = vector.load %arg5[%c0, %c0_4] : memref<128x128xbf16, #tpu.memory_space<vmem>>, vector<128x128xbf16>
      %c0_5 = arith.constant 0 : index
      %c0_6 = arith.constant 0 : index
      %12 = vector.load %arg12[%c0_5, %c0_6] : memref<128x128xf32, #tpu.memory_space<vmem>>, vector<128x128xf32>
      %c0_7 = arith.constant 0 : index
      %c0_8 = arith.constant 0 : index
      %c0_9 = arith.constant 0 : index
      %13 = vector.load %arg6[%c0_7, %c0_8, %c0_9] : memref<7x128x128xi8, #tpu.memory_space<vmem>>, vector<1x128x128xi8>
      %14 = vector.shape_cast %13 : vector<1x128x128xi8> to vector<128x128xi8>
      %15 = arith.sitofp %14 : vector<128x128xi8> to vector<128x128xbf16>
      %c0_10 = arith.constant 0 : index
      %c0_11 = arith.constant 0 : index
      %c0_12 = arith.constant 0 : index
      %16 = vector.load %arg8[%c0_10, %c0_11, %c0_12] : memref<7x128x128xbf16, #tpu.memory_space<vmem>>, vector<1x128x128xbf16>
      %17 = vector.shape_cast %16 : vector<1x128x128xbf16> to vector<128x128xbf16>
      %cst = arith.constant dense<0.000000e+00> : vector<128x128xf32>
      %18 = tpu.matmul %11, %17, %cst {dimension_numbers = #tpu.dot_dimension_numbers<[1], [0], [0], [1], [0, 0, 1, 1], [], []>} : vector<128x128xbf16>, vector<128x128xbf16>, vector<128x128xf32> -> vector<128x128xf32>
      %19 = arith.truncf %18 : vector<128x128xf32> to vector<128x128xbf16>
      %cst_13 = arith.constant dense<0.000000e+00> : vector<128x128xf32>
      %20 = tpu.matmul %15, %19, %cst_13 {dimension_numbers = #tpu.dot_dimension_numbers<[1], [0], [0], [1], [0, 0, 1, 1], [], []>} : vector<128x128xbf16>, vector<128x128xbf16>, vector<128x128xf32> -> vector<128x128xf32>
      %c0_14 = arith.constant 0 : index
      %c0_15 = arith.constant 0 : index
      %c0_16 = arith.constant 0 : index
      %21 = vector.load %arg7[%c0_14, %c0_15, %c0_16] : memref<7x128x1xf32, #tpu.memory_space<vmem>>, vector<1x128x1xf32>
      %22 = vector.shape_cast %21 : vector<1x128x1xf32> to vector<128x1xf32>
      %23 = vector.broadcast %22 : vector<128x1xf32> to vector<128x128xf32>
      %24 = arith.mulf %23, %20 : vector<128x128xf32>
      %25 = arith.addf %12, %24 : vector<128x128xf32>
      %c1 = arith.constant 1 : index
      %c0_17 = arith.constant 0 : index
      %c0_18 = arith.constant 0 : index
      %26 = vector.load %arg6[%c1, %c0_17, %c0_18] : memref<7x128x128xi8, #tpu.memory_space<vmem>>, vector<1x128x128xi8>
      %27 = vector.shape_cast %26 : vector<1x128x128xi8> to vector<128x128xi8>
      %28 = arith.sitofp %27 : vector<128x128xi8> to vector<128x128xbf16>
      %c1_19 = arith.constant 1 : index
      %c0_20 = arith.constant 0 : index
      %c0_21 = arith.constant 0 : index
      %29 = vector.load %arg8[%c1_19, %c0_20, %c0_21] : memref<7x128x128xbf16, #tpu.memory_space<vmem>>, vector<1x128x128xbf16>
      %30 = vector.shape_cast %29 : vector<1x128x128xbf16> to vector<128x128xbf16>
      %cst_22 = arith.constant dense<0.000000e+00> : vector<128x128xf32>
      %31 = tpu.matmul %11, %30, %cst_22 {dimension_numbers = #tpu.dot_dimension_numbers<[1], [0], [0], [1], [0, 0, 1, 1], [], []>} : vector<128x128xbf16>, vector<128x128xbf16>, vector<128x128xf32> -> vector<128x128xf32>
      %32 = arith.truncf %31 : vector<128x128xf32> to vector<128x128xbf16>
      %cst_23 = arith.constant dense<0.000000e+00> : vector<128x128xf32>
      %33 = tpu.matmul %28, %32, %cst_23 {dimension_numbers = #tpu.dot_dimension_numbers<[1], [0], [0], [1], [0, 0, 1, 1], [], []>} : vector<128x128xbf16>, vector<128x128xbf16>, vector<128x128xf32> -> vector<128x128xf32>
      %c1_24 = arith.constant 1 : index
      %c0_25 = arith.constant 0 : index
      %c0_26 = arith.constant 0 : index
      %34 = vector.load %arg7[%c1_24, %c0_25, %c0_26] : memref<7x128x1xf32, #tpu.memory_space<vmem>>, vector<1x128x1xf32>
      %35 = vector.shape_cast %34 : vector<1x128x1xf32> to vector<128x1xf32>
      %36 = vector.broadcast %35 : vector<128x1xf32> to vector<128x128xf32>
      %37 = arith.mulf %36, %33 : vector<128x128xf32>
      %38 = arith.addf %25, %37 : vector<128x128xf32>
      %c2 = arith.constant 2 : index
      %c0_27 = arith.constant 0 : index
      %c0_28 = arith.constant 0 : index
      %39 = vector.load %arg6[%c2, %c0_27, %c0_28] : memref<7x128x128xi8, #tpu.memory_space<vmem>>, vector<1x128x128xi8>
      %40 = vector.shape_cast %39 : vector<1x128x128xi8> to vector<128x128xi8>
      %41 = arith.sitofp %40 : vector<128x128xi8> to vector<128x128xbf16>
      %c2_29 = arith.constant 2 : index
      %c0_30 = arith.constant 0 : index
      %c0_31 = arith.constant 0 : index
      %42 = vector.load %arg8[%c2_29, %c0_30, %c0_31] : memref<7x128x128xbf16, #tpu.memory_space<vmem>>, vector<1x128x128xbf16>
      %43 = vector.shape_cast %42 : vector<1x128x128xbf16> to vector<128x128xbf16>
      %cst_32 = arith.constant dense<0.000000e+00> : vector<128x128xf32>
      %44 = tpu.matmul %11, %43, %cst_32 {dimension_numbers = #tpu.dot_dimension_numbers<[1], [0], [0], [1], [0, 0, 1, 1], [], []>} : vector<128x128xbf16>, vector<128x128xbf16>, vector<128x128xf32> -> vector<128x128xf32>
      %45 = arith.truncf %44 : vector<128x128xf32> to vector<128x128xbf16>
      %cst_33 = arith.constant dense<0.000000e+00> : vector<128x128xf32>
      %46 = tpu.matmul %41, %45, %cst_33 {dimension_numbers = #tpu.dot_dimension_numbers<[1], [0], [0], [1], [0, 0, 1, 1], [], []>} : vector<128x128xbf16>, vector<128x128xbf16>, vector<128x128xf32> -> vector<128x128xf32>
      %c2_34 = arith.constant 2 : index
      %c0_35 = arith.constant 0 : index
      %c0_36 = arith.constant 0 : index
      %47 = vector.load %arg7[%c2_34, %c0_35, %c0_36] : memref<7x128x1xf32, #tpu.memory_space<vmem>>, vector<1x128x1xf32>
      %48 = vector.shape_cast %47 : vector<1x128x1xf32> to vector<128x1xf32>
      %49 = vector.broadcast %48 : vector<128x1xf32> to vector<128x128xf32>
      %50 = arith.mulf %49, %46 : vector<128x128xf32>
      %51 = arith.addf %38, %50 : vector<128x128xf32>
      %c3 = arith.constant 3 : index
      %c0_37 = arith.constant 0 : index
      %c0_38 = arith.constant 0 : index
      %52 = vector.load %arg6[%c3, %c0_37, %c0_38] : memref<7x128x128xi8, #tpu.memory_space<vmem>>, vector<1x128x128xi8>
      %53 = vector.shape_cast %52 : vector<1x128x128xi8> to vector<128x128xi8>
      %54 = arith.sitofp %53 : vector<128x128xi8> to vector<128x128xbf16>
      %c3_39 = arith.constant 3 : index
      %c0_40 = arith.constant 0 : index
      %c0_41 = arith.constant 0 : index
      %55 = vector.load %arg8[%c3_39, %c0_40, %c0_41] : memref<7x128x128xbf16, #tpu.memory_space<vmem>>, vector<1x128x128xbf16>
      %56 = vector.shape_cast %55 : vector<1x128x128xbf16> to vector<128x128xbf16>
      %cst_42 = arith.constant dense<0.000000e+00> : vector<128x128xf32>
      %57 = tpu.matmul %11, %56, %cst_42 {dimension_numbers = #tpu.dot_dimension_numbers<[1], [0], [0], [1], [0, 0, 1, 1], [], []>} : vector<128x128xbf16>, vector<128x128xbf16>, vector<128x128xf32> -> vector<128x128xf32>
      %58 = arith.truncf %57 : vector<128x128xf32> to vector<128x128xbf16>
      %cst_43 = arith.constant dense<0.000000e+00> : vector<128x128xf32>
      %59 = tpu.matmul %54, %58, %cst_43 {dimension_numbers = #tpu.dot_dimension_numbers<[1], [0], [0], [1], [0, 0, 1, 1], [], []>} : vector<128x128xbf16>, vector<128x128xbf16>, vector<128x128xf32> -> vector<128x128xf32>
      %c3_44 = arith.constant 3 : index
      %c0_45 = arith.constant 0 : index
      %c0_46 = arith.constant 0 : index
      %60 = vector.load %arg7[%c3_44, %c0_45, %c0_46] : memref<7x128x1xf32, #tpu.memory_space<vmem>>, vector<1x128x1xf32>
      %61 = vector.shape_cast %60 : vector<1x128x1xf32> to vector<128x1xf32>
      %62 = vector.broadcast %61 : vector<128x1xf32> to vector<128x128xf32>
      %63 = arith.mulf %62, %59 : vector<128x128xf32>
      %64 = arith.addf %51, %63 : vector<128x128xf32>
      %c4 = arith.constant 4 : index
      %c0_47 = arith.constant 0 : index
      %c0_48 = arith.constant 0 : index
      %65 = vector.load %arg6[%c4, %c0_47, %c0_48] : memref<7x128x128xi8, #tpu.memory_space<vmem>>, vector<1x128x128xi8>
      %66 = vector.shape_cast %65 : vector<1x128x128xi8> to vector<128x128xi8>
      %67 = arith.sitofp %66 : vector<128x128xi8> to vector<128x128xbf16>
      %c4_49 = arith.constant 4 : index
      %c0_50 = arith.constant 0 : index
      %c0_51 = arith.constant 0 : index
      %68 = vector.load %arg8[%c4_49, %c0_50, %c0_51] : memref<7x128x128xbf16, #tpu.memory_space<vmem>>, vector<1x128x128xbf16>
      %69 = vector.shape_cast %68 : vector<1x128x128xbf16> to vector<128x128xbf16>
      %cst_52 = arith.constant dense<0.000000e+00> : vector<128x128xf32>
      %70 = tpu.matmul %11, %69, %cst_52 {dimension_numbers = #tpu.dot_dimension_numbers<[1], [0], [0], [1], [0, 0, 1, 1], [], []>} : vector<128x128xbf16>, vector<128x128xbf16>, vector<128x128xf32> -> vector<128x128xf32>
      %71 = arith.truncf %70 : vector<128x128xf32> to vector<128x128xbf16>
      %cst_53 = arith.constant dense<0.000000e+00> : vector<128x128xf32>
      %72 = tpu.matmul %67, %71, %cst_53 {dimension_numbers = #tpu.dot_dimension_numbers<[1], [0], [0], [1], [0, 0, 1, 1], [], []>} : vector<128x128xbf16>, vector<128x128xbf16>, vector<128x128xf32> -> vector<128x128xf32>
      %c4_54 = arith.constant 4 : index
      %c0_55 = arith.constant 0 : index
      %c0_56 = arith.constant 0 : index
      %73 = vector.load %arg7[%c4_54, %c0_55, %c0_56] : memref<7x128x1xf32, #tpu.memory_space<vmem>>, vector<1x128x1xf32>
      %74 = vector.shape_cast %73 : vector<1x128x1xf32> to vector<128x1xf32>
      %75 = vector.broadcast %74 : vector<128x1xf32> to vector<128x128xf32>
      %76 = arith.mulf %75, %72 : vector<128x128xf32>
      %77 = arith.addf %64, %76 : vector<128x128xf32>
      %c5 = arith.constant 5 : index
      %c0_57 = arith.constant 0 : index
      %c0_58 = arith.constant 0 : index
      %78 = vector.load %arg6[%c5, %c0_57, %c0_58] : memref<7x128x128xi8, #tpu.memory_space<vmem>>, vector<1x128x128xi8>
      %79 = vector.shape_cast %78 : vector<1x128x128xi8> to vector<128x128xi8>
      %80 = arith.sitofp %79 : vector<128x128xi8> to vector<128x128xbf16>
      %c5_59 = arith.constant 5 : index
      %c0_60 = arith.constant 0 : index
      %c0_61 = arith.constant 0 : index
      %81 = vector.load %arg8[%c5_59, %c0_60, %c0_61] : memref<7x128x128xbf16, #tpu.memory_space<vmem>>, vector<1x128x128xbf16>
      %82 = vector.shape_cast %81 : vector<1x128x128xbf16> to vector<128x128xbf16>
      %cst_62 = arith.constant dense<0.000000e+00> : vector<128x128xf32>
      %83 = tpu.matmul %11, %82, %cst_62 {dimension_numbers = #tpu.dot_dimension_numbers<[1], [0], [0], [1], [0, 0, 1, 1], [], []>} : vector<128x128xbf16>, vector<128x128xbf16>, vector<128x128xf32> -> vector<128x128xf32>
      %84 = arith.truncf %83 : vector<128x128xf32> to vector<128x128xbf16>
      %cst_63 = arith.constant dense<0.000000e+00> : vector<128x128xf32>
      %85 = tpu.matmul %80, %84, %cst_63 {dimension_numbers = #tpu.dot_dimension_numbers<[1], [0], [0], [1], [0, 0, 1, 1], [], []>} : vector<128x128xbf16>, vector<128x128xbf16>, vector<128x128xf32> -> vector<128x128xf32>
      %c5_64 = arith.constant 5 : index
      %c0_65 = arith.constant 0 : index
      %c0_66 = arith.constant 0 : index
      %86 = vector.load %arg7[%c5_64, %c0_65, %c0_66] : memref<7x128x1xf32, #tpu.memory_space<vmem>>, vector<1x128x1xf32>
      %87 = vector.shape_cast %86 : vector<1x128x1xf32> to vector<128x1xf32>
      %88 = vector.broadcast %87 : vector<128x1xf32> to vector<128x128xf32>
      %89 = arith.mulf %88, %85 : vector<128x128xf32>
      %90 = arith.addf %77, %89 : vector<128x128xf32>
      %c6 = arith.constant 6 : index
      %c0_67 = arith.constant 0 : index
      %c0_68 = arith.constant 0 : index
      %91 = vector.load %arg6[%c6, %c0_67, %c0_68] : memref<7x128x128xi8, #tpu.memory_space<vmem>>, vector<1x128x128xi8>
      %92 = vector.shape_cast %91 : vector<1x128x128xi8> to vector<128x128xi8>
      %93 = arith.sitofp %92 : vector<128x128xi8> to vector<128x128xbf16>
      %c6_69 = arith.constant 6 : index
      %c0_70 = arith.constant 0 : index
      %c0_71 = arith.constant 0 : index
      %94 = vector.load %arg8[%c6_69, %c0_70, %c0_71] : memref<7x128x128xbf16, #tpu.memory_space<vmem>>, vector<1x128x128xbf16>
      %95 = vector.shape_cast %94 : vector<1x128x128xbf16> to vector<128x128xbf16>
      %cst_72 = arith.constant dense<0.000000e+00> : vector<128x128xf32>
      %96 = tpu.matmul %11, %95, %cst_72 {dimension_numbers = #tpu.dot_dimension_numbers<[1], [0], [0], [1], [0, 0, 1, 1], [], []>} : vector<128x128xbf16>, vector<128x128xbf16>, vector<128x128xf32> -> vector<128x128xf32>
      %97 = arith.truncf %96 : vector<128x128xf32> to vector<128x128xbf16>
      %cst_73 = arith.constant dense<0.000000e+00> : vector<128x128xf32>
      %98 = tpu.matmul %93, %97, %cst_73 {dimension_numbers = #tpu.dot_dimension_numbers<[1], [0], [0], [1], [0, 0, 1, 1], [], []>} : vector<128x128xbf16>, vector<128x128xbf16>, vector<128x128xf32> -> vector<128x128xf32>
      %c6_74 = arith.constant 6 : index
      %c0_75 = arith.constant 0 : index
      %c0_76 = arith.constant 0 : index
      %99 = vector.load %arg7[%c6_74, %c0_75, %c0_76] : memref<7x128x1xf32, #tpu.memory_space<vmem>>, vector<1x128x1xf32>
      %100 = vector.shape_cast %99 : vector<1x128x1xf32> to vector<128x1xf32>
      %101 = vector.broadcast %100 : vector<128x1xf32> to vector<128x128xf32>
      %102 = arith.mulf %101, %98 : vector<128x128xf32>
      %103 = arith.addf %90, %102 : vector<128x128xf32>
      %c0_77 = arith.constant 0 : index
      %c0_78 = arith.constant 0 : index
      %104 = vector.load %arg12[%c0_77, %c0_78] : memref<128x128xf32, #tpu.memory_space<vmem>>, vector<128x128xf32>
      tpu.vector_store %arg12[%c0_77, %c0_78], %103 {strides = array<i32>} : memref<128x128xf32, #tpu.memory_space<vmem>>, vector<128x128xf32>,
    } else {
    }
    %c0_i32_2 = arith.constant 0 : i32
    %8 = arith.cmpi eq, %arg1, %c0_i32_2 : i32
    %9 = arith.extui %8 : i1 to i32
    %c0_i32_3 = arith.constant 0 : i32
    %10 = arith.cmpi ne, %9, %c0_i32_3 : i32
    scf.if %10 {
      %c0 = arith.constant 0 : index
      %c0_4 = arith.constant 0 : index
      %11 = vector.load %arg12[%c0, %c0_4] : memref<128x128xf32, #tpu.memory_space<vmem>>, vector<128x128xf32>
      %cst = arith.constant 0.000000e+00 : f32
      %12 = vector.broadcast %cst : f32 to vector<128x128xf32>
      %13 = arith.maximumf %11, %12 : vector<128x128xf32>
      %14 = arith.mulf %13, %13 : vector<128x128xf32>
      %cst_5 = arith.constant dense<0.000000e+00> : vector<128xf32>
      %15 = vector.multi_reduction <add>, %14, %cst_5 [1] : vector<128x128xf32> to vector<128xf32>
      %16 = vector.shape_cast %15 : vector<128xf32> to vector<128x1xf32>
      %17 = math.sqrt %16 : vector<128x1xf32>
      %cst_6 = arith.constant 9.99999996E-13 : f32
      %18 = vector.broadcast %cst_6 : f32 to vector<128x1xf32>
      %19 = arith.maximumf %17, %18 : vector<128x1xf32>
      %20 = vector.broadcast %19 : vector<128x1xf32> to vector<128x128xf32>
      %21 = arith.divf %13, %20 : vector<128x128xf32>
      %22 = arith.truncf %21 : vector<128x128xf32> to vector<128x128xbf16>
      %c0_7 = arith.constant 0 : index
      %c0_8 = arith.constant 0 : index
      %23 = vector.load %arg11[%c0_7, %c0_8] : memref<128x128xbf16, #tpu.memory_space<vmem>>, vector<128x128xbf16>
      tpu.vector_store %arg11[%c0_7, %c0_8], %22 {strides = array<i32>} : memref<128x128xbf16, #tpu.memory_space<vmem>>, vector<128x128xbf16>,
    } else {
    }
    return
  }
  func.func @transform_0(%arg0: i32, %arg1: i32, %arg2: memref<1x1xi32, #tpu.memory_space<smem>>, %arg3: memref<1xi32, #tpu.memory_space<smem>>) -> (i32, i32) {
    %c0_i32 = arith.constant 0 : i32
    %c0_i32_0 = arith.constant 0 : i32
    return %arg0, %c0_i32 : i32, i32
  }
  func.func @transform_1(%arg0: i32, %arg1: i32, %arg2: memref<1x1xi32, #tpu.memory_space<smem>>, %arg3: memref<1xi32, #tpu.memory_space<smem>>) -> (i32, i32) {
    %0 = arith.index_cast %arg0 : i32 to index
    %1 = arith.index_cast %arg1 : i32 to index
    %2 = memref.load %arg2[%0, %1] : memref<1x1xi32, #tpu.memory_space<smem>>
    %c0_i32 = arith.constant 0 : i32
    %c0_i32_0 = arith.constant 0 : i32
    return %2, %c0_i32 : i32, i32
  }
  func.func @transform_2(%arg0: i32, %arg1: i32, %arg2: memref<1x1xi32, #tpu.memory_space<smem>>, %arg3: memref<1xi32, #tpu.memory_space<smem>>) -> (i32, i32, i32) {
    %0 = arith.index_cast %arg0 : i32 to index
    %1 = arith.index_cast %arg1 : i32 to index
    %2 = memref.load %arg2[%0, %1] : memref<1x1xi32, #tpu.memory_space<smem>>
    %c0_i32 = arith.constant 0 : i32
    %c0_i32_0 = arith.constant 0 : i32
    return %c0_i32, %arg0, %2 : i32, i32, i32
  }
  func.func @transform_3(%arg0: i32, %arg1: i32, %arg2: memref<1x1xi32, #tpu.memory_space<smem>>, %arg3: memref<1xi32, #tpu.memory_space<smem>>) -> (i32, i32, i32) {
    %c0_i32 = arith.constant 0 : i32
    %c0_i32_0 = arith.constant 0 : i32
    %c0_i32_1 = arith.constant 0 : i32
    return %c0_i32, %arg0, %c0_i32_0 : i32, i32, i32
  }
  func.func @transform_4(%arg0: i32, %arg1: i32, %arg2: memref<1x1xi32, #tpu.memory_space<smem>>, %arg3: memref<1xi32, #tpu.memory_space<smem>>) -> (i32, i32, i32) {
    %c0_i32 = arith.constant 0 : i32
    %c0_i32_0 = arith.constant 0 : i32
    %c0_i32_1 = arith.constant 0 : i32
    %c0_i32_2 = arith.constant 0 : i32
    return %c0_i32, %c0_i32_0, %c0_i32_1 : i32, i32, i32
  }
  func.func @transform_5(%arg0: i32, %arg1: i32, %arg2: memref<1x1xi32, #tpu.memory_space<smem>>, %arg3: memref<1xi32, #tpu.memory_space<smem>>) -> (i32, i32) {
    %c0_i32 = arith.constant 0 : i32
    %c0_i32_0 = arith.constant 0 : i32
    %c0_i32_1 = arith.constant 0 : i32
    return %c0_i32, %c0_i32_0 : i32, i32
  }
  func.func @transform_6(%arg0: i32, %arg1: i32, %arg2: memref<1x1xi32, #tpu.memory_space<smem>>, %arg3: memref<1xi32, #tpu.memory_space<smem>>) -> (i32, i32) {
    %c0_i32 = arith.constant 0 : i32
    %c0_i32_0 = arith.constant 0 : i32
    %c0_i32_1 = arith.constant 0 : i32
    return %c0_i32, %c0_i32_0 : i32, i32
  }
  func.func @transform_7(%arg0: i32, %arg1: i32, %arg2: memref<1x1xi32, #tpu.memory_space<smem>>, %arg3: memref<1xi32, #tpu.memory_space<smem>>) -> (i32, i32) {
    %c0_i32 = arith.constant 0 : i32
    %c0_i32_0 = arith.constant 0 : i32
    return %arg0, %c0_i32 : i32, i32
  }
}

module attributes {stable_mosaic.version = 11 : i64} {
  func.func @hetero_sage_layer_kernel(%arg0: i32, %arg1: i32, %arg2: memref<1x1xi32, #tpu.memory_space<smem>>, %arg3: memref<1xi32, #tpu.memory_space<smem>>, %arg4: memref<128x128xbf16, #tpu.memory_space<vmem>>, %arg5: memref<128x128xbf16, #tpu.memory_space<vmem>>, %arg6: memref<7x128x128xi8, #tpu.memory_space<vmem>>, %arg7: memref<7x128x1xf32, #tpu.memory_space<vmem>>, %arg8: memref<7x128x128xbf16, #tpu.memory_space<vmem>>, %arg9: memref<128x128xbf16, #tpu.memory_space<vmem>>, %arg10: memref<1x128xf32, #tpu.memory_space<vmem>>, %arg11: memref<128x128xf32, #tpu.memory_space<vmem>>, %arg12: memref<128x128xf32, #tpu.memory_space<vmem>>) attributes {dimension_semantics = [#tpu.dimension_semantics<parallel>, #tpu.dimension_semantics<arbitrary>], iteration_bounds = array<i64: 1, 1>, scalar_prefetch = 2 : i64, scratch_operands = 1 : i64, tpu.core_type = #tpu.core_type<tc>, window_params = [{transform_indices = @transform_0, window_bounds = array<i64: 128, 128>}, {transform_indices = @transform_1, window_bounds = array<i64: 128, 128>}, {transform_indices = @transform_2, window_bounds = array<i64: 7, 128, 128>}, {transform_indices = @transform_3, window_bounds = array<i64: 7, 128, 1>}, {pipeline_mode = #tpu.pipeline_mode<synchronous>, transform_indices = @transform_4, window_bounds = array<i64: 7, 128, 128>}, {pipeline_mode = #tpu.pipeline_mode<synchronous>, transform_indices = @transform_5, window_bounds = array<i64: 128, 128>}, {pipeline_mode = #tpu.pipeline_mode<synchronous>, transform_indices = @transform_6, window_bounds = array<i64: 1, 128>}, {transform_indices = @transform_7, window_bounds = array<i64: 128, 128>}]} {
    %c0_i32 = arith.constant 0 : i32
    %0 = arith.cmpi eq, %arg1, %c0_i32 : i32
    %1 = arith.extui %0 : i1 to i32
    %c0_i32_0 = arith.constant 0 : i32
    %2 = arith.cmpi ne, %1, %c0_i32_0 : i32
    scf.if %2 {
      %c0 = arith.constant 0 : index
      %c0_4 = arith.constant 0 : index
      %11 = vector.load %arg4[%c0, %c0_4] : memref<128x128xbf16, #tpu.memory_space<vmem>>, vector<128x128xbf16>
      %c0_5 = arith.constant 0 : index
      %c0_6 = arith.constant 0 : index
      %12 = vector.load %arg9[%c0_5, %c0_6] : memref<128x128xbf16, #tpu.memory_space<vmem>>, vector<128x128xbf16>
      %cst = arith.constant dense<0.000000e+00> : vector<128x128xf32>
      %13 = tpu.matmul %11, %12, %cst {dimension_numbers = #tpu.dot_dimension_numbers<[1], [0], [0], [1], [0, 0, 1, 1], [], []>} : vector<128x128xbf16>, vector<128x128xbf16>, vector<128x128xf32> -> vector<128x128xf32>
      %c0_7 = arith.constant 0 : index
      %c0_8 = arith.constant 0 : index
      %14 = vector.load %arg10[%c0_7, %c0_8] : memref<1x128xf32, #tpu.memory_space<vmem>>, vector<1x128xf32>
      %15 = vector.broadcast %14 : vector<1x128xf32> to vector<128x128xf32>
      %16 = arith.addf %13, %15 : vector<128x128xf32>
      %c0_9 = arith.constant 0 : index
      %c0_10 = arith.constant 0 : index
      %17 = vector.load %arg12[%c0_9, %c0_10] : memref<128x128xf32, #tpu.memory_space<vmem>>, vector<128x128xf32>
      tpu.vector_store %arg12[%c0_9, %c0_10], %16 {strides = array<i32>} : memref<128x128xf32, #tpu.memory_space<vmem>>, vector<128x128xf32>,
    } else {
    }
    %3 = arith.index_cast %arg0 : i32 to index
    %4 = memref.load %arg3[%3] : memref<1xi32, #tpu.memory_space<smem>>
    %5 = arith.cmpi slt, %arg1, %4 : i32
    %6 = arith.extui %5 : i1 to i32
    %c0_i32_1 = arith.constant 0 : i32
    %7 = arith.cmpi ne, %6, %c0_i32_1 : i32
    scf.if %7 {
      %c0 = arith.constant 0 : index
      %c0_4 = arith.constant 0 : index
      %11 = vector.load %arg5[%c0, %c0_4] : memref<128x128xbf16, #tpu.memory_space<vmem>>, vector<128x128xbf16>
      %c0_5 = arith.constant 0 : index
      %c0_6 = arith.constant 0 : index
      %12 = vector.load %arg12[%c0_5, %c0_6] : memref<128x128xf32, #tpu.memory_space<vmem>>, vector<128x128xf32>
      %c0_7 = arith.constant 0 : index
      %c0_8 = arith.constant 0 : index
      %c0_9 = arith.constant 0 : index
      %13 = vector.load %arg6[%c0_7, %c0_8, %c0_9] : memref<7x128x128xi8, #tpu.memory_space<vmem>>, vector<1x128x128xi8>
      %14 = vector.shape_cast %13 : vector<1x128x128xi8> to vector<128x128xi8>
      %15 = arith.sitofp %14 : vector<128x128xi8> to vector<128x128xbf16>
      %c0_10 = arith.constant 0 : index
      %c0_11 = arith.constant 0 : index
      %c0_12 = arith.constant 0 : index
      %16 = vector.load %arg8[%c0_10, %c0_11, %c0_12] : memref<7x128x128xbf16, #tpu.memory_space<vmem>>, vector<1x128x128xbf16>
      %17 = vector.shape_cast %16 : vector<1x128x128xbf16> to vector<128x128xbf16>
      %cst = arith.constant dense<0.000000e+00> : vector<128x128xf32>
      %18 = tpu.matmul %11, %17, %cst {dimension_numbers = #tpu.dot_dimension_numbers<[1], [0], [0], [1], [0, 0, 1, 1], [], []>} : vector<128x128xbf16>, vector<128x128xbf16>, vector<128x128xf32> -> vector<128x128xf32>
      %19 = arith.truncf %18 : vector<128x128xf32> to vector<128x128xbf16>
      %cst_13 = arith.constant dense<0.000000e+00> : vector<128x128xf32>
      %20 = tpu.matmul %15, %19, %cst_13 {dimension_numbers = #tpu.dot_dimension_numbers<[1], [0], [0], [1], [0, 0, 1, 1], [], []>} : vector<128x128xbf16>, vector<128x128xbf16>, vector<128x128xf32> -> vector<128x128xf32>
      %c0_14 = arith.constant 0 : index
      %c0_15 = arith.constant 0 : index
      %c0_16 = arith.constant 0 : index
      %21 = vector.load %arg7[%c0_14, %c0_15, %c0_16] : memref<7x128x1xf32, #tpu.memory_space<vmem>>, vector<1x128x1xf32>
      %22 = vector.shape_cast %21 : vector<1x128x1xf32> to vector<128x1xf32>
      %23 = vector.broadcast %22 : vector<128x1xf32> to vector<128x128xf32>
      %24 = arith.mulf %23, %20 : vector<128x128xf32>
      %25 = arith.addf %12, %24 : vector<128x128xf32>
      %c1 = arith.constant 1 : index
      %c0_17 = arith.constant 0 : index
      %c0_18 = arith.constant 0 : index
      %26 = vector.load %arg6[%c1, %c0_17, %c0_18] : memref<7x128x128xi8, #tpu.memory_space<vmem>>, vector<1x128x128xi8>
      %27 = vector.shape_cast %26 : vector<1x128x128xi8> to vector<128x128xi8>
      %28 = arith.sitofp %27 : vector<128x128xi8> to vector<128x128xbf16>
      %c1_19 = arith.constant 1 : index
      %c0_20 = arith.constant 0 : index
      %c0_21 = arith.constant 0 : index
      %29 = vector.load %arg8[%c1_19, %c0_20, %c0_21] : memref<7x128x128xbf16, #tpu.memory_space<vmem>>, vector<1x128x128xbf16>
      %30 = vector.shape_cast %29 : vector<1x128x128xbf16> to vector<128x128xbf16>
      %cst_22 = arith.constant dense<0.000000e+00> : vector<128x128xf32>
      %31 = tpu.matmul %11, %30, %cst_22 {dimension_numbers = #tpu.dot_dimension_numbers<[1], [0], [0], [1], [0, 0, 1, 1], [], []>} : vector<128x128xbf16>, vector<128x128xbf16>, vector<128x128xf32> -> vector<128x128xf32>
      %32 = arith.truncf %31 : vector<128x128xf32> to vector<128x128xbf16>
      %cst_23 = arith.constant dense<0.000000e+00> : vector<128x128xf32>
      %33 = tpu.matmul %28, %32, %cst_23 {dimension_numbers = #tpu.dot_dimension_numbers<[1], [0], [0], [1], [0, 0, 1, 1], [], []>} : vector<128x128xbf16>, vector<128x128xbf16>, vector<128x128xf32> -> vector<128x128xf32>
      %c1_24 = arith.constant 1 : index
      %c0_25 = arith.constant 0 : index
      %c0_26 = arith.constant 0 : index
      %34 = vector.load %arg7[%c1_24, %c0_25, %c0_26] : memref<7x128x1xf32, #tpu.memory_space<vmem>>, vector<1x128x1xf32>
      %35 = vector.shape_cast %34 : vector<1x128x1xf32> to vector<128x1xf32>
      %36 = vector.broadcast %35 : vector<128x1xf32> to vector<128x128xf32>
      %37 = arith.mulf %36, %33 : vector<128x128xf32>
      %38 = arith.addf %25, %37 : vector<128x128xf32>
      %c2 = arith.constant 2 : index
      %c0_27 = arith.constant 0 : index
      %c0_28 = arith.constant 0 : index
      %39 = vector.load %arg6[%c2, %c0_27, %c0_28] : memref<7x128x128xi8, #tpu.memory_space<vmem>>, vector<1x128x128xi8>
      %40 = vector.shape_cast %39 : vector<1x128x128xi8> to vector<128x128xi8>
      %41 = arith.sitofp %40 : vector<128x128xi8> to vector<128x128xbf16>
      %c2_29 = arith.constant 2 : index
      %c0_30 = arith.constant 0 : index
      %c0_31 = arith.constant 0 : index
      %42 = vector.load %arg8[%c2_29, %c0_30, %c0_31] : memref<7x128x128xbf16, #tpu.memory_space<vmem>>, vector<1x128x128xbf16>
      %43 = vector.shape_cast %42 : vector<1x128x128xbf16> to vector<128x128xbf16>
      %cst_32 = arith.constant dense<0.000000e+00> : vector<128x128xf32>
      %44 = tpu.matmul %11, %43, %cst_32 {dimension_numbers = #tpu.dot_dimension_numbers<[1], [0], [0], [1], [0, 0, 1, 1], [], []>} : vector<128x128xbf16>, vector<128x128xbf16>, vector<128x128xf32> -> vector<128x128xf32>
      %45 = arith.truncf %44 : vector<128x128xf32> to vector<128x128xbf16>
      %cst_33 = arith.constant dense<0.000000e+00> : vector<128x128xf32>
      %46 = tpu.matmul %41, %45, %cst_33 {dimension_numbers = #tpu.dot_dimension_numbers<[1], [0], [0], [1], [0, 0, 1, 1], [], []>} : vector<128x128xbf16>, vector<128x128xbf16>, vector<128x128xf32> -> vector<128x128xf32>
      %c2_34 = arith.constant 2 : index
      %c0_35 = arith.constant 0 : index
      %c0_36 = arith.constant 0 : index
      %47 = vector.load %arg7[%c2_34, %c0_35, %c0_36] : memref<7x128x1xf32, #tpu.memory_space<vmem>>, vector<1x128x1xf32>
      %48 = vector.shape_cast %47 : vector<1x128x1xf32> to vector<128x1xf32>
      %49 = vector.broadcast %48 : vector<128x1xf32> to vector<128x128xf32>
      %50 = arith.mulf %49, %46 : vector<128x128xf32>
      %51 = arith.addf %38, %50 : vector<128x128xf32>
      %c3 = arith.constant 3 : index
      %c0_37 = arith.constant 0 : index
      %c0_38 = arith.constant 0 : index
      %52 = vector.load %arg6[%c3, %c0_37, %c0_38] : memref<7x128x128xi8, #tpu.memory_space<vmem>>, vector<1x128x128xi8>
      %53 = vector.shape_cast %52 : vector<1x128x128xi8> to vector<128x128xi8>
      %54 = arith.sitofp %53 : vector<128x128xi8> to vector<128x128xbf16>
      %c3_39 = arith.constant 3 : index
      %c0_40 = arith.constant 0 : index
      %c0_41 = arith.constant 0 : index
      %55 = vector.load %arg8[%c3_39, %c0_40, %c0_41] : memref<7x128x128xbf16, #tpu.memory_space<vmem>>, vector<1x128x128xbf16>
      %56 = vector.shape_cast %55 : vector<1x128x128xbf16> to vector<128x128xbf16>
      %cst_42 = arith.constant dense<0.000000e+00> : vector<128x128xf32>
      %57 = tpu.matmul %11, %56, %cst_42 {dimension_numbers = #tpu.dot_dimension_numbers<[1], [0], [0], [1], [0, 0, 1, 1], [], []>} : vector<128x128xbf16>, vector<128x128xbf16>, vector<128x128xf32> -> vector<128x128xf32>
      %58 = arith.truncf %57 : vector<128x128xf32> to vector<128x128xbf16>
      %cst_43 = arith.constant dense<0.000000e+00> : vector<128x128xf32>
      %59 = tpu.matmul %54, %58, %cst_43 {dimension_numbers = #tpu.dot_dimension_numbers<[1], [0], [0], [1], [0, 0, 1, 1], [], []>} : vector<128x128xbf16>, vector<128x128xbf16>, vector<128x128xf32> -> vector<128x128xf32>
      %c3_44 = arith.constant 3 : index
      %c0_45 = arith.constant 0 : index
      %c0_46 = arith.constant 0 : index
      %60 = vector.load %arg7[%c3_44, %c0_45, %c0_46] : memref<7x128x1xf32, #tpu.memory_space<vmem>>, vector<1x128x1xf32>
      %61 = vector.shape_cast %60 : vector<1x128x1xf32> to vector<128x1xf32>
      %62 = vector.broadcast %61 : vector<128x1xf32> to vector<128x128xf32>
      %63 = arith.mulf %62, %59 : vector<128x128xf32>
      %64 = arith.addf %51, %63 : vector<128x128xf32>
      %c4 = arith.constant 4 : index
      %c0_47 = arith.constant 0 : index
      %c0_48 = arith.constant 0 : index
      %65 = vector.load %arg6[%c4, %c0_47, %c0_48] : memref<7x128x128xi8, #tpu.memory_space<vmem>>, vector<1x128x128xi8>
      %66 = vector.shape_cast %65 : vector<1x128x128xi8> to vector<128x128xi8>
      %67 = arith.sitofp %66 : vector<128x128xi8> to vector<128x128xbf16>
      %c4_49 = arith.constant 4 : index
      %c0_50 = arith.constant 0 : index
      %c0_51 = arith.constant 0 : index
      %68 = vector.load %arg8[%c4_49, %c0_50, %c0_51] : memref<7x128x128xbf16, #tpu.memory_space<vmem>>, vector<1x128x128xbf16>
      %69 = vector.shape_cast %68 : vector<1x128x128xbf16> to vector<128x128xbf16>
      %cst_52 = arith.constant dense<0.000000e+00> : vector<128x128xf32>
      %70 = tpu.matmul %11, %69, %cst_52 {dimension_numbers = #tpu.dot_dimension_numbers<[1], [0], [0], [1], [0, 0, 1, 1], [], []>} : vector<128x128xbf16>, vector<128x128xbf16>, vector<128x128xf32> -> vector<128x128xf32>
      %71 = arith.truncf %70 : vector<128x128xf32> to vector<128x128xbf16>
      %cst_53 = arith.constant dense<0.000000e+00> : vector<128x128xf32>
      %72 = tpu.matmul %67, %71, %cst_53 {dimension_numbers = #tpu.dot_dimension_numbers<[1], [0], [0], [1], [0, 0, 1, 1], [], []>} : vector<128x128xbf16>, vector<128x128xbf16>, vector<128x128xf32> -> vector<128x128xf32>
      %c4_54 = arith.constant 4 : index
      %c0_55 = arith.constant 0 : index
      %c0_56 = arith.constant 0 : index
      %73 = vector.load %arg7[%c4_54, %c0_55, %c0_56] : memref<7x128x1xf32, #tpu.memory_space<vmem>>, vector<1x128x1xf32>
      %74 = vector.shape_cast %73 : vector<1x128x1xf32> to vector<128x1xf32>
      %75 = vector.broadcast %74 : vector<128x1xf32> to vector<128x128xf32>
      %76 = arith.mulf %75, %72 : vector<128x128xf32>
      %77 = arith.addf %64, %76 : vector<128x128xf32>
      %c5 = arith.constant 5 : index
      %c0_57 = arith.constant 0 : index
      %c0_58 = arith.constant 0 : index
      %78 = vector.load %arg6[%c5, %c0_57, %c0_58] : memref<7x128x128xi8, #tpu.memory_space<vmem>>, vector<1x128x128xi8>
      %79 = vector.shape_cast %78 : vector<1x128x128xi8> to vector<128x128xi8>
      %80 = arith.sitofp %79 : vector<128x128xi8> to vector<128x128xbf16>
      %c5_59 = arith.constant 5 : index
      %c0_60 = arith.constant 0 : index
      %c0_61 = arith.constant 0 : index
      %81 = vector.load %arg8[%c5_59, %c0_60, %c0_61] : memref<7x128x128xbf16, #tpu.memory_space<vmem>>, vector<1x128x128xbf16>
      %82 = vector.shape_cast %81 : vector<1x128x128xbf16> to vector<128x128xbf16>
      %cst_62 = arith.constant dense<0.000000e+00> : vector<128x128xf32>
      %83 = tpu.matmul %11, %82, %cst_62 {dimension_numbers = #tpu.dot_dimension_numbers<[1], [0], [0], [1], [0, 0, 1, 1], [], []>} : vector<128x128xbf16>, vector<128x128xbf16>, vector<128x128xf32> -> vector<128x128xf32>
      %84 = arith.truncf %83 : vector<128x128xf32> to vector<128x128xbf16>
      %cst_63 = arith.constant dense<0.000000e+00> : vector<128x128xf32>
      %85 = tpu.matmul %80, %84, %cst_63 {dimension_numbers = #tpu.dot_dimension_numbers<[1], [0], [0], [1], [0, 0, 1, 1], [], []>} : vector<128x128xbf16>, vector<128x128xbf16>, vector<128x128xf32> -> vector<128x128xf32>
      %c5_64 = arith.constant 5 : index
      %c0_65 = arith.constant 0 : index
      %c0_66 = arith.constant 0 : index
      %86 = vector.load %arg7[%c5_64, %c0_65, %c0_66] : memref<7x128x1xf32, #tpu.memory_space<vmem>>, vector<1x128x1xf32>
      %87 = vector.shape_cast %86 : vector<1x128x1xf32> to vector<128x1xf32>
      %88 = vector.broadcast %87 : vector<128x1xf32> to vector<128x128xf32>
      %89 = arith.mulf %88, %85 : vector<128x128xf32>
      %90 = arith.addf %77, %89 : vector<128x128xf32>
      %c6 = arith.constant 6 : index
      %c0_67 = arith.constant 0 : index
      %c0_68 = arith.constant 0 : index
      %91 = vector.load %arg6[%c6, %c0_67, %c0_68] : memref<7x128x128xi8, #tpu.memory_space<vmem>>, vector<1x128x128xi8>
      %92 = vector.shape_cast %91 : vector<1x128x128xi8> to vector<128x128xi8>
      %93 = arith.sitofp %92 : vector<128x128xi8> to vector<128x128xbf16>
      %c6_69 = arith.constant 6 : index
      %c0_70 = arith.constant 0 : index
      %c0_71 = arith.constant 0 : index
      %94 = vector.load %arg8[%c6_69, %c0_70, %c0_71] : memref<7x128x128xbf16, #tpu.memory_space<vmem>>, vector<1x128x128xbf16>
      %95 = vector.shape_cast %94 : vector<1x128x128xbf16> to vector<128x128xbf16>
      %cst_72 = arith.constant dense<0.000000e+00> : vector<128x128xf32>
      %96 = tpu.matmul %11, %95, %cst_72 {dimension_numbers = #tpu.dot_dimension_numbers<[1], [0], [0], [1], [0, 0, 1, 1], [], []>} : vector<128x128xbf16>, vector<128x128xbf16>, vector<128x128xf32> -> vector<128x128xf32>
      %97 = arith.truncf %96 : vector<128x128xf32> to vector<128x128xbf16>
      %cst_73 = arith.constant dense<0.000000e+00> : vector<128x128xf32>
      %98 = tpu.matmul %93, %97, %cst_73 {dimension_numbers = #tpu.dot_dimension_numbers<[1], [0], [0], [1], [0, 0, 1, 1], [], []>} : vector<128x128xbf16>, vector<128x128xbf16>, vector<128x128xf32> -> vector<128x128xf32>
      %c6_74 = arith.constant 6 : index
      %c0_75 = arith.constant 0 : index
      %c0_76 = arith.constant 0 : index
      %99 = vector.load %arg7[%c6_74, %c0_75, %c0_76] : memref<7x128x1xf32, #tpu.memory_space<vmem>>, vector<1x128x1xf32>
      %100 = vector.shape_cast %99 : vector<1x128x1xf32> to vector<128x1xf32>
      %101 = vector.broadcast %100 : vector<128x1xf32> to vector<128x128xf32>
      %102 = arith.mulf %101, %98 : vector<128x128xf32>
      %103 = arith.addf %90, %102 : vector<128x128xf32>
      %c0_77 = arith.constant 0 : index
      %c0_78 = arith.constant 0 : index
      %104 = vector.load %arg12[%c0_77, %c0_78] : memref<128x128xf32, #tpu.memory_space<vmem>>, vector<128x128xf32>
      tpu.vector_store %arg12[%c0_77, %c0_78], %103 {strides = array<i32>} : memref<128x128xf32, #tpu.memory_space<vmem>>, vector<128x128xf32>,
    } else {
    }
    %c0_i32_2 = arith.constant 0 : i32
    %8 = arith.cmpi eq, %arg1, %c0_i32_2 : i32
    %9 = arith.extui %8 : i1 to i32
    %c0_i32_3 = arith.constant 0 : i32
    %10 = arith.cmpi ne, %9, %c0_i32_3 : i32
    scf.if %10 {
      %c0 = arith.constant 0 : index
      %c0_4 = arith.constant 0 : index
      %11 = vector.load %arg12[%c0, %c0_4] : memref<128x128xf32, #tpu.memory_space<vmem>>, vector<128x128xf32>
      %c0_5 = arith.constant 0 : index
      %c0_6 = arith.constant 0 : index
      %12 = vector.load %arg11[%c0_5, %c0_6] : memref<128x128xf32, #tpu.memory_space<vmem>>, vector<128x128xf32>
      tpu.vector_store %arg11[%c0_5, %c0_6], %11 {strides = array<i32>} : memref<128x128xf32, #tpu.memory_space<vmem>>, vector<128x128xf32>,
    } else {
    }
    return
  }
  func.func @transform_0(%arg0: i32, %arg1: i32, %arg2: memref<1x1xi32, #tpu.memory_space<smem>>, %arg3: memref<1xi32, #tpu.memory_space<smem>>) -> (i32, i32) {
    %c0_i32 = arith.constant 0 : i32
    %c0_i32_0 = arith.constant 0 : i32
    return %arg0, %c0_i32 : i32, i32
  }
  func.func @transform_1(%arg0: i32, %arg1: i32, %arg2: memref<1x1xi32, #tpu.memory_space<smem>>, %arg3: memref<1xi32, #tpu.memory_space<smem>>) -> (i32, i32) {
    %0 = arith.index_cast %arg0 : i32 to index
    %1 = arith.index_cast %arg1 : i32 to index
    %2 = memref.load %arg2[%0, %1] : memref<1x1xi32, #tpu.memory_space<smem>>
    %c0_i32 = arith.constant 0 : i32
    %c0_i32_0 = arith.constant 0 : i32
    return %2, %c0_i32 : i32, i32
  }
  func.func @transform_2(%arg0: i32, %arg1: i32, %arg2: memref<1x1xi32, #tpu.memory_space<smem>>, %arg3: memref<1xi32, #tpu.memory_space<smem>>) -> (i32, i32, i32) {
    %0 = arith.index_cast %arg0 : i32 to index
    %1 = arith.index_cast %arg1 : i32 to index
    %2 = memref.load %arg2[%0, %1] : memref<1x1xi32, #tpu.memory_space<smem>>
    %c0_i32 = arith.constant 0 : i32
    %c0_i32_0 = arith.constant 0 : i32
    return %c0_i32, %arg0, %2 : i32, i32, i32
  }
  func.func @transform_3(%arg0: i32, %arg1: i32, %arg2: memref<1x1xi32, #tpu.memory_space<smem>>, %arg3: memref<1xi32, #tpu.memory_space<smem>>) -> (i32, i32, i32) {
    %c0_i32 = arith.constant 0 : i32
    %c0_i32_0 = arith.constant 0 : i32
    %c0_i32_1 = arith.constant 0 : i32
    return %c0_i32, %arg0, %c0_i32_0 : i32, i32, i32
  }
  func.func @transform_4(%arg0: i32, %arg1: i32, %arg2: memref<1x1xi32, #tpu.memory_space<smem>>, %arg3: memref<1xi32, #tpu.memory_space<smem>>) -> (i32, i32, i32) {
    %c0_i32 = arith.constant 0 : i32
    %c0_i32_0 = arith.constant 0 : i32
    %c0_i32_1 = arith.constant 0 : i32
    %c0_i32_2 = arith.constant 0 : i32
    return %c0_i32, %c0_i32_0, %c0_i32_1 : i32, i32, i32
  }
  func.func @transform_5(%arg0: i32, %arg1: i32, %arg2: memref<1x1xi32, #tpu.memory_space<smem>>, %arg3: memref<1xi32, #tpu.memory_space<smem>>) -> (i32, i32) {
    %c0_i32 = arith.constant 0 : i32
    %c0_i32_0 = arith.constant 0 : i32
    %c0_i32_1 = arith.constant 0 : i32
    return %c0_i32, %c0_i32_0 : i32, i32
  }
  func.func @transform_6(%arg0: i32, %arg1: i32, %arg2: memref<1x1xi32, #tpu.memory_space<smem>>, %arg3: memref<1xi32, #tpu.memory_space<smem>>) -> (i32, i32) {
    %c0_i32 = arith.constant 0 : i32
    %c0_i32_0 = arith.constant 0 : i32
    %c0_i32_1 = arith.constant 0 : i32
    return %c0_i32, %c0_i32_0 : i32, i32
  }
  func.func @transform_7(%arg0: i32, %arg1: i32, %arg2: memref<1x1xi32, #tpu.memory_space<smem>>, %arg3: memref<1xi32, #tpu.memory_space<smem>>) -> (i32, i32) {
    %c0_i32 = arith.constant 0 : i32
    %c0_i32_0 = arith.constant 0 : i32
    return %arg0, %c0_i32 : i32, i32
  }
}

</mosaic_0001>

<bundles_post_ra>
// kernel: tpu_custom_call.1
= control target key start
LH: loop header
LB: loop body
LE: loop exit
PB: predicated region body
PF: predicated region fallthrough
CT: control target
= control target key end

     0   :  { %6 = vsyncpa [#allocation3], 0  ;;  %s102_s0 = inlined_call_operand.hbm [shape: f32[8,128], index: 0, kind: input, shape index: {}]   ;;  %s103_s1 = inlined_call_operand.hbm [shape: f32[8,128], index: 1, kind: output, shape index: {}]  }
   0x1   :  { %7 = vsyncpa [#allocation4], 0  ;;  %s84_s6 = smov [#allocation2]  }
   0x2   :  { %s14_s7 = sshll.u32 %s84_s6, 4  ;;  %s15_s7 = int_to_ptr.vmem [resolvable:$true] %s14_s7 }
   0x3   :  { %s48_s8 = scalar_lea.vmem %s15_s7, 128  ;;  %p53_p1 = scmp.lt.s32.totalorder %s15_s7, %s15_s7 }
   0x4   :  { %p49_p0 = scmp.ne.s32.totalorder %s15_s7, %s48_s8  ;;  %p54_p2 = scmp.lt.s32.totalorder %s48_s8, %s48_s8 }
   0x6   :  { %p55_p3 = por %p54_p2, %p53_p1 }
   0x8   :  { %p56_p4 = pnand %p55_p3, %p49_p0 }
   0xa   :  { %59 = shalt.err (!%p56_p4)
}
   0xb   :  { %17 = dma.hbm_to_vmem [thread:$0]  %s102_s0, 128, %s15_s7, [#allocation3]  }
   0xc   :  { %80 = dma.done.wait [#allocation3], 128  }
   0xd   :  { %81 = vsyncadd [#allocation3], 4294967168  ;;  %s85_s11 = smov [#allocation5]   ;;  %v21_v0 = vld [vmem:[#allocation2] sm:$0xff] }
   0xe   :  { %s29_s12 = sshll.u32 %s85_s11, 4  ;;  %22 = vst [vmem:[#allocation5] sm:$0xff] %v21_v0  ;;  %s30_s12 = int_to_ptr.vmem [resolvable:$true] %s29_s12 }
   0xf   :  { %s60_s13 = scalar_lea.vmem %s30_s12, 128  ;;  %p65_p6 = scmp.lt.s32.totalorder %s30_s12, %s30_s12 }
  0x10   :  { %p61_p5 = scmp.ne.s32.totalorder %s30_s12, %s60_s13  ;;  %p66_p7 = scmp.lt.s32.totalorder %s60_s13, %s60_s13 }
  0x12   :  { %p67_p8 = por %p66_p7, %p65_p6 }
  0x14   :  { %p68_p9 = pnand %p67_p8, %p61_p5 }
  0x16   :  { %71 = shalt.err (!%p68_p9)
}
  0x17   :  { %32 = dma.vmem_to_hbm [thread:$0]  %s30_s12, 128, %s103_s1, [#allocation4]  }
  0x18   :  { %82 = dma.done.wait [#allocation4], 128  }
  0x19   :  { %83 = vsyncadd [#allocation4], 4294967168 }
  0x1a   :  { %36 = vsyncpa [#allocation3], 1 }
  0x1b   :  { %37 = vsyncpa [#allocation4], 1 }

// kernel: _lambda_.4
= control target key start
LH: loop header
LB: loop body
LE: loop exit
PB: predicated region body
PF: predicated region fallthrough
CT: control target
= control target key end

     0   :  { %s6448_s0 = inlined_call_operand.<no memory space> [shape: s32[1,1], index: 0, kind: input, shape index: {}]   ;;  %s6449_s1 = inlined_call_operand.<no memory space> [shape: s32[1], index: 1, kind: input, shape index: {}]   ;;  %s6450_s5 = inlined_call_operand.vmem [shape: f32[7,128,1], index: 5, kind: input, shape index: {}]   ;;  %s6451_s6 = inlined_call_operand.vmem [shape: bf16[7,128,128], index: 6, kind: input, shape index: {}]   ;;  %s6452_s7 = inlined_call_operand.vmem [shape: bf16[128,128], index: 7, kind: input, shape index: {}]   ;;  %s6453_s9 = inlined_call_operand.vmem [shape: bf16[128,128], index: 9, kind: output, shape index: {}]   ;;  %s6454_s4 = inlined_call_operand.vmem [shape: s8[7,128,128], index: 4, kind: input, shape index: {}]   ;;  %s6455_s3 = inlined_call_operand.vmem [shape: bf16[128,128], index: 3, kind: input, shape index: {}, may-alias: {2,3}]   ;;  %s6456_s2 = inlined_call_operand.vmem [shape: bf16[128,128], index: 2, kind: input, shape index: {}, may-alias: {2,3}]   ;;  %s6457_s8 = inlined_call_operand.vmem [shape: f32[1,128], index: 8, kind: input, shape index: {}]  }
   0x1   :  { %s3652_s11 = sshll.u32 %s6448_s0, 4  ;;  %p91_p0 = scmp.lt.s32.totalorder %s6448_s0, 0  ;;  %v4770_v0 = vld [vmem:[%s6452_s7 + $0x38] sm:$0xff]   ;;  %v4771_v1 = vld [vmem:[%s6452_s7 + $0x30] sm:$0xff]   ;;  %v4772_v2 = vld [vmem:[%s6452_s7 + $0x28] sm:$0xff]  }
   0x2   :  { %p78_p1 = scmp.lt.s32.totalorder %s3652_s11, 15  ;;  %4273 = vmatprep.subr.bf16.mxu0 %v4770_v0  ;;  %4753 = vmatprep.subr.bf16.mxu1 %v4770_v0  ;;  %v4773_v3 = vld [vmem:[%s6452_s7 + $0x20] sm:$0xff]   ;;  %v4774_v6 = vld [vmem:[%s6452_s7 + $0x18] sm:$0xff]   ;;  %v4775_v7 = vld [vmem:[%s6452_s7 + $0x10] sm:$0xff]   ;;  %p3673_p2 = scmp.le.s32.totalorder %s6449_s1, 0 }
   0x3   :  { %s6521_s0 = smov (!%p91_p0, %s6448_s0), 0  ;;  %4274 = vmatpush3.bf16.msra.mxu0 %v4770_v0  ;;  %4761 = vmatpush3.bf16.msra.mxu1 %v4770_v0  ;;  %v4778_v4 = vld [vmem:[%s6456_s2] sm:$0xff]   ;;  %v4776_v8 = vld [vmem:[%s6452_s7 + $0x8] sm:$0xff]   ;;  %v4782_v12 = vld [vmem:[%s6456_s2 + $0x10] sm:$0xff]  }
   0x4   :  { %s6523_s11 = smov (!%p78_p1, %s3652_s11), 15  ;;  %s3654_s20 = sshll.u32 %s6521_s0, 3  ;;  %4275 = vmatprep.subr.bf16.mxu0 %v4771_v1  ;;  %4754 = vmatprep.subr.bf16.mxu1 %v4771_v1  ;;  %v4779_v5 = vld [vmem:[%s6456_s2 + $0x20] sm:$0xff]   ;;  %v4780_v10 = vld [vmem:[%s6456_s2 + $0x8] sm:$0xff]   ;;  %v4783_v13 = vld [vmem:[%s6456_s2 + $0x30] sm:$0xff]  }
   0x5   :  { %s3653_s21 = sshll.u32 %s6523_s11, 2  ;;  %s4985_s24 = scalar_lea.vmem %s6454_s4, %s3654_s20  ;;  %4289 = vmatprep.mubr.bf16.mxu0 %v4778_v4  ;;  %4297 = vmatprep.mubr.bf16.mxu1 %v4779_v5  ;;  %v4777_v9 = vld [vmem:[%s6452_s7] sm:$0xff]   ;;  %v4781_v11 = vld [vmem:[%s6456_s2 + $0x28] sm:$0xff]   ;;  %v4784_v14 = vld [vmem:[%s6456_s2 + $0x18] sm:$0xff]  }
   0x6   :  { %s4993_s29 = scalar_lea.vmem %s6455_s3, %s3653_s21  ;;  %v4785_v15 = vld [vmem:[%s6456_s2 + $0x38] sm:$0xff]   ;;  %v3655_v16 = vld [vmem:[%s6457_s8] ss:$0 sm:$0xff] }
   0x7   :  { %4276 = vmatpush3.bf16.msra.mxu0 %v4771_v1  ;;  %4762 = vmatpush3.bf16.msra.mxu1 %v4771_v1 }
   0x8   :  { %4277 = vmatprep.subr.bf16.mxu0 %v4772_v2  ;;  %4755 = vmatprep.subr.bf16.mxu1 %v4772_v2 }
   0xb   :  { %4278 = vmatpush3.bf16.msra.mxu0 %v4772_v2  ;;  %4763 = vmatpush3.bf16.msra.mxu1 %v4772_v2 }
   0xc   :  { %4279 = vmatprep.subr.bf16.mxu0 %v4773_v3  ;;  %4756 = vmatprep.subr.bf16.mxu1 %v4773_v3 }
   0xf   :  { %4280 = vmatpush3.bf16.msra.mxu0 %v4773_v3  ;;  %4764 = vmatpush3.bf16.msra.mxu1 %v4773_v3 }
  0x10   :  { %4281 = vmatprep.subr.bf16.mxu0 %v4774_v6  ;;  %4757 = vmatprep.subr.bf16.mxu1 %v4774_v6 }
  0x13   :  { %4282 = vmatpush3.bf16.msra.mxu0 %v4774_v6  ;;  %4765 = vmatpush3.bf16.msra.mxu1 %v4774_v6 }
  0x14   :  { %4283 = vmatprep.subr.bf16.mxu0 %v4775_v7  ;;  %4758 = vmatprep.subr.bf16.mxu1 %v4775_v7 }
  0x17   :  { %4284 = vmatpush3.bf16.msra.mxu0 %v4775_v7  ;;  %4766 = vmatpush3.bf16.msra.mxu1 %v4775_v7 }
  0x18   :  { %4285 = vmatprep.subr.bf16.mxu0 %v4776_v8  ;;  %4759 = vmatprep.subr.bf16.mxu1 %v4776_v8 }
  0x1b   :  { %4286 = vmatpush3.bf16.msra.mxu0 %v4776_v8  ;;  %4767 = vmatpush3.bf16.msra.mxu1 %v4776_v8 }
  0x1c   :  { %4287 = vmatprep.subr.bf16.mxu0 %v4777_v9  ;;  %4760 = vmatprep.subr.bf16.mxu1 %v4777_v9 }
  0x1f   :  { %4288 = vmatpush3.bf16.msra.mxu0 %v4777_v9  ;;  %4768 = vmatpush3.bf16.msra.mxu1 %v4777_v9 }
  0x22   :  { %4290 = vmatmul.mubr.bf16.vlgmr.msra.gmra.mxu0 %v4780_v10  ;;  %4298 = vmatmul.mubr.bf16.vlgmr.msra.gmra.mxu1 %v4781_v11 }
  0x23   :  { %4293 = vmatprep.mubr.bf16.mxu0 %v4782_v12  ;;  %4301 = vmatprep.mubr.bf16.mxu1 %v4783_v13 }
  0x2a   :  { %4294 = vmatmul.mubr.bf16.gmra.mxu0 %v4784_v14  ;;  %4302 = vmatmul.mubr.bf16.gmra.mxu1 %v4785_v15 }
  0xe2   :  { %v4291_v17 = vpop.f32.mrf.mxu0  ;;  %v4299_v18 = vpop.f32.mrf.mxu1 }
  0xe3   :  { %v282_v19 = vadd.f32 %v4291_v17, %v3655_v16  ;;  %v314_v20 = vadd.f32 %v4299_v18, %v3655_v16 }
  0xe4   :  { %v273_v21 = vpop.f32.mrf.mxu0  ;;  %v305_v22 = vpop.f32.mrf.mxu1 }
  0xe5   :  { %338 = vst [vmem:[#allocation2 + $0x58] sm:$0xff] %v282_v19  ;;  %346 = vst [vmem:[#allocation2 + $0x10] sm:$0xff] %v314_v20  ;;  %v274_v23 = vadd.f32 %v3655_v16, %v273_v21  ;;  %v306_v24 = vadd.f32 %v3655_v16, %v305_v22 }
  0xe6   :  { %v4292_v25 = vpop.f32.mrf.mxu0  ;;  %v4300_v26 = vpop.f32.mrf.mxu1 }
  0xe7   :  { %336 = vst [vmem:[#allocation2 + $0x30] sm:$0xff] %v274_v23  ;;  %344 = vst [vmem:[#allocation2 + $0x40] sm:$0xff] %v306_v24  ;;  %v285_v27 = vadd.f32 %v4292_v25, %v3655_v16  ;;  %v317_v28 = vadd.f32 %v4300_v26, %v3655_v16 }
  0xe8   :  { %v276_v29 = vpop.f32.mrf.mxu0  ;;  %v308_v30 = vpop.f32.mrf.mxu1 }
  0xe9   :  { %339 = vst [vmem:[#allocation2 + $0x18] sm:$0xff] %v285_v27  ;;  %347 = vst [vmem:[#allocation2 + $0x38] sm:$0xff] %v317_v28  ;;  %v277_v31 = vadd.f32 %v3655_v16, %v276_v29  ;;  %v309_v32 = vadd.f32 %v3655_v16, %v308_v30 }
  0xea   :  { %v4295_v33 = vpop.f32.mrf.mxu0  ;;  %v4303_v34 = vpop.f32.mrf.mxu1 }
  0xeb   :  { %337 = vst [vmem:[#allocation2] sm:$0xff] %v277_v31  ;;  %345 = vst [vmem:[#allocation2 + $0x20] sm:$0xff] %v309_v32  ;;  %v298_v35 = vadd.f32 %v4295_v33, %v3655_v16  ;;  %v330_v36 = vadd.f32 %v4303_v34, %v3655_v16 }
  0xec   :  { %v289_v37 = vpop.f32.mrf.mxu0  ;;  %v321_v38 = vpop.f32.mrf.mxu1 }
  0xed   :  { %342 = vst [vmem:[#allocation2 + $0x8] sm:$0xff] %v298_v35  ;;  %350 = vst [vmem:[#allocation2 + $0x78] sm:$0xff] %v330_v36  ;;  %v290_v39 = vadd.f32 %v3655_v16, %v289_v37  ;;  %v322_v40 = vadd.f32 %v3655_v16, %v321_v38 }
  0xee   :  { %v4296_v41 = vpop.f32.mrf.mxu0  ;;  %v4304_v42 = vpop.f32.mrf.mxu1 }
  0xef   :  { %340 = vst [vmem:[#allocation2 + $0x50] sm:$0xff] %v290_v39  ;;  %348 = vst [vmem:[#allocation2 + $0x60] sm:$0xff] %v322_v40  ;;  %v301_v43 = vadd.f32 %v4296_v41, %v3655_v16  ;;  %v333_v44 = vadd.f32 %v4304_v42, %v3655_v16  ;;  %356 = sbr.rel (%p3673_p2) target bundleno = 952 (0x3b8), region = 37 }
  0xf0   :  { %v292_v45 = vpop.f32.mrf.mxu0  ;;  %v324_v46 = vpop.f32.mrf.mxu1 }
  0xf1   :  { %343 = vst [vmem:[#allocation2 + $0x48] sm:$0xff] %v301_v43  ;;  %351 = vst [vmem:[#allocation2 + $0x28] sm:$0xff] %v333_v44  ;;  %v293_v47 = vadd.f32 %v3655_v16, %v292_v45  ;;  %v325_v48 = vadd.f32 %v3655_v16, %v324_v46 }
  0xf3   :  { %341 = vst [vmem:[#allocation2 + $0x68] sm:$0xff] %v293_v47  ;;  %349 = vst [vmem:[#allocation2 + $0x70] sm:$0xff] %v325_v48 }
  0xf4   :  { %v4788_v49 = vld [vmem:[%s6451_s6 + $0x38] sm:$0xff]   ;;  %v4789_v50 = vld [vmem:[%s6451_s6 + $0x30] sm:$0xff]   ;;  %v4790_v51 = vld [vmem:[%s6451_s6 + $0x28] sm:$0xff]   ;;  %v4916_v54 = vmov 0  }
  0xf5   :  { %4305 = vmatprep.subr.bf16.mxu0 %v4788_v49  ;;  %v4791_v52 = vld [vmem:[%s6451_s6 + $0x20] sm:$0xff]   ;;  %4787 = vset.pattern.permute.xlu1 %v4916_v54  ;;  %v4792_v55 = vld [vmem:[%s6451_s6 + $0x18] sm:$0xff]   ;;  %v4793_v56 = vld [vmem:[%s6451_s6 + $0x10] sm:$0xff]  }
  0xf6   :  { %4306 = vmatpush3.bf16.msra.mxu0 %v4788_v49  ;;  %v5053_v53 = vld [vmem:[%s4993_s29] sm:$0xff]   ;;  %4786 = vset.pattern.permute.xlu0 %v4916_v54  ;;  %v4794_v57 = vld [vmem:[%s6451_s6 + $0x8] sm:$0xff]   ;;  %v4798_v59 = vld [vmem:[%s6451_s6 + $0x78] sm:$0xff]  }
  0xf7   :  { %4307 = vmatprep.subr.bf16.mxu0 %v4789_v50  ;;  %4321 = vmatprep.mubr.bf16.mxu0 %v5053_v53  ;;  %v4795_v58 = vld [vmem:[%s6451_s6] sm:$0xff]   ;;  %v5072_v60 = vld [vmem:[%s4993_s29 + $0x8] sm:$0xff]   ;;  %v5075_v61 = vld [vmem:[%s4993_s29 + $0x10] sm:$0xff]  }
  0xf8   :  { %v4799_v62 = vld [vmem:[%s6451_s6 + $0x70] sm:$0xff]   ;;  %v4802_v63 = vld [vmem:[%s6451_s6 + $0x68] sm:$0xff]   ;;  %v5086_v0 = vld [vmem:[%s4993_s29 + $0x18] sm:$0xff]  }
  0xf9   :  { %v5089_v1 = vld [vmem:[%s4993_s29 + $0x20] sm:$0xff]   ;;  %v717_v3 = vld [vmem:[%s6450_s5 + $0x10] sm:$0xff]  ;;  %v4806_v5 = vld [vmem:[%s6451_s6 + $0x58] sm:$0xff]  }
  0xfa   :  { %4308 = vmatpush3.bf16.msra.mxu0 %v4789_v50  ;;  %v4803_v2 = vld [vmem:[%s6451_s6 + $0x60] sm:$0xff]   ;;  %743 = vperm.xlu1 %4787, %v717_v3   ;;  %v718_v6 = vld [vmem:[%s6450_s5 + $0x18] sm:$0xff]  ;;  %v5109_v7 = vld [vmem:[%s4993_s29 + $0x28] sm:$0xff]  }
  0xfb   :  { %4309 = vmatprep.subr.bf16.mxu0 %v4790_v51  ;;  %v715_v4 = vld [vmem:[%s6450_s5] sm:$0xff]  ;;  %v716_v8 = vld [vmem:[%s6450_s5 + $0x8] sm:$0xff]  ;;  %v5115_v9 = vld [vmem:[%s4993_s29 + $0x30] sm:$0xff]  }
  0xfc   :  { %733 = vperm.xlu0 %4786, %v715_v4   ;;  %v4807_v10 = vld [vmem:[%s6451_s6 + $0x50] sm:$0xff]   ;;  %v720_v11 = vld [vmem:[%s6450_s5 + $0x28] sm:$0xff]  ;;  %v719_v12 = vld [vmem:[%s6450_s5 + $0x20] sm:$0xff] }
  0xfd   :  { %v4810_v13 = vld [vmem:[%s6451_s6 + $0x48] sm:$0xff]   ;;  %v722_v14 = vld [vmem:[%s6450_s5 + $0x38] sm:$0xff]  ;;  %v721_v16 = vld [vmem:[%s6450_s5 + $0x30] sm:$0xff] }
  0xfe   :  { %4310 = vmatpush3.bf16.msra.mxu0 %v4790_v51  ;;  %748 = vperm.xlu1 %4787, %v718_v6   ;;  %v5135_v15 = vld [vmem:[%s4993_s29 + $0x38] sm:$0xff]   ;;  %v4811_v17 = vld [vmem:[%s6451_s6 + $0x40] sm:$0xff]   ;;  %v724_v18 = vld [vmem:[%s6450_s5 + $0x48] sm:$0xff] }
  0xff   :  { %4311 = vmatprep.subr.bf16.mxu0 %v4791_v52  ;;  %v723_v19 = vld [vmem:[%s6450_s5 + $0x40] sm:$0xff]  ;;  %v4812_v20 = vld [vmem:[%s6451_s6 + $0xb8] sm:$0xff]   ;;  %v725_v22 = vld [vmem:[%s6450_s5 + $0x50] sm:$0xff] }
 0x100   :  { %738 = vperm.xlu0 %4786, %v716_v8   ;;  %v726_v21 = vld [vmem:[%s6450_s5 + $0x58] sm:$0xff]  ;;  %v4813_v23 = vld [vmem:[%s6451_s6 + $0xb0] sm:$0xff]   ;;  %v728_v24 = vld [vmem:[%s6450_s5 + $0x68] sm:$0xff] }
 0x101   :  { %v727_v25 = vld [vmem:[%s6450_s5 + $0x60] sm:$0xff]  ;;  %v4814_v26 = vld [vmem:[%s6451_s6 + $0xa8] sm:$0xff]   ;;  %v730_v27 = vld [vmem:[%s6450_s5 + $0x78] sm:$0xff] }
 0x102   :  { %4312 = vmatpush3.bf16.msra.mxu0 %v4791_v52  ;;  %758 = vperm.xlu1 %4787, %v720_v11   ;;  %v729_v28 = vld [vmem:[%s6450_s5 + $0x70] sm:$0xff]  ;;  %v4815_v29 = vld [vmem:[%s6451_s6 + $0xa0] sm:$0xff]   ;;  %v3719_v30 = vld [vmem:[%s6450_s5 + $0x88] sm:$0xff] }
 0x103   :  { %4313 = vmatprep.subr.bf16.mxu0 %v4792_v55  ;;  %v3718_v31 = vld [vmem:[%s6450_s5 + $0x80] sm:$0xff]  ;;  %v4816_v32 = vld [vmem:[%s6451_s6 + $0x98] sm:$0xff]   ;;  %v3720_v34 = vld [vmem:[%s6450_s5 + $0x90] sm:$0xff] }
 0x104   :  { %753 = vperm.xlu0 %4786, %v719_v12   ;;  %v3721_v33 = vld [vmem:[%s6450_s5 + $0x98] sm:$0xff]  ;;  %v4817_v35 = vld [vmem:[%s6451_s6 + $0x90] sm:$0xff]   ;;  %v3723_v36 = vld [vmem:[%s6450_s5 + $0xa8] sm:$0xff] }
 0x105   :  { %v3722_v37 = vld [vmem:[%s6450_s5 + $0xa0] sm:$0xff]  ;;  %v4818_v38 = vld [vmem:[%s6451_s6 + $0x88] sm:$0xff]   ;;  %v3725_v39 = vld [vmem:[%s6450_s5 + $0xb8] sm:$0xff] }
 0x106   :  { %4314 = vmatpush3.bf16.msra.mxu0 %v4792_v55  ;;  %768 = vperm.xlu1 %4787, %v722_v14   ;;  %v3724_v40 = vld [vmem:[%s6450_s5 + $0xb0] sm:$0xff]  ;;  %v4819_v41 = vld [vmem:[%s6451_s6 + $0x80] sm:$0xff]   ;;  %v3727_v42 = vld [vmem:[%s6450_s5 + $0xc8] sm:$0xff] }
 0x107   :  { %4315 = vmatprep.subr.bf16.mxu0 %v4793_v56  ;;  %v3726_v43 = vld [vmem:[%s6450_s5 + $0xc0] sm:$0xff]  ;;  %v4820_v44 = vld [vmem:[%s6451_s6 + $0xf8] sm:$0xff]   ;;  %v3728_v46 = vld [vmem:[%s6450_s5 + $0xd0] sm:$0xff] }
 0x108   :  { %763 = vperm.xlu0 %4786, %v721_v16   ;;  %v3729_v45 = vld [vmem:[%s6450_s5 + $0xd8] sm:$0xff]  ;;  %v4821_v47 = vld [vmem:[%s6451_s6 + $0xf0] sm:$0xff]   ;;  %v3731_v48 = vld [vmem:[%s6450_s5 + $0xe8] sm:$0xff] }
 0x109   :  { %v3730_v49 = vld [vmem:[%s6450_s5 + $0xe0] sm:$0xff]  ;;  %v4822_v50 = vld [vmem:[%s6451_s6 + $0xe8] sm:$0xff]   ;;  %v3733_v51 = vld [vmem:[%s6450_s5 + $0xf8] sm:$0xff] }
 0x10a   :  { %4316 = vmatpush3.bf16.msra.mxu0 %v4793_v56  ;;  %778 = vperm.xlu1 %4787, %v724_v18   ;;  %v3732_v52 = vld [vmem:[%s6450_s5 + $0xf0] sm:$0xff]  ;;  %v4823_v54 = vld [vmem:[%s6451_s6 + $0xe0] sm:$0xff]   ;;  %v3763_v55 = vld [vmem:[%s6450_s5 + $0x108] sm:$0xff] }
 0x10b   :  { %4317 = vmatprep.subr.bf16.mxu0 %v4794_v57  ;;  %v3762_v56 = vld [vmem:[%s6450_s5 + $0x100] sm:$0xff]  ;;  %v4826_v3 = vld [vmem:[%s6451_s6 + $0xc8] sm:$0xff]   ;;  %v3769_v4 = vld [vmem:[%s6450_s5 + $0x138] sm:$0xff] }
 0x10c   :  { %773 = vperm.xlu0 %4786, %v723_v19   ;;  %v4827_v6 = vld [vmem:[%s6451_s6 + $0xc0] sm:$0xff]   ;;  %v3771_v8 = vld [vmem:[%s6450_s5 + $0x148] sm:$0xff]  ;;  %v4828_v11 = vld [vmem:[%s6451_s6 + $0x138] sm:$0xff]  }
 0x10d   :  { %v3773_v12 = vld [vmem:[%s6450_s5 + $0x158] sm:$0xff]  ;;  %v4829_v14 = vld [vmem:[%s6451_s6 + $0x130] sm:$0xff]   ;;  %v3775_v16 = vld [vmem:[%s6450_s5 + $0x168] sm:$0xff] }
 0x10e   :  { %4318 = vmatpush3.bf16.msra.mxu0 %v4794_v57  ;;  %788 = vperm.xlu1 %4787, %v726_v21   ;;  %v4824_v57 = vld [vmem:[%s6451_s6 + $0xd8] sm:$0xff]   ;;  %v4830_v18 = vld [vmem:[%s6451_s6 + $0x128] sm:$0xff]   ;;  %v4831_v21 = vld [vmem:[%s6451_s6 + $0x120] sm:$0xff]  }
 0x10f   :  { %4319 = vmatprep.subr.bf16.mxu0 %v4795_v58  ;;  %v3777_v19 = vld [vmem:[%s6450_s5 + $0x178] sm:$0xff] }
 0x110   :  { %783 = vperm.xlu0 %4786, %v725_v22   ;;  %v3807_v22 = vld [vmem:[%s6450_s5 + $0x188] sm:$0xff] }
 0x112   :  { %4320 = vmatpush3.bf16.msra.mxu0 %v4795_v58  ;;  %798 = vperm.xlu1 %4787, %v728_v24   ;;  %v3765_v58 = vld [vmem:[%s6450_s5 + $0x118] sm:$0xff] }
 0x113   :  { %4369 = vmatprep.subr.bf16.mxu0 %v4798_v59  ;;  %v4832_v24 = vld [vmem:[%s6451_s6 + $0x118] sm:$0xff]  }
 0x114   :  { %793 = vperm.xlu0 %4786, %v727_v25   ;;  %v3809_v25 = vld [vmem:[%s6450_s5 + $0x198] sm:$0xff] }
 0x115   :  { %4322 = vmatmul.mubr.bf16.vlgmr.msra.gmra.mxu0 %v5072_v60 }
 0x116   :  { %4370 = vmatpush3.bf16.msra.mxu0 %v4798_v59  ;;  %4325 = vmatprep.mubr.bf16.mxu0 %v5075_v61  ;;  %v3764_v59 = vld [vmem:[%s6450_s5 + $0x110] sm:$0xff] }
 0x117   :  { %4371 = vmatprep.subr.bf16.mxu0 %v4799_v62  ;;  %808 = vperm.xlu1 %4787, %v730_v27   ;;  %v4833_v27 = vld [vmem:[%s6451_s6 + $0x110] sm:$0xff]  }
 0x118   :  { %803 = vperm.xlu0 %4786, %v729_v28   ;;  %v3811_v28 = vld [vmem:[%s6450_s5 + $0x1a8] sm:$0xff] }
 0x11a   :  { %4372 = vmatpush3.bf16.msra.mxu0 %v4799_v62  ;;  %v4825_v62 = vld [vmem:[%s6451_s6 + $0xd0] sm:$0xff]  }
 0x11b   :  { %4373 = vmatprep.subr.bf16.mxu0 %v4802_v63  ;;  %1147 = vperm.xlu1 %4787, %v3719_v30   ;;  %v4834_v30 = vld [vmem:[%s6451_s6 + $0x108] sm:$0xff]  }
 0x11c   :  { %1142 = vperm.xlu0 %4786, %v3718_v31   ;;  %v3813_v31 = vld [vmem:[%s6450_s5 + $0x1b8] sm:$0xff] }
 0x11d   :  { %4326 = vmatmul.mubr.bf16.gmra.mxu0 %v5086_v0 }
 0x11e   :  { %4374 = vmatpush3.bf16.msra.mxu0 %v4802_v63  ;;  %4329 = vmatprep.mubr.bf16.mxu0 %v5089_v1  ;;  %v3767_v63 = vld [vmem:[%s6450_s5 + $0x128] sm:$0xff] }
 0x11f   :  { %4375 = vmatprep.subr.bf16.mxu0 %v4803_v2  ;;  %1157 = vperm.xlu1 %4787, %v3721_v33   ;;  %v4835_v33 = vld [vmem:[%s6451_s6 + $0x100] sm:$0xff]  }
 0x120   :  { %1152 = vperm.xlu0 %4786, %v3720_v34   ;;  %v3815_v34 = vld [vmem:[%s6450_s5 + $0x1c8] sm:$0xff] }
 0x122   :  { %4376 = vmatpush3.bf16.msra.mxu0 %v4803_v2  ;;  %v3766_v2 = vld [vmem:[%s6450_s5 + $0x120] sm:$0xff] }
 0x123   :  { %4377 = vmatprep.subr.bf16.mxu0 %v4806_v5  ;;  %1167 = vperm.xlu1 %4787, %v3723_v36   ;;  %v4836_v36 = vld [vmem:[%s6451_s6 + $0x178] sm:$0xff]  }
 0x124   :  { %1162 = vperm.xlu0 %4786, %v3722_v37   ;;  %v3817_v37 = vld [vmem:[%s6450_s5 + $0x1d8] sm:$0xff] }
 0x125   :  { %4330 = vmatmul.mubr.bf16.gmra.mxu0 %v5109_v7 }
 0x126   :  { %4378 = vmatpush3.bf16.msra.mxu0 %v4806_v5  ;;  %4333 = vmatprep.mubr.bf16.mxu0 %v5115_v9  ;;  %v3768_v5 = vld [vmem:[%s6450_s5 + $0x130] sm:$0xff] }
 0x127   :  { %4379 = vmatprep.subr.bf16.mxu0 %v4807_v10  ;;  %1177 = vperm.xlu1 %4787, %v3725_v39   ;;  %v3816_v39 = vld [vmem:[%s6450_s5 + $0x1d0] sm:$0xff] }
 0x128   :  { %1172 = vperm.xlu0 %4786, %v3724_v40  }
 0x12a   :  { %4380 = vmatpush3.bf16.msra.mxu0 %v4807_v10  ;;  %v3770_v10 = vld [vmem:[%s6450_s5 + $0x140] sm:$0xff] }
 0x12b   :  { %4381 = vmatprep.subr.bf16.mxu0 %v4810_v13  ;;  %1187 = vperm.xlu1 %4787, %v3727_v42   ;;  %v3819_v42 = vld [vmem:[%s6450_s5 + $0x1e8] sm:$0xff] }
 0x12c   :  { %1182 = vperm.xlu0 %4786, %v3726_v43   ;;  %v3818_v43 = vld [vmem:[%s6450_s5 + $0x1e0] sm:$0xff] }
 0x12d   :  { %4334 = vmatmul.mubr.bf16.gmra.mxu0 %v5135_v15 }
 0x12e   :  { %4382 = vmatpush3.bf16.msra.mxu0 %v4810_v13  ;;  %4385 = vmatprep.mubr.bf16.mxu0 %v5053_v53  ;;  %v3772_v13 = vld [vmem:[%s6450_s5 + $0x150] sm:$0xff] }
 0x12f   :  { %4383 = vmatprep.subr.bf16.mxu0 %v4811_v17  ;;  %1197 = vperm.xlu1 %4787, %v3729_v45   ;;  %v3821_v45 = vld [vmem:[%s6450_s5 + $0x1f8] sm:$0xff] }
 0x130   :  { %1192 = vperm.xlu0 %4786, %v3728_v46   ;;  %v3820_v46 = vld [vmem:[%s6450_s5 + $0x1f0] sm:$0xff] }
 0x132   :  { %4384 = vmatpush3.bf16.msra.mxu0 %v4811_v17  ;;  %v3774_v17 = vld [vmem:[%s6450_s5 + $0x160] sm:$0xff] }
 0x133   :  { %4433 = vmatprep.subr.bf16.mxu0 %v4812_v20  ;;  %1207 = vperm.xlu1 %4787, %v3731_v48   ;;  %v3851_v48 = vld [vmem:[%s6450_s5 + $0x208] sm:$0xff] }
 0x134   :  { %1202 = vperm.xlu0 %4786, %v3730_v49   ;;  %v3850_v49 = vld [vmem:[%s6450_s5 + $0x200] sm:$0xff] }
 0x135   :  { %4386 = vmatmul.mubr.bf16.vlgmr.msra.gmra.mxu0 %v5072_v60 }
 0x136   :  { %4434 = vmatpush3.bf16.msra.mxu0 %v4812_v20  ;;  %4389 = vmatprep.mubr.bf16.mxu0 %v5075_v61  ;;  %v3776_v20 = vld [vmem:[%s6450_s5 + $0x170] sm:$0xff] }
 0x137   :  { %4435 = vmatprep.subr.bf16.mxu0 %v4813_v23  ;;  %1217 = vperm.xlu1 %4787, %v3733_v51   ;;  %v3853_v51 = vld [vmem:[%s6450_s5 + $0x218] sm:$0xff] }
 0x138   :  { %1212 = vperm.xlu0 %4786, %v3732_v52   ;;  %v3852_v52 = vld [vmem:[%s6450_s5 + $0x210] sm:$0xff] }
 0x13a   :  { %4436 = vmatpush3.bf16.msra.mxu0 %v4813_v23  ;;  %v3806_v23 = vld [vmem:[%s6450_s5 + $0x180] sm:$0xff] }
 0x13b   :  { %4437 = vmatprep.subr.bf16.mxu0 %v4814_v26  ;;  %1556 = vperm.xlu1 %4787, %v3763_v55   ;;  %v3855_v55 = vld [vmem:[%s6450_s5 + $0x228] sm:$0xff] }
 0x13c   :  { %1551 = vperm.xlu0 %4786, %v3762_v56   ;;  %v3854_v56 = vld [vmem:[%s6450_s5 + $0x220] sm:$0xff] }
 0x13d   :  { %4390 = vmatmul.mubr.bf16.gmra.mxu0 %v5086_v0 }
 0x13e   :  { %4438 = vmatpush3.bf16.msra.mxu0 %v4814_v26  ;;  %4393 = vmatprep.mubr.bf16.mxu0 %v5089_v1  ;;  %v3808_v26 = vld [vmem:[%s6450_s5 + $0x190] sm:$0xff] }
 0x13f   :  { %4439 = vmatprep.subr.bf16.mxu0 %v4815_v29  ;;  %1566 = vperm.xlu1 %4787, %v3765_v58   ;;  %v3857_v58 = vld [vmem:[%s6450_s5 + $0x238] sm:$0xff] }
 0x140   :  { %1561 = vperm.xlu0 %4786, %v3764_v59   ;;  %v3856_v59 = vld [vmem:[%s6450_s5 + $0x230] sm:$0xff] }
 0x142   :  { %4440 = vmatpush3.bf16.msra.mxu0 %v4815_v29  ;;  %v3810_v29 = vld [vmem:[%s6450_s5 + $0x1a0] sm:$0xff] }
 0x143   :  { %4441 = vmatprep.subr.bf16.mxu0 %v4816_v32  ;;  %1576 = vperm.xlu1 %4787, %v3767_v63   ;;  %v3859_v63 = vld [vmem:[%s6450_s5 + $0x248] sm:$0xff] }
 0x144   :  { %1571 = vperm.xlu0 %4786, %v3766_v2   ;;  %v3858_v2 = vld [vmem:[%s6450_s5 + $0x240] sm:$0xff] }
 0x145   :  { %4394 = vmatmul.mubr.bf16.gmra.mxu0 %v5109_v7 }
 0x146   :  { %4442 = vmatpush3.bf16.msra.mxu0 %v4816_v32  ;;  %4397 = vmatprep.mubr.bf16.mxu0 %v5115_v9  ;;  %v3812_v32 = vld [vmem:[%s6450_s5 + $0x1b0] sm:$0xff] }
 0x147   :  { %4443 = vmatprep.subr.bf16.mxu0 %v4817_v35  ;;  %1586 = vperm.xlu1 %4787, %v3769_v4   ;;  %v3861_v4 = vld [vmem:[%s6450_s5 + $0x258] sm:$0xff] }
 0x148   :  { %1581 = vperm.xlu0 %4786, %v3768_v5   ;;  %v3860_v5 = vld [vmem:[%s6450_s5 + $0x250] sm:$0xff] }
 0x14a   :  { %4444 = vmatpush3.bf16.msra.mxu0 %v4817_v35  ;;  %v3814_v35 = vld [vmem:[%s6450_s5 + $0x1c0] sm:$0xff] }
 0x14b   :  { %4445 = vmatprep.subr.bf16.mxu0 %v4818_v38  ;;  %1596 = vperm.xlu1 %4787, %v3771_v8   ;;  %v3863_v8 = vld [vmem:[%s6450_s5 + $0x268] sm:$0xff] }
 0x14c   :  { %1591 = vperm.xlu0 %4786, %v3770_v10   ;;  %v3862_v10 = vld [vmem:[%s6450_s5 + $0x260] sm:$0xff] }
 0x14d   :  { %4398 = vmatmul.mubr.bf16.gmra.mxu0 %v5135_v15 }
 0x14e   :  { %4446 = vmatpush3.bf16.msra.mxu0 %v4818_v38  ;;  %4449 = vmatprep.mubr.bf16.mxu0 %v5053_v53  ;;  %v5398_v38 = vld [vmem:[%s4985_s24] sm:$0xff] }
 0x14f   :  { %4447 = vmatprep.subr.bf16.mxu0 %v4819_v41  ;;  %1606 = vperm.xlu1 %4787, %v3773_v12   ;;  %v393_v40 = vunpack.c.l.s8.bf16 %v5398_v38  ;;  %v3865_v12 = vld [vmem:[%s6450_s5 + $0x278] sm:$0xff] }
 0x150   :  { %1601 = vperm.xlu0 %4786, %v3772_v13   ;;  %v3864_v13 = vld [vmem:[%s6450_s5 + $0x270] sm:$0xff] }
 0x151   :  { %4353 = vmatprep.mubr.bf16.mxu1 %v393_v40 }
 0x152   :  { %4448 = vmatpush3.bf16.msra.mxu0 %v4819_v41  ;;  %v4837_v41 = vld [vmem:[%s6451_s6 + $0x170] sm:$0xff]  }
 0x153   :  { %4497 = vmatprep.subr.bf16.mxu0 %v4820_v44  ;;  %1616 = vperm.xlu1 %4787, %v3775_v16   ;;  %v3895_v16 = vld [vmem:[%s6450_s5 + $0x288] sm:$0xff] }
 0x154   :  { %1611 = vperm.xlu0 %4786, %v3774_v17   ;;  %v3894_v17 = vld [vmem:[%s6450_s5 + $0x280] sm:$0xff] }
 0x155   :  { %4450 = vmatmul.mubr.bf16.vlgmr.msra.gmra.mxu0 %v5072_v60 }
 0x156   :  { %4498 = vmatpush3.bf16.msra.mxu0 %v4820_v44  ;;  %4453 = vmatprep.mubr.bf16.mxu0 %v5075_v61  ;;  %v4838_v44 = vld [vmem:[%s6451_s6 + $0x168] sm:$0xff]  }
 0x157   :  { %4499 = vmatprep.subr.bf16.mxu0 %v4821_v47  ;;  %1626 = vperm.xlu1 %4787, %v3777_v19   ;;  %v3897_v19 = vld [vmem:[%s6450_s5 + $0x298] sm:$0xff] }
 0x158   :  { %1621 = vperm.xlu0 %4786, %v3776_v20   ;;  %v3896_v20 = vld [vmem:[%s6450_s5 + $0x290] sm:$0xff] }
 0x15a   :  { %4500 = vmatpush3.bf16.msra.mxu0 %v4821_v47  ;;  %v4839_v47 = vld [vmem:[%s6451_s6 + $0x160] sm:$0xff]  }
 0x15b   :  { %4501 = vmatprep.subr.bf16.mxu0 %v4822_v50  ;;  %1965 = vperm.xlu1 %4787, %v3807_v22   ;;  %v3899_v22 = vld [vmem:[%s6450_s5 + $0x2a8] sm:$0xff] }
 0x15c   :  { %1960 = vperm.xlu0 %4786, %v3806_v23   ;;  %v3898_v23 = vld [vmem:[%s6450_s5 + $0x2a0] sm:$0xff] }
 0x15d   :  { %4454 = vmatmul.mubr.bf16.gmra.mxu0 %v5086_v0 }
 0x15e   :  { %4502 = vmatpush3.bf16.msra.mxu0 %v4822_v50  ;;  %4457 = vmatprep.mubr.bf16.mxu0 %v5089_v1  ;;  %v4840_v50 = vld [vmem:[%s6451_s6 + $0x158] sm:$0xff]  }
 0x15f   :  { %4503 = vmatprep.subr.bf16.mxu0 %v4823_v54  ;;  %1975 = vperm.xlu1 %4787, %v3809_v25   ;;  %v3901_v25 = vld [vmem:[%s6450_s5 + $0x2b8] sm:$0xff] }
 0x160   :  { %1970 = vperm.xlu0 %4786, %v3808_v26   ;;  %v3900_v26 = vld [vmem:[%s6450_s5 + $0x2b0] sm:$0xff] }
 0x162   :  { %4504 = vmatpush3.bf16.msra.mxu0 %v4823_v54  ;;  %v4841_v54 = vld [vmem:[%s6451_s6 + $0x150] sm:$0xff]  }
 0x163   :  { %4505 = vmatprep.subr.bf16.mxu0 %v4824_v57  ;;  %1985 = vperm.xlu1 %4787, %v3811_v28   ;;  %v3903_v28 = vld [vmem:[%s6450_s5 + $0x2c8] sm:$0xff] }
 0x164   :  { %1980 = vperm.xlu0 %4786, %v3810_v29   ;;  %v3902_v29 = vld [vmem:[%s6450_s5 + $0x2c0] sm:$0xff] }
 0x165   :  { %4458 = vmatmul.mubr.bf16.gmra.mxu0 %v5109_v7 }
 0x166   :  { %4506 = vmatpush3.bf16.msra.mxu0 %v4824_v57  ;;  %4461 = vmatprep.mubr.bf16.mxu0 %v5115_v9  ;;  %v4842_v57 = vld [vmem:[%s6451_s6 + $0x148] sm:$0xff]  }
 0x167   :  { %4507 = vmatprep.subr.bf16.mxu0 %v4825_v62  ;;  %1995 = vperm.xlu1 %4787, %v3813_v31   ;;  %v3904_v31 = vld [vmem:[%s6450_s5 + $0x2d0] sm:$0xff] }
 0x168   :  { %1990 = vperm.xlu0 %4786, %v3812_v32   ;;  %v3907_v32 = vld [vmem:[%s6450_s5 + $0x2e8] sm:$0xff] }
 0x16a   :  { %4508 = vmatpush3.bf16.msra.mxu0 %v4825_v62  ;;  %v4843_v62 = vld [vmem:[%s6451_s6 + $0x140] sm:$0xff]  }
 0x16b   :  { %4509 = vmatprep.subr.bf16.mxu0 %v4826_v3  ;;  %2005 = vperm.xlu1 %4787, %v3815_v34  }
 0x16c   :  { %2000 = vperm.xlu0 %4786, %v3814_v35  }
 0x16d   :  { %4462 = vmatmul.mubr.bf16.gmra.mxu0 %v5135_v15 }
 0x16e   :  { %4510 = vmatpush3.bf16.msra.mxu0 %v4826_v3  ;;  %4513 = vmatprep.mubr.bf16.mxu0 %v5053_v53  ;;  %v4844_v3 = vld [vmem:[%s6451_s6 + $0x1b8] sm:$0xff]  }
 0x16f   :  { %4511 = vmatprep.subr.bf16.mxu0 %v4827_v6  ;;  %2015 = vperm.xlu1 %4787, %v3817_v37   ;;  %v3909_v37 = vld [vmem:[%s6450_s5 + $0x2f8] sm:$0xff] }
 0x170   :  { %2010 = vperm.xlu0 %4786, %v3816_v39  }
 0x172   :  { %4512 = vmatpush3.bf16.msra.mxu0 %v4827_v6  ;;  %v4845_v6 = vld [vmem:[%s6451_s6 + $0x1b0] sm:$0xff]  }
 0x173   :  { %4561 = vmatprep.subr.bf16.mxu0 %v4828_v11  ;;  %2025 = vperm.xlu1 %4787, %v3819_v42  }
 0x174   :  { %2020 = vperm.xlu0 %4786, %v3818_v43   ;;  %v3938_v43 = vld [vmem:[%s6450_s5 + $0x300] sm:$0xff] }
 0x175   :  { %4514 = vmatmul.mubr.bf16.vlgmr.msra.gmra.mxu0 %v5072_v60  ;;  %v5573_v35 = vpop.permute.xlu1 %743 }
 0x176   :  { %4562 = vmatpush3.bf16.msra.mxu0 %v4828_v11  ;;  %4517 = vmatprep.mubr.bf16.mxu0 %v5075_v61  ;;  %v4846_v11 = vld [vmem:[%s6451_s6 + $0x1a8] sm:$0xff]  }
 0x177   :  { %4563 = vmatprep.subr.bf16.mxu0 %v4829_v14  ;;  %2035 = vperm.xlu1 %4787, %v3821_v45  }
 0x178   :  { %2030 = vperm.xlu0 %4786, %v3820_v46   ;;  %v3941_v46 = vld [vmem:[%s6450_s5 + $0x318] sm:$0xff] }
 0x179   :  { %v5593_v42 = vpop.permute.xlu1 %748 }
 0x17a   :  { %4564 = vmatpush3.bf16.msra.mxu0 %v4829_v14  ;;  %v4847_v14 = vld [vmem:[%s6451_s6 + $0x1a0] sm:$0xff]  }
 0x17b   :  { %4565 = vmatprep.subr.bf16.mxu0 %v4830_v18  ;;  %2374 = vperm.xlu1 %4787, %v3851_v48  }
 0x17c   :  { %2369 = vperm.xlu0 %4786, %v3850_v49  }
 0x17d   :  { %4518 = vmatmul.mubr.bf16.gmra.mxu0 %v5086_v0  ;;  %v5613_v49 = vpop.permute.xlu1 %758 }
 0x17e   :  { %4566 = vmatpush3.bf16.msra.mxu0 %v4830_v18  ;;  %4521 = vmatprep.mubr.bf16.mxu0 %v5089_v1  ;;  %v4848_v18 = vld [vmem:[%s6451_s6 + $0x198] sm:$0xff]  }
 0x17f   :  { %4567 = vmatprep.subr.bf16.mxu0 %v4831_v21  ;;  %2384 = vperm.xlu1 %4787, %v3853_v51  }
 0x180   :  { %2379 = vperm.xlu0 %4786, %v3852_v52   ;;  %v3942_v52 = vld [vmem:[%s6450_s5 + $0x320] sm:$0xff] }
 0x182   :  { %4568 = vmatpush3.bf16.msra.mxu0 %v4831_v21  ;;  %v4849_v21 = vld [vmem:[%s6451_s6 + $0x190] sm:$0xff]  }
 0x183   :  { %4569 = vmatprep.subr.bf16.mxu0 %v4832_v24  ;;  %2394 = vperm.xlu1 %4787, %v3855_v55   ;;  %v3945_v55 = vld [vmem:[%s6450_s5 + $0x338] sm:$0xff] }
 0x184   :  { %2389 = vperm.xlu0 %4786, %v3854_v56  }
 0x185   :  { %4522 = vmatmul.mubr.bf16.gmra.mxu0 %v5109_v7 }
 0x186   :  { %4570 = vmatpush3.bf16.msra.mxu0 %v4832_v24  ;;  %4525 = vmatprep.mubr.bf16.mxu0 %v5115_v9  ;;  %v4850_v24 = vld [vmem:[%s6451_s6 + $0x188] sm:$0xff]  }
 0x187   :  { %4571 = vmatprep.subr.bf16.mxu0 %v4833_v27  ;;  %2404 = vperm.xlu1 %4787, %v3857_v58  }
 0x188   :  { %2399 = vperm.xlu0 %4786, %v3856_v59  }
 0x18a   :  { %4572 = vmatpush3.bf16.msra.mxu0 %v4833_v27  ;;  %v4851_v27 = vld [vmem:[%s6451_s6 + $0x180] sm:$0xff]  }
 0x18b   :  { %4573 = vmatprep.subr.bf16.mxu0 %v4834_v30  ;;  %2414 = vperm.xlu1 %4787, %v3859_v63   ;;  %v3946_v63 = vld [vmem:[%s6450_s5 + $0x340] sm:$0xff] }
 0x18c   :  { %2409 = vperm.xlu0 %4786, %v3858_v2  }
 0x18d   :  { %4526 = vmatmul.mubr.bf16.gmra.mxu0 %v5135_v15 }
 0x18e   :  { %4574 = vmatpush3.bf16.msra.mxu0 %v4834_v30  ;;  %4577 = vmatprep.mubr.bf16.mxu0 %v5053_v53  ;;  %v3905_v30 = vld [vmem:[%s6450_s5 + $0x2d8] sm:$0xff] }
 0x18f   :  { %4575 = vmatprep.subr.bf16.mxu0 %v4835_v33  ;;  %2424 = vperm.xlu1 %4787, %v3861_v4  }
 0x190   :  { %2419 = vperm.xlu0 %4786, %v3860_v5   ;;  %v3949_v5 = vld [vmem:[%s6450_s5 + $0x358] sm:$0xff] }
 0x192   :  { %4576 = vmatpush3.bf16.msra.mxu0 %v4835_v33 }
 0x193   :  { %4625 = vmatprep.subr.bf16.mxu0 %v4836_v36  ;;  %2434 = vperm.xlu1 %4787, %v3863_v8  }
 0x194   :  { %2429 = vperm.xlu0 %4786, %v3862_v10  }
 0x195   :  { %4578 = vmatmul.mubr.bf16.vlgmr.msra.gmra.mxu0 %v5072_v60 }
 0x196   :  { %4626 = vmatpush3.bf16.msra.mxu0 %v4836_v36  ;;  %4581 = vmatprep.mubr.bf16.mxu0 %v5075_v61  ;;  %v5575_v36 = vpop.permute.xlu0 %733 }
 0x197   :  { %4627 = vmatprep.subr.bf16.mxu0 %v4837_v41  ;;  %2444 = vperm.xlu1 %4787, %v3865_v12   ;;  %v3951_v12 = vld [vmem:[%s6450_s5 + $0x368] sm:$0xff] }
 0x198   :  { %2439 = vperm.xlu0 %4786, %v3864_v13  }
 0x19a   :  { %4628 = vmatpush3.bf16.msra.mxu0 %v4837_v41 }
 0x19b   :  { %4629 = vmatprep.subr.bf16.mxu0 %v4838_v44  ;;  %2783 = vperm.xlu1 %4787, %v3895_v16   ;;  %v3950_v16 = vld [vmem:[%s6450_s5 + $0x360] sm:$0xff] }
 0x19c   :  { %2778 = vperm.xlu0 %4786, %v3894_v17  }
 0x19d   :  { %4582 = vmatmul.mubr.bf16.gmra.mxu0 %v5086_v0 }
 0x19e   :  { %4630 = vmatpush3.bf16.msra.mxu0 %v4838_v44  ;;  %4585 = vmatprep.mubr.bf16.mxu0 %v5089_v1  ;;  %v5599_v44 = vpop.permute.xlu0 %738 }
 0x19f   :  { %4631 = vmatprep.subr.bf16.mxu0 %v4839_v47  ;;  %2793 = vperm.xlu1 %4787, %v3897_v19  }
 0x1a0   :  { %2788 = vperm.xlu0 %4786, %v3896_v20   ;;  %v3953_v20 = vld [vmem:[%s6450_s5 + $0x378] sm:$0xff] }
 0x1a2   :  { %4632 = vmatpush3.bf16.msra.mxu0 %v4839_v47 }
 0x1a3   :  { %4633 = vmatprep.subr.bf16.mxu0 %v4840_v50  ;;  %2803 = vperm.xlu1 %4787, %v3899_v22   ;;  %v3952_v22 = vld [vmem:[%s6450_s5 + $0x370] sm:$0xff] }
 0x1a4   :  { %2798 = vperm.xlu0 %4786, %v3898_v23  }
 0x1a5   :  { %4586 = vmatmul.mubr.bf16.gmra.mxu0 %v5109_v7 }
 0x1a6   :  { %4634 = vmatpush3.bf16.msra.mxu0 %v4840_v50  ;;  %4589 = vmatprep.mubr.bf16.mxu0 %v5115_v9  ;;  %v3943_v50 = vld [vmem:[%s6450_s5 + $0x328] sm:$0xff] }
 0x1a7   :  { %4635 = vmatprep.subr.bf16.mxu0 %v4841_v54  ;;  %2813 = vperm.xlu1 %4787, %v3901_v25  }
 0x1a8   :  { %2808 = vperm.xlu0 %4786, %v3900_v26  }
 0x1aa   :  { %4636 = vmatpush3.bf16.msra.mxu0 %v4841_v54 }
 0x1ab   :  { %4637 = vmatprep.subr.bf16.mxu0 %v4842_v57  ;;  %2823 = vperm.xlu1 %4787, %v3903_v28  }
 0x1ac   :  { %2818 = vperm.xlu0 %4786, %v3902_v29  }
 0x1ad   :  { %4590 = vmatmul.mubr.bf16.gmra.mxu0 %v5135_v15 }
 0x1ae   :  { %4638 = vmatpush3.bf16.msra.mxu0 %v4842_v57  ;;  %4641 = vmatprep.mubr.bf16.mxu0 %v5053_v53  ;;  %v5628_v57 = vpop.permute.xlu1 %768 }
 0x1af   :  { %4639 = vmatprep.subr.bf16.mxu0 %v4843_v62  ;;  %2833 = vperm.xlu1 %4787, %v3905_v30  }
 0x1b0   :  { %2828 = vperm.xlu0 %4786, %v3904_v31  }
 0x1b2   :  { %4640 = vmatpush3.bf16.msra.mxu0 %v4843_v62 }
 0x1b3   :  { %4689 = vmatprep.subr.bf16.mxu0 %v4844_v3  ;;  %2843 = vperm.xlu1 %4787, %v3907_v32  }
 0x1b5   :  { %4642 = vmatmul.mubr.bf16.vlgmr.msra.gmra.mxu0 %v5072_v60 }
 0x1b6   :  { %4690 = vmatpush3.bf16.msra.mxu0 %v4844_v3  ;;  %4645 = vmatprep.mubr.bf16.mxu0 %v5075_v61  ;;  %v5642_v3 = vpop.permute.xlu1 %778 }
 0x1b7   :  { %4691 = vmatprep.subr.bf16.mxu0 %v4845_v6  ;;  %2853 = vperm.xlu1 %4787, %v3909_v37  }
 0x1ba   :  { %4692 = vmatpush3.bf16.msra.mxu0 %v4845_v6 }
 0x1bb   :  { %4693 = vmatprep.subr.bf16.mxu0 %v4846_v11 }
 0x1bd   :  { %4646 = vmatmul.mubr.bf16.gmra.mxu0 %v5086_v0 }
 0x1be   :  { %4694 = vmatpush3.bf16.msra.mxu0 %v4846_v11  ;;  %4649 = vmatprep.mubr.bf16.mxu0 %v5089_v1 }
 0x1bf   :  { %4695 = vmatprep.subr.bf16.mxu0 %v4847_v14 }
 0x1c2   :  { %4696 = vmatpush3.bf16.msra.mxu0 %v4847_v14  ;;  %v5657_v14 = vpop.permute.xlu1 %788 }
 0x1c3   :  { %4697 = vmatprep.subr.bf16.mxu0 %v4848_v18 }
 0x1c5   :  { %4650 = vmatmul.mubr.bf16.gmra.mxu0 %v5109_v7 }
 0x1c6   :  { %4698 = vmatpush3.bf16.msra.mxu0 %v4848_v18  ;;  %4653 = vmatprep.mubr.bf16.mxu0 %v5115_v9 }
 0x1c7   :  { %4699 = vmatprep.subr.bf16.mxu0 %v4849_v21 }
 0x1ca   :  { %4700 = vmatpush3.bf16.msra.mxu0 %v4849_v21 }
 0x1cb   :  { %4701 = vmatprep.subr.bf16.mxu0 %v4850_v24 }
 0x1cd   :  { %4654 = vmatmul.mubr.bf16.gmra.mxu0 %v5135_v15 }
 0x1ce   :  { %4702 = vmatpush3.bf16.msra.mxu0 %v4850_v24  ;;  %4705 = vmatprep.mubr.bf16.mxu0 %v5053_v53  ;;  %v3906_v53 = vld [vmem:[%s6450_s5 + $0x2e0] sm:$0xff]  ;;  %v5676_v24 = vpop.permute.xlu1 %798 }
 0x1cf   :  { %4703 = vmatprep.subr.bf16.mxu0 %v4851_v27  ;;  %2838 = vperm.xlu0 %4786, %v3906_v53  }
 0x1d2   :  { %4704 = vmatpush3.bf16.msra.mxu0 %v4851_v27 }
 0x1d5   :  { %v5564_v33 = vpop.f32.mrf.mxu0  ;;  %4706 = vmatmul.mubr.bf16.vlgmr.msra.gmra.mxu0 %v5072_v60  ;;  %v3908_v60 = vld [vmem:[%s6450_s5 + $0x2f0] sm:$0xff] }
 0x1d6   :  { %4709 = vmatprep.mubr.bf16.mxu0 %v5075_v61  ;;  %2848 = vperm.xlu0 %4786, %v3908_v60   ;;  %v3939_v61 = vld [vmem:[%s6450_s5 + $0x308] sm:$0xff] }
 0x1d7   :  { %v5571_v34 = vpop.f32.mrf.mxu0  ;;  %3192 = vperm.xlu1 %4787, %v3939_v61  }
 0x1d9   :  { %v5580_v39 = vpop.f32.mrf.mxu0 }
 0x1da   :  { %3187 = vperm.xlu0 %4786, %v3938_v43   ;;  %v611_v60 = vpack.c.bf16 %v5580_v39, %v5564_v33 }
 0x1db   :  { %v5585_v40 = vpop.f32.mrf.mxu0  ;;  %3202 = vperm.xlu1 %4787, %v3941_v46  }
 0x1dd   :  { %v5590_v41 = vpop.f32.mrf.mxu0  ;;  %4710 = vmatmul.mubr.bf16.gmra.mxu0 %v5086_v0  ;;  %v3940_v0 = vld [vmem:[%s6450_s5 + $0x310] sm:$0xff] }
 0x1de   :  { %4713 = vmatprep.mubr.bf16.mxu0 %v5089_v1  ;;  %v5615_v1 = vpop.permute.xlu0 %753  ;;  %3197 = vperm.xlu0 %4786, %v3940_v0   ;;  %v394_v0 = vunpack.c.h.s8.bf16 %v5398_v38 }
 0x1df   :  { %v5601_v45 = vpop.f32.mrf.mxu0  ;;  %3212 = vperm.xlu1 %4787, %v3943_v50  }
 0x1e1   :  { %v5606_v47 = vpop.f32.mrf.mxu0 }
 0x1e2   :  { %3207 = vperm.xlu0 %4786, %v3942_v52   ;;  %v5633_v58 = vpop.permute.xlu0 %763  ;;  %v613_v29 = vpack.c.bf16 %v5606_v47, %v5590_v41  ;;  %v610_v41 = vpack.c.bf16 %v5585_v40, %v5571_v34  ;;  %v390_v47 = vld [vmem:[%s4985_s24 + $0x8] sm:$0xff]  ;;  %v391_v34 = vld [vmem:[%s4985_s24 + $0x10] sm:$0xff] }
 0x1e3   :  { %v5611_v48 = vpop.f32.mrf.mxu0  ;;  %3222 = vperm.xlu1 %4787, %v3945_v55   ;;  %v395_v50 = vunpack.c.l.s8.bf16 %v390_v47  ;;  %v396_v55 = vunpack.c.h.s8.bf16 %v390_v47 }
 0x1e4   :  { %v612_v32 = vpack.c.bf16 %v5611_v48, %v5601_v45 }
 0x1e5   :  { %v4331_v51 = vpop.f32.mrf.mxu0  ;;  %4714 = vmatmul.mubr.bf16.gmra.mxu0 %v5109_v7  ;;  %v3944_v7 = vld [vmem:[%s6450_s5 + $0x330] sm:$0xff] }
 0x1e6   :  { %4717 = vmatprep.mubr.bf16.mxu0 %v5115_v9  ;;  %3217 = vperm.xlu0 %4786, %v3944_v7   ;;  %v3947_v9 = vld [vmem:[%s6450_s5 + $0x348] sm:$0xff]  ;;  %v5644_v4 = vpop.permute.xlu0 %773 }
 0x1e7   :  { %v579_v54 = vpop.f32.mrf.mxu0  ;;  %3232 = vperm.xlu1 %4787, %v3947_v9  }
 0x1e9   :  { %v4332_v56 = vpop.f32.mrf.mxu0 }
 0x1ea   :  { %3227 = vperm.xlu0 %4786, %v3946_v63   ;;  %v5662_v17 = vpop.permute.xlu0 %783  ;;  %v615_v19 = vpack.c.bf16 %v4332_v56, %v4331_v51  ;;  %v397_v56 = vunpack.c.l.s8.bf16 %v391_v34 }
 0x1eb   :  { %v582_v59 = vpop.f32.mrf.mxu0  ;;  %3242 = vperm.xlu1 %4787, %v3949_v5   ;;  %v398_v5 = vunpack.c.h.s8.bf16 %v391_v34 }
 0x1ec   :  { %v614_v25 = vpack.c.bf16 %v582_v59, %v579_v54 }
 0x1ed   :  { %v4335_v62 = vpop.f32.mrf.mxu0  ;;  %4718 = vmatmul.mubr.bf16.gmra.mxu0 %v5135_v15  ;;  %v3948_v15 = vld [vmem:[%s6450_s5 + $0x350] sm:$0xff] }
 0x1ee   :  { %3237 = vperm.xlu0 %4786, %v3948_v15   ;;  %v5678_v26 = vpop.permute.xlu0 %793 }
 0x1ef   :  { %v595_v2 = vpop.f32.mrf.mxu0  ;;  %3252 = vperm.xlu1 %4787, %v3951_v12   ;;  %v3690_v12 = vld [vmem:[%s4985_s24 + $0x20] sm:$0xff] }
 0x1f1   :  { %v4336_v6 = vpop.f32.mrf.mxu0 }
 0x1f2   :  { %v617_v8 = vpack.c.bf16 %v4336_v6, %v4335_v62  ;;  %3247 = vperm.xlu0 %4786, %v3950_v16   ;;  %v392_v62 = vld [vmem:[%s4985_s24 + $0x18] sm:$0xff] }
 0x1f3   :  { %v598_v10 = vpop.f32.mrf.mxu0  ;;  %3262 = vperm.xlu1 %4787, %v3953_v20   ;;  %v399_v15 = vunpack.c.l.s8.bf16 %v392_v62  ;;  %v400_v20 = vunpack.c.h.s8.bf16 %v392_v62  ;;  %v3734_v62 = vld [vmem:[%s4985_s24 + $0x40] sm:$0xff] }
 0x1f4   :  { %v616_v11 = vpack.c.bf16 %v598_v10, %v595_v2  ;;  %4337 = vmatprep.subr.bf16.mxu1 %v617_v8 }
 0x1f5   :  { %4338 = vmatpush3.bf16.msra.mxu1 %v617_v8  ;;  %v5655_v13 = vpop.f32.mrf.mxu0 }
 0x1f6   :  { %4339 = vmatprep.subr.bf16.mxu1 %v616_v11  ;;  %3257 = vperm.xlu0 %4786, %v3952_v22  }
 0x1f7   :  { %v5664_v18 = vpop.f32.mrf.mxu0 }
 0x1f9   :  { %4340 = vmatpush3.bf16.msra.mxu1 %v616_v11  ;;  %v5669_v21 = vpop.f32.mrf.mxu0 }
 0x1fa   :  { %4341 = vmatprep.subr.bf16.mxu1 %v615_v19 }
 0x1fb   :  { %v5674_v23 = vpop.f32.mrf.mxu0 }
 0x1fd   :  { %4342 = vmatpush3.bf16.msra.mxu1 %v615_v19  ;;  %v4391_v27 = vpop.f32.mrf.mxu0  ;;  %v1019_v19 = vpack.c.bf16 %v5669_v21, %v5655_v13 }
 0x1fe   :  { %4343 = vmatprep.subr.bf16.mxu1 %v614_v25 }
 0x1ff   :  { %v971_v28 = vpop.f32.mrf.mxu0 }
 0x201   :  { %4344 = vmatpush3.bf16.msra.mxu1 %v614_v25  ;;  %v4392_v30 = vpop.f32.mrf.mxu0  ;;  %v848_v25 = vunpack.c.l.s8.bf16 %v3690_v12 }
 0x202   :  { %4345 = vmatprep.subr.bf16.mxu1 %v613_v29  ;;  %v1021_v2 = vpack.c.bf16 %v4392_v30, %v4391_v27  ;;  %v3691_v30 = vld [vmem:[%s4985_s24 + $0x28] sm:$0xff] }
 0x203   :  { %v974_v31 = vpop.f32.mrf.mxu0  ;;  %v850_v21 = vunpack.c.l.s8.bf16 %v3691_v30 }
 0x204   :  { %v1020_v10 = vpack.c.bf16 %v974_v31, %v971_v28  ;;  %v1018_v28 = vpack.c.bf16 %v5674_v23, %v5664_v18  ;;  %v3692_v18 = vld [vmem:[%s4985_s24 + $0x30] sm:$0xff] }
 0x205   :  { %4346 = vmatpush3.bf16.msra.mxu1 %v613_v29  ;;  %v4395_v53 = vpop.f32.mrf.mxu0  ;;  %v852_v47 = vunpack.c.l.s8.bf16 %v3692_v18 }
 0x206   :  { %4347 = vmatprep.subr.bf16.mxu1 %v612_v32 }
 0x207   :  { %v987_v37 = vpop.f32.mrf.mxu0 }
 0x209   :  { %4348 = vmatpush3.bf16.msra.mxu1 %v612_v32  ;;  %v4396_v61 = vpop.f32.mrf.mxu0  ;;  %v849_v32 = vunpack.c.h.s8.bf16 %v3690_v12 }
 0x20a   :  { %4349 = vmatprep.subr.bf16.mxu1 %v611_v60  ;;  %v1023_v54 = vpack.c.bf16 %v4396_v61, %v4395_v53 }
 0x20b   :  { %v990_v43 = vpop.f32.mrf.mxu0 }
 0x20c   :  { %v1022_v59 = vpack.c.bf16 %v990_v43, %v987_v37 }
 0x20d   :  { %4350 = vmatpush3.bf16.msra.mxu1 %v611_v60  ;;  %v4399_v46 = vpop.f32.mrf.mxu0 }
 0x20e   :  { %4351 = vmatprep.subr.bf16.mxu1 %v610_v41 }
 0x20f   :  { %v1003_v45 = vpop.f32.mrf.mxu0 }
 0x211   :  { %4352 = vmatpush3.bf16.msra.mxu1 %v610_v41  ;;  %v4400_v48 = vpop.f32.mrf.mxu0  ;;  %v851_v41 = vunpack.c.h.s8.bf16 %v3691_v30 }
 0x212   :  { %v1025_v51 = vpack.c.bf16 %v4400_v48, %v4399_v46 }
 0x213   :  { %v1006_v33 = vpop.f32.mrf.mxu0 }
 0x214   :  { %v1024_v39 = vpack.c.bf16 %v1006_v33, %v1003_v45  ;;  %4354 = vmatmul.mubr.bf16.vlgmr.msra.gmra.mxu1 %v394_v0  ;;  %4401 = vmatprep.subr.bf16.mxu1 %v1025_v51 }
 0x215   :  { %4402 = vmatpush3.bf16.msra.mxu1 %v1025_v51  ;;  %v5690_v52 = vpop.f32.mrf.mxu0  ;;  %4357 = vmatprep.mubr.bf16.mxu1 %v395_v50  ;;  %v3693_v50 = vld [vmem:[%s4985_s24 + $0x38] sm:$0xff] }
 0x216   :  { %4403 = vmatprep.subr.bf16.mxu1 %v1024_v39 }
 0x217   :  { %v5693_v40 = vpop.f32.mrf.mxu0 }
 0x219   :  { %4404 = vmatpush3.bf16.msra.mxu1 %v1024_v39  ;;  %v5695_v38 = vpop.f32.mrf.mxu0  ;;  %v853_v39 = vunpack.c.h.s8.bf16 %v3692_v18 }
 0x21a   :  { %4405 = vmatprep.subr.bf16.mxu1 %v1023_v54 }
 0x21b   :  { %v5697_v7 = vpop.f32.mrf.mxu0 }
 0x21c   :  { %4358 = vmatmul.mubr.bf16.gmra.mxu1 %v396_v55 }
 0x21d   :  { %4406 = vmatpush3.bf16.msra.mxu1 %v1023_v54  ;;  %v5699_v9 = vpop.f32.mrf.mxu0  ;;  %4361 = vmatprep.mubr.bf16.mxu1 %v397_v56  ;;  %v854_v54 = vunpack.c.l.s8.bf16 %v3693_v50 }
 0x21e   :  { %4407 = vmatprep.subr.bf16.mxu1 %v1022_v59 }
 0x21f   :  { %v5702_v63 = vpop.f32.mrf.mxu0 }
 0x221   :  { %4408 = vmatpush3.bf16.msra.mxu1 %v1022_v59  ;;  %v4456_v6 = vpop.f32.mrf.mxu0 }
 0x222   :  { %4409 = vmatprep.subr.bf16.mxu1 %v1021_v2  ;;  %v1430_v33 = vpack.c.bf16 %v4456_v6, %v5699_v9  ;;  %v855_v9 = vunpack.c.h.s8.bf16 %v3693_v50  ;;  %v3778_v50 = vld [vmem:[%s4985_s24 + $0x60] sm:$0xff] }
 0x223   :  { %v1383_v8 = vpop.f32.mrf.mxu0 }
 0x224   :  { %4362 = vmatmul.mubr.bf16.gmra.mxu1 %v398_v5  ;;  %v1429_v56 = vpack.c.bf16 %v1383_v8, %v5702_v63  ;;  %v1428_v5 = vpack.c.bf16 %v5695_v38, %v5690_v52  ;;  %v1427_v63 = vpack.c.bf16 %v5697_v7, %v5693_v40  ;;  %v3736_v40 = vld [vmem:[%s4985_s24 + $0x50] sm:$0xff] }
 0x225   :  { %4410 = vmatpush3.bf16.msra.mxu1 %v1021_v2  ;;  %v4459_v11 = vpop.f32.mrf.mxu0  ;;  %4365 = vmatprep.mubr.bf16.mxu1 %v399_v15  ;;  %v1257_v15 = vunpack.c.l.s8.bf16 %v3734_v62  ;;  %v1261_v30 = vunpack.c.l.s8.bf16 %v3736_v40 }
 0x226   :  { %4411 = vmatprep.subr.bf16.mxu1 %v1020_v10 }
 0x227   :  { %v1396_v16 = vpop.f32.mrf.mxu0 }
 0x229   :  { %4412 = vmatpush3.bf16.msra.mxu1 %v1020_v10  ;;  %v4460_v22 = vpop.f32.mrf.mxu0 }
 0x22a   :  { %4413 = vmatprep.subr.bf16.mxu1 %v1019_v19  ;;  %v1432_v43 = vpack.c.bf16 %v4460_v22, %v4459_v11  ;;  %v3735_v11 = vld [vmem:[%s4985_s24 + $0x48] sm:$0xff] }
 0x22b   :  { %v1399_v27 = vpop.f32.mrf.mxu0  ;;  %v1259_v38 = vunpack.c.l.s8.bf16 %v3735_v11 }
 0x22c   :  { %4366 = vmatmul.mubr.bf16.gmra.mxu1 %v400_v20  ;;  %v1431_v0 = vpack.c.bf16 %v1399_v27, %v1396_v16  ;;  %v1258_v16 = vunpack.c.h.s8.bf16 %v3734_v62 }
 0x22d   :  { %4414 = vmatpush3.bf16.msra.mxu1 %v1019_v19  ;;  %v4463_v29 = vpop.f32.mrf.mxu0  ;;  %4417 = vmatprep.mubr.bf16.mxu1 %v848_v25 }
 0x22e   :  { %4415 = vmatprep.subr.bf16.mxu1 %v1018_v28 }
 0x22f   :  { %v1412_v31 = vpop.f32.mrf.mxu0 }
 0x231   :  { %4416 = vmatpush3.bf16.msra.mxu1 %v1018_v28  ;;  %v4464_v13 = vpop.f32.mrf.mxu0  ;;  %v1260_v28 = vunpack.c.h.s8.bf16 %v3735_v11 }
 0x232   :  { %v1434_v53 = vpack.c.bf16 %v4464_v13, %v4463_v29 }
 0x233   :  { %v1415_v37 = vpop.f32.mrf.mxu0 }
 0x234   :  { %v1433_v60 = vpack.c.bf16 %v1415_v37, %v1412_v31  ;;  %4418 = vmatmul.mubr.bf16.vlgmr.msra.gmra.mxu1 %v849_v32  ;;  %4465 = vmatprep.subr.bf16.mxu1 %v1434_v53 }
 0x235   :  { %4466 = vmatpush3.bf16.msra.mxu1 %v1434_v53  ;;  %v5710_v61 = vpop.f32.mrf.mxu0  ;;  %4421 = vmatprep.mubr.bf16.mxu1 %v850_v21  ;;  %v3737_v21 = vld [vmem:[%s4985_s24 + $0x58] sm:$0xff] }
 0x236   :  { %4467 = vmatprep.subr.bf16.mxu1 %v1433_v60 }
 0x237   :  { %v5713_v23 = vpop.f32.mrf.mxu0 }
 0x239   :  { %4468 = vmatpush3.bf16.msra.mxu1 %v1433_v60  ;;  %v5715_v46 = vpop.f32.mrf.mxu0  ;;  %v1262_v60 = vunpack.c.h.s8.bf16 %v3736_v40 }
 0x23a   :  { %4469 = vmatprep.subr.bf16.mxu1 %v1432_v43 }
 0x23b   :  { %v5717_v45 = vpop.f32.mrf.mxu0 }
 0x23c   :  { %4422 = vmatmul.mubr.bf16.gmra.mxu1 %v851_v41 }
 0x23d   :  { %4470 = vmatpush3.bf16.msra.mxu1 %v1432_v43  ;;  %v5719_v48 = vpop.f32.mrf.mxu0  ;;  %4425 = vmatprep.mubr.bf16.mxu1 %v852_v47  ;;  %v1263_v43 = vunpack.c.l.s8.bf16 %v3737_v21 }
 0x23e   :  { %4471 = vmatprep.subr.bf16.mxu1 %v1431_v0 }
 0x23f   :  { %v5722_v51 = vpop.f32.mrf.mxu0 }
 0x241   :  { %4472 = vmatpush3.bf16.msra.mxu1 %v1431_v0  ;;  %v4520_v34 = vpop.f32.mrf.mxu0 }
 0x242   :  { %4473 = vmatprep.subr.bf16.mxu1 %v1430_v33  ;;  %v1839_v37 = vpack.c.bf16 %v4520_v34, %v5719_v48  ;;  %v1264_v48 = vunpack.c.h.s8.bf16 %v3737_v21  ;;  %v3822_v21 = vld [vmem:[%s4985_s24 + $0x80] sm:$0xff] }
 0x243   :  { %v1792_v55 = vpop.f32.mrf.mxu0 }
 0x244   :  { %4426 = vmatmul.mubr.bf16.gmra.mxu1 %v853_v39  ;;  %v1838_v47 = vpack.c.bf16 %v1792_v55, %v5722_v51  ;;  %v1837_v39 = vpack.c.bf16 %v5715_v46, %v5710_v61  ;;  %v1836_v51 = vpack.c.bf16 %v5717_v45, %v5713_v23  ;;  %v3780_v23 = vld [vmem:[%s4985_s24 + $0x70] sm:$0xff] }
 0x245   :  { %4474 = vmatpush3.bf16.msra.mxu1 %v1430_v33  ;;  %v4523_v59 = vpop.f32.mrf.mxu0  ;;  %4429 = vmatprep.mubr.bf16.mxu1 %v854_v54  ;;  %v1666_v54 = vunpack.c.l.s8.bf16 %v3778_v50  ;;  %v1670_v11 = vunpack.c.l.s8.bf16 %v3780_v23 }
 0x246   :  { %4475 = vmatprep.subr.bf16.mxu1 %v1429_v56 }
 0x247   :  { %v1805_v2 = vpop.f32.mrf.mxu0 }
 0x249   :  { %4476 = vmatpush3.bf16.msra.mxu1 %v1429_v56  ;;  %v4524_v6 = vpop.f32.mrf.mxu0 }
 0x24a   :  { %4477 = vmatprep.subr.bf16.mxu1 %v1428_v5  ;;  %v1841_v27 = vpack.c.bf16 %v4524_v6, %v4523_v59  ;;  %v3779_v59 = vld [vmem:[%s4985_s24 + $0x68] sm:$0xff] }
 0x24b   :  { %v1808_v10 = vpop.f32.mrf.mxu0  ;;  %v1668_v46 = vunpack.c.l.s8.bf16 %v3779_v59 }
 0x24c   :  { %4430 = vmatmul.mubr.bf16.gmra.mxu1 %v855_v9  ;;  %v1840_v32 = vpack.c.bf16 %v1808_v10, %v1805_v2  ;;  %v1667_v2 = vunpack.c.h.s8.bf16 %v3778_v50  ;;  %v3823_v50 = vld [vmem:[%s4985_s24 + $0x88] sm:$0xff] }
 0x24d   :  { %4478 = vmatpush3.bf16.msra.mxu1 %v1428_v5  ;;  %v4527_v8 = vpop.f32.mrf.mxu0  ;;  %4481 = vmatprep.mubr.bf16.mxu1 %v1257_v15 }
 0x24e   :  { %4479 = vmatprep.subr.bf16.mxu1 %v1427_v63 }
 0x24f   :  { %v1821_v12 = vpop.f32.mrf.mxu0 }
 0x251   :  { %4480 = vmatpush3.bf16.msra.mxu1 %v1427_v63  ;;  %v4528_v52 = vpop.f32.mrf.mxu0  ;;  %v1669_v63 = vunpack.c.h.s8.bf16 %v3779_v59 }
 0x252   :  { %v1843_v19 = vpack.c.bf16 %v4528_v52, %v4527_v8 }
 0x253   :  { %v1824_v20 = vpop.f32.mrf.mxu0 }
 0x254   :  { %v1842_v22 = vpack.c.bf16 %v1824_v20, %v1821_v12  ;;  %4482 = vmatmul.mubr.bf16.vlgmr.msra.gmra.mxu1 %v1258_v16  ;;  %4529 = vmatprep.subr.bf16.mxu1 %v1843_v19 }
 0x255   :  { %4530 = vmatpush3.bf16.msra.mxu1 %v1843_v19  ;;  %v5732_v25 = vpop.f32.mrf.mxu0  ;;  %4485 = vmatprep.mubr.bf16.mxu1 %v1259_v38  ;;  %v3781_v38 = vld [vmem:[%s4985_s24 + $0x78] sm:$0xff] }
 0x256   :  { %4531 = vmatprep.subr.bf16.mxu1 %v1842_v22 }
 0x257   :  { %v5735_v7 = vpop.f32.mrf.mxu0 }
 0x259   :  { %4532 = vmatpush3.bf16.msra.mxu1 %v1842_v22  ;;  %v5737_v29 = vpop.f32.mrf.mxu0  ;;  %v1671_v22 = vunpack.c.h.s8.bf16 %v3780_v23 }
 0x25a   :  { %4533 = vmatprep.subr.bf16.mxu1 %v1841_v27 }
 0x25b   :  { %v5739_v31 = vpop.f32.mrf.mxu0 }
 0x25c   :  { %4486 = vmatmul.mubr.bf16.gmra.mxu1 %v1260_v28 }
 0x25d   :  { %4534 = vmatpush3.bf16.msra.mxu1 %v1841_v27  ;;  %v5741_v13 = vpop.f32.mrf.mxu0  ;;  %4489 = vmatprep.mubr.bf16.mxu1 %v1261_v30  ;;  %v1672_v27 = vunpack.c.l.s8.bf16 %v3781_v38 }
 0x25e   :  { %4535 = vmatprep.subr.bf16.mxu1 %v1840_v32 }
 0x25f   :  { %v5744_v53 = vpop.f32.mrf.mxu0 }
 0x261   :  { %4536 = vmatpush3.bf16.msra.mxu1 %v1840_v32  ;;  %v4584_v18 = vpop.f32.mrf.mxu0 }
 0x262   :  { %4537 = vmatprep.subr.bf16.mxu1 %v1839_v37  ;;  %v2248_v20 = vpack.c.bf16 %v4584_v18, %v5741_v13  ;;  %v2246_v13 = vpack.c.bf16 %v5737_v29, %v5732_v25  ;;  %v2076_v25 = vunpack.c.h.s8.bf16 %v3822_v21 }
 0x263   :  { %v2201_v41 = vpop.f32.mrf.mxu0 }
 0x264   :  { %4490 = vmatmul.mubr.bf16.gmra.mxu1 %v1262_v60  ;;  %v2247_v30 = vpack.c.bf16 %v2201_v41, %v5744_v53  ;;  %v1673_v60 = vunpack.c.h.s8.bf16 %v3781_v38  ;;  %v2245_v53 = vpack.c.bf16 %v5739_v31, %v5735_v7 }
 0x265   :  { %4538 = vmatpush3.bf16.msra.mxu1 %v1839_v37  ;;  %v4587_v0 = vpop.f32.mrf.mxu0  ;;  %4493 = vmatprep.mubr.bf16.mxu1 %v1263_v43  ;;  %v2075_v43 = vunpack.c.l.s8.bf16 %v3822_v21 }
 0x266   :  { %4539 = vmatprep.subr.bf16.mxu1 %v1838_v47 }
 0x267   :  { %v2214_v33 = vpop.f32.mrf.mxu0 }
 0x269   :  { %4540 = vmatpush3.bf16.msra.mxu1 %v1838_v47  ;;  %v4588_v34 = vpop.f32.mrf.mxu0 }
 0x26a   :  { %4541 = vmatprep.subr.bf16.mxu1 %v1837_v39  ;;  %v2250_v10 = vpack.c.bf16 %v4588_v34, %v4587_v0  ;;  %v5777_v0 = vpop.permute.xlu0 %803 }
 0x26b   :  { %v2217_v56 = vpop.f32.mrf.mxu0 }
 0x26c   :  { %4494 = vmatmul.mubr.bf16.gmra.mxu1 %v1264_v48  ;;  %v2249_v16 = vpack.c.bf16 %v2217_v56, %v2214_v33  ;;  %v2077_v48 = vunpack.c.l.s8.bf16 %v3823_v50 }
 0x26d   :  { %4542 = vmatpush3.bf16.msra.mxu1 %v1837_v39  ;;  %v4591_v55 = vpop.f32.mrf.mxu0  ;;  %4545 = vmatprep.mubr.bf16.mxu1 %v1666_v54  ;;  %v5782_v39 = vpop.permute.xlu1 %808 }
 0x26e   :  { %4543 = vmatprep.subr.bf16.mxu1 %v1836_v51  ;;  %v5784_v34 = vpop.permute.xlu0 %1142 }
 0x26f   :  { %v2230_v62 = vpop.f32.mrf.mxu0 }
 0x271   :  { %4544 = vmatpush3.bf16.msra.mxu1 %v1836_v51  ;;  %v4592_v61 = vpop.f32.mrf.mxu0  ;;  %v5788_v31 = vpop.permute.xlu1 %1147 }
 0x272   :  { %v2252_v5 = vpack.c.bf16 %v4592_v61, %v4591_v55  ;;  %v3824_v55 = vld [vmem:[%s4985_s24 + $0x90] sm:$0xff]  ;;  %v2078_v61 = vunpack.c.h.s8.bf16 %v3823_v50 }
 0x273   :  { %v2233_v9 = vpop.f32.mrf.mxu0 }
 0x274   :  { %v2251_v6 = vpack.c.bf16 %v2233_v9, %v2230_v62  ;;  %4546 = vmatmul.mubr.bf16.vlgmr.msra.gmra.mxu1 %v1667_v2  ;;  %4593 = vmatprep.subr.bf16.mxu1 %v2252_v5  ;;  %v5793_v62 = vpop.permute.xlu0 %1152 }
 0x275   :  { %4594 = vmatpush3.bf16.msra.mxu1 %v2252_v5  ;;  %v5754_v15 = vpop.f32.mrf.mxu0  ;;  %4549 = vmatprep.mubr.bf16.mxu1 %v1668_v46  ;;  %v2079_v5 = vunpack.c.l.s8.bf16 %v3824_v55 }
 0x276   :  { %4595 = vmatprep.subr.bf16.mxu1 %v2251_v6 }
 0x277   :  { %v5757_v45 = vpop.f32.mrf.mxu0 }
 0x279   :  { %4596 = vmatpush3.bf16.msra.mxu1 %v2251_v6  ;;  %v5759_v8 = vpop.f32.mrf.mxu0  ;;  %v5799_v6 = vpop.permute.xlu1 %1157 }
 0x27a   :  { %4597 = vmatprep.subr.bf16.mxu1 %v2250_v10 }
 0x27b   :  { %v5761_v12 = vpop.f32.mrf.mxu0 }
 0x27c   :  { %4550 = vmatmul.mubr.bf16.gmra.mxu1 %v1669_v63  ;;  %v5803_v63 = vpop.permute.xlu0 %1162 }
 0x27d   :  { %4598 = vmatpush3.bf16.msra.mxu1 %v2250_v10  ;;  %v5763_v52 = vpop.f32.mrf.mxu0  ;;  %4553 = vmatprep.mubr.bf16.mxu1 %v1670_v11  ;;  %v3825_v11 = vld [vmem:[%s4985_s24 + $0x98] sm:$0xff] }
 0x27e   :  { %4599 = vmatprep.subr.bf16.mxu1 %v2249_v16 }
 0x27f   :  { %v5766_v19 = vpop.f32.mrf.mxu0 }
 0x280   :  { %v5814_v21 = vpop.permute.xlu0 %1172 }
 0x281   :  { %4600 = vmatpush3.bf16.msra.mxu1 %v2249_v16  ;;  %v5769_v40 = vpop.f32.mrf.mxu0 }
 0x282   :  { %4601 = vmatprep.subr.bf16.mxu1 %v2248_v20  ;;  %v2657_v38 = vpack.c.bf16 %v5769_v40, %v5763_v52  ;;  %v3866_v52 = vld [vmem:[%s4985_s24 + $0xa0] sm:$0xff] }
 0x283   :  { %v5771_v28 = vpop.f32.mrf.mxu0 }
 0x284   :  { %4554 = vmatmul.mubr.bf16.gmra.mxu1 %v1671_v22 }
 0x285   :  { %4602 = vmatpush3.bf16.msra.mxu1 %v2248_v20  ;;  %v4651_v32 = vpop.f32.mrf.mxu0  ;;  %4557 = vmatprep.mubr.bf16.mxu1 %v1672_v27  ;;  %v2080_v20 = vunpack.c.h.s8.bf16 %v3824_v55  ;;  %v2081_v27 = vunpack.c.l.s8.bf16 %v3825_v11 }
 0x286   :  { %4603 = vmatprep.subr.bf16.mxu1 %v2247_v30 }
 0x287   :  { %v2623_v37 = vpop.f32.mrf.mxu0 }
 0x289   :  { %4604 = vmatpush3.bf16.msra.mxu1 %v2247_v30  ;;  %v4652_v18 = vpop.f32.mrf.mxu0  ;;  %v5810_v30 = vpop.permute.xlu1 %1167 }
 0x28a   :  { %4605 = vmatprep.subr.bf16.mxu1 %v2246_v13  ;;  %v2659_v2 = vpack.c.bf16 %v4652_v18, %v4651_v32  ;;  %v2655_v18 = vpack.c.bf16 %v5759_v8, %v5754_v15 }
 0x28b   :  { %v2626_v47 = vpop.f32.mrf.mxu0 }
 0x28c   :  { %4558 = vmatmul.mubr.bf16.gmra.mxu1 %v1673_v60  ;;  %v2658_v23 = vpack.c.bf16 %v2626_v47, %v2623_v37  ;;  %v2656_v37 = vpack.c.bf16 %v5771_v28, %v5766_v19  ;;  %v2654_v28 = vpack.c.bf16 %v5761_v12, %v5757_v45 }
 0x28d   :  { %4606 = vmatpush3.bf16.msra.mxu1 %v2246_v13  ;;  %v4655_v41 = vpop.f32.mrf.mxu0  ;;  %4609 = vmatprep.mubr.bf16.mxu1 %v2075_v43  ;;  %v5819_v60 = vpop.permute.xlu1 %1177  ;;  %v2082_v43 = vunpack.c.h.s8.bf16 %v3825_v11 }
 0x28e   :  { %4607 = vmatprep.subr.bf16.mxu1 %v2245_v53 }
 0x28f   :  { %v2639_v33 = vpop.f32.mrf.mxu0 }
 0x291   :  { %4608 = vmatpush3.bf16.msra.mxu1 %v2245_v53  ;;  %v4656_v29 = vpop.f32.mrf.mxu0  ;;  %v2484_v53 = vunpack.c.l.s8.bf16 %v3866_v52 }
 0x292   :  { %v2661_v54 = vpack.c.bf16 %v4656_v29, %v4655_v41  ;;  %v5823_v41 = vpop.permute.xlu0 %1182  ;;  %v2485_v29 = vunpack.c.h.s8.bf16 %v3866_v52 }
 0x293   :  { %v2642_v56 = vpop.f32.mrf.mxu0 }
 0x294   :  { %v2660_v51 = vpack.c.bf16 %v2642_v56, %v2639_v33  ;;  %4610 = vmatmul.mubr.bf16.vlgmr.msra.gmra.mxu1 %v2076_v25  ;;  %4657 = vmatprep.subr.bf16.mxu1 %v2661_v54  ;;  %v5827_v33 = vpop.permute.xlu1 %1187  ;;  %v3867_v25 = vld [vmem:[%s4985_s24 + $0xa8] sm:$0xff] }
 0x295   :  { %4658 = vmatpush3.bf16.msra.mxu1 %v2661_v54  ;;  %v5786_v7 = vpop.f32.mrf.mxu0  ;;  %4613 = vmatprep.mubr.bf16.mxu1 %v2077_v48  ;;  %v2486_v54 = vunpack.c.l.s8.bf16 %v3867_v25 }
 0x296   :  { %4659 = vmatprep.subr.bf16.mxu1 %v2660_v51  ;;  %v5830_v8 = vpop.permute.xlu0 %1192 }
 0x297   :  { %v5791_v59 = vpop.f32.mrf.mxu0 }
 0x298   :  { %v5832_v55 = vpop.permute.xlu1 %1197 }
 0x299   :  { %4660 = vmatpush3.bf16.msra.mxu1 %v2660_v51  ;;  %v5795_v46 = vpop.f32.mrf.mxu0 }
 0x29a   :  { %4661 = vmatprep.subr.bf16.mxu1 %v2659_v2  ;;  %v5834_v12 = vpop.permute.xlu0 %1202 }
 0x29b   :  { %v5797_v9 = vpop.f32.mrf.mxu0 }
 0x29c   :  { %4614 = vmatmul.mubr.bf16.gmra.mxu1 %v2078_v61  ;;  %v5837_v11 = vpop.permute.xlu1 %1207 }
 0x29d   :  { %4662 = vmatpush3.bf16.msra.mxu1 %v2659_v2  ;;  %v5801_v10 = vpop.f32.mrf.mxu0  ;;  %4617 = vmatprep.mubr.bf16.mxu1 %v2079_v5  ;;  %v3868_v2 = vld [vmem:[%s4985_s24 + $0xb0] sm:$0xff]  ;;  %v2487_v5 = vunpack.c.h.s8.bf16 %v3867_v25  ;;  %v3911_v25 = vld [vmem:[%s4985_s24 + $0xc8] sm:$0xff] }
 0x29e   :  { %4663 = vmatprep.subr.bf16.mxu1 %v2658_v23 }
 0x29f   :  { %v5806_v16 = vpop.f32.mrf.mxu0 }
 0x2a1   :  { %4664 = vmatpush3.bf16.msra.mxu1 %v2658_v23  ;;  %v4712_v22 = vpop.f32.mrf.mxu0  ;;  %v2488_v23 = vunpack.c.l.s8.bf16 %v3868_v2 }
 0x2a2   :  { %4665 = vmatprep.subr.bf16.mxu1 %v2657_v38  ;;  %v3066_v52 = vpack.c.bf16 %v4712_v22, %v5801_v10  ;;  %v3064_v10 = vpack.c.bf16 %v5795_v46, %v5786_v7  ;;  %v2895_v7 = vunpack.c.l.s8.bf16 %v3911_v25 }
 0x2a3   :  { %v5812_v32 = vpop.f32.mrf.mxu0 }
 0x2a4   :  { %4618 = vmatmul.mubr.bf16.gmra.mxu1 %v2080_v20 }
 0x2a5   :  { %4666 = vmatpush3.bf16.msra.mxu1 %v2657_v38  ;;  %v4715_v13 = vpop.f32.mrf.mxu0  ;;  %4621 = vmatprep.mubr.bf16.mxu1 %v2081_v27  ;;  %v5839_v38 = vpop.permute.xlu0 %1212  ;;  %v3869_v27 = vld [vmem:[%s4985_s24 + $0xb8] sm:$0xff] }
 0x2a6   :  { %4667 = vmatprep.subr.bf16.mxu1 %v2656_v37  ;;  %v2491_v22 = vunpack.c.h.s8.bf16 %v3869_v27 }
 0x2a7   :  { %v3032_v40 = vpop.f32.mrf.mxu0 }
 0x2a9   :  { %4668 = vmatpush3.bf16.msra.mxu1 %v2656_v37  ;;  %v4716_v47 = vpop.f32.mrf.mxu0  ;;  %v5842_v37 = vpop.permute.xlu1 %1217 }
 0x2aa   :  { %4669 = vmatprep.subr.bf16.mxu1 %v2655_v18  ;;  %v3068_v61 = vpack.c.bf16 %v4716_v47, %v4715_v13  ;;  %v2489_v13 = vunpack.c.h.s8.bf16 %v3868_v2  ;;  %v3065_v47 = vpack.c.bf16 %v5812_v32, %v5806_v16  ;;  %v3063_v16 = vpack.c.bf16 %v5797_v9, %v5791_v59  ;;  %v3912_v9 = vld [vmem:[%s4985_s24 + $0xd0] sm:$0xff] }
 0x2ab   :  { %v3035_v19 = vpop.f32.mrf.mxu0 }
 0x2ac   :  { %4622 = vmatmul.mubr.bf16.gmra.mxu1 %v2082_v43  ;;  %v3067_v20 = vpack.c.bf16 %v3035_v19, %v3032_v40  ;;  %v5845_v43 = vpop.permute.xlu0 %1551 }
 0x2ad   :  { %4670 = vmatpush3.bf16.msra.mxu1 %v2655_v18  ;;  %v4719_v50 = vpop.f32.mrf.mxu0  ;;  %4673 = vmatprep.mubr.bf16.mxu1 %v2484_v53  ;;  %v2490_v18 = vunpack.c.l.s8.bf16 %v3869_v27  ;;  %v5849_v40 = vpop.permute.xlu1 %1556  ;;  %v3910_v53 = vld [vmem:[%s4985_s24 + $0xc0] sm:$0xff]  ;;  %v3913_v27 = vld [vmem:[%s4985_s24 + $0xd8] sm:$0xff] }
 0x2ae   :  { %4671 = vmatprep.subr.bf16.mxu1 %v2654_v28  ;;  %6458 = vst [vmem:[#allocation6_spill] sm:$0xff] %v5849_v40 }
 0x2af   :  { %v3048_v15 = vpop.f32.mrf.mxu0 }
 0x2b0   :  { %v5852_v19 = vpop.permute.xlu0 %1561 }
 0x2b1   :  { %4672 = vmatpush3.bf16.msra.mxu1 %v2654_v28  ;;  %v4720_v48 = vpop.f32.mrf.mxu0  ;;  %v2893_v28 = vunpack.c.l.s8.bf16 %v3910_v53 }
 0x2b2   :  { %v3070_v56 = vpack.c.bf16 %v4720_v48, %v4719_v50  ;;  %v5856_v50 = vpop.permute.xlu1 %1566 }
 0x2b3   :  { %v3051_v51 = vpop.f32.mrf.mxu0  ;;  %6459 = vst [vmem:[#allocation7_spill] sm:$0xff] %v5856_v50 }
 0x2b4   :  { %v3069_v45 = vpack.c.bf16 %v3051_v51, %v3048_v15  ;;  %4674 = vmatmul.mubr.bf16.vlgmr.msra.gmra.mxu1 %v2485_v29  ;;  %4721 = vmatprep.subr.bf16.mxu1 %v3070_v56  ;;  %v5860_v32 = vpop.permute.xlu0 %1571  ;;  %v2894_v15 = vunpack.c.h.s8.bf16 %v3910_v53  ;;  %v2896_v51 = vunpack.c.h.s8.bf16 %v3911_v25 }
 0x2b5   :  { %4722 = vmatpush3.bf16.msra.mxu1 %v3070_v56  ;;  %4677 = vmatprep.mubr.bf16.mxu1 %v2486_v54  ;;  %6460 = vst [vmem:[#allocation8_spill] sm:$0xff] %v5860_v32 }
 0x2b6   :  { %4723 = vmatprep.subr.bf16.mxu1 %v3069_v45  ;;  %v5863_v46 = vpop.permute.xlu1 %1576 }
 0x2b7   :  { %6461 = vst [vmem:[#allocation9_spill] sm:$0xff] %v5863_v46 }
 0x2b8   :  { %v5865_v29 = vpop.permute.xlu0 %1581 }
 0x2b9   :  { %4724 = vmatpush3.bf16.msra.mxu1 %v3069_v45  ;;  %6462 = vst [vmem:[#allocation10_spill] sm:$0xff] %v5865_v29  ;;  %v2897_v45 = vunpack.c.l.s8.bf16 %v3912_v9 }
 0x2ba   :  { %4725 = vmatprep.subr.bf16.mxu1 %v3068_v61  ;;  %v5868_v54 = vpop.permute.xlu1 %1586 }
 0x2bb   :  { %6463 = vst [vmem:[#allocation11_spill] sm:$0xff] %v5868_v54 }
 0x2bc   :  { %4678 = vmatmul.mubr.bf16.gmra.mxu1 %v2487_v5  ;;  %v5870_v2 = vpop.permute.xlu0 %1591 }
 0x2bd   :  { %4726 = vmatpush3.bf16.msra.mxu1 %v3068_v61  ;;  %4681 = vmatprep.mubr.bf16.mxu1 %v2488_v23  ;;  %6464 = vst [vmem:[#allocation12_spill] sm:$0xff] %v5870_v2 }
 0x2be   :  { %4727 = vmatprep.subr.bf16.mxu1 %v3067_v20  ;;  %v5872_v23 = vpop.permute.xlu1 %1596 }
 0x2bf   :  { %6465 = vst [vmem:[#allocation13_spill] sm:$0xff] %v5872_v23 }
 0x2c1   :  { %4728 = vmatpush3.bf16.msra.mxu1 %v3067_v20 }
 0x2c2   :  { %4729 = vmatprep.subr.bf16.mxu1 %v3066_v52 }
 0x2c4   :  { %4682 = vmatmul.mubr.bf16.gmra.mxu1 %v2489_v13 }
 0x2c5   :  { %4730 = vmatpush3.bf16.msra.mxu1 %v3066_v52  ;;  %4685 = vmatprep.mubr.bf16.mxu1 %v2490_v18  ;;  %v5875_v52 = vpop.permute.xlu0 %1601  ;;  %v2898_v18 = vunpack.c.h.s8.bf16 %v3912_v9 }
 0x2c6   :  { %4731 = vmatprep.subr.bf16.mxu1 %v3065_v47  ;;  %6466 = vst [vmem:[#allocation14_spill] sm:$0xff] %v5875_v52  ;;  %v373_v52 = vld [vmem:[#allocation2 + $0x30] sm:$0xff] }
 0x2c9   :  { %4732 = vmatpush3.bf16.msra.mxu1 %v3065_v47  ;;  %v2899_v47 = vunpack.c.l.s8.bf16 %v3913_v27 }
 0x2ca   :  { %4733 = vmatprep.subr.bf16.mxu1 %v3064_v10 }
 0x2cc   :  { %4686 = vmatmul.mubr.bf16.gmra.mxu1 %v2491_v22 }
 0x2cd   :  { %4734 = vmatpush3.bf16.msra.mxu1 %v3064_v10  ;;  %4737 = vmatprep.mubr.bf16.mxu1 %v2893_v28  ;;  %v5877_v10 = vpop.permute.xlu1 %1606  ;;  %v5879_v28 = vpop.permute.xlu0 %1611 }
 0x2ce   :  { %4735 = vmatprep.subr.bf16.mxu1 %v3063_v16  ;;  %6467 = vst [vmem:[#allocation15_spill] sm:$0xff] %v5877_v10  ;;  %6468 = vst [vmem:[#allocation16_spill] sm:$0xff] %v5879_v28 }
 0x2d1   :  { %4736 = vmatpush3.bf16.msra.mxu1 %v3063_v16 }
 0x2d4   :  { %v4355_v48 = vpop.f32.mrf.mxu1  ;;  %4738 = vmatmul.mubr.bf16.vlgmr.msra.gmra.mxu1 %v2894_v15  ;;  %v2900_v15 = vunpack.c.h.s8.bf16 %v3913_v27  ;;  %v375_v27 = vld [vmem:[#allocation2 + $0x58] sm:$0xff] }
 0x2d5   :  { %4741 = vmatprep.mubr.bf16.mxu1 %v2895_v7  ;;  %v5885_v7 = vpop.permute.xlu1 %1616  ;;  %v813_v28 = vmul.f32 %v4355_v48, %v5573_v35 }
 0x2d6   :  { %v652_v59 = vpop.f32.mrf.mxu1  ;;  %6469 = vst [vmem:[#allocation17_spill] sm:$0xff] %v5885_v7 }
 0x2d7   :  { %v811_v7 = vmul.f32 %v5575_v36, %v652_v59  ;;  %v829_v46 = vadd.f32 %v813_v28, %v375_v27  ;;  %v374_v36 = vld [vmem:[#allocation2] sm:$0xff] }
 0x2d8   :  { %v4356_v56 = vpop.f32.mrf.mxu1 }
 0x2d9   :  { %v827_v40 = vadd.f32 %v811_v7, %v373_v52 }
 0x2da   :  { %v655_v61 = vpop.f32.mrf.mxu1 }
 0x2db   :  { %v812_v35 = vmul.f32 %v5599_v44, %v655_v61 }
 0x2dc   :  { %v4359_v5 = vpop.f32.mrf.mxu1  ;;  %4742 = vmatmul.mubr.bf16.gmra.mxu1 %v2896_v51 }
 0x2dd   :  { %4745 = vmatprep.mubr.bf16.mxu1 %v2897_v45  ;;  %v5889_v45 = vpop.permute.xlu0 %1621  ;;  %v828_v52 = vadd.f32 %v812_v35, %v374_v36  ;;  %v378_v35 = vld [vmem:[#allocation2 + $0x68] sm:$0xff] }
 0x2de   :  { %v668_v20 = vpop.f32.mrf.mxu1  ;;  %6470 = vst [vmem:[#allocation18_spill] sm:$0xff] %v5889_v45 }
 0x2df   :  { %v815_v44 = vmul.f32 %v5615_v1, %v668_v20 }
 0x2e0   :  { %v4360_v13 = vpop.f32.mrf.mxu1 }
 0x2e1   :  { %v5900_v10 = vpop.permute.xlu0 %1960 }
 0x2e2   :  { %v671_v53 = vpop.f32.mrf.mxu1  ;;  %6472 = vst [vmem:[#allocation20_spill] sm:$0xff] %v5900_v10 }
 0x2e3   :  { %v816_v20 = vmul.f32 %v5613_v49, %v671_v53 }
 0x2e4   :  { %v4363_v22 = vpop.f32.mrf.mxu1  ;;  %4746 = vmatmul.mubr.bf16.gmra.mxu1 %v2898_v18  ;;  %v5895_v18 = vpop.permute.xlu1 %1626 }
 0x2e5   :  { %4749 = vmatprep.mubr.bf16.mxu1 %v2899_v47  ;;  %6471 = vst [vmem:[#allocation19_spill] sm:$0xff] %v5895_v18  ;;  %v376_v18 = vld [vmem:[#allocation2 + $0x18] sm:$0xff]  ;;  %v5913_v50 = vpop.permute.xlu0 %1970 }
 0x2e6   :  { %v5881_v16 = vpop.f32.mrf.mxu1 }
 0x2e7   :  { %v819_v49 = vmul.f32 %v5644_v4, %v5881_v16 }
 0x2e8   :  { %v5883_v25 = vpop.f32.mrf.mxu1  ;;  %v5907_v32 = vpop.permute.xlu1 %1965 }
 0x2ea   :  { %v5887_v51 = vpop.f32.mrf.mxu1 }
 0x2eb   :  { %v820_v4 = vmul.f32 %v5642_v3, %v5887_v51 }
 0x2ec   :  { %v5891_v9 = vpop.f32.mrf.mxu1  ;;  %4750 = vmatmul.mubr.bf16.gmra.mxu1 %v2900_v15  ;;  %v814_v15 = vmul.f32 %v4356_v56, %v5593_v42  ;;  %v817_v42 = vmul.f32 %v4359_v5, %v5633_v58  ;;  %v818_v58 = vmul.f32 %v4360_v13, %v5628_v57  ;;  %v5929_v5 = vpop.permute.xlu0 %1980  ;;  %v821_v57 = vmul.f32 %v4363_v22, %v5662_v17 }
 0x2ee   :  { %v5893_v23 = vpop.f32.mrf.mxu1  ;;  %v830_v28 = vadd.f32 %v814_v15, %v376_v18 }
 0x2f0   :  { %v5897_v47 = vpop.f32.mrf.mxu1 }
 0x2f2   :  { %v5902_v2 = vpop.f32.mrf.mxu1 }
 0x2f4   :  { %v4419_v45 = vpop.f32.mrf.mxu1 }
 0x2f5   :  { %v1222_v54 = vmul.f32 %v4419_v45, %v5793_v62  ;;  %v379_v45 = vld [vmem:[#allocation2 + $0x8] sm:$0xff] }
 0x2f6   :  { %v1060_v29 = vpop.f32.mrf.mxu1  ;;  %v833_v7 = vadd.f32 %v817_v42, %v379_v45  ;;  %v383_v42 = vld [vmem:[#allocation2 + $0x10] sm:$0xff]  ;;  %v832_v45 = vadd.f32 %v816_v20, %v378_v35  ;;  %v387_v20 = vld [vmem:[#allocation2 + $0x78] sm:$0xff] }
 0x2f7   :  { %v5910_v48 = vadd.f32 %v1222_v54, %v829_v46  ;;  %v1220_v10 = vmul.f32 %v5784_v34, %v1060_v29  ;;  %v5923_v29 = vpop.permute.xlu1 %1975  ;;  %v377_v54 = vld [vmem:[#allocation2 + $0x50] sm:$0xff]  ;;  %v837_v22 = vadd.f32 %v821_v57, %v383_v42  ;;  %v388_v42 = vld [vmem:[#allocation2 + $0x28] sm:$0xff] }
 0x2f8   :  { %v4420_v59 = vpop.f32.mrf.mxu1  ;;  %v831_v1 = vadd.f32 %v815_v44, %v377_v54  ;;  %v384_v54 = vld [vmem:[#allocation2 + $0x38] sm:$0xff] }
 0x2f9   :  { %v5916_v56 = vadd.f32 %v1220_v10, %v827_v40  ;;  %v1223_v62 = vmul.f32 %v4420_v59, %v5799_v6  ;;  %v380_v10 = vld [vmem:[#allocation2 + $0x48] sm:$0xff] }
 0x2fa   :  { %v1063_v27 = vpop.f32.mrf.mxu1  ;;  %v834_v59 = vadd.f32 %v818_v58, %v380_v10 }
 0x2fb   :  { %v5920_v46 = vadd.f32 %v1223_v62, %v830_v28  ;;  %v1221_v34 = vmul.f32 %v5788_v31, %v1063_v27  ;;  %v5939_v28 = vpop.permute.xlu1 %1985  ;;  %v5946_v27 = vpop.permute.xlu0 %1990 }
 0x2fc   :  { %v4423_v61 = vpop.f32.mrf.mxu1 }
 0x2fd   :  { %v5926_v40 = vadd.f32 %v1221_v34, %v828_v52  ;;  %v1226_v6 = vmul.f32 %v4423_v61, %v5814_v21  ;;  %v381_v52 = vld [vmem:[#allocation2 + $0x40] sm:$0xff] }
 0x2fe   :  { %v1076_v18 = vpop.f32.mrf.mxu1 }
 0x2ff   :  { %v5932_v15 = vadd.f32 %v1226_v6, %v833_v7  ;;  %v1224_v31 = vmul.f32 %v5803_v63, %v1076_v18  ;;  %v835_v7 = vadd.f32 %v819_v49, %v381_v52  ;;  %v5958_v58 = vpop.permute.xlu1 %1995  ;;  %v382_v6 = vld [vmem:[#allocation2 + $0x20] sm:$0xff] }
 0x300   :  { %v4424_v36 = vpop.f32.mrf.mxu1  ;;  %v836_v51 = vadd.f32 %v820_v4, %v382_v6 }
 0x301   :  { %v5936_v13 = vadd.f32 %v1224_v31, %v831_v1  ;;  %v1227_v21 = vmul.f32 %v4424_v36, %v5819_v60  ;;  %v822_v60 = vmul.f32 %v5883_v25, %v5657_v14  ;;  %v825_v14 = vmul.f32 %v5891_v9, %v5777_v0  ;;  %v5965_v1 = vpop.permute.xlu0 %2000  ;;  %v385_v36 = vld [vmem:[#allocation2 + $0x60] sm:$0xff] }
 0x302   :  { %v1079_v62 = vpop.f32.mrf.mxu1  ;;  %v826_v0 = vmul.f32 %v5897_v47, %v5782_v39 }
 0x303   :  { %v5943_v53 = vadd.f32 %v1227_v21, %v834_v59  ;;  %v1225_v63 = vmul.f32 %v5810_v30, %v1079_v62  ;;  %v838_v18 = vadd.f32 %v822_v60, %v384_v54  ;;  %v841_v57 = vadd.f32 %v825_v14, %v387_v20  ;;  %v5977_v21 = vpop.permute.xlu1 %2005  ;;  %v6474_v20 = vld [vmem:[#allocation6_spill] sm:$0xff] }
 0x304   :  { %v4427_v17 = vpop.f32.mrf.mxu1  ;;  %v842_v39 = vadd.f32 %v826_v0, %v388_v42 }
 0x305   :  { %v5950_v44 = vadd.f32 %v1225_v63, %v832_v45  ;;  %v1230_v34 = vmul.f32 %v4427_v17, %v5830_v8  ;;  %v5982_v49 = vpop.permute.xlu0 %2010  ;;  %v386_v63 = vld [vmem:[#allocation2 + $0x70] sm:$0xff] }
 0x306   :  { %v1092_v61 = vpop.f32.mrf.mxu1 }
 0x307   :  { %v5955_v16 = vadd.f32 %v1230_v34, %v837_v22  ;;  %v1228_v30 = vmul.f32 %v5823_v41, %v1092_v61  ;;  %v823_v41 = vmul.f32 %v5678_v26, %v5893_v23  ;;  %v824_v26 = vmul.f32 %v5676_v24, %v5902_v2  ;;  %v5986_v54 = vpop.permute.xlu1 %2015 }
 0x308   :  { %v4428_v10 = vpop.f32.mrf.mxu1 }
 0x309   :  { %v5962_v25 = vadd.f32 %v1228_v30, %v835_v7  ;;  %v1231_v8 = vmul.f32 %v4428_v10, %v5832_v55  ;;  %v839_v45 = vadd.f32 %v823_v41, %v385_v36  ;;  %v840_v22 = vadd.f32 %v824_v26, %v386_v63  ;;  %v6473_v10 = vld [vmem:[#allocation7_spill] sm:$0xff] }
 0x30a   :  { %v1095_v3 = vpop.f32.mrf.mxu1 }
 0x30b   :  { %v5969_v31 = vadd.f32 %v1231_v8, %v838_v18  ;;  %v1229_v35 = vmul.f32 %v5827_v33, %v1095_v3  ;;  %v5995_v14 = vpop.permute.xlu1 %2025 }
 0x30c   :  { %v4431_v59 = vpop.f32.mrf.mxu1 }
 0x30d   :  { %v5974_v9 = vadd.f32 %v1229_v35, %v836_v51  ;;  %v1234_v55 = vmul.f32 %v4431_v59, %v5839_v38 }
 0x30e   :  { %v1108_v62 = vpop.f32.mrf.mxu1 }
 0x30f   :  { %v1250_v23 = vadd.f32 %v1234_v55, %v841_v57  ;;  %v1232_v33 = vmul.f32 %v5834_v12, %v1108_v62  ;;  %v5989_v12 = vpop.permute.xlu0 %2020  ;;  %v6005_v57 = vpop.permute.xlu1 %2035 }
 0x310   :  { %v4432_v52 = vpop.f32.mrf.mxu1 }
 0x311   :  { %v1248_v47 = vadd.f32 %v1232_v33, %v839_v45  ;;  %v1235_v17 = vmul.f32 %v4432_v52, %v5842_v37 }
 0x312   :  { %v1111_v38 = vpop.f32.mrf.mxu1 }
 0x313   :  { %v1251_v60 = vadd.f32 %v1235_v17, %v842_v39  ;;  %v1233_v34 = vmul.f32 %v5837_v11, %v1111_v38  ;;  %v6015_v17 = vpop.permute.xlu1 %2374 }
 0x314   :  { %v4483_v61 = vpop.f32.mrf.mxu1 }
 0x315   :  { %v1249_v24 = vadd.f32 %v1233_v34, %v840_v22  ;;  %v1631_v2 = vmul.f32 %v4483_v61, %v5852_v19  ;;  %v5999_v19 = vpop.permute.xlu0 %2030 }
 0x316   :  { %v1469_v7 = vpop.f32.mrf.mxu1 }
 0x317   :  { %v1647_v4 = vadd.f32 %v1631_v2, %v5910_v48  ;;  %v1629_v30 = vmul.f32 %v5845_v43, %v1469_v7  ;;  %v6475_v48 = vld [vmem:[#allocation10_spill] sm:$0xff] }
 0x318   :  { %v4484_v6 = vpop.f32.mrf.mxu1 }
 0x319   :  { %v1645_v37 = vadd.f32 %v1629_v30, %v5916_v56  ;;  %v1632_v18 = vmul.f32 %v4484_v6, %v6473_v10  ;;  %v6476_v56 = vld [vmem:[#allocation8_spill] sm:$0xff]  ;;  %v6009_v62 = vpop.permute.xlu0 %2369 }
 0x31a   :  { %v1472_v11 = vpop.f32.mrf.mxu1 }
 0x31b   :  { %v1648_v8 = vadd.f32 %v1632_v18, %v5920_v46  ;;  %v1630_v3 = vmul.f32 %v6474_v20, %v1472_v11  ;;  %v6477_v46 = vld [vmem:[#allocation11_spill] sm:$0xff]  ;;  %v6025_v11 = vpop.permute.xlu1 %2384 }
 0x31c   :  { %v4487_v51 = vpop.f32.mrf.mxu1 }
 0x31d   :  { %v1646_v41 = vadd.f32 %v1630_v3, %v5926_v40  ;;  %v1635_v35 = vmul.f32 %v4487_v51, %v6475_v48  ;;  %v6478_v40 = vld [vmem:[#allocation9_spill] sm:$0xff]  ;;  %v6019_v61 = vpop.permute.xlu0 %2379 }
 0x31e   :  { %v1485_v43 = vpop.f32.mrf.mxu1 }
 0x31f   :  { %v1651_v36 = vadd.f32 %v1635_v35, %v5932_v15  ;;  %v1633_v59 = vmul.f32 %v6476_v56, %v1485_v43  ;;  %v6479_v15 = vld [vmem:[#allocation14_spill] sm:$0xff]  ;;  %v6484_v56 = vld [vmem:[#allocation16_spill] sm:$0xff] }
 0x320   :  { %v4488_v0 = vpop.f32.mrf.mxu1 }
 0x321   :  { %v1649_v55 = vadd.f32 %v1633_v59, %v5936_v13  ;;  %v1636_v42 = vmul.f32 %v4488_v0, %v6477_v46  ;;  %v6480_v13 = vld [vmem:[#allocation12_spill] sm:$0xff]  ;;  %v6029_v48 = vpop.permute.xlu0 %2389  ;;  %v6485_v46 = vld [vmem:[#allocation19_spill] sm:$0xff] }
 0x322   :  { %v1488_v45 = vpop.f32.mrf.mxu1 }
 0x323   :  { %v1652_v26 = vadd.f32 %v1636_v42, %v5943_v53  ;;  %v1634_v33 = vmul.f32 %v6478_v40, %v1488_v45  ;;  %v6481_v53 = vld [vmem:[#allocation15_spill] sm:$0xff] }
 0x324   :  { %v4491_v63 = vpop.f32.mrf.mxu1 }
 0x325   :  { %v1650_v52 = vadd.f32 %v1634_v33, %v5950_v44  ;;  %v1639_v39 = vmul.f32 %v4491_v63, %v6479_v15  ;;  %v6482_v44 = vld [vmem:[#allocation13_spill] sm:$0xff]  ;;  %v6036_v15 = vpop.permute.xlu0 %2399 }
 0x326   :  { %v1501_v38 = vpop.f32.mrf.mxu1  ;;  %v6486_v33 = vld [vmem:[#allocation17_spill] sm:$0xff] }
 0x327   :  { %v1655_v22 = vadd.f32 %v1639_v39, %v5955_v16  ;;  %v1637_v34 = vmul.f32 %v6480_v13, %v1501_v38  ;;  %v6483_v16 = vld [vmem:[#allocation18_spill] sm:$0xff] }
 0x328   :  { %v4492_v2 = vpop.f32.mrf.mxu1 }
 0x329   :  { %v1653_v7 = vadd.f32 %v1637_v34, %v5962_v25  ;;  %v1640_v30 = vmul.f32 %v4492_v2, %v6481_v53  ;;  %v6487_v34 = vld [vmem:[#allocation20_spill] sm:$0xff] }
 0x32a   :  { %v1504_v6 = vpop.f32.mrf.mxu1 }
 0x32b   :  { %v1656_v10 = vadd.f32 %v1640_v30, %v5969_v31  ;;  %v1638_v18 = vmul.f32 %v6482_v44, %v1504_v6  ;;  %v6033_v31 = vpop.permute.xlu1 %2394 }
 0x32c   :  { %v4495_v20 = vpop.f32.mrf.mxu1 }
 0x32d   :  { %v1654_v3 = vadd.f32 %v1638_v18, %v5974_v9  ;;  %v1643_v51 = vmul.f32 %v4495_v20, %v6483_v16 }
 0x32e   :  { %v1517_v35 = vpop.f32.mrf.mxu1 }
 0x32f   :  { %v1659_v43 = vadd.f32 %v1643_v51, %v1250_v23  ;;  %v1641_v25 = vmul.f32 %v6484_v56, %v1517_v35 }
 0x330   :  { %v4496_v59 = vpop.f32.mrf.mxu1 }
 0x331   :  { %v1657_v0 = vadd.f32 %v1641_v25, %v1248_v47  ;;  %v1644_v42 = vmul.f32 %v4496_v59, %v6485_v46  ;;  %v6042_v47 = vpop.permute.xlu1 %2404 }
 0x332   :  { %v1520_v45 = vpop.f32.mrf.mxu1 }
 0x333   :  { %v1660_v40 = vadd.f32 %v1644_v42, %v1251_v60  ;;  %v1642_v63 = vmul.f32 %v6486_v33, %v1520_v45  ;;  %v6045_v60 = vpop.permute.xlu0 %2409 }
 0x334   :  { %v4547_v9 = vpop.f32.mrf.mxu1 }
 0x335   :  { %v1658_v39 = vadd.f32 %v1642_v63, %v1249_v24  ;;  %v2040_v38 = vmul.f32 %v4547_v9, %v5913_v50  ;;  %v6051_v16 = vpop.permute.xlu1 %2414 }
 0x336   :  { %v1878_v13 = vpop.f32.mrf.mxu1 }
 0x337   :  { %v6039_v23 = vadd.f32 %v2040_v38, %v1647_v4  ;;  %v2038_v2 = vmul.f32 %v6487_v34, %v1878_v13  ;;  %v6056_v56 = vpop.permute.xlu0 %2419 }
 0x338   :  { %v4548_v53 = vpop.f32.mrf.mxu1 }
 0x339   :  { %v2054_v30 = vadd.f32 %v2038_v2, %v1645_v37  ;;  %v2041_v6 = vmul.f32 %v4548_v53, %v5923_v29 }
 0x33a   :  { %v1881_v44 = vpop.f32.mrf.mxu1 }
 0x33b   :  { %v6047_v18 = vadd.f32 %v2041_v6, %v1648_v8  ;;  %v2039_v24 = vmul.f32 %v5907_v32, %v1881_v44  ;;  %v2430_v45 = vpop.permute.xlu0 %2429 }
 0x33c   :  { %v4551_v20 = vpop.f32.mrf.mxu1 }
 0x33d   :  { %v2055_v50 = vadd.f32 %v2039_v24, %v1646_v41  ;;  %v2044_v4 = vmul.f32 %v4551_v20, %v5946_v27  ;;  %v6062_v41 = vpop.permute.xlu1 %2424 }
 0x33e   :  { %v1894_v51 = vpop.f32.mrf.mxu1 }
 0x33f   :  { %v6053_v35 = vadd.f32 %v2044_v4, %v1651_v36  ;;  %v2042_v37 = vmul.f32 %v5929_v5, %v1894_v51  ;;  %v6072_v34 = vpop.permute.xlu0 %2439 }
 0x340   :  { %v4552_v29 = vpop.f32.mrf.mxu1 }
 0x341   :  { %v2058_v25 = vadd.f32 %v2042_v37, %v1649_v55  ;;  %v2045_v8 = vmul.f32 %v4552_v29, %v5958_v58 }
 0x342   :  { %v1897_v59 = vpop.f32.mrf.mxu1 }
 0x343   :  { %v6059_v46 = vadd.f32 %v2045_v8, %v1652_v26  ;;  %v2043_v32 = vmul.f32 %v5939_v28, %v1897_v59  ;;  %v2435_v26 = vpop.permute.xlu1 %2434  ;;  %v6081_v44 = vpop.permute.xlu0 %2778 }
 0x344   :  { %v4555_v27 = vpop.f32.mrf.mxu1 }
 0x345   :  { %v2059_v42 = vadd.f32 %v2043_v32, %v1650_v52  ;;  %v2048_v36 = vmul.f32 %v4555_v27, %v5982_v49 }
 0x346   :  { %v1910_v33 = vpop.f32.mrf.mxu1 }
 0x347   :  { %v6065_v5 = vadd.f32 %v2048_v36, %v1655_v22  ;;  %v2046_v63 = vmul.f32 %v5965_v1, %v1910_v33  ;;  %v6091_v51 = vpop.permute.xlu0 %2788 }
 0x348   :  { %v4556_v55 = vpop.f32.mrf.mxu1 }
 0x349   :  { %v2062_v9 = vadd.f32 %v2046_v63, %v1653_v7  ;;  %v2049_v58 = vmul.f32 %v4556_v55, %v5986_v54  ;;  %v6078_v7 = vpop.permute.xlu1 %2444 }
 0x34a   :  { %v1913_v38 = vpop.f32.mrf.mxu1  ;;  %6489 = vst [vmem:[#allocation6_spill] sm:$0xff] %v6078_v7 }
 0x34b   :  { %v6069_v13 = vadd.f32 %v2049_v58, %v1656_v10  ;;  %v2047_v28 = vmul.f32 %v5977_v21, %v1913_v38 }
 0x34c   :  { %v4559_v52 = vpop.f32.mrf.mxu1 }
 0x34d   :  { %v2063_v49 = vadd.f32 %v2047_v28, %v1654_v3  ;;  %v2052_v2 = vmul.f32 %v4559_v52, %v5999_v19 }
 0x34e   :  { %v1926_v22 = vpop.f32.mrf.mxu1 }
 0x34f   :  { %v6075_v53 = vadd.f32 %v2052_v2, %v1659_v43  ;;  %v2050_v1 = vmul.f32 %v5989_v12, %v1926_v22  ;;  %v6088_v43 = vpop.permute.xlu1 %2783 }
 0x350   :  { %v4560_v54 = vpop.f32.mrf.mxu1 }
 0x351   :  { %6488 = vst [vmem:[#allocation7_spill] sm:$0xff] %v6075_v53  ;;  %v2066_v6 = vadd.f32 %v2050_v1, %v1657_v0  ;;  %v2053_v10 = vmul.f32 %v4560_v54, %v6005_v57 }
 0x352   :  { %v1929_v21 = vpop.f32.mrf.mxu1 }
 0x353   :  { %v6083_v24 = vadd.f32 %v2053_v10, %v1660_v40  ;;  %v2051_v3 = vmul.f32 %v5995_v14, %v1929_v21  ;;  %v6098_v29 = vpop.permute.xlu1 %2793 }
 0x354   :  { %v6086_v20 = vpop.f32.mrf.mxu1 }
 0x355   :  { %6490 = vst [vmem:[#allocation10_spill] sm:$0xff] %v6083_v24  ;;  %v2067_v19 = vadd.f32 %v2051_v3, %v1658_v39  ;;  %v6104_v39 = vpop.permute.xlu0 %2798  ;;  %v2449_v24 = vmul.f32 %v6086_v20, %v6019_v61 }
 0x356   :  { %v2287_v4 = vpop.f32.mrf.mxu1 }
 0x357   :  { %v2447_v12 = vmul.f32 %v6009_v62, %v2287_v4  ;;  %v2465_v53 = vadd.f32 %v2449_v24, %v6039_v23 }
 0x358   :  { %v6093_v0 = vpop.f32.mrf.mxu1 }
 0x359   :  { %v6095_v57 = vadd.f32 %v2447_v12, %v2054_v30  ;;  %v6111_v30 = vpop.permute.xlu1 %2803  ;;  %v6114_v33 = vpop.permute.xlu0 %2808 }
 0x35a   :  { %v2290_v37 = vpop.f32.mrf.mxu1 }
 0x35b   :  { %v2448_v40 = vmul.f32 %v6015_v17, %v2290_v37 }
 0x35c   :  { %v6100_v14 = vpop.f32.mrf.mxu1 }
 0x35d   :  { %v6102_v8 = vadd.f32 %v2448_v40, %v2055_v50  ;;  %v6121_v38 = vpop.permute.xlu1 %2813  ;;  %v6127_v28 = vpop.permute.xlu0 %2818 }
 0x35e   :  { %v2303_v59 = vpop.f32.mrf.mxu1 }
 0x35f   :  { %v2451_v62 = vmul.f32 %v6029_v48, %v2303_v59 }
 0x360   :  { %v6107_v32 = vpop.f32.mrf.mxu1 }
 0x361   :  { %v6109_v27 = vadd.f32 %v2451_v62, %v2058_v25 }
 0x362   :  { %v2306_v36 = vpop.f32.mrf.mxu1 }
 0x363   :  { %v2452_v17 = vmul.f32 %v6033_v31, %v2306_v36 }
 0x364   :  { %v6116_v63 = vpop.f32.mrf.mxu1 }
 0x365   :  { %v6118_v50 = vadd.f32 %v2452_v17, %v2059_v42  ;;  %v6134_v42 = vpop.permute.xlu1 %2823 }
 0x366   :  { %v2319_v55 = vpop.f32.mrf.mxu1  ;;  %6492 = vst [vmem:[#allocation11_spill] sm:$0xff] %v6134_v42 }
 0x367   :  { %v2455_v58 = vmul.f32 %v6045_v60, %v2319_v55  ;;  %v6136_v60 = vpop.permute.xlu0 %2828 }
 0x368   :  { %v6123_v48 = vpop.f32.mrf.mxu1 }
 0x369   :  { %v6125_v25 = vadd.f32 %v2455_v58, %v2062_v9  ;;  %v6142_v4 = vpop.permute.xlu1 %2833 }
 0x36a   :  { %v2322_v52 = vpop.f32.mrf.mxu1 }
 0x36b   :  { %v2456_v31 = vmul.f32 %v6051_v16, %v2322_v52  ;;  %v6146_v37 = vpop.permute.xlu0 %2838 }
 0x36c   :  { %v6130_v2 = vpop.f32.mrf.mxu1  ;;  %6496 = vst [vmem:[#allocation15_spill] sm:$0xff] %v6146_v37 }
 0x36d   :  { %v6132_v22 = vadd.f32 %v2456_v31, %v2063_v49  ;;  %v6148_v59 = vpop.permute.xlu1 %2843 }
 0x36e   :  { %v2335_v1 = vpop.f32.mrf.mxu1  ;;  %6497 = vst [vmem:[#allocation13_spill] sm:$0xff] %v6148_v59 }
 0x36f   :  { %6491 = vst [vmem:[#allocation8_spill] sm:$0xff] %v6132_v22  ;;  %v2459_v54 = vmul.f32 %v2430_v45, %v2335_v1  ;;  %v6150_v62 = vpop.permute.xlu0 %2848 }
 0x370   :  { %v6138_v10 = vpop.f32.mrf.mxu1  ;;  %6498 = vst [vmem:[#allocation18_spill] sm:$0xff] %v6150_v62 }
 0x371   :  { %6493 = vst [vmem:[#allocation9_spill] sm:$0xff] %v6138_v10  ;;  %v6140_v21 = vadd.f32 %v2459_v54, %v2066_v6  ;;  %v6152_v6 = vpop.permute.xlu1 %2853  ;;  %v2450_v10 = vmul.f32 %v6093_v0, %v6025_v11 }
 0x372   :  { %v2338_v9 = vpop.f32.mrf.mxu1  ;;  %6499 = vst [vmem:[#allocation16_spill] sm:$0xff] %v6152_v6 }
 0x373   :  { %6494 = vst [vmem:[#allocation14_spill] sm:$0xff] %v6140_v21  ;;  %v2460_v3 = vmul.f32 %v2435_v26, %v2338_v9  ;;  %v3188_v26 = vpop.permute.xlu0 %3187  ;;  %v2466_v20 = vadd.f32 %v2450_v10, %v6047_v18 }
 0x374   :  { %v4675_v12 = vpop.f32.mrf.mxu1 }
 0x375   :  { %v6144_v16 = vadd.f32 %v2460_v3, %v2067_v19  ;;  %v3193_v19 = vpop.permute.xlu1 %3192  ;;  %v2858_v37 = vmul.f32 %v4675_v12, %v6091_v51  ;;  %v2453_v51 = vmul.f32 %v6100_v14, %v6036_v15  ;;  %v2454_v15 = vmul.f32 %v6107_v32, %v6042_v47 }
 0x376   :  { %v2696_v49 = vpop.f32.mrf.mxu1  ;;  %v2457_v47 = vmul.f32 %v6116_v63, %v6056_v56  ;;  %v2458_v56 = vmul.f32 %v6123_v48, %v6062_v41 }
 0x377   :  { %6495 = vst [vmem:[#allocation12_spill] sm:$0xff] %v6144_v16  ;;  %v3198_v1 = vpop.permute.xlu0 %3197  ;;  %v2469_v18 = vadd.f32 %v2453_v51, %v6053_v35  ;;  %v2470_v35 = vadd.f32 %v2454_v15, %v6059_v46  ;;  %v6511_v15 = vld [vmem:[#allocation8_spill] sm:$0xff] }
 0x378   :  { %v4676_v40 = vpop.f32.mrf.mxu1  ;;  %v2474_v41 = vadd.f32 %v2458_v56, %v6069_v13 }
 0x379   :  { %v3203_v3 = vpop.permute.xlu1 %3202 }
 0x37a   :  { %v2699_v45 = vpop.f32.mrf.mxu1 }
 0x37b   :  { %v3208_v59 = vpop.permute.xlu0 %3207  ;;  %v2857_v0 = vmul.f32 %v6088_v43, %v2699_v45 }
 0x37c   :  { %v4679_v36 = vpop.f32.mrf.mxu1 }
 0x37d   :  { %v3213_v22 = vpop.permute.xlu1 %3212 }
 0x37e   :  { %v2712_v17 = vpop.f32.mrf.mxu1 }
 0x37f   :  { %v3218_v62 = vpop.permute.xlu0 %3217  ;;  %v2860_v43 = vmul.f32 %v6104_v39, %v2712_v17 }
 0x380   :  { %v4680_v55 = vpop.f32.mrf.mxu1 }
 0x381   :  { %v3223_v24 = vpop.permute.xlu1 %3222 }
 0x382   :  { %v2715_v58 = vpop.f32.mrf.mxu1 }
 0x383   :  { %v2861_v39 = vmul.f32 %v6111_v30, %v2715_v58 }
 0x384   :  { %v6154_v52 = vpop.f32.mrf.mxu1 }
 0x385   :  { %v2877_v30 = vadd.f32 %v2861_v39, %v6118_v50  ;;  %v2461_v50 = vmul.f32 %v6130_v2, %v6072_v34  ;;  %v6509_v2 = vld [vmem:[#allocation6_spill] sm:$0xff] }
 0x386   :  { %v6156_v31 = vpop.f32.mrf.mxu1 }
 0x387   :  { %v2864_v63 = vmul.f32 %v6127_v28, %v6156_v31 }
 0x388   :  { %v6158_v54 = vpop.f32.mrf.mxu1 }
 0x389   :  { %v2880_v28 = vadd.f32 %v2864_v63, %v6125_v25 }
 0x38a   :  { %v6160_v9 = vpop.f32.mrf.mxu1 }
 0x38b   :  { %6500 = vst [vmem:[#allocation19_spill] sm:$0xff] %v6160_v9  ;;  %v2859_v9 = vmul.f32 %v4676_v40, %v6098_v29 }
 0x38c   :  { %v6162_v16 = vpop.f32.mrf.mxu1 }
 0x38d   :  { %6501 = vst [vmem:[#allocation17_spill] sm:$0xff] %v6162_v16  ;;  %v2856_v16 = vmul.f32 %v6081_v44, %v2696_v49  ;;  %v2875_v49 = vadd.f32 %v2859_v9, %v2466_v20  ;;  %v2473_v9 = vadd.f32 %v2457_v47, %v6065_v5 }
 0x38e   :  { %v6164_v21 = vpop.f32.mrf.mxu1 }
 0x38f   :  { %6502 = vst [vmem:[#allocation20_spill] sm:$0xff] %v6164_v21  ;;  %v2874_v21 = vadd.f32 %v2858_v37, %v2465_v53  ;;  %v2872_v11 = vadd.f32 %v2856_v16, %v6095_v57  ;;  %v2862_v53 = vmul.f32 %v4679_v36, %v6114_v33  ;;  %v3228_v37 = vpop.permute.xlu0 %3227  ;;  %v2873_v57 = vadd.f32 %v2857_v0, %v6102_v8  ;;  %v3233_v36 = vpop.permute.xlu1 %3232 }
 0x390   :  { %v6168_v6 = vpop.f32.mrf.mxu1  ;;  %v2876_v8 = vadd.f32 %v2860_v43, %v6109_v27  ;;  %v6513_v43 = vld [vmem:[#allocation15_spill] sm:$0xff] }
 0x391   :  { %v2878_v40 = vadd.f32 %v2862_v53, %v2469_v18 }
 0x392   :  { %v6173_v7 = vpop.f32.mrf.mxu1  ;;  %v6504_v31 = vld [vmem:[#allocation19_spill] sm:$0xff] }
 0x393   :  { %6503 = vst [vmem:[#allocation21_spill] sm:$0xff] %v6173_v7 }
 0x394   :  { %v4739_v42 = vpop.f32.mrf.mxu1 }
 0x395   :  { %v3267_v61 = vmul.f32 %v4739_v42, %v3198_v1 }
 0x396   :  { %v3105_v12 = vpop.f32.mrf.mxu1 }
 0x397   :  { %v3283_v7 = vadd.f32 %v3267_v61, %v2874_v21  ;;  %v3265_v23 = vmul.f32 %v3188_v26, %v3105_v12 }
 0x398   :  { %v4740_v44 = vpop.f32.mrf.mxu1 }
 0x399   :  { %3299 = vst [vmem:[#allocation2 + $0x58] sm:$0xff] %v3283_v7  ;;  %v3281_v29 = vadd.f32 %v3265_v23, %v2872_v11  ;;  %v3268_v42 = vmul.f32 %v4740_v44, %v3203_v3  ;;  %v2863_v7 = vmul.f32 %v4680_v55, %v6121_v38  ;;  %v3243_v3 = vpop.permute.xlu1 %3242 }
 0x39a   :  { %v3108_v14 = vpop.f32.mrf.mxu1 }
 0x39b   :  { %3297 = vst [vmem:[#allocation2 + $0x30] sm:$0xff] %v3281_v29  ;;  %v3284_v10 = vadd.f32 %v3268_v42, %v2875_v49  ;;  %v3266_v21 = vmul.f32 %v3193_v19, %v3108_v14  ;;  %v3238_v19 = vpop.permute.xlu0 %3237  ;;  %v2879_v38 = vadd.f32 %v2863_v7, %v2470_v35  ;;  %v6508_v29 = vld [vmem:[#allocation7_spill] sm:$0xff]  ;;  %v6510_v42 = vld [vmem:[#allocation9_spill] sm:$0xff] }
 0x39c   :  { %v4743_v16 = vpop.f32.mrf.mxu1  ;;  %v2477_v34 = vadd.f32 %v2461_v50, %v6508_v29  ;;  %v2462_v25 = vmul.f32 %v6510_v42, %v6509_v2 }
 0x39d   :  { %3300 = vst [vmem:[#allocation2 + $0x18] sm:$0xff] %v3284_v10  ;;  %v3282_v33 = vadd.f32 %v3266_v21, %v2873_v57  ;;  %v3271_v45 = vmul.f32 %v4743_v16, %v3218_v62  ;;  %v2866_v62 = vmul.f32 %v6154_v52, %v6136_v60  ;;  %v2867_v52 = vmul.f32 %v6158_v54, %v6142_v4  ;;  %v6506_v54 = vld [vmem:[#allocation18_spill] sm:$0xff]  ;;  %v3253_v53 = vpop.permute.xlu1 %3252  ;;  %v6512_v57 = vld [vmem:[#allocation20_spill] sm:$0xff] }
 0x39e   :  { %v3121_v32 = vpop.f32.mrf.mxu1 }
 0x39f   :  { %3298 = vst [vmem:[#allocation2] sm:$0xff] %v3282_v33  ;;  %v3287_v17 = vadd.f32 %v3271_v45, %v2878_v40  ;;  %v3269_v26 = vmul.f32 %v3208_v59, %v3121_v32  ;;  %v2882_v60 = vadd.f32 %v2866_v62, %v2473_v9  ;;  %v3248_v51 = vpop.permute.xlu0 %3247  ;;  %v2883_v4 = vadd.f32 %v2867_v52, %v2474_v41  ;;  %v6514_v33 = vld [vmem:[#allocation16_spill] sm:$0xff]  ;;  %v6515_v32 = vld [vmem:[#allocation10_spill] sm:$0xff] }
 0x3a0   :  { %v4744_v1 = vpop.f32.mrf.mxu1  ;;  %v2871_v45 = vmul.f32 %v6168_v6, %v6514_v33 }
 0x3a1   :  { %3303 = vst [vmem:[#allocation2 + $0x8] sm:$0xff] %v3287_v17  ;;  %v3285_v55 = vadd.f32 %v3269_v26, %v2876_v8  ;;  %v3272_v46 = vmul.f32 %v4744_v1, %v3223_v24  ;;  %v6507_v24 = vld [vmem:[#allocation17_spill] sm:$0xff]  ;;  %v2478_v8 = vadd.f32 %v2462_v25, %v6515_v32  ;;  %v6516_v17 = vld [vmem:[#allocation14_spill] sm:$0xff] }
 0x3a2   :  { %v3124_v27 = vpop.f32.mrf.mxu1  ;;  %v2870_v44 = vmul.f32 %v6507_v24, %v6506_v54  ;;  %v6518_v1 = vld [vmem:[#allocation13_spill] sm:$0xff] }
 0x3a3   :  { %3301 = vst [vmem:[#allocation2 + $0x50] sm:$0xff] %v3285_v55  ;;  %v3288_v59 = vadd.f32 %v3272_v46, %v2879_v38  ;;  %v3270_v58 = vmul.f32 %v3213_v22, %v3124_v27  ;;  %v6505_v22 = vld [vmem:[#allocation11_spill] sm:$0xff]  ;;  %v3258_v16 = vpop.permute.xlu0 %3257  ;;  %v3263_v55 = vpop.permute.xlu1 %3262  ;;  %v2887_v9 = vadd.f32 %v2871_v45, %v2478_v8 }
 0x3a4   :  { %v4747_v61 = vpop.f32.mrf.mxu1  ;;  %v2865_v12 = vmul.f32 %v6505_v22, %v6504_v31  ;;  %v2886_v7 = vadd.f32 %v2870_v44, %v2477_v34 }
 0x3a5   :  { %3304 = vst [vmem:[#allocation2 + $0x48] sm:$0xff] %v3288_v59  ;;  %v3286_v5 = vadd.f32 %v3270_v58, %v2877_v30  ;;  %v3275_v20 = vmul.f32 %v4747_v61, %v3238_v19  ;;  %v6517_v19 = vld [vmem:[#allocation21_spill] sm:$0xff]  ;;  %v6519_v30 = vld [vmem:[#allocation12_spill] sm:$0xff] }
 0x3a6   :  { %v3137_v48 = vpop.f32.mrf.mxu1  ;;  %v2881_v14 = vadd.f32 %v2865_v12, %v6511_v15  ;;  %v2869_v38 = vmul.f32 %v6518_v1, %v6517_v19 }
 0x3a7   :  { %3302 = vst [vmem:[#allocation2 + $0x68] sm:$0xff] %v3286_v5  ;;  %v3291_v11 = vadd.f32 %v3275_v20, %v2882_v60  ;;  %v3273_v0 = vmul.f32 %v3228_v37, %v3137_v48  ;;  %v2868_v37 = vmul.f32 %v6513_v43, %v6512_v57 }
 0x3a8   :  { %v4748_v23 = vpop.f32.mrf.mxu1  ;;  %v2885_v63 = vadd.f32 %v2869_v38, %v6519_v30 }
 0x3a9   :  { %3307 = vst [vmem:[#allocation2 + $0x10] sm:$0xff] %v3291_v11  ;;  %v3289_v49 = vadd.f32 %v3273_v0, %v2880_v28  ;;  %v3276_v13 = vmul.f32 %v4748_v23, %v3243_v3  ;;  %v2884_v26 = vadd.f32 %v2868_v37, %v6516_v17 }
 0x3aa   :  { %v3140_v18 = vpop.f32.mrf.mxu1 }
 0x3ab   :  { %3305 = vst [vmem:[#allocation2 + $0x40] sm:$0xff] %v3289_v49  ;;  %v3292_v10 = vadd.f32 %v3276_v13, %v2883_v4  ;;  %v3274_v21 = vmul.f32 %v3233_v36, %v3140_v18 }
 0x3ac   :  { %v4751_v40 = vpop.f32.mrf.mxu1 }
 0x3ad   :  { %3308 = vst [vmem:[#allocation2 + $0x38] sm:$0xff] %v3292_v10  ;;  %v3290_v35 = vadd.f32 %v3274_v21, %v2881_v14  ;;  %v3279_v47 = vmul.f32 %v4751_v40, %v3258_v16 }
 0x3ae   :  { %v3153_v39 = vpop.f32.mrf.mxu1 }
 0x3af   :  { %3306 = vst [vmem:[#allocation2 + $0x20] sm:$0xff] %v3290_v35  ;;  %v3295_v62 = vadd.f32 %v3279_v47, %v2886_v7  ;;  %v3277_v36 = vmul.f32 %v3248_v51, %v3153_v39 }
 0x3b0   :  { %v4752_v46 = vpop.f32.mrf.mxu1 }
 0x3b1   :  { %3311 = vst [vmem:[#allocation2 + $0x78] sm:$0xff] %v3295_v62  ;;  %v3293_v56 = vadd.f32 %v3277_v36, %v2884_v26  ;;  %v3280_v6 = vmul.f32 %v4752_v46, %v3263_v55 }
 0x3b2   :  { %v3156_v27 = vpop.f32.mrf.mxu1 }
 0x3b3   :  { %3309 = vst [vmem:[#allocation2 + $0x60] sm:$0xff] %v3293_v56  ;;  %v3296_v59 = vadd.f32 %v3280_v6, %v2887_v9  ;;  %v3278_v58 = vmul.f32 %v3253_v53, %v3156_v27 }
 0x3b5   :  { %3312 = vst [vmem:[#allocation2 + $0x28] sm:$0xff] %v3296_v59  ;;  %v3294_v3 = vadd.f32 %v3278_v58, %v2885_v63 }
 0x3b7   :  { %3310 = vst [vmem:[#allocation2 + $0x70] sm:$0xff] %v3294_v3 }
 0x3b8 PF:  { %v3318_v61 = vld [vmem:[#allocation2 + $0x58] sm:$0xff]  ;;  %v3316_v60 = vld [vmem:[#allocation2 + $0x30] sm:$0xff]  ;;  %v3317_v41 = vld [vmem:[#allocation2] sm:$0xff] }
 0x3b9   :  { %v3319_v52 = vld [vmem:[#allocation2 + $0x18] sm:$0xff]  ;;  %v6226_v5 = vmax.f32 %v3318_v61, 0.0  ;;  %v6228_v20 = vmax.f32 %v3316_v60, 0.0  ;;  %v6232_v50 = vmax.f32 %v3317_v41, 0.0  ;;  %v3322_v54 = vld [vmem:[#allocation2 + $0x8] sm:$0xff]  ;;  %v3325_v53 = vld [vmem:[#allocation2 + $0x20] sm:$0xff] }
 0x3ba   :  { %v6230_v51 = vmax.f32 %v3319_v52, 0.0  ;;  %v3320_v28 = vld [vmem:[#allocation2 + $0x50] sm:$0xff]  ;;  %v6252_v13 = vmax.f32 %v3322_v54, 0.0  ;;  %v3324_v29 = vld [vmem:[#allocation2 + $0x40] sm:$0xff]  ;;  %v6258_v42 = vmax.f32 %v3325_v53, 0.0  ;;  %v3327_v18 = vld [vmem:[#allocation2 + $0x38] sm:$0xff] }
 0x3bb   :  { %v3350_v31 = vmul.f32 %v6226_v5, %v6226_v5  ;;  %v3348_v22 = vmul.f32 %v6228_v20, %v6228_v20  ;;  %v3349_v11 = vmul.f32 %v6232_v50, %v6232_v50  ;;  %v6244_v23 = vmax.f32 %v3320_v28, 0.0  ;;  %v3326_v15 = vld [vmem:[#allocation2 + $0x10] sm:$0xff]  ;;  %v3328_v21 = vld [vmem:[#allocation2 + $0x60] sm:$0xff]  ;;  %v3330_v35 = vld [vmem:[#allocation2 + $0x78] sm:$0xff] }
 0x3bc   :  { %v3351_v12 = vmul.f32 %v6230_v51, %v6230_v51  ;;  %v3323_v4 = vld [vmem:[#allocation2 + $0x48] sm:$0xff]  ;;  %v3354_v2 = vmul.f32 %v6252_v13, %v6252_v13  ;;  %v6260_v25 = vmax.f32 %v3324_v29, 0.0  ;;  %v3357_v14 = vmul.f32 %v6258_v42, %v6258_v42 }
 0x3bd   :  { %3368 = vadd.xlane.f32.xlu1 %v3350_v31  ;;  %3364 = vadd.xlane.f32.xlu0 %v3348_v22  ;;  %v3352_v44 = vmul.f32 %v6244_v23, %v6244_v23  ;;  %v6250_v49 = vmax.f32 %v3323_v4, 0.0  ;;  %v6266_v43 = vmax.f32 %v3327_v18, 0.0  ;;  %v6268_v37 = vmax.f32 %v3326_v15, 0.0  ;;  %v3331_v45 = vld [vmem:[#allocation2 + $0x28] sm:$0xff] }
 0x3be   :  { %v3321_v48 = vld [vmem:[#allocation2 + $0x68] sm:$0xff]  ;;  %v3356_v57 = vmul.f32 %v6260_v25, %v6260_v25  ;;  %v3329_v10 = vld [vmem:[#allocation2 + $0x70] sm:$0xff]  ;;  %v6276_v33 = vmax.f32 %v3328_v21, 0.0  ;;  %v6282_v8 = vmax.f32 %v3331_v45, 0.0  ;;  %v6284_v39 = vmax.f32 %v3330_v35, 0.0 }
 0x3bf   :  { %v6242_v0 = vmax.f32 %v3321_v48, 0.0  ;;  %v3355_v34 = vmul.f32 %v6250_v49, %v6250_v49  ;;  %v3359_v16 = vmul.f32 %v6266_v43, %v6266_v43  ;;  %v3358_v40 = vmul.f32 %v6268_v37, %v6268_v37 }
 0x3c0   :  { %v6274_v7 = vmax.f32 %v3329_v10, 0.0  ;;  %v3360_v32 = vmul.f32 %v6276_v33, %v6276_v33  ;;  %v3363_v17 = vmul.f32 %v6282_v8, %v6282_v8  ;;  %v3362_v26 = vmul.f32 %v6284_v39, %v6284_v39 }
 0x3c1   :  { %3370 = vadd.xlane.f32.xlu1 %v3351_v12  ;;  %3366 = vadd.xlane.f32.xlu0 %v3349_v11  ;;  %v3353_v24 = vmul.f32 %v6242_v0, %v6242_v0 }
 0x3c2   :  { %v3361_v47 = vmul.f32 %v6274_v7, %v6274_v7 }
 0x3c5   :  { %3374 = vadd.xlane.f32.xlu1 %v3353_v24  ;;  %3372 = vadd.xlane.f32.xlu0 %v3352_v44 }
 0x3c9   :  { %3378 = vadd.xlane.f32.xlu1 %v3355_v34  ;;  %3376 = vadd.xlane.f32.xlu0 %v3354_v2 }
 0x3cd   :  { %3382 = vadd.xlane.f32.xlu1 %v3357_v14  ;;  %3380 = vadd.xlane.f32.xlu0 %v3356_v57 }
 0x3d1   :  { %3386 = vadd.xlane.f32.xlu1 %v3359_v16  ;;  %3384 = vadd.xlane.f32.xlu0 %v3358_v40 }
 0x3d5   :  { %3390 = vadd.xlane.f32.xlu1 %v3361_v47  ;;  %3388 = vadd.xlane.f32.xlu0 %v3360_v32 }
 0x3d9   :  { %3394 = vadd.xlane.f32.xlu1 %v3363_v17  ;;  %3392 = vadd.xlane.f32.xlu0 %v3362_v26 }
 0x446   :  { %v3369_v19 = vpop.xlane.xlu1 %3368  ;;  %v3365_v1 = vpop.xlane.xlu0 %3364 }
 0x447   :  { %4852 = vrsqrt.f32 %v3369_v19  ;;  %vm3412_vm0 = vcmp.eq.f32.partialorder %v3369_v19, inf  ;;  %vm3414_vm1 = vcmp.eq.f32.partialorder %v3369_v19, 0.0  ;;  %v3415_v30 = vand.u32 2147483648, %v3369_v19 }
 0x448   :  { %4854 = vrsqrt.f32 %v3365_v1  ;;  %vm3398_vm2 = vcmp.eq.f32.partialorder %v3365_v1, inf  ;;  %vm3400_vm3 = vcmp.eq.f32.partialorder %v3365_v1, 0.0  ;;  %v3401_v59 = vand.u32 2147483648, %v3365_v1 }
 0x44a   :  { %v3371_v38 = vpop.xlane.xlu1 %3370  ;;  %v3367_v62 = vpop.xlane.xlu0 %3366 }
 0x44b   :  { %4856 = vrsqrt.f32 %v3371_v38  ;;  %vm3419_vm4 = vcmp.eq.f32.partialorder %v3371_v38, inf  ;;  %vm3421_vm5 = vcmp.eq.f32.partialorder %v3371_v38, 0.0  ;;  %v3422_v60 = vand.u32 2147483648, %v3371_v38 }
 0x44c   :  { %4858 = vrsqrt.f32 %v3367_v62  ;;  %vm3405_vm6 = vcmp.eq.f32.partialorder %v3367_v62, inf  ;;  %vm3407_vm7 = vcmp.eq.f32.partialorder %v3367_v62, 0.0  ;;  %v3408_v11 = vand.u32 2147483648, %v3367_v62 }
 0x44e   :  { %v6290_v36 = vpop.xlane.xlu1 %3374  ;;  %v6292_v55 = vpop.xlane.xlu0 %3372 }
 0x44f   :  { %4860 = vrsqrt.f32 %v6290_v36  ;;  %vm3433_vm8 = vcmp.eq.f32.partialorder %v6290_v36, inf  ;;  %vm3435_vm9 = vcmp.eq.f32.partialorder %v6290_v36, 0.0  ;;  %v3436_v29 = vand.u32 2147483648, %v6290_v36 }
 0x450   :  { %4862 = vrsqrt.f32 %v6292_v55  ;;  %vm3426_vm10 = vcmp.eq.f32.partialorder %v6292_v55, inf  ;;  %vm3428_vm11 = vcmp.eq.f32.partialorder %v6292_v55, 0.0  ;;  %v3429_v40 = vand.u32 2147483648, %v6292_v55 }
 0x452   :  { %v6296_v46 = vpop.xlane.xlu1 %3378  ;;  %v6298_v9 = vpop.xlane.xlu0 %3376 }
 0x453   :  { %4864 = vrsqrt.f32 %v6296_v46  ;;  %vm3447_vm12 = vcmp.eq.f32.partialorder %v6296_v46, inf  ;;  %vm3449_vm13 = vcmp.eq.f32.partialorder %v6296_v46, 0.0  ;;  %v3450_v26 = vand.u32 2147483648, %v6296_v46 }
 0x454   :  { %v4853_v56 = vpop.eup %4852  ;;  %4866 = vrsqrt.f32 %v6298_v9  ;;  %vm3440_vm14 = vcmp.eq.f32.partialorder %v6298_v9, inf  ;;  %vm3442_vm15 = vcmp.eq.f32.partialorder %v6298_v9, 0.0 }
 0x455   :  { %v4855_v6 = vpop.eup %4854  ;;  %v3411_v27 = vmul.f32 %v4853_v56, %v3369_v19 }
 0x456   :  { %v3397_v63 = vmul.f32 %v4855_v6, %v3365_v1  ;;  %v6302_v58 = vpop.xlane.xlu1 %3382  ;;  %v6304_v3 = vpop.xlane.xlu0 %3380 }
 0x457   :  { %v3413_v61 = vsel %vm3412_vm0, %v3369_v19, %v3411_v27  ;;  %4868 = vrsqrt.f32 %v6302_v58  ;;  %vm3461_vm0 = vcmp.eq.f32.partialorder %v6302_v58, inf }
 0x458   :  { %v4857_v52 = vpop.eup %4856  ;;  %v3416_v41 = vsel %vm3414_vm1, %v3415_v30, %v3413_v61  ;;  %v3399_v48 = vsel %vm3398_vm2, %v3365_v1, %v3397_v63  ;;  %4870 = vrsqrt.f32 %v6304_v3  ;;  %v3443_v30 = vand.u32 2147483648, %v6298_v9 }
 0x459   :  { %v4859_v28 = vpop.eup %4858  ;;  %v3510_v31 = vmax.f32 %v3416_v41, 1e-12  ;;  %v3402_v22 = vsel %vm3400_vm3, %v3401_v59, %v3399_v48  ;;  %v3418_v12 = vmul.f32 %v4857_v52, %v3371_v38  ;;  %vm3463_vm1 = vcmp.eq.f32.partialorder %v6302_v58, 0.0 }
 0x45a   :  { %v3508_v4 = vmax.f32 %v3402_v22, 1e-12  ;;  %v3404_v54 = vmul.f32 %v4859_v28, %v3367_v62  ;;  %v6312_v24 = vpop.xlane.xlu1 %3386  ;;  %v6314_v44 = vpop.xlane.xlu0 %3384  ;;  %vm3454_vm2 = vcmp.eq.f32.partialorder %v6304_v3, inf  ;;  %vm3456_vm3 = vcmp.eq.f32.partialorder %v6304_v3, 0.0 }
 0x45b   :  { %4872 = vrcp.f32 %v3510_v31  ;;  %v3420_v53 = vsel %vm3419_vm4, %v3371_v38, %v3418_v12  ;;  %v3464_v31 = vand.u32 2147483648, %v6302_v58  ;;  %v3457_v12 = vand.u32 2147483648, %v6304_v3 }
 0x45c   :  { %v4861_v34 = vpop.eup %4860  ;;  %4874 = vrcp.f32 %v3508_v4  ;;  %v3423_v2 = vsel %vm3421_vm5, %v3422_v60, %v3420_v53  ;;  %v3406_v18 = vsel %vm3405_vm6, %v3367_v62, %v3404_v54  ;;  %vm3475_vm4 = vcmp.eq.f32.partialorder %v6312_v24, inf }
 0x45d   :  { %v4863_v15 = vpop.eup %4862  ;;  %v3511_v14 = vmax.f32 %v3423_v2, 1e-12  ;;  %v3409_v57 = vsel %vm3407_vm7, %v3408_v11, %v3406_v18  ;;  %v3432_v10 = vmul.f32 %v4861_v34, %v6290_v36  ;;  %4876 = vrsqrt.f32 %v6312_v24 }
 0x45e   :  { %v3509_v21 = vmax.f32 %v3409_v57, 1e-12  ;;  %v3425_v16 = vmul.f32 %v4863_v15, %v6292_v55  ;;  %4878 = vrsqrt.f32 %v6314_v44  ;;  %v6328_v45 = vpop.xlane.xlu1 %3390  ;;  %v6341_v19 = vpop.xlane.xlu0 %3388  ;;  %vm3477_vm5 = vcmp.eq.f32.partialorder %v6312_v24, 0.0 }
 0x45f   :  { %4880 = vrcp.f32 %v3511_v14  ;;  %v3434_v35 = vsel %vm3433_vm8, %v6290_v36, %v3432_v10  ;;  %vm3468_vm6 = vcmp.eq.f32.partialorder %v6314_v44, inf  ;;  %vm3470_vm7 = vcmp.eq.f32.partialorder %v6314_v44, 0.0 }
 0x460   :  { %v4865_v47 = vpop.eup %4864  ;;  %4882 = vrcp.f32 %v3509_v21  ;;  %v3437_v32 = vsel %vm3435_vm9, %v3436_v29, %v3434_v35  ;;  %v3427_v17 = vsel %vm3426_vm10, %v6292_v55, %v3425_v16  ;;  %v3471_v35 = vand.u32 2147483648, %v6314_v44 }
 0x461   :  { %v4867_v1 = vpop.eup %4866  ;;  %v3513_v38 = vmax.f32 %v3437_v32, 1e-12  ;;  %v3430_v62 = vsel %vm3428_vm11, %v3429_v40, %v3427_v17  ;;  %v3446_v56 = vmul.f32 %v4865_v47, %v6296_v46  ;;  %4884 = vrsqrt.f32 %v6328_v45 }
 0x462   :  { %v3512_v6 = vmax.f32 %v3430_v62, 1e-12  ;;  %v3439_v36 = vmul.f32 %v4867_v1, %v6298_v9  ;;  %v6355_v55 = vpop.xlane.xlu1 %3394  ;;  %vm3489_vm8 = vcmp.eq.f32.partialorder %v6328_v45, inf  ;;  %vm3491_vm9 = vcmp.eq.f32.partialorder %v6328_v45, 0.0 }
 0x463   :  { %4886 = vrcp.f32 %v3513_v38  ;;  %v3448_v27 = vsel %vm3447_vm12, %v6296_v46, %v3446_v56  ;;  %v6366_v46 = vpop.xlane.xlu0 %3392  ;;  %vm3482_vm10 = vcmp.eq.f32.partialorder %v6341_v19, inf  ;;  %vm3484_vm11 = vcmp.eq.f32.partialorder %v6341_v19, 0.0 }
 0x464   :  { %v4869_v63 = vpop.eup %4868  ;;  %4888 = vrcp.f32 %v3512_v6  ;;  %v3451_v59 = vsel %vm3449_vm13, %v3450_v26, %v3448_v27  ;;  %v3441_v61 = vsel %vm3440_vm14, %v6298_v9, %v3439_v36  ;;  %vm3503_vm12 = vcmp.eq.f32.partialorder %v6355_v55, inf }
 0x465   :  { %v4871_v60 = vpop.eup %4870  ;;  %v3515_v52 = vmax.f32 %v3451_v59, 1e-12  ;;  %v3444_v41 = vsel %vm3442_vm15, %v3443_v30, %v3441_v61  ;;  %v3460_v48 = vmul.f32 %v4869_v63, %v6302_v58  ;;  %4890 = vrsqrt.f32 %v6341_v19 }
 0x466   :  { %v3514_v28 = vmax.f32 %v3444_v41, 1e-12  ;;  %v3453_v22 = vmul.f32 %v4871_v60, %v6304_v3  ;;  %4892 = vrsqrt.f32 %v6355_v55  ;;  %vm3505_vm13 = vcmp.eq.f32.partialorder %v6355_v55, 0.0 }
 0x467   :  { %4894 = vrcp.f32 %v3515_v52  ;;  %v3462_v9 = vsel %vm3461_vm0, %v6302_v58, %v3460_v48  ;;  %v3478_v58 = vand.u32 2147483648, %v6312_v24  ;;  %vm3496_vm14 = vcmp.eq.f32.partialorder %v6366_v46, inf }
 0x468   :  { %v4873_v11 = vpop.eup %4872  ;;  %4896 = vrcp.f32 %v3514_v28  ;;  %v3465_v4 = vsel %vm3463_vm1, %v3464_v31, %v3462_v9  ;;  %v3455_v54 = vsel %vm3454_vm2, %v6304_v3, %v3453_v22  ;;  %v3506_v31 = vand.u32 2147483648, %v6355_v55 }
 0x469   :  { %v4875_v53 = vpop.eup %4874  ;;  %v3517_v29 = vmax.f32 %v3465_v4, 1e-12  ;;  %v3458_v34 = vsel %vm3456_vm3, %v3457_v12, %v3455_v54  ;;  %4898 = vrsqrt.f32 %v6366_v46  ;;  %v3529_v21 = vmul.f32 %v4873_v11, %v6226_v5 }
 0x46a   :  { %v4877_v2 = vpop.eup %4876  ;;  %v3516_v18 = vmax.f32 %v3458_v34, 1e-12  ;;  %v3525_v32 = vmul.f32 %v4875_v53, %v6228_v20  ;;  %v3499_v34 = vand.u32 2147483648, %v6366_v46  ;;  %vm3498_vm15 = vcmp.eq.f32.partialorder %v6366_v46, 0.0 }
 0x46b   :  { %v4879_v15 = vpop.eup %4878  ;;  %4900 = vrcp.f32 %v3517_v29  ;;  %v3474_v14 = vmul.f32 %v4877_v2, %v6312_v24 }
 0x46c   :  { %v4881_v57 = vpop.eup %4880  ;;  %4902 = vrcp.f32 %v3516_v18  ;;  %v3467_v3 = vmul.f32 %v4879_v15, %v6314_v44 }
 0x46d   :  { %v4883_v10 = vpop.eup %4882  ;;  %v3531_v16 = vmul.f32 %v4881_v57, %v6230_v51  ;;  %v3476_v40 = vsel %vm3475_vm4, %v6312_v24, %v3474_v14  ;;  %v3492_v24 = vand.u32 2147483648, %v6328_v45 }
 0x46e   :  { %v4885_v47 = vpop.eup %4884  ;;  %v3527_v17 = vmul.f32 %v4883_v10, %v6232_v50  ;;  %v3479_v26 = vsel %vm3477_vm5, %v3478_v58, %v3476_v40  ;;  %v3469_v1 = vsel %vm3468_vm6, %v6314_v44, %v3467_v3 }
 0x46f   :  { %v3994_v38 = vpack.c.bf16 %v3531_v16, %v3529_v21  ;;  %v3519_v62 = vmax.f32 %v3479_v26, 1e-12  ;;  %v3472_v56 = vsel %vm3470_vm7, %v3471_v35, %v3469_v1  ;;  %v3488_v6 = vmul.f32 %v4885_v47, %v6328_v45 }
 0x470   :  { %v4887_v5 = vpop.eup %4886  ;;  %v3989_v36 = vpack.c.bf16 %v3527_v17, %v3525_v32  ;;  %v3518_v51 = vmax.f32 %v3472_v56, 1e-12 }
 0x471   :  { %v4889_v27 = vpop.eup %4888  ;;  %4026 = vst [vmem:[%s6453_s9 + $0x8] sm:$0xff] %v3994_v38   ;;  %v3535_v20 = vmul.f32 %v4887_v5, %v6242_v0  ;;  %4904 = vrcp.f32 %v3519_v62  ;;  %v3490_v50 = vsel %vm3489_vm8, %v6328_v45, %v3488_v6  ;;  %v3485_v45 = vand.u32 2147483648, %v6341_v19 }
 0x472   :  { %v4891_v44 = vpop.eup %4890  ;;  %3990 = vst [vmem:[%s6453_s9] sm:$0xff] %v3989_v36   ;;  %v3533_v30 = vmul.f32 %v4889_v27, %v6244_v23  ;;  %4906 = vrcp.f32 %v3518_v51  ;;  %v3493_v63 = vsel %vm3491_vm9, %v3492_v24, %v3490_v50 }
 0x473   :  { %v4893_v59 = vpop.eup %4892  ;;  %v3521_v61 = vmax.f32 %v3493_v63, 1e-12  ;;  %v3481_v60 = vmul.f32 %v4891_v44, %v6341_v19 }
 0x474   :  { %v4895_v0 = vpop.eup %4894  ;;  %v3999_v52 = vpack.c.bf16 %v3535_v20, %v3533_v30  ;;  %v3502_v41 = vmul.f32 %v4893_v59, %v6355_v55 }
 0x475   :  { %v4897_v48 = vpop.eup %4896  ;;  %v3539_v23 = vmul.f32 %v4895_v0, %v6250_v49  ;;  %4908 = vrcp.f32 %v3521_v61  ;;  %v3483_v28 = vsel %vm3482_vm10, %v6341_v19, %v3481_v60 }
 0x476   :  { %v4899_v22 = vpop.eup %4898  ;;  %4027 = vst [vmem:[%s6453_s9 + $0x10] sm:$0xff] %v3999_v52   ;;  %v3537_v9 = vmul.f32 %v4897_v48, %v6252_v13  ;;  %v3486_v12 = vsel %vm3484_vm11, %v3485_v45, %v3483_v28  ;;  %v3504_v11 = vsel %vm3503_vm12, %v6355_v55, %v3502_v41 }
 0x477   :  { %v3520_v4 = vmax.f32 %v3486_v12, 1e-12  ;;  %v3507_v54 = vsel %vm3505_vm13, %v3506_v31, %v3504_v11  ;;  %v3495_v49 = vmul.f32 %v4899_v22, %v6366_v46 }
 0x478   :  { %v4901_v53 = vpop.eup %4900  ;;  %v4004_v19 = vpack.c.bf16 %v3539_v23, %v3537_v9  ;;  %v3523_v29 = vmax.f32 %v3507_v54, 1e-12 }
 0x479   :  { %v4903_v2 = vpop.eup %4902  ;;  %v3543_v18 = vmul.f32 %v4901_v53, %v6258_v42  ;;  %4910 = vrcp.f32 %v3520_v4  ;;  %v3497_v13 = vsel %vm3496_vm14, %v6366_v46, %v3495_v49 }
 0x47a   :  { %4028 = vst [vmem:[%s6453_s9 + $0x18] sm:$0xff] %v4004_v19   ;;  %v3541_v55 = vmul.f32 %v4903_v2, %v6260_v25  ;;  %4912 = vrcp.f32 %v3523_v29  ;;  %v3500_v15 = vsel %vm3498_vm15, %v3499_v34, %v3497_v13 }
 0x47b   :  { %v3522_v14 = vmax.f32 %v3500_v15, 1e-12 }
 0x47c   :  { %v4009_v58 = vpack.c.bf16 %v3543_v18, %v3541_v55 }
 0x47d   :  { %4914 = vrcp.f32 %v3522_v14 }
 0x47e   :  { %v4905_v57 = vpop.eup %4904  ;;  %4029 = vst [vmem:[%s6453_s9 + $0x20] sm:$0xff] %v4009_v58  }
 0x47f   :  { %v4907_v42 = vpop.eup %4906  ;;  %v3547_v3 = vmul.f32 %v4905_v57, %v6266_v43 }
 0x480   :  { %v3545_v46 = vmul.f32 %v4907_v42, %v6268_v37 }
 0x482   :  { %v4909_v10 = vpop.eup %4908  ;;  %v4014_v21 = vpack.c.bf16 %v3547_v3, %v3545_v46 }
 0x483   :  { %v3551_v25 = vmul.f32 %v4909_v10, %v6274_v7 }
 0x484   :  { %4030 = vst [vmem:[%s6453_s9 + $0x28] sm:$0xff] %v4014_v21  }
 0x486   :  { %v4911_v16 = vpop.eup %4910 }
 0x487   :  { %v4913_v40 = vpop.eup %4912  ;;  %v3549_v35 = vmul.f32 %v4911_v16, %v6276_v33 }
 0x488   :  { %v3555_v32 = vmul.f32 %v4913_v40, %v6282_v8 }
 0x489   :  { %v4019_v47 = vpack.c.bf16 %v3551_v25, %v3549_v35 }
 0x48a   :  { %v4915_v17 = vpop.eup %4914 }
 0x48b   :  { %4031 = vst [vmem:[%s6453_s9 + $0x30] sm:$0xff] %v4019_v47   ;;  %v3553_v43 = vmul.f32 %v4915_v17, %v6284_v39 }
 0x48d   :  { %v4024_v37 = vpack.c.bf16 %v3555_v32, %v3553_v43 }
 0x48f   :  { %4032 = vst [vmem:[%s6453_s9 + $0x38] sm:$0xff] %v4024_v37  }

// kernel: _lambda_.3
= control target key start
LH: loop header
LB: loop body
LE: loop exit
PB: predicated region body
PF: predicated region fallthrough
CT: control target
= control target key end

     0   :  { %16 = vsyncpa [#allocation7], 0  ;;  %s4908_s15 = smov [#allocation6]   ;;  %s6416_s0 = inlined_call_operand.<no memory space> [shape: s32[1,1], index: 0, kind: input, shape index: {}]   ;;  %s6417_s1 = inlined_call_operand.<no memory space> [shape: s32[1], index: 1, kind: input, shape index: {}]   ;;  %s6418_s2 = inlined_call_operand.vmem [shape: bf16[128,128], index: 2, kind: input, shape index: {}, may-alias: {2,3}]   ;;  %s6419_s3 = inlined_call_operand.vmem [shape: bf16[128,128], index: 3, kind: input, shape index: {}, may-alias: {2,3}]   ;;  %s6420_s4 = inlined_call_operand.hbm [shape: s8[7,128,128], index: 4, kind: input, shape index: {}]   ;;  %s6421_s5 = inlined_call_operand.vmem [shape: f32[7,128,1], index: 5, kind: input, shape index: {}]   ;;  %s6422_s6 = inlined_call_operand.vmem [shape: bf16[7,128,128], index: 6, kind: input, shape index: {}]   ;;  %s6423_s7 = inlined_call_operand.vmem [shape: bf16[128,128], index: 7, kind: input, shape index: {}]   ;;  %s6424_s8 = inlined_call_operand.vmem [shape: f32[1,128], index: 8, kind: input, shape index: {}]   ;;  %s6425_s9 = inlined_call_operand.vmem [shape: bf16[128,128], index: 9, kind: output, shape index: {}]  }
   0x1   :  { %s3641_s11 = sshll.u32 %s6416_s0, 7  ;;  %s46_s16 = sshll.u32 %s4908_s15, 4  ;;  %s47_s16 = int_to_ptr.vmem [resolvable:$true] %s46_s16 }
   0x2   :  { %s45_s14 = scalar_lea.hbm %s6420_s4, %s3641_s11  ;;  %s4886_s20 = scalar_lea.hbm %s6420_s4, 3584 }
   0x3   :  { %s4884_s17 = scalar_lea.hbm %s45_s14, 3584  ;;  %p4887_p1 = scmp.lt.s32.totalorder %s45_s14, %s6420_s4 }
   0x4   :  { %p4885_p0 = scmp.ne.s32.totalorder %s45_s14, %s4884_s17  ;;  %p4888_p2 = scmp.lt.s32.totalorder %s4886_s20, %s4884_s17 }
   0x6   :  { %p4889_p3 = por %p4888_p2, %p4887_p1 }
   0x8   :  { %p4890_p4 = pnand %p4889_p3, %p4885_p0 }
   0xa   :  { %4893 = shalt.err (!%p4890_p4)
}
   0xb   :  { %s4894_s23 = scalar_lea.vmem %s47_s16, 3584  ;;  %p4899_p6 = scmp.lt.s32.totalorder %s47_s16, %s47_s16 }
   0xc   :  { %p4895_p5 = scmp.ne.s32.totalorder %s47_s16, %s4894_s23  ;;  %p4900_p7 = scmp.lt.s32.totalorder %s4894_s23, %s4894_s23 }
   0xe   :  { %p4901_p8 = por %p4900_p7, %p4899_p6 }
  0x10   :  { %p4902_p9 = pnand %p4901_p8, %p4895_p5 }
  0x12   :  { %4905 = shalt.err (!%p4902_p9)
}
  0x13   :  { %s4909_s24 = smov 128   ;;  %s4910_s25 = smov 8  }
  0x14   :  { %52 = dma.hbm_to_vmem [thread:$0]  %s45_s14, 3584, %s47_s16, [#allocation7], %s4909_s24, %s4909_s24, %s4910_s25  }
  0x15   :  { %4906 = dma.done.wait [#allocation7], 3584  }
  0x16   :  { %4907 = vsyncadd [#allocation7], 4294963712  ;;  %s3642_s4 = sshll.u32 %s6416_s0, 4  ;;  %v4738_v0 = vld [vmem:[%s6423_s7 + $0x38] sm:$0xff]   ;;  %v4739_v1 = vld [vmem:[%s6423_s7 + $0x30] sm:$0xff]   ;;  %p3662_p11 = scmp.le.s32.totalorder %s6417_s1, 0 }
  0x17   :  { %p78_p10 = scmp.lt.s32.totalorder %s3642_s4, 15  ;;  %4238 = vmatprep.subr.bf16.mxu0 %v4738_v0  ;;  %4718 = vmatprep.subr.bf16.mxu1 %v4738_v0  ;;  %v4740_v2 = vld [vmem:[%s6423_s7 + $0x28] sm:$0xff]   ;;  %v4741_v3 = vld [vmem:[%s6423_s7 + $0x20] sm:$0xff]   ;;  %v4742_v6 = vld [vmem:[%s6423_s7 + $0x18] sm:$0xff]  }
  0x18   :  { %4239 = vmatpush3.bf16.msra.mxu0 %v4738_v0  ;;  %4726 = vmatpush3.bf16.msra.mxu1 %v4738_v0  ;;  %v4746_v4 = vld [vmem:[%s6418_s2] sm:$0xff]   ;;  %v4743_v7 = vld [vmem:[%s6423_s7 + $0x10] sm:$0xff]   ;;  %v4744_v8 = vld [vmem:[%s6423_s7 + $0x8] sm:$0xff]  }
  0x19   :  { %s6489_s4 = smov (!%p78_p10, %s3642_s4), 15  ;;  %4240 = vmatprep.subr.bf16.mxu0 %v4739_v1  ;;  %4719 = vmatprep.subr.bf16.mxu1 %v4739_v1  ;;  %v4747_v5 = vld [vmem:[%s6418_s2 + $0x20] sm:$0xff]   ;;  %v4748_v10 = vld [vmem:[%s6418_s2 + $0x8] sm:$0xff]   ;;  %v4750_v12 = vld [vmem:[%s6418_s2 + $0x10] sm:$0xff]  }
  0x1a   :  { %s3643_s28 = sshll.u32 %s6489_s4, 2  ;;  %4254 = vmatprep.mubr.bf16.mxu0 %v4746_v4  ;;  %4262 = vmatprep.mubr.bf16.mxu1 %v4747_v5  ;;  %v4745_v9 = vld [vmem:[%s6423_s7] sm:$0xff]   ;;  %v4749_v11 = vld [vmem:[%s6418_s2 + $0x28] sm:$0xff]   ;;  %v4751_v13 = vld [vmem:[%s6418_s2 + $0x30] sm:$0xff]  }
  0x1b   :  { %s4980_s10 = scalar_lea.vmem %s6419_s3, %s3643_s28  ;;  %v4752_v14 = vld [vmem:[%s6418_s2 + $0x18] sm:$0xff]   ;;  %v3644_v16 = vld [vmem:[%s6424_s8] ss:$0 sm:$0xff] }
  0x1c   :  { %4241 = vmatpush3.bf16.msra.mxu0 %v4739_v1  ;;  %4727 = vmatpush3.bf16.msra.mxu1 %v4739_v1  ;;  %v4753_v15 = vld [vmem:[%s6418_s2 + $0x38] sm:$0xff]  }
  0x1d   :  { %4242 = vmatprep.subr.bf16.mxu0 %v4740_v2  ;;  %4720 = vmatprep.subr.bf16.mxu1 %v4740_v2 }
  0x20   :  { %4243 = vmatpush3.bf16.msra.mxu0 %v4740_v2  ;;  %4728 = vmatpush3.bf16.msra.mxu1 %v4740_v2 }
  0x21   :  { %4244 = vmatprep.subr.bf16.mxu0 %v4741_v3  ;;  %4721 = vmatprep.subr.bf16.mxu1 %v4741_v3 }
  0x24   :  { %4245 = vmatpush3.bf16.msra.mxu0 %v4741_v3  ;;  %4729 = vmatpush3.bf16.msra.mxu1 %v4741_v3 }
  0x25   :  { %4246 = vmatprep.subr.bf16.mxu0 %v4742_v6  ;;  %4722 = vmatprep.subr.bf16.mxu1 %v4742_v6 }
  0x28   :  { %4247 = vmatpush3.bf16.msra.mxu0 %v4742_v6  ;;  %4730 = vmatpush3.bf16.msra.mxu1 %v4742_v6 }
  0x29   :  { %4248 = vmatprep.subr.bf16.mxu0 %v4743_v7  ;;  %4723 = vmatprep.subr.bf16.mxu1 %v4743_v7 }
  0x2c   :  { %4249 = vmatpush3.bf16.msra.mxu0 %v4743_v7  ;;  %4731 = vmatpush3.bf16.msra.mxu1 %v4743_v7 }
  0x2d   :  { %4250 = vmatprep.subr.bf16.mxu0 %v4744_v8  ;;  %4724 = vmatprep.subr.bf16.mxu1 %v4744_v8 }
  0x30   :  { %4251 = vmatpush3.bf16.msra.mxu0 %v4744_v8  ;;  %4732 = vmatpush3.bf16.msra.mxu1 %v4744_v8 }
  0x31   :  { %4252 = vmatprep.subr.bf16.mxu0 %v4745_v9  ;;  %4725 = vmatprep.subr.bf16.mxu1 %v4745_v9 }
  0x34   :  { %4253 = vmatpush3.bf16.msra.mxu0 %v4745_v9  ;;  %4733 = vmatpush3.bf16.msra.mxu1 %v4745_v9 }
  0x37   :  { %4255 = vmatmul.mubr.bf16.vlgmr.msra.gmra.mxu0 %v4748_v10  ;;  %4263 = vmatmul.mubr.bf16.vlgmr.msra.gmra.mxu1 %v4749_v11 }
  0x38   :  { %4258 = vmatprep.mubr.bf16.mxu0 %v4750_v12  ;;  %4266 = vmatprep.mubr.bf16.mxu1 %v4751_v13 }
  0x3f   :  { %4259 = vmatmul.mubr.bf16.gmra.mxu0 %v4752_v14  ;;  %4267 = vmatmul.mubr.bf16.gmra.mxu1 %v4753_v15 }
  0xf7   :  { %v4256_v17 = vpop.f32.mrf.mxu0  ;;  %v4264_v18 = vpop.f32.mrf.mxu1 }
  0xf8   :  { %v274_v19 = vadd.f32 %v4256_v17, %v3644_v16  ;;  %v306_v20 = vadd.f32 %v4264_v18, %v3644_v16 }
  0xf9   :  { %v265_v21 = vpop.f32.mrf.mxu0  ;;  %v297_v22 = vpop.f32.mrf.mxu1 }
  0xfa   :  { %330 = vst [vmem:[#allocation2 + $0x58] sm:$0xff] %v274_v19  ;;  %338 = vst [vmem:[#allocation2 + $0x10] sm:$0xff] %v306_v20  ;;  %v266_v23 = vadd.f32 %v3644_v16, %v265_v21  ;;  %v298_v24 = vadd.f32 %v3644_v16, %v297_v22 }
  0xfb   :  { %v4257_v25 = vpop.f32.mrf.mxu0  ;;  %v4265_v26 = vpop.f32.mrf.mxu1 }
  0xfc   :  { %328 = vst [vmem:[#allocation2 + $0x30] sm:$0xff] %v266_v23  ;;  %336 = vst [vmem:[#allocation2 + $0x40] sm:$0xff] %v298_v24  ;;  %v277_v27 = vadd.f32 %v4257_v25, %v3644_v16  ;;  %v309_v28 = vadd.f32 %v4265_v26, %v3644_v16 }
  0xfd   :  { %v268_v29 = vpop.f32.mrf.mxu0  ;;  %v300_v30 = vpop.f32.mrf.mxu1 }
  0xfe   :  { %331 = vst [vmem:[#allocation2 + $0x18] sm:$0xff] %v277_v27  ;;  %339 = vst [vmem:[#allocation2 + $0x38] sm:$0xff] %v309_v28  ;;  %v269_v31 = vadd.f32 %v3644_v16, %v268_v29  ;;  %v301_v32 = vadd.f32 %v3644_v16, %v300_v30 }
  0xff   :  { %v4260_v33 = vpop.f32.mrf.mxu0  ;;  %v4268_v34 = vpop.f32.mrf.mxu1 }
 0x100   :  { %329 = vst [vmem:[#allocation2] sm:$0xff] %v269_v31  ;;  %337 = vst [vmem:[#allocation2 + $0x20] sm:$0xff] %v301_v32  ;;  %v290_v35 = vadd.f32 %v4260_v33, %v3644_v16  ;;  %v322_v36 = vadd.f32 %v4268_v34, %v3644_v16 }
 0x101   :  { %v281_v37 = vpop.f32.mrf.mxu0  ;;  %v313_v38 = vpop.f32.mrf.mxu1 }
 0x102   :  { %334 = vst [vmem:[#allocation2 + $0x8] sm:$0xff] %v290_v35  ;;  %342 = vst [vmem:[#allocation2 + $0x78] sm:$0xff] %v322_v36  ;;  %v282_v39 = vadd.f32 %v3644_v16, %v281_v37  ;;  %v314_v40 = vadd.f32 %v3644_v16, %v313_v38 }
 0x103   :  { %v4261_v41 = vpop.f32.mrf.mxu0  ;;  %v4269_v42 = vpop.f32.mrf.mxu1 }
 0x104   :  { %332 = vst [vmem:[#allocation2 + $0x50] sm:$0xff] %v282_v39  ;;  %340 = vst [vmem:[#allocation2 + $0x60] sm:$0xff] %v314_v40  ;;  %v293_v43 = vadd.f32 %v4261_v41, %v3644_v16  ;;  %v325_v44 = vadd.f32 %v4269_v42, %v3644_v16  ;;  %348 = sbr.rel (%p3662_p11) target bundleno = 973 (0x3cd), region = 41 }
 0x105   :  { %v284_v45 = vpop.f32.mrf.mxu0  ;;  %v316_v46 = vpop.f32.mrf.mxu1 }
 0x106   :  { %335 = vst [vmem:[#allocation2 + $0x48] sm:$0xff] %v293_v43  ;;  %343 = vst [vmem:[#allocation2 + $0x28] sm:$0xff] %v325_v44  ;;  %v285_v47 = vadd.f32 %v3644_v16, %v284_v45  ;;  %v317_v48 = vadd.f32 %v3644_v16, %v316_v46 }
 0x108   :  { %333 = vst [vmem:[#allocation2 + $0x68] sm:$0xff] %v285_v47  ;;  %341 = vst [vmem:[#allocation2 + $0x70] sm:$0xff] %v317_v48 }
 0x109   :  { %v4756_v49 = vld [vmem:[%s6422_s6 + $0x38] sm:$0xff]   ;;  %v4757_v50 = vld [vmem:[%s6422_s6 + $0x30] sm:$0xff]   ;;  %v4758_v51 = vld [vmem:[%s6422_s6 + $0x28] sm:$0xff]   ;;  %v4911_v54 = vmov 0  }
 0x10a   :  { %4270 = vmatprep.subr.bf16.mxu0 %v4756_v49  ;;  %v4759_v52 = vld [vmem:[%s6422_s6 + $0x20] sm:$0xff]   ;;  %4755 = vset.pattern.permute.xlu1 %v4911_v54  ;;  %v4760_v55 = vld [vmem:[%s6422_s6 + $0x18] sm:$0xff]   ;;  %v4761_v56 = vld [vmem:[%s6422_s6 + $0x10] sm:$0xff]  }
 0x10b   :  { %4271 = vmatpush3.bf16.msra.mxu0 %v4756_v49  ;;  %v5049_v53 = vld [vmem:[%s4980_s10] sm:$0xff]   ;;  %4754 = vset.pattern.permute.xlu0 %v4911_v54  ;;  %v4762_v57 = vld [vmem:[%s6422_s6 + $0x8] sm:$0xff]   ;;  %v4766_v59 = vld [vmem:[%s6422_s6 + $0x78] sm:$0xff]  }
 0x10c   :  { %4272 = vmatprep.subr.bf16.mxu0 %v4757_v50  ;;  %4286 = vmatprep.mubr.bf16.mxu0 %v5049_v53  ;;  %v4763_v58 = vld [vmem:[%s6422_s6] sm:$0xff]   ;;  %v5068_v60 = vld [vmem:[%s4980_s10 + $0x8] sm:$0xff]   ;;  %v5071_v61 = vld [vmem:[%s4980_s10 + $0x10] sm:$0xff]  }
 0x10d   :  { %v4767_v62 = vld [vmem:[%s6422_s6 + $0x70] sm:$0xff]   ;;  %v4770_v63 = vld [vmem:[%s6422_s6 + $0x68] sm:$0xff]   ;;  %v5082_v0 = vld [vmem:[%s4980_s10 + $0x18] sm:$0xff]  }
 0x10e   :  { %v5085_v1 = vld [vmem:[%s4980_s10 + $0x20] sm:$0xff]   ;;  %v709_v3 = vld [vmem:[%s6421_s5 + $0x10] sm:$0xff]  ;;  %v4774_v5 = vld [vmem:[%s6422_s6 + $0x58] sm:$0xff]  }
 0x10f   :  { %4273 = vmatpush3.bf16.msra.mxu0 %v4757_v50  ;;  %v4771_v2 = vld [vmem:[%s6422_s6 + $0x60] sm:$0xff]   ;;  %735 = vperm.xlu1 %4755, %v709_v3   ;;  %v710_v6 = vld [vmem:[%s6421_s5 + $0x18] sm:$0xff]  ;;  %v5105_v7 = vld [vmem:[%s4980_s10 + $0x28] sm:$0xff]  }
 0x110   :  { %4274 = vmatprep.subr.bf16.mxu0 %v4758_v51  ;;  %v707_v4 = vld [vmem:[%s6421_s5] sm:$0xff]  ;;  %v708_v8 = vld [vmem:[%s6421_s5 + $0x8] sm:$0xff]  ;;  %v5111_v9 = vld [vmem:[%s4980_s10 + $0x30] sm:$0xff]  }
 0x111   :  { %725 = vperm.xlu0 %4754, %v707_v4   ;;  %v4775_v10 = vld [vmem:[%s6422_s6 + $0x50] sm:$0xff]   ;;  %v712_v11 = vld [vmem:[%s6421_s5 + $0x28] sm:$0xff]  ;;  %v711_v12 = vld [vmem:[%s6421_s5 + $0x20] sm:$0xff] }
 0x112   :  { %v4778_v13 = vld [vmem:[%s6422_s6 + $0x48] sm:$0xff]   ;;  %v714_v14 = vld [vmem:[%s6421_s5 + $0x38] sm:$0xff]  ;;  %v713_v16 = vld [vmem:[%s6421_s5 + $0x30] sm:$0xff] }
 0x113   :  { %4275 = vmatpush3.bf16.msra.mxu0 %v4758_v51  ;;  %740 = vperm.xlu1 %4755, %v710_v6   ;;  %v5131_v15 = vld [vmem:[%s4980_s10 + $0x38] sm:$0xff]   ;;  %v4779_v17 = vld [vmem:[%s6422_s6 + $0x40] sm:$0xff]   ;;  %v716_v18 = vld [vmem:[%s6421_s5 + $0x48] sm:$0xff] }
 0x114   :  { %4276 = vmatprep.subr.bf16.mxu0 %v4759_v52  ;;  %v715_v19 = vld [vmem:[%s6421_s5 + $0x40] sm:$0xff]  ;;  %v4780_v20 = vld [vmem:[%s6422_s6 + $0xb8] sm:$0xff]   ;;  %v717_v22 = vld [vmem:[%s6421_s5 + $0x50] sm:$0xff] }
 0x115   :  { %730 = vperm.xlu0 %4754, %v708_v8   ;;  %v718_v21 = vld [vmem:[%s6421_s5 + $0x58] sm:$0xff]  ;;  %v4781_v23 = vld [vmem:[%s6422_s6 + $0xb0] sm:$0xff]   ;;  %v720_v24 = vld [vmem:[%s6421_s5 + $0x68] sm:$0xff] }
 0x116   :  { %v719_v25 = vld [vmem:[%s6421_s5 + $0x60] sm:$0xff]  ;;  %v4782_v26 = vld [vmem:[%s6422_s6 + $0xa8] sm:$0xff]   ;;  %v722_v27 = vld [vmem:[%s6421_s5 + $0x78] sm:$0xff] }
 0x117   :  { %4277 = vmatpush3.bf16.msra.mxu0 %v4759_v52  ;;  %750 = vperm.xlu1 %4755, %v712_v11   ;;  %v721_v28 = vld [vmem:[%s6421_s5 + $0x70] sm:$0xff]  ;;  %v4783_v29 = vld [vmem:[%s6422_s6 + $0xa0] sm:$0xff]   ;;  %v3704_v30 = vld [vmem:[%s6421_s5 + $0x88] sm:$0xff] }
 0x118   :  { %4278 = vmatprep.subr.bf16.mxu0 %v4760_v55  ;;  %v3703_v31 = vld [vmem:[%s6421_s5 + $0x80] sm:$0xff]  ;;  %v4784_v32 = vld [vmem:[%s6422_s6 + $0x98] sm:$0xff]   ;;  %v3705_v34 = vld [vmem:[%s6421_s5 + $0x90] sm:$0xff] }
 0x119   :  { %745 = vperm.xlu0 %4754, %v711_v12   ;;  %v3706_v33 = vld [vmem:[%s6421_s5 + $0x98] sm:$0xff]  ;;  %v4785_v35 = vld [vmem:[%s6422_s6 + $0x90] sm:$0xff]   ;;  %v3708_v36 = vld [vmem:[%s6421_s5 + $0xa8] sm:$0xff] }
 0x11a   :  { %v3707_v37 = vld [vmem:[%s6421_s5 + $0xa0] sm:$0xff]  ;;  %v4786_v38 = vld [vmem:[%s6422_s6 + $0x88] sm:$0xff]   ;;  %v3710_v39 = vld [vmem:[%s6421_s5 + $0xb8] sm:$0xff] }
 0x11b   :  { %4279 = vmatpush3.bf16.msra.mxu0 %v4760_v55  ;;  %760 = vperm.xlu1 %4755, %v714_v14   ;;  %v3709_v40 = vld [vmem:[%s6421_s5 + $0xb0] sm:$0xff]  ;;  %v4787_v41 = vld [vmem:[%s6422_s6 + $0x80] sm:$0xff]   ;;  %v3712_v42 = vld [vmem:[%s6421_s5 + $0xc8] sm:$0xff] }
 0x11c   :  { %4280 = vmatprep.subr.bf16.mxu0 %v4761_v56  ;;  %v3711_v43 = vld [vmem:[%s6421_s5 + $0xc0] sm:$0xff]  ;;  %v4788_v44 = vld [vmem:[%s6422_s6 + $0xf8] sm:$0xff]   ;;  %v3713_v46 = vld [vmem:[%s6421_s5 + $0xd0] sm:$0xff] }
 0x11d   :  { %755 = vperm.xlu0 %4754, %v713_v16   ;;  %v3714_v45 = vld [vmem:[%s6421_s5 + $0xd8] sm:$0xff]  ;;  %v4789_v47 = vld [vmem:[%s6422_s6 + $0xf0] sm:$0xff]   ;;  %v3716_v48 = vld [vmem:[%s6421_s5 + $0xe8] sm:$0xff] }
 0x11e   :  { %v3715_v49 = vld [vmem:[%s6421_s5 + $0xe0] sm:$0xff]  ;;  %v4790_v50 = vld [vmem:[%s6422_s6 + $0xe8] sm:$0xff]   ;;  %v3718_v51 = vld [vmem:[%s6421_s5 + $0xf8] sm:$0xff] }
 0x11f   :  { %4281 = vmatpush3.bf16.msra.mxu0 %v4761_v56  ;;  %770 = vperm.xlu1 %4755, %v716_v18   ;;  %v3717_v52 = vld [vmem:[%s6421_s5 + $0xf0] sm:$0xff]  ;;  %v4791_v54 = vld [vmem:[%s6422_s6 + $0xe0] sm:$0xff]   ;;  %v3744_v55 = vld [vmem:[%s6421_s5 + $0x108] sm:$0xff] }
 0x120   :  { %4282 = vmatprep.subr.bf16.mxu0 %v4762_v57  ;;  %v3743_v56 = vld [vmem:[%s6421_s5 + $0x100] sm:$0xff]  ;;  %v4794_v3 = vld [vmem:[%s6422_s6 + $0xc8] sm:$0xff]   ;;  %v3750_v4 = vld [vmem:[%s6421_s5 + $0x138] sm:$0xff] }
 0x121   :  { %765 = vperm.xlu0 %4754, %v715_v19   ;;  %v4795_v6 = vld [vmem:[%s6422_s6 + $0xc0] sm:$0xff]   ;;  %v3752_v8 = vld [vmem:[%s6421_s5 + $0x148] sm:$0xff]  ;;  %v4796_v11 = vld [vmem:[%s6422_s6 + $0x138] sm:$0xff]  }
 0x122   :  { %v3754_v12 = vld [vmem:[%s6421_s5 + $0x158] sm:$0xff]  ;;  %v4797_v14 = vld [vmem:[%s6422_s6 + $0x130] sm:$0xff]   ;;  %v3756_v16 = vld [vmem:[%s6421_s5 + $0x168] sm:$0xff] }
 0x123   :  { %4283 = vmatpush3.bf16.msra.mxu0 %v4762_v57  ;;  %780 = vperm.xlu1 %4755, %v718_v21   ;;  %v4792_v57 = vld [vmem:[%s6422_s6 + $0xd8] sm:$0xff]   ;;  %v4798_v18 = vld [vmem:[%s6422_s6 + $0x128] sm:$0xff]   ;;  %v4799_v21 = vld [vmem:[%s6422_s6 + $0x120] sm:$0xff]  }
 0x124   :  { %4284 = vmatprep.subr.bf16.mxu0 %v4763_v58  ;;  %v3758_v19 = vld [vmem:[%s6421_s5 + $0x178] sm:$0xff] }
 0x125   :  { %775 = vperm.xlu0 %4754, %v717_v22   ;;  %v3784_v22 = vld [vmem:[%s6421_s5 + $0x188] sm:$0xff] }
 0x127   :  { %4285 = vmatpush3.bf16.msra.mxu0 %v4763_v58  ;;  %790 = vperm.xlu1 %4755, %v720_v24   ;;  %v3746_v58 = vld [vmem:[%s6421_s5 + $0x118] sm:$0xff] }
 0x128   :  { %4334 = vmatprep.subr.bf16.mxu0 %v4766_v59  ;;  %v4800_v24 = vld [vmem:[%s6422_s6 + $0x118] sm:$0xff]  }
 0x129   :  { %785 = vperm.xlu0 %4754, %v719_v25   ;;  %v3786_v25 = vld [vmem:[%s6421_s5 + $0x198] sm:$0xff] }
 0x12a   :  { %4287 = vmatmul.mubr.bf16.vlgmr.msra.gmra.mxu0 %v5068_v60 }
 0x12b   :  { %4335 = vmatpush3.bf16.msra.mxu0 %v4766_v59  ;;  %4290 = vmatprep.mubr.bf16.mxu0 %v5071_v61  ;;  %v3745_v59 = vld [vmem:[%s6421_s5 + $0x110] sm:$0xff] }
 0x12c   :  { %4336 = vmatprep.subr.bf16.mxu0 %v4767_v62  ;;  %800 = vperm.xlu1 %4755, %v722_v27   ;;  %v4801_v27 = vld [vmem:[%s6422_s6 + $0x110] sm:$0xff]  }
 0x12d   :  { %795 = vperm.xlu0 %4754, %v721_v28   ;;  %v3788_v28 = vld [vmem:[%s6421_s5 + $0x1a8] sm:$0xff] }
 0x12f   :  { %4337 = vmatpush3.bf16.msra.mxu0 %v4767_v62  ;;  %v4793_v62 = vld [vmem:[%s6422_s6 + $0xd0] sm:$0xff]  }
 0x130   :  { %4338 = vmatprep.subr.bf16.mxu0 %v4770_v63  ;;  %1139 = vperm.xlu1 %4755, %v3704_v30   ;;  %v4802_v30 = vld [vmem:[%s6422_s6 + $0x108] sm:$0xff]  }
 0x131   :  { %1134 = vperm.xlu0 %4754, %v3703_v31   ;;  %v3790_v31 = vld [vmem:[%s6421_s5 + $0x1b8] sm:$0xff] }
 0x132   :  { %4291 = vmatmul.mubr.bf16.gmra.mxu0 %v5082_v0 }
 0x133   :  { %4339 = vmatpush3.bf16.msra.mxu0 %v4770_v63  ;;  %4294 = vmatprep.mubr.bf16.mxu0 %v5085_v1  ;;  %v3748_v63 = vld [vmem:[%s6421_s5 + $0x128] sm:$0xff] }
 0x134   :  { %4340 = vmatprep.subr.bf16.mxu0 %v4771_v2  ;;  %1149 = vperm.xlu1 %4755, %v3706_v33   ;;  %v4803_v33 = vld [vmem:[%s6422_s6 + $0x100] sm:$0xff]  }
 0x135   :  { %1144 = vperm.xlu0 %4754, %v3705_v34   ;;  %v3792_v34 = vld [vmem:[%s6421_s5 + $0x1c8] sm:$0xff] }
 0x137   :  { %4341 = vmatpush3.bf16.msra.mxu0 %v4771_v2  ;;  %v3747_v2 = vld [vmem:[%s6421_s5 + $0x120] sm:$0xff] }
 0x138   :  { %4342 = vmatprep.subr.bf16.mxu0 %v4774_v5  ;;  %1159 = vperm.xlu1 %4755, %v3708_v36   ;;  %v4804_v36 = vld [vmem:[%s6422_s6 + $0x178] sm:$0xff]  }
 0x139   :  { %1154 = vperm.xlu0 %4754, %v3707_v37   ;;  %v3794_v37 = vld [vmem:[%s6421_s5 + $0x1d8] sm:$0xff] }
 0x13a   :  { %4295 = vmatmul.mubr.bf16.gmra.mxu0 %v5105_v7 }
 0x13b   :  { %4343 = vmatpush3.bf16.msra.mxu0 %v4774_v5  ;;  %4298 = vmatprep.mubr.bf16.mxu0 %v5111_v9  ;;  %v3749_v5 = vld [vmem:[%s6421_s5 + $0x130] sm:$0xff] }
 0x13c   :  { %4344 = vmatprep.subr.bf16.mxu0 %v4775_v10  ;;  %1169 = vperm.xlu1 %4755, %v3710_v39   ;;  %v3793_v39 = vld [vmem:[%s6421_s5 + $0x1d0] sm:$0xff] }
 0x13d   :  { %1164 = vperm.xlu0 %4754, %v3709_v40  }
 0x13f   :  { %4345 = vmatpush3.bf16.msra.mxu0 %v4775_v10  ;;  %v3751_v10 = vld [vmem:[%s6421_s5 + $0x140] sm:$0xff] }
 0x140   :  { %4346 = vmatprep.subr.bf16.mxu0 %v4778_v13  ;;  %1179 = vperm.xlu1 %4755, %v3712_v42   ;;  %v3796_v42 = vld [vmem:[%s6421_s5 + $0x1e8] sm:$0xff] }
 0x141   :  { %1174 = vperm.xlu0 %4754, %v3711_v43   ;;  %v3795_v43 = vld [vmem:[%s6421_s5 + $0x1e0] sm:$0xff] }
 0x142   :  { %4299 = vmatmul.mubr.bf16.gmra.mxu0 %v5131_v15 }
 0x143   :  { %4347 = vmatpush3.bf16.msra.mxu0 %v4778_v13  ;;  %4350 = vmatprep.mubr.bf16.mxu0 %v5049_v53  ;;  %v3753_v13 = vld [vmem:[%s6421_s5 + $0x150] sm:$0xff] }
 0x144   :  { %4348 = vmatprep.subr.bf16.mxu0 %v4779_v17  ;;  %1189 = vperm.xlu1 %4755, %v3714_v45   ;;  %v3798_v45 = vld [vmem:[%s6421_s5 + $0x1f8] sm:$0xff] }
 0x145   :  { %1184 = vperm.xlu0 %4754, %v3713_v46   ;;  %v3797_v46 = vld [vmem:[%s6421_s5 + $0x1f0] sm:$0xff] }
 0x147   :  { %4349 = vmatpush3.bf16.msra.mxu0 %v4779_v17  ;;  %v3755_v17 = vld [vmem:[%s6421_s5 + $0x160] sm:$0xff] }
 0x148   :  { %4398 = vmatprep.subr.bf16.mxu0 %v4780_v20  ;;  %1199 = vperm.xlu1 %4755, %v3716_v48   ;;  %v3824_v48 = vld [vmem:[%s6421_s5 + $0x208] sm:$0xff] }
 0x149   :  { %1194 = vperm.xlu0 %4754, %v3715_v49   ;;  %v3823_v49 = vld [vmem:[%s6421_s5 + $0x200] sm:$0xff] }
 0x14a   :  { %4351 = vmatmul.mubr.bf16.vlgmr.msra.gmra.mxu0 %v5068_v60 }
 0x14b   :  { %4399 = vmatpush3.bf16.msra.mxu0 %v4780_v20  ;;  %4354 = vmatprep.mubr.bf16.mxu0 %v5071_v61  ;;  %v3757_v20 = vld [vmem:[%s6421_s5 + $0x170] sm:$0xff] }
 0x14c   :  { %4400 = vmatprep.subr.bf16.mxu0 %v4781_v23  ;;  %1209 = vperm.xlu1 %4755, %v3718_v51   ;;  %v3826_v51 = vld [vmem:[%s6421_s5 + $0x218] sm:$0xff] }
 0x14d   :  { %1204 = vperm.xlu0 %4754, %v3717_v52   ;;  %v3825_v52 = vld [vmem:[%s6421_s5 + $0x210] sm:$0xff] }
 0x14f   :  { %4401 = vmatpush3.bf16.msra.mxu0 %v4781_v23  ;;  %v3783_v23 = vld [vmem:[%s6421_s5 + $0x180] sm:$0xff] }
 0x150   :  { %4402 = vmatprep.subr.bf16.mxu0 %v4782_v26  ;;  %1548 = vperm.xlu1 %4755, %v3744_v55   ;;  %v3828_v55 = vld [vmem:[%s6421_s5 + $0x228] sm:$0xff] }
 0x151   :  { %1543 = vperm.xlu0 %4754, %v3743_v56   ;;  %v3827_v56 = vld [vmem:[%s6421_s5 + $0x220] sm:$0xff] }
 0x152   :  { %4355 = vmatmul.mubr.bf16.gmra.mxu0 %v5082_v0 }
 0x153   :  { %4403 = vmatpush3.bf16.msra.mxu0 %v4782_v26  ;;  %4358 = vmatprep.mubr.bf16.mxu0 %v5085_v1  ;;  %v3785_v26 = vld [vmem:[%s6421_s5 + $0x190] sm:$0xff] }
 0x154   :  { %4404 = vmatprep.subr.bf16.mxu0 %v4783_v29  ;;  %1558 = vperm.xlu1 %4755, %v3746_v58   ;;  %v3830_v58 = vld [vmem:[%s6421_s5 + $0x238] sm:$0xff] }
 0x155   :  { %1553 = vperm.xlu0 %4754, %v3745_v59   ;;  %v3829_v59 = vld [vmem:[%s6421_s5 + $0x230] sm:$0xff] }
 0x157   :  { %4405 = vmatpush3.bf16.msra.mxu0 %v4783_v29  ;;  %v3787_v29 = vld [vmem:[%s6421_s5 + $0x1a0] sm:$0xff] }
 0x158   :  { %4406 = vmatprep.subr.bf16.mxu0 %v4784_v32  ;;  %1568 = vperm.xlu1 %4755, %v3748_v63   ;;  %v3832_v63 = vld [vmem:[%s6421_s5 + $0x248] sm:$0xff] }
 0x159   :  { %1563 = vperm.xlu0 %4754, %v3747_v2   ;;  %v3831_v2 = vld [vmem:[%s6421_s5 + $0x240] sm:$0xff] }
 0x15a   :  { %4359 = vmatmul.mubr.bf16.gmra.mxu0 %v5105_v7 }
 0x15b   :  { %4407 = vmatpush3.bf16.msra.mxu0 %v4784_v32  ;;  %4362 = vmatprep.mubr.bf16.mxu0 %v5111_v9  ;;  %v3789_v32 = vld [vmem:[%s6421_s5 + $0x1b0] sm:$0xff] }
 0x15c   :  { %4408 = vmatprep.subr.bf16.mxu0 %v4785_v35  ;;  %1578 = vperm.xlu1 %4755, %v3750_v4   ;;  %v3834_v4 = vld [vmem:[%s6421_s5 + $0x258] sm:$0xff] }
 0x15d   :  { %1573 = vperm.xlu0 %4754, %v3749_v5   ;;  %v3833_v5 = vld [vmem:[%s6421_s5 + $0x250] sm:$0xff] }
 0x15f   :  { %4409 = vmatpush3.bf16.msra.mxu0 %v4785_v35  ;;  %v3791_v35 = vld [vmem:[%s6421_s5 + $0x1c0] sm:$0xff] }
 0x160   :  { %4410 = vmatprep.subr.bf16.mxu0 %v4786_v38  ;;  %1588 = vperm.xlu1 %4755, %v3752_v8   ;;  %v3836_v8 = vld [vmem:[%s6421_s5 + $0x268] sm:$0xff] }
 0x161   :  { %1583 = vperm.xlu0 %4754, %v3751_v10   ;;  %v3835_v10 = vld [vmem:[%s6421_s5 + $0x260] sm:$0xff] }
 0x162   :  { %4363 = vmatmul.mubr.bf16.gmra.mxu0 %v5131_v15 }
 0x163   :  { %4411 = vmatpush3.bf16.msra.mxu0 %v4786_v38  ;;  %4414 = vmatprep.mubr.bf16.mxu0 %v5049_v53  ;;  %v5393_v38 = vld [vmem:[#allocation6] sm:$0xff] }
 0x164   :  { %4412 = vmatprep.subr.bf16.mxu0 %v4787_v41  ;;  %1598 = vperm.xlu1 %4755, %v3754_v12   ;;  %v385_v40 = vunpack.c.l.s8.bf16 %v5393_v38  ;;  %v3838_v12 = vld [vmem:[%s6421_s5 + $0x278] sm:$0xff] }
 0x165   :  { %1593 = vperm.xlu0 %4754, %v3753_v13   ;;  %v3837_v13 = vld [vmem:[%s6421_s5 + $0x270] sm:$0xff] }
 0x166   :  { %4318 = vmatprep.mubr.bf16.mxu1 %v385_v40 }
 0x167   :  { %4413 = vmatpush3.bf16.msra.mxu0 %v4787_v41  ;;  %v4805_v41 = vld [vmem:[%s6422_s6 + $0x170] sm:$0xff]  }
 0x168   :  { %4462 = vmatprep.subr.bf16.mxu0 %v4788_v44  ;;  %1608 = vperm.xlu1 %4755, %v3756_v16   ;;  %v3864_v16 = vld [vmem:[%s6421_s5 + $0x288] sm:$0xff] }
 0x169   :  { %1603 = vperm.xlu0 %4754, %v3755_v17   ;;  %v3863_v17 = vld [vmem:[%s6421_s5 + $0x280] sm:$0xff] }
 0x16a   :  { %4415 = vmatmul.mubr.bf16.vlgmr.msra.gmra.mxu0 %v5068_v60 }
 0x16b   :  { %4463 = vmatpush3.bf16.msra.mxu0 %v4788_v44  ;;  %4418 = vmatprep.mubr.bf16.mxu0 %v5071_v61  ;;  %v4806_v44 = vld [vmem:[%s6422_s6 + $0x168] sm:$0xff]  }
 0x16c   :  { %4464 = vmatprep.subr.bf16.mxu0 %v4789_v47  ;;  %1618 = vperm.xlu1 %4755, %v3758_v19   ;;  %v3866_v19 = vld [vmem:[%s6421_s5 + $0x298] sm:$0xff] }
 0x16d   :  { %1613 = vperm.xlu0 %4754, %v3757_v20   ;;  %v3865_v20 = vld [vmem:[%s6421_s5 + $0x290] sm:$0xff] }
 0x16f   :  { %4465 = vmatpush3.bf16.msra.mxu0 %v4789_v47  ;;  %v4807_v47 = vld [vmem:[%s6422_s6 + $0x160] sm:$0xff]  }
 0x170   :  { %4466 = vmatprep.subr.bf16.mxu0 %v4790_v50  ;;  %1957 = vperm.xlu1 %4755, %v3784_v22   ;;  %v3868_v22 = vld [vmem:[%s6421_s5 + $0x2a8] sm:$0xff] }
 0x171   :  { %1952 = vperm.xlu0 %4754, %v3783_v23   ;;  %v3867_v23 = vld [vmem:[%s6421_s5 + $0x2a0] sm:$0xff] }
 0x172   :  { %4419 = vmatmul.mubr.bf16.gmra.mxu0 %v5082_v0 }
 0x173   :  { %4467 = vmatpush3.bf16.msra.mxu0 %v4790_v50  ;;  %4422 = vmatprep.mubr.bf16.mxu0 %v5085_v1  ;;  %v4808_v50 = vld [vmem:[%s6422_s6 + $0x158] sm:$0xff]  }
 0x174   :  { %4468 = vmatprep.subr.bf16.mxu0 %v4791_v54  ;;  %1967 = vperm.xlu1 %4755, %v3786_v25   ;;  %v3870_v25 = vld [vmem:[%s6421_s5 + $0x2b8] sm:$0xff] }
 0x175   :  { %1962 = vperm.xlu0 %4754, %v3785_v26   ;;  %v3869_v26 = vld [vmem:[%s6421_s5 + $0x2b0] sm:$0xff] }
 0x177   :  { %4469 = vmatpush3.bf16.msra.mxu0 %v4791_v54  ;;  %v4809_v54 = vld [vmem:[%s6422_s6 + $0x150] sm:$0xff]  }
 0x178   :  { %4470 = vmatprep.subr.bf16.mxu0 %v4792_v57  ;;  %1977 = vperm.xlu1 %4755, %v3788_v28   ;;  %v3872_v28 = vld [vmem:[%s6421_s5 + $0x2c8] sm:$0xff] }
 0x179   :  { %1972 = vperm.xlu0 %4754, %v3787_v29   ;;  %v3871_v29 = vld [vmem:[%s6421_s5 + $0x2c0] sm:$0xff] }
 0x17a   :  { %4423 = vmatmul.mubr.bf16.gmra.mxu0 %v5105_v7 }
 0x17b   :  { %4471 = vmatpush3.bf16.msra.mxu0 %v4792_v57  ;;  %4426 = vmatprep.mubr.bf16.mxu0 %v5111_v9  ;;  %v4810_v57 = vld [vmem:[%s6422_s6 + $0x148] sm:$0xff]  }
 0x17c   :  { %4472 = vmatprep.subr.bf16.mxu0 %v4793_v62  ;;  %1987 = vperm.xlu1 %4755, %v3790_v31   ;;  %v3873_v31 = vld [vmem:[%s6421_s5 + $0x2d0] sm:$0xff] }
 0x17d   :  { %1982 = vperm.xlu0 %4754, %v3789_v32   ;;  %v3876_v32 = vld [vmem:[%s6421_s5 + $0x2e8] sm:$0xff] }
 0x17f   :  { %4473 = vmatpush3.bf16.msra.mxu0 %v4793_v62  ;;  %v4811_v62 = vld [vmem:[%s6422_s6 + $0x140] sm:$0xff]  }
 0x180   :  { %4474 = vmatprep.subr.bf16.mxu0 %v4794_v3  ;;  %1997 = vperm.xlu1 %4755, %v3792_v34  }
 0x181   :  { %1992 = vperm.xlu0 %4754, %v3791_v35  }
 0x182   :  { %4427 = vmatmul.mubr.bf16.gmra.mxu0 %v5131_v15 }
 0x183   :  { %4475 = vmatpush3.bf16.msra.mxu0 %v4794_v3  ;;  %4478 = vmatprep.mubr.bf16.mxu0 %v5049_v53  ;;  %v4812_v3 = vld [vmem:[%s6422_s6 + $0x1b8] sm:$0xff]  }
 0x184   :  { %4476 = vmatprep.subr.bf16.mxu0 %v4795_v6  ;;  %2007 = vperm.xlu1 %4755, %v3794_v37   ;;  %v3878_v37 = vld [vmem:[%s6421_s5 + $0x2f8] sm:$0xff] }
 0x185   :  { %2002 = vperm.xlu0 %4754, %v3793_v39  }
 0x187   :  { %4477 = vmatpush3.bf16.msra.mxu0 %v4795_v6  ;;  %v4813_v6 = vld [vmem:[%s6422_s6 + $0x1b0] sm:$0xff]  }
 0x188   :  { %4526 = vmatprep.subr.bf16.mxu0 %v4796_v11  ;;  %2017 = vperm.xlu1 %4755, %v3796_v42  }
 0x189   :  { %2012 = vperm.xlu0 %4754, %v3795_v43   ;;  %v3903_v43 = vld [vmem:[%s6421_s5 + $0x300] sm:$0xff] }
 0x18a   :  { %4479 = vmatmul.mubr.bf16.vlgmr.msra.gmra.mxu0 %v5068_v60  ;;  %v5568_v35 = vpop.permute.xlu1 %735 }
 0x18b   :  { %4527 = vmatpush3.bf16.msra.mxu0 %v4796_v11  ;;  %4482 = vmatprep.mubr.bf16.mxu0 %v5071_v61  ;;  %v4814_v11 = vld [vmem:[%s6422_s6 + $0x1a8] sm:$0xff]  }
 0x18c   :  { %4528 = vmatprep.subr.bf16.mxu0 %v4797_v14  ;;  %2027 = vperm.xlu1 %4755, %v3798_v45  }
 0x18d   :  { %2022 = vperm.xlu0 %4754, %v3797_v46   ;;  %v3906_v46 = vld [vmem:[%s6421_s5 + $0x318] sm:$0xff] }
 0x18e   :  { %v5588_v42 = vpop.permute.xlu1 %740 }
 0x18f   :  { %4529 = vmatpush3.bf16.msra.mxu0 %v4797_v14  ;;  %v4815_v14 = vld [vmem:[%s6422_s6 + $0x1a0] sm:$0xff]  }
 0x190   :  { %4530 = vmatprep.subr.bf16.mxu0 %v4798_v18  ;;  %2366 = vperm.xlu1 %4755, %v3824_v48  }
 0x191   :  { %2361 = vperm.xlu0 %4754, %v3823_v49  }
 0x192   :  { %4483 = vmatmul.mubr.bf16.gmra.mxu0 %v5082_v0  ;;  %v5608_v49 = vpop.permute.xlu1 %750 }
 0x193   :  { %4531 = vmatpush3.bf16.msra.mxu0 %v4798_v18  ;;  %4486 = vmatprep.mubr.bf16.mxu0 %v5085_v1  ;;  %v4816_v18 = vld [vmem:[%s6422_s6 + $0x198] sm:$0xff]  }
 0x194   :  { %4532 = vmatprep.subr.bf16.mxu0 %v4799_v21  ;;  %2376 = vperm.xlu1 %4755, %v3826_v51  }
 0x195   :  { %2371 = vperm.xlu0 %4754, %v3825_v52   ;;  %v3907_v52 = vld [vmem:[%s6421_s5 + $0x320] sm:$0xff] }
 0x197   :  { %4533 = vmatpush3.bf16.msra.mxu0 %v4799_v21  ;;  %v4817_v21 = vld [vmem:[%s6422_s6 + $0x190] sm:$0xff]  }
 0x198   :  { %4534 = vmatprep.subr.bf16.mxu0 %v4800_v24  ;;  %2386 = vperm.xlu1 %4755, %v3828_v55   ;;  %v3910_v55 = vld [vmem:[%s6421_s5 + $0x338] sm:$0xff] }
 0x199   :  { %2381 = vperm.xlu0 %4754, %v3827_v56  }
 0x19a   :  { %4487 = vmatmul.mubr.bf16.gmra.mxu0 %v5105_v7 }
 0x19b   :  { %4535 = vmatpush3.bf16.msra.mxu0 %v4800_v24  ;;  %4490 = vmatprep.mubr.bf16.mxu0 %v5111_v9  ;;  %v4818_v24 = vld [vmem:[%s6422_s6 + $0x188] sm:$0xff]  }
 0x19c   :  { %4536 = vmatprep.subr.bf16.mxu0 %v4801_v27  ;;  %2396 = vperm.xlu1 %4755, %v3830_v58  }
 0x19d   :  { %2391 = vperm.xlu0 %4754, %v3829_v59  }
 0x19f   :  { %4537 = vmatpush3.bf16.msra.mxu0 %v4801_v27  ;;  %v4819_v27 = vld [vmem:[%s6422_s6 + $0x180] sm:$0xff]  }
 0x1a0   :  { %4538 = vmatprep.subr.bf16.mxu0 %v4802_v30  ;;  %2406 = vperm.xlu1 %4755, %v3832_v63   ;;  %v3911_v63 = vld [vmem:[%s6421_s5 + $0x340] sm:$0xff] }
 0x1a1   :  { %2401 = vperm.xlu0 %4754, %v3831_v2  }
 0x1a2   :  { %4491 = vmatmul.mubr.bf16.gmra.mxu0 %v5131_v15 }
 0x1a3   :  { %4539 = vmatpush3.bf16.msra.mxu0 %v4802_v30  ;;  %4542 = vmatprep.mubr.bf16.mxu0 %v5049_v53  ;;  %v3874_v30 = vld [vmem:[%s6421_s5 + $0x2d8] sm:$0xff] }
 0x1a4   :  { %4540 = vmatprep.subr.bf16.mxu0 %v4803_v33  ;;  %2416 = vperm.xlu1 %4755, %v3834_v4  }
 0x1a5   :  { %2411 = vperm.xlu0 %4754, %v3833_v5   ;;  %v3914_v5 = vld [vmem:[%s6421_s5 + $0x358] sm:$0xff] }
 0x1a7   :  { %4541 = vmatpush3.bf16.msra.mxu0 %v4803_v33 }
 0x1a8   :  { %4590 = vmatprep.subr.bf16.mxu0 %v4804_v36  ;;  %2426 = vperm.xlu1 %4755, %v3836_v8  }
 0x1a9   :  { %2421 = vperm.xlu0 %4754, %v3835_v10  }
 0x1aa   :  { %4543 = vmatmul.mubr.bf16.vlgmr.msra.gmra.mxu0 %v5068_v60 }
 0x1ab   :  { %4591 = vmatpush3.bf16.msra.mxu0 %v4804_v36  ;;  %4546 = vmatprep.mubr.bf16.mxu0 %v5071_v61  ;;  %v5570_v36 = vpop.permute.xlu0 %725 }
 0x1ac   :  { %4592 = vmatprep.subr.bf16.mxu0 %v4805_v41  ;;  %2436 = vperm.xlu1 %4755, %v3838_v12   ;;  %v3916_v12 = vld [vmem:[%s6421_s5 + $0x368] sm:$0xff] }
 0x1ad   :  { %2431 = vperm.xlu0 %4754, %v3837_v13  }
 0x1af   :  { %4593 = vmatpush3.bf16.msra.mxu0 %v4805_v41 }
 0x1b0   :  { %4594 = vmatprep.subr.bf16.mxu0 %v4806_v44  ;;  %2775 = vperm.xlu1 %4755, %v3864_v16   ;;  %v3915_v16 = vld [vmem:[%s6421_s5 + $0x360] sm:$0xff] }
 0x1b1   :  { %2770 = vperm.xlu0 %4754, %v3863_v17  }
 0x1b2   :  { %4547 = vmatmul.mubr.bf16.gmra.mxu0 %v5082_v0 }
 0x1b3   :  { %4595 = vmatpush3.bf16.msra.mxu0 %v4806_v44  ;;  %4550 = vmatprep.mubr.bf16.mxu0 %v5085_v1  ;;  %v5594_v44 = vpop.permute.xlu0 %730 }
 0x1b4   :  { %4596 = vmatprep.subr.bf16.mxu0 %v4807_v47  ;;  %2785 = vperm.xlu1 %4755, %v3866_v19  }
 0x1b5   :  { %2780 = vperm.xlu0 %4754, %v3865_v20   ;;  %v3918_v20 = vld [vmem:[%s6421_s5 + $0x378] sm:$0xff] }
 0x1b7   :  { %4597 = vmatpush3.bf16.msra.mxu0 %v4807_v47 }
 0x1b8   :  { %4598 = vmatprep.subr.bf16.mxu0 %v4808_v50  ;;  %2795 = vperm.xlu1 %4755, %v3868_v22   ;;  %v3917_v22 = vld [vmem:[%s6421_s5 + $0x370] sm:$0xff] }
 0x1b9   :  { %2790 = vperm.xlu0 %4754, %v3867_v23  }
 0x1ba   :  { %4551 = vmatmul.mubr.bf16.gmra.mxu0 %v5105_v7 }
 0x1bb   :  { %4599 = vmatpush3.bf16.msra.mxu0 %v4808_v50  ;;  %4554 = vmatprep.mubr.bf16.mxu0 %v5111_v9  ;;  %v3908_v50 = vld [vmem:[%s6421_s5 + $0x328] sm:$0xff] }
 0x1bc   :  { %4600 = vmatprep.subr.bf16.mxu0 %v4809_v54  ;;  %2805 = vperm.xlu1 %4755, %v3870_v25  }
 0x1bd   :  { %2800 = vperm.xlu0 %4754, %v3869_v26  }
 0x1bf   :  { %4601 = vmatpush3.bf16.msra.mxu0 %v4809_v54 }
 0x1c0   :  { %4602 = vmatprep.subr.bf16.mxu0 %v4810_v57  ;;  %2815 = vperm.xlu1 %4755, %v3872_v28  }
 0x1c1   :  { %2810 = vperm.xlu0 %4754, %v3871_v29  }
 0x1c2   :  { %4555 = vmatmul.mubr.bf16.gmra.mxu0 %v5131_v15 }
 0x1c3   :  { %4603 = vmatpush3.bf16.msra.mxu0 %v4810_v57  ;;  %4606 = vmatprep.mubr.bf16.mxu0 %v5049_v53  ;;  %v5623_v57 = vpop.permute.xlu1 %760 }
 0x1c4   :  { %4604 = vmatprep.subr.bf16.mxu0 %v4811_v62  ;;  %2825 = vperm.xlu1 %4755, %v3874_v30  }
 0x1c5   :  { %2820 = vperm.xlu0 %4754, %v3873_v31  }
 0x1c7   :  { %4605 = vmatpush3.bf16.msra.mxu0 %v4811_v62 }
 0x1c8   :  { %4654 = vmatprep.subr.bf16.mxu0 %v4812_v3  ;;  %2835 = vperm.xlu1 %4755, %v3876_v32  }
 0x1ca   :  { %4607 = vmatmul.mubr.bf16.vlgmr.msra.gmra.mxu0 %v5068_v60 }
 0x1cb   :  { %4655 = vmatpush3.bf16.msra.mxu0 %v4812_v3  ;;  %4610 = vmatprep.mubr.bf16.mxu0 %v5071_v61  ;;  %v5637_v3 = vpop.permute.xlu1 %770 }
 0x1cc   :  { %4656 = vmatprep.subr.bf16.mxu0 %v4813_v6  ;;  %2845 = vperm.xlu1 %4755, %v3878_v37  }
 0x1cf   :  { %4657 = vmatpush3.bf16.msra.mxu0 %v4813_v6 }
 0x1d0   :  { %4658 = vmatprep.subr.bf16.mxu0 %v4814_v11 }
 0x1d2   :  { %4611 = vmatmul.mubr.bf16.gmra.mxu0 %v5082_v0 }
 0x1d3   :  { %4659 = vmatpush3.bf16.msra.mxu0 %v4814_v11  ;;  %4614 = vmatprep.mubr.bf16.mxu0 %v5085_v1 }
 0x1d4   :  { %4660 = vmatprep.subr.bf16.mxu0 %v4815_v14 }
 0x1d7   :  { %4661 = vmatpush3.bf16.msra.mxu0 %v4815_v14  ;;  %v5652_v14 = vpop.permute.xlu1 %780 }
 0x1d8   :  { %4662 = vmatprep.subr.bf16.mxu0 %v4816_v18 }
 0x1da   :  { %4615 = vmatmul.mubr.bf16.gmra.mxu0 %v5105_v7 }
 0x1db   :  { %4663 = vmatpush3.bf16.msra.mxu0 %v4816_v18  ;;  %4618 = vmatprep.mubr.bf16.mxu0 %v5111_v9 }
 0x1dc   :  { %4664 = vmatprep.subr.bf16.mxu0 %v4817_v21 }
 0x1df   :  { %4665 = vmatpush3.bf16.msra.mxu0 %v4817_v21 }
 0x1e0   :  { %4666 = vmatprep.subr.bf16.mxu0 %v4818_v24 }
 0x1e2   :  { %4619 = vmatmul.mubr.bf16.gmra.mxu0 %v5131_v15 }
 0x1e3   :  { %4667 = vmatpush3.bf16.msra.mxu0 %v4818_v24  ;;  %4670 = vmatprep.mubr.bf16.mxu0 %v5049_v53  ;;  %v3875_v53 = vld [vmem:[%s6421_s5 + $0x2e0] sm:$0xff]  ;;  %v5671_v24 = vpop.permute.xlu1 %790 }
 0x1e4   :  { %4668 = vmatprep.subr.bf16.mxu0 %v4819_v27  ;;  %2830 = vperm.xlu0 %4754, %v3875_v53  }
 0x1e7   :  { %4669 = vmatpush3.bf16.msra.mxu0 %v4819_v27 }
 0x1ea   :  { %v5559_v33 = vpop.f32.mrf.mxu0  ;;  %4671 = vmatmul.mubr.bf16.vlgmr.msra.gmra.mxu0 %v5068_v60  ;;  %v3877_v60 = vld [vmem:[%s6421_s5 + $0x2f0] sm:$0xff] }
 0x1eb   :  { %4674 = vmatprep.mubr.bf16.mxu0 %v5071_v61  ;;  %2840 = vperm.xlu0 %4754, %v3877_v60   ;;  %v3904_v61 = vld [vmem:[%s6421_s5 + $0x308] sm:$0xff] }
 0x1ec   :  { %v5566_v34 = vpop.f32.mrf.mxu0  ;;  %3184 = vperm.xlu1 %4755, %v3904_v61  }
 0x1ee   :  { %v5575_v39 = vpop.f32.mrf.mxu0 }
 0x1ef   :  { %3179 = vperm.xlu0 %4754, %v3903_v43   ;;  %v603_v60 = vpack.c.bf16 %v5575_v39, %v5559_v33 }
 0x1f0   :  { %v5580_v40 = vpop.f32.mrf.mxu0  ;;  %3194 = vperm.xlu1 %4755, %v3906_v46  }
 0x1f2   :  { %v5585_v41 = vpop.f32.mrf.mxu0  ;;  %4675 = vmatmul.mubr.bf16.gmra.mxu0 %v5082_v0  ;;  %v3905_v0 = vld [vmem:[%s6421_s5 + $0x310] sm:$0xff] }
 0x1f3   :  { %4678 = vmatprep.mubr.bf16.mxu0 %v5085_v1  ;;  %v5610_v1 = vpop.permute.xlu0 %745  ;;  %3189 = vperm.xlu0 %4754, %v3905_v0  }
 0x1f4   :  { %v5596_v45 = vpop.f32.mrf.mxu0  ;;  %3204 = vperm.xlu1 %4755, %v3908_v50  }
 0x1f6   :  { %v5601_v47 = vpop.f32.mrf.mxu0 }
 0x1f7   :  { %3199 = vperm.xlu0 %4754, %v3907_v52   ;;  %v5628_v58 = vpop.permute.xlu0 %755  ;;  %v605_v29 = vpack.c.bf16 %v5601_v47, %v5585_v41  ;;  %v602_v41 = vpack.c.bf16 %v5580_v40, %v5566_v34  ;;  %v382_v47 = vld [vmem:[#allocation6 + $0x8] sm:$0xff]  ;;  %v383_v34 = vld [vmem:[#allocation6 + $0x10] sm:$0xff] }
 0x1f8   :  { %v5606_v48 = vpop.f32.mrf.mxu0  ;;  %3214 = vperm.xlu1 %4755, %v3910_v55   ;;  %v387_v50 = vunpack.c.l.s8.bf16 %v382_v47  ;;  %v388_v55 = vunpack.c.h.s8.bf16 %v382_v47 }
 0x1f9   :  { %v604_v32 = vpack.c.bf16 %v5606_v48, %v5596_v45  ;;  %v386_v45 = vunpack.c.h.s8.bf16 %v5393_v38 }
 0x1fa   :  { %v4296_v51 = vpop.f32.mrf.mxu0  ;;  %4679 = vmatmul.mubr.bf16.gmra.mxu0 %v5105_v7  ;;  %v3909_v7 = vld [vmem:[%s6421_s5 + $0x330] sm:$0xff] }
 0x1fb   :  { %4682 = vmatprep.mubr.bf16.mxu0 %v5111_v9  ;;  %3209 = vperm.xlu0 %4754, %v3909_v7   ;;  %v3912_v9 = vld [vmem:[%s6421_s5 + $0x348] sm:$0xff]  ;;  %v5639_v4 = vpop.permute.xlu0 %765 }
 0x1fc   :  { %v571_v54 = vpop.f32.mrf.mxu0  ;;  %3224 = vperm.xlu1 %4755, %v3912_v9  }
 0x1fe   :  { %v4297_v56 = vpop.f32.mrf.mxu0 }
 0x1ff   :  { %3219 = vperm.xlu0 %4754, %v3911_v63   ;;  %v5657_v17 = vpop.permute.xlu0 %775  ;;  %v607_v19 = vpack.c.bf16 %v4297_v56, %v4296_v51  ;;  %v389_v56 = vunpack.c.l.s8.bf16 %v383_v34 }
 0x200   :  { %v574_v59 = vpop.f32.mrf.mxu0  ;;  %3234 = vperm.xlu1 %4755, %v3914_v5   ;;  %v390_v5 = vunpack.c.h.s8.bf16 %v383_v34 }
 0x201   :  { %v606_v25 = vpack.c.bf16 %v574_v59, %v571_v54 }
 0x202   :  { %v4300_v62 = vpop.f32.mrf.mxu0  ;;  %4683 = vmatmul.mubr.bf16.gmra.mxu0 %v5131_v15  ;;  %v3913_v15 = vld [vmem:[%s6421_s5 + $0x350] sm:$0xff] }
 0x203   :  { %3229 = vperm.xlu0 %4754, %v3913_v15   ;;  %v5673_v26 = vpop.permute.xlu0 %785 }
 0x204   :  { %v587_v2 = vpop.f32.mrf.mxu0  ;;  %3244 = vperm.xlu1 %4755, %v3916_v12   ;;  %v836_v12 = vld [vmem:[#allocation6 + $0x20] sm:$0xff] }
 0x206   :  { %v4301_v6 = vpop.f32.mrf.mxu0 }
 0x207   :  { %v609_v8 = vpack.c.bf16 %v4301_v6, %v4300_v62  ;;  %3239 = vperm.xlu0 %4754, %v3915_v16   ;;  %v384_v62 = vld [vmem:[#allocation6 + $0x18] sm:$0xff] }
 0x208   :  { %v590_v10 = vpop.f32.mrf.mxu0  ;;  %3254 = vperm.xlu1 %4755, %v3918_v20   ;;  %v391_v15 = vunpack.c.l.s8.bf16 %v384_v62  ;;  %v392_v20 = vunpack.c.h.s8.bf16 %v384_v62  ;;  %v1245_v62 = vld [vmem:[#allocation6 + $0x40] sm:$0xff] }
 0x209   :  { %v608_v11 = vpack.c.bf16 %v590_v10, %v587_v2  ;;  %4302 = vmatprep.subr.bf16.mxu1 %v609_v8 }
 0x20a   :  { %4303 = vmatpush3.bf16.msra.mxu1 %v609_v8  ;;  %v5650_v13 = vpop.f32.mrf.mxu0 }
 0x20b   :  { %4304 = vmatprep.subr.bf16.mxu1 %v608_v11  ;;  %3249 = vperm.xlu0 %4754, %v3917_v22  }
 0x20c   :  { %v5659_v18 = vpop.f32.mrf.mxu0 }
 0x20e   :  { %4305 = vmatpush3.bf16.msra.mxu1 %v608_v11  ;;  %v5664_v21 = vpop.f32.mrf.mxu0 }
 0x20f   :  { %4306 = vmatprep.subr.bf16.mxu1 %v607_v19 }
 0x210   :  { %v5669_v23 = vpop.f32.mrf.mxu0 }
 0x212   :  { %4307 = vmatpush3.bf16.msra.mxu1 %v607_v19  ;;  %v4356_v27 = vpop.f32.mrf.mxu0  ;;  %v1011_v19 = vpack.c.bf16 %v5664_v21, %v5650_v13 }
 0x213   :  { %4308 = vmatprep.subr.bf16.mxu1 %v606_v25 }
 0x214   :  { %v963_v28 = vpop.f32.mrf.mxu0 }
 0x216   :  { %4309 = vmatpush3.bf16.msra.mxu1 %v606_v25  ;;  %v4357_v30 = vpop.f32.mrf.mxu0  ;;  %v840_v25 = vunpack.c.l.s8.bf16 %v836_v12 }
 0x217   :  { %4310 = vmatprep.subr.bf16.mxu1 %v605_v29  ;;  %v1013_v2 = vpack.c.bf16 %v4357_v30, %v4356_v27  ;;  %v837_v30 = vld [vmem:[#allocation6 + $0x28] sm:$0xff] }
 0x218   :  { %v966_v31 = vpop.f32.mrf.mxu0  ;;  %v842_v13 = vunpack.c.l.s8.bf16 %v837_v30 }
 0x219   :  { %v1012_v10 = vpack.c.bf16 %v966_v31, %v963_v28 }
 0x21a   :  { %4311 = vmatpush3.bf16.msra.mxu1 %v605_v29  ;;  %v4360_v53 = vpop.f32.mrf.mxu0  ;;  %v1010_v29 = vpack.c.bf16 %v5669_v23, %v5659_v18  ;;  %v838_v18 = vld [vmem:[#allocation6 + $0x30] sm:$0xff] }
 0x21b   :  { %4312 = vmatprep.subr.bf16.mxu1 %v604_v32  ;;  %v844_v47 = vunpack.c.l.s8.bf16 %v838_v18 }
 0x21c   :  { %v979_v37 = vpop.f32.mrf.mxu0 }
 0x21e   :  { %4313 = vmatpush3.bf16.msra.mxu1 %v604_v32  ;;  %v4361_v61 = vpop.f32.mrf.mxu0  ;;  %v841_v32 = vunpack.c.h.s8.bf16 %v836_v12 }
 0x21f   :  { %4314 = vmatprep.subr.bf16.mxu1 %v603_v60  ;;  %v1015_v54 = vpack.c.bf16 %v4361_v61, %v4360_v53 }
 0x220   :  { %v982_v43 = vpop.f32.mrf.mxu0 }
 0x221   :  { %v1014_v59 = vpack.c.bf16 %v982_v43, %v979_v37 }
 0x222   :  { %4315 = vmatpush3.bf16.msra.mxu1 %v603_v60  ;;  %v4364_v46 = vpop.f32.mrf.mxu0 }
 0x223   :  { %4316 = vmatprep.subr.bf16.mxu1 %v602_v41 }
 0x224   :  { %v995_v0 = vpop.f32.mrf.mxu0 }
 0x226   :  { %4317 = vmatpush3.bf16.msra.mxu1 %v602_v41  ;;  %v4365_v48 = vpop.f32.mrf.mxu0  ;;  %v843_v41 = vunpack.c.h.s8.bf16 %v837_v30 }
 0x227   :  { %v1017_v51 = vpack.c.bf16 %v4365_v48, %v4364_v46 }
 0x228   :  { %v998_v52 = vpop.f32.mrf.mxu0 }
 0x229   :  { %v1016_v33 = vpack.c.bf16 %v998_v52, %v995_v0  ;;  %4319 = vmatmul.mubr.bf16.vlgmr.msra.gmra.mxu1 %v386_v45  ;;  %4366 = vmatprep.subr.bf16.mxu1 %v1017_v51 }
 0x22a   :  { %4367 = vmatpush3.bf16.msra.mxu1 %v1017_v51  ;;  %v5684_v39 = vpop.f32.mrf.mxu0  ;;  %4322 = vmatprep.mubr.bf16.mxu1 %v387_v50  ;;  %v839_v50 = vld [vmem:[#allocation6 + $0x38] sm:$0xff] }
 0x22b   :  { %4368 = vmatprep.subr.bf16.mxu1 %v1016_v33 }
 0x22c   :  { %v5686_v40 = vpop.f32.mrf.mxu0 }
 0x22e   :  { %4369 = vmatpush3.bf16.msra.mxu1 %v1016_v33  ;;  %v5688_v38 = vpop.f32.mrf.mxu0  ;;  %v845_v33 = vunpack.c.h.s8.bf16 %v838_v18 }
 0x22f   :  { %4370 = vmatprep.subr.bf16.mxu1 %v1015_v54 }
 0x230   :  { %v5690_v7 = vpop.f32.mrf.mxu0 }
 0x231   :  { %4323 = vmatmul.mubr.bf16.gmra.mxu1 %v388_v55 }
 0x232   :  { %4371 = vmatpush3.bf16.msra.mxu1 %v1015_v54  ;;  %v5692_v9 = vpop.f32.mrf.mxu0  ;;  %4326 = vmatprep.mubr.bf16.mxu1 %v389_v56  ;;  %v846_v54 = vunpack.c.l.s8.bf16 %v839_v50 }
 0x233   :  { %4372 = vmatprep.subr.bf16.mxu1 %v1014_v59 }
 0x234   :  { %v5694_v63 = vpop.f32.mrf.mxu0 }
 0x236   :  { %4373 = vmatpush3.bf16.msra.mxu1 %v1014_v59  ;;  %v4421_v6 = vpop.f32.mrf.mxu0 }
 0x237   :  { %4374 = vmatprep.subr.bf16.mxu1 %v1013_v2  ;;  %v1422_v52 = vpack.c.bf16 %v4421_v6, %v5692_v9  ;;  %v1249_v6 = vunpack.c.l.s8.bf16 %v1245_v62 }
 0x238   :  { %v1375_v8 = vpop.f32.mrf.mxu0 }
 0x239   :  { %4327 = vmatmul.mubr.bf16.gmra.mxu1 %v390_v5  ;;  %v1421_v56 = vpack.c.bf16 %v1375_v8, %v5694_v63  ;;  %v1420_v5 = vpack.c.bf16 %v5688_v38, %v5684_v39  ;;  %v1246_v8 = vld [vmem:[#allocation6 + $0x48] sm:$0xff] }
 0x23a   :  { %4375 = vmatpush3.bf16.msra.mxu1 %v1013_v2  ;;  %v4424_v11 = vpop.f32.mrf.mxu0  ;;  %4330 = vmatprep.mubr.bf16.mxu1 %v391_v15  ;;  %v847_v15 = vunpack.c.h.s8.bf16 %v839_v50  ;;  %v1251_v39 = vunpack.c.l.s8.bf16 %v1246_v8  ;;  %v1654_v50 = vld [vmem:[#allocation6 + $0x60] sm:$0xff] }
 0x23b   :  { %4376 = vmatprep.subr.bf16.mxu1 %v1012_v10 }
 0x23c   :  { %v1388_v16 = vpop.f32.mrf.mxu0 }
 0x23e   :  { %4377 = vmatpush3.bf16.msra.mxu1 %v1012_v10  ;;  %v4425_v22 = vpop.f32.mrf.mxu0 }
 0x23f   :  { %4378 = vmatprep.subr.bf16.mxu1 %v1011_v19  ;;  %v1424_v43 = vpack.c.bf16 %v4425_v22, %v4424_v11  ;;  %v1419_v11 = vpack.c.bf16 %v5690_v7, %v5686_v40  ;;  %v1247_v40 = vld [vmem:[#allocation6 + $0x50] sm:$0xff] }
 0x240   :  { %v1391_v27 = vpop.f32.mrf.mxu0  ;;  %v1253_v30 = vunpack.c.l.s8.bf16 %v1247_v40 }
 0x241   :  { %4331 = vmatmul.mubr.bf16.gmra.mxu1 %v392_v20  ;;  %v1423_v45 = vpack.c.bf16 %v1391_v27, %v1388_v16  ;;  %v1250_v16 = vunpack.c.h.s8.bf16 %v1245_v62 }
 0x242   :  { %4379 = vmatpush3.bf16.msra.mxu1 %v1011_v19  ;;  %v4428_v28 = vpop.f32.mrf.mxu0  ;;  %4382 = vmatprep.mubr.bf16.mxu1 %v840_v25 }
 0x243   :  { %4380 = vmatprep.subr.bf16.mxu1 %v1010_v29 }
 0x244   :  { %v1404_v31 = vpop.f32.mrf.mxu0 }
 0x246   :  { %4381 = vmatpush3.bf16.msra.mxu1 %v1010_v29  ;;  %v4429_v53 = vpop.f32.mrf.mxu0  ;;  %v1252_v29 = vunpack.c.h.s8.bf16 %v1246_v8 }
 0x247   :  { %v1426_v21 = vpack.c.bf16 %v4429_v53, %v4428_v28 }
 0x248   :  { %v1407_v37 = vpop.f32.mrf.mxu0 }
 0x249   :  { %v1425_v60 = vpack.c.bf16 %v1407_v37, %v1404_v31  ;;  %4383 = vmatmul.mubr.bf16.vlgmr.msra.gmra.mxu1 %v841_v32  ;;  %4430 = vmatprep.subr.bf16.mxu1 %v1426_v21 }
 0x24a   :  { %4431 = vmatpush3.bf16.msra.mxu1 %v1426_v21  ;;  %v5700_v61 = vpop.f32.mrf.mxu0  ;;  %4386 = vmatprep.mubr.bf16.mxu1 %v842_v13  ;;  %v1248_v13 = vld [vmem:[#allocation6 + $0x58] sm:$0xff] }
 0x24b   :  { %4432 = vmatprep.subr.bf16.mxu1 %v1425_v60 }
 0x24c   :  { %v5702_v23 = vpop.f32.mrf.mxu0 }
 0x24e   :  { %4433 = vmatpush3.bf16.msra.mxu1 %v1425_v60  ;;  %v5704_v46 = vpop.f32.mrf.mxu0  ;;  %v1254_v60 = vunpack.c.h.s8.bf16 %v1247_v40 }
 0x24f   :  { %4434 = vmatprep.subr.bf16.mxu1 %v1424_v43 }
 0x250   :  { %v5706_v0 = vpop.f32.mrf.mxu0 }
 0x251   :  { %4387 = vmatmul.mubr.bf16.gmra.mxu1 %v843_v41 }
 0x252   :  { %4435 = vmatpush3.bf16.msra.mxu1 %v1424_v43  ;;  %v5708_v48 = vpop.f32.mrf.mxu0  ;;  %4390 = vmatprep.mubr.bf16.mxu1 %v844_v47  ;;  %v1255_v43 = vunpack.c.l.s8.bf16 %v1248_v13 }
 0x253   :  { %4436 = vmatprep.subr.bf16.mxu1 %v1423_v45 }
 0x254   :  { %v5710_v51 = vpop.f32.mrf.mxu0 }
 0x256   :  { %4437 = vmatpush3.bf16.msra.mxu1 %v1423_v45  ;;  %v4485_v34 = vpop.f32.mrf.mxu0 }
 0x257   :  { %4438 = vmatprep.subr.bf16.mxu1 %v1422_v52  ;;  %v1831_v37 = vpack.c.bf16 %v4485_v34, %v5708_v48  ;;  %v1658_v34 = vunpack.c.l.s8.bf16 %v1654_v50 }
 0x258   :  { %v1784_v55 = vpop.f32.mrf.mxu0 }
 0x259   :  { %4391 = vmatmul.mubr.bf16.gmra.mxu1 %v845_v33  ;;  %v1830_v47 = vpack.c.bf16 %v1784_v55, %v5710_v51  ;;  %v1829_v33 = vpack.c.bf16 %v5704_v46, %v5700_v61  ;;  %v1655_v55 = vld [vmem:[#allocation6 + $0x68] sm:$0xff] }
 0x25a   :  { %4439 = vmatpush3.bf16.msra.mxu1 %v1422_v52  ;;  %v4488_v59 = vpop.f32.mrf.mxu0  ;;  %4394 = vmatprep.mubr.bf16.mxu1 %v846_v54  ;;  %v1256_v54 = vunpack.c.h.s8.bf16 %v1248_v13  ;;  %v1660_v61 = vunpack.c.l.s8.bf16 %v1655_v55  ;;  %v2063_v13 = vld [vmem:[#allocation6 + $0x80] sm:$0xff] }
 0x25b   :  { %4440 = vmatprep.subr.bf16.mxu1 %v1421_v56 }
 0x25c   :  { %v1797_v2 = vpop.f32.mrf.mxu0 }
 0x25e   :  { %4441 = vmatpush3.bf16.msra.mxu1 %v1421_v56  ;;  %v4489_v9 = vpop.f32.mrf.mxu0 }
 0x25f   :  { %4442 = vmatprep.subr.bf16.mxu1 %v1420_v5  ;;  %v1833_v27 = vpack.c.bf16 %v4489_v9, %v4488_v59  ;;  %v1828_v59 = vpack.c.bf16 %v5706_v0, %v5702_v23  ;;  %v1656_v23 = vld [vmem:[#allocation6 + $0x70] sm:$0xff] }
 0x260   :  { %v1800_v10 = vpop.f32.mrf.mxu0  ;;  %v1662_v8 = vunpack.c.l.s8.bf16 %v1656_v23 }
 0x261   :  { %4395 = vmatmul.mubr.bf16.gmra.mxu1 %v847_v15  ;;  %v1832_v32 = vpack.c.bf16 %v1800_v10, %v1797_v2  ;;  %v1659_v2 = vunpack.c.h.s8.bf16 %v1654_v50  ;;  %v2064_v50 = vld [vmem:[#allocation6 + $0x88] sm:$0xff] }
 0x262   :  { %4443 = vmatpush3.bf16.msra.mxu1 %v1420_v5  ;;  %v4492_v63 = vpop.f32.mrf.mxu0  ;;  %4446 = vmatprep.mubr.bf16.mxu1 %v1249_v6 }
 0x263   :  { %4444 = vmatprep.subr.bf16.mxu1 %v1419_v11 }
 0x264   :  { %v1813_v12 = vpop.f32.mrf.mxu0 }
 0x266   :  { %4445 = vmatpush3.bf16.msra.mxu1 %v1419_v11  ;;  %v4493_v19 = vpop.f32.mrf.mxu0  ;;  %v1661_v11 = vunpack.c.h.s8.bf16 %v1655_v55 }
 0x267   :  { %v1835_v38 = vpack.c.bf16 %v4493_v19, %v4492_v63 }
 0x268   :  { %v1816_v20 = vpop.f32.mrf.mxu0 }
 0x269   :  { %v1834_v22 = vpack.c.bf16 %v1816_v20, %v1813_v12  ;;  %4447 = vmatmul.mubr.bf16.vlgmr.msra.gmra.mxu1 %v1250_v16  ;;  %4494 = vmatprep.subr.bf16.mxu1 %v1835_v38 }
 0x26a   :  { %4495 = vmatpush3.bf16.msra.mxu1 %v1835_v38  ;;  %v5718_v25 = vpop.f32.mrf.mxu0  ;;  %4450 = vmatprep.mubr.bf16.mxu1 %v1251_v39  ;;  %v1657_v39 = vld [vmem:[#allocation6 + $0x78] sm:$0xff] }
 0x26b   :  { %4496 = vmatprep.subr.bf16.mxu1 %v1834_v22 }
 0x26c   :  { %v5720_v7 = vpop.f32.mrf.mxu0 }
 0x26e   :  { %4497 = vmatpush3.bf16.msra.mxu1 %v1834_v22  ;;  %v5722_v28 = vpop.f32.mrf.mxu0  ;;  %v1663_v22 = vunpack.c.h.s8.bf16 %v1656_v23 }
 0x26f   :  { %4498 = vmatprep.subr.bf16.mxu1 %v1833_v27 }
 0x270   :  { %v5724_v31 = vpop.f32.mrf.mxu0 }
 0x271   :  { %4451 = vmatmul.mubr.bf16.gmra.mxu1 %v1252_v29 }
 0x272   :  { %4499 = vmatpush3.bf16.msra.mxu1 %v1833_v27  ;;  %v5726_v53 = vpop.f32.mrf.mxu0  ;;  %4454 = vmatprep.mubr.bf16.mxu1 %v1253_v30  ;;  %v1664_v27 = vunpack.c.l.s8.bf16 %v1657_v39 }
 0x273   :  { %4500 = vmatprep.subr.bf16.mxu1 %v1832_v32 }
 0x274   :  { %v5728_v21 = vpop.f32.mrf.mxu0 }
 0x276   :  { %4501 = vmatpush3.bf16.msra.mxu1 %v1832_v32  ;;  %v4549_v18 = vpop.f32.mrf.mxu0 }
 0x277   :  { %4502 = vmatprep.subr.bf16.mxu1 %v1831_v37  ;;  %v2240_v20 = vpack.c.bf16 %v4549_v18, %v5726_v53  ;;  %v2238_v53 = vpack.c.bf16 %v5722_v28, %v5718_v25  ;;  %v2068_v25 = vunpack.c.h.s8.bf16 %v2063_v13 }
 0x278   :  { %v2193_v41 = vpop.f32.mrf.mxu0 }
 0x279   :  { %4455 = vmatmul.mubr.bf16.gmra.mxu1 %v1254_v60  ;;  %v2239_v30 = vpack.c.bf16 %v2193_v41, %v5728_v21  ;;  %v1665_v60 = vunpack.c.h.s8.bf16 %v1657_v39  ;;  %v2237_v21 = vpack.c.bf16 %v5724_v31, %v5720_v7 }
 0x27a   :  { %4503 = vmatpush3.bf16.msra.mxu1 %v1831_v37  ;;  %v4552_v45 = vpop.f32.mrf.mxu0  ;;  %4458 = vmatprep.mubr.bf16.mxu1 %v1255_v43  ;;  %v2067_v43 = vunpack.c.l.s8.bf16 %v2063_v13 }
 0x27b   :  { %4504 = vmatprep.subr.bf16.mxu1 %v1830_v47 }
 0x27c   :  { %v2206_v52 = vpop.f32.mrf.mxu0 }
 0x27e   :  { %4505 = vmatpush3.bf16.msra.mxu1 %v1830_v47  ;;  %v4553_v48 = vpop.f32.mrf.mxu0 }
 0x27f   :  { %4506 = vmatprep.subr.bf16.mxu1 %v1829_v33  ;;  %v2242_v10 = vpack.c.bf16 %v4553_v48, %v4552_v45  ;;  %v5756_v45 = vpop.permute.xlu0 %795 }
 0x280   :  { %v2209_v56 = vpop.f32.mrf.mxu0 }
 0x281   :  { %4459 = vmatmul.mubr.bf16.gmra.mxu1 %v1256_v54  ;;  %v2241_v16 = vpack.c.bf16 %v2209_v56, %v2206_v52  ;;  %v2069_v54 = vunpack.c.l.s8.bf16 %v2064_v50 }
 0x282   :  { %4507 = vmatpush3.bf16.msra.mxu1 %v1829_v33  ;;  %v4556_v51 = vpop.f32.mrf.mxu0  ;;  %4510 = vmatprep.mubr.bf16.mxu1 %v1658_v34  ;;  %v5760_v33 = vpop.permute.xlu1 %800 }
 0x283   :  { %4508 = vmatprep.subr.bf16.mxu1 %v1828_v59  ;;  %v5762_v48 = vpop.permute.xlu0 %1134 }
 0x284   :  { %v2222_v62 = vpop.f32.mrf.mxu0 }
 0x286   :  { %4509 = vmatpush3.bf16.msra.mxu1 %v1828_v59  ;;  %v4557_v5 = vpop.f32.mrf.mxu0  ;;  %v5766_v31 = vpop.permute.xlu1 %1139 }
 0x287   :  { %v2244_v46 = vpack.c.bf16 %v4557_v5, %v4556_v51  ;;  %v2065_v51 = vld [vmem:[#allocation6 + $0x90] sm:$0xff]  ;;  %v2070_v5 = vunpack.c.h.s8.bf16 %v2064_v50 }
 0x288   :  { %v2225_v15 = vpop.f32.mrf.mxu0 }
 0x289   :  { %v2243_v9 = vpack.c.bf16 %v2225_v15, %v2222_v62  ;;  %4511 = vmatmul.mubr.bf16.vlgmr.msra.gmra.mxu1 %v1659_v2  ;;  %4558 = vmatprep.subr.bf16.mxu1 %v2244_v46  ;;  %v5770_v62 = vpop.permute.xlu0 %1144 }
 0x28a   :  { %4559 = vmatpush3.bf16.msra.mxu1 %v2244_v46  ;;  %v5736_v6 = vpop.f32.mrf.mxu0  ;;  %4514 = vmatprep.mubr.bf16.mxu1 %v1660_v61  ;;  %v2071_v46 = vunpack.c.l.s8.bf16 %v2065_v51 }
 0x28b   :  { %4560 = vmatprep.subr.bf16.mxu1 %v2243_v9 }
 0x28c   :  { %v5738_v0 = vpop.f32.mrf.mxu0 }
 0x28e   :  { %4561 = vmatpush3.bf16.msra.mxu1 %v2243_v9  ;;  %v5740_v63 = vpop.f32.mrf.mxu0  ;;  %v5776_v9 = vpop.permute.xlu1 %1149 }
 0x28f   :  { %4562 = vmatprep.subr.bf16.mxu1 %v2242_v10 }
 0x290   :  { %v5742_v12 = vpop.f32.mrf.mxu0 }
 0x291   :  { %4515 = vmatmul.mubr.bf16.gmra.mxu1 %v1661_v11  ;;  %v5780_v11 = vpop.permute.xlu0 %1154 }
 0x292   :  { %4563 = vmatpush3.bf16.msra.mxu1 %v2242_v10  ;;  %v5744_v19 = vpop.f32.mrf.mxu0  ;;  %4518 = vmatprep.mubr.bf16.mxu1 %v1662_v8  ;;  %v2066_v8 = vld [vmem:[#allocation6 + $0x98] sm:$0xff] }
 0x293   :  { %4564 = vmatprep.subr.bf16.mxu1 %v2241_v16 }
 0x294   :  { %v5746_v38 = vpop.f32.mrf.mxu0 }
 0x295   :  { %v5790_v13 = vpop.permute.xlu0 %1164 }
 0x296   :  { %4565 = vmatpush3.bf16.msra.mxu1 %v2241_v16  ;;  %v5749_v40 = vpop.f32.mrf.mxu0 }
 0x297   :  { %4566 = vmatprep.subr.bf16.mxu1 %v2240_v20  ;;  %v2649_v39 = vpack.c.bf16 %v5749_v40, %v5744_v19  ;;  %v2472_v19 = vld [vmem:[#allocation6 + $0xa0] sm:$0xff] }
 0x298   :  { %v5751_v29 = vpop.f32.mrf.mxu0 }
 0x299   :  { %4519 = vmatmul.mubr.bf16.gmra.mxu1 %v1663_v22 }
 0x29a   :  { %4567 = vmatpush3.bf16.msra.mxu1 %v2240_v20  ;;  %v4616_v32 = vpop.f32.mrf.mxu0  ;;  %4522 = vmatprep.mubr.bf16.mxu1 %v1664_v27  ;;  %v2072_v20 = vunpack.c.h.s8.bf16 %v2065_v51  ;;  %v2073_v27 = vunpack.c.l.s8.bf16 %v2066_v8 }
 0x29b   :  { %4568 = vmatprep.subr.bf16.mxu1 %v2239_v30 }
 0x29c   :  { %v2615_v37 = vpop.f32.mrf.mxu0 }
 0x29e   :  { %4569 = vmatpush3.bf16.msra.mxu1 %v2239_v30  ;;  %v4617_v18 = vpop.f32.mrf.mxu0  ;;  %v5786_v30 = vpop.permute.xlu1 %1159 }
 0x29f   :  { %4570 = vmatprep.subr.bf16.mxu1 %v2238_v53  ;;  %v2651_v2 = vpack.c.bf16 %v4617_v18, %v4616_v32  ;;  %v2647_v18 = vpack.c.bf16 %v5740_v63, %v5736_v6 }
 0x2a0   :  { %v2618_v47 = vpop.f32.mrf.mxu0 }
 0x2a1   :  { %4523 = vmatmul.mubr.bf16.gmra.mxu1 %v1665_v60  ;;  %v2650_v23 = vpack.c.bf16 %v2618_v47, %v2615_v37  ;;  %v2648_v37 = vpack.c.bf16 %v5751_v29, %v5746_v38  ;;  %v2646_v29 = vpack.c.bf16 %v5742_v12, %v5738_v0 }
 0x2a2   :  { %4571 = vmatpush3.bf16.msra.mxu1 %v2238_v53  ;;  %v4620_v41 = vpop.f32.mrf.mxu0  ;;  %4574 = vmatprep.mubr.bf16.mxu1 %v2067_v43  ;;  %v5794_v60 = vpop.permute.xlu1 %1169  ;;  %v2074_v43 = vunpack.c.h.s8.bf16 %v2066_v8 }
 0x2a3   :  { %4572 = vmatprep.subr.bf16.mxu1 %v2237_v21 }
 0x2a4   :  { %v2631_v52 = vpop.f32.mrf.mxu0 }
 0x2a6   :  { %4573 = vmatpush3.bf16.msra.mxu1 %v2237_v21  ;;  %v4621_v28 = vpop.f32.mrf.mxu0  ;;  %v2476_v21 = vunpack.c.l.s8.bf16 %v2472_v19 }
 0x2a7   :  { %v2653_v34 = vpack.c.bf16 %v4621_v28, %v4620_v41  ;;  %v5798_v41 = vpop.permute.xlu0 %1174  ;;  %v2477_v28 = vunpack.c.h.s8.bf16 %v2472_v19 }
 0x2a8   :  { %v2634_v56 = vpop.f32.mrf.mxu0 }
 0x2a9   :  { %v2652_v59 = vpack.c.bf16 %v2634_v56, %v2631_v52  ;;  %4575 = vmatmul.mubr.bf16.vlgmr.msra.gmra.mxu1 %v2068_v25  ;;  %4622 = vmatprep.subr.bf16.mxu1 %v2653_v34  ;;  %v5802_v52 = vpop.permute.xlu1 %1179  ;;  %v2473_v25 = vld [vmem:[#allocation6 + $0xa8] sm:$0xff] }
 0x2aa   :  { %4623 = vmatpush3.bf16.msra.mxu1 %v2653_v34  ;;  %v5764_v7 = vpop.f32.mrf.mxu0  ;;  %4578 = vmatprep.mubr.bf16.mxu1 %v2069_v54  ;;  %v2478_v34 = vunpack.c.l.s8.bf16 %v2473_v25 }
 0x2ab   :  { %4624 = vmatprep.subr.bf16.mxu1 %v2652_v59  ;;  %v5804_v63 = vpop.permute.xlu0 %1184 }
 0x2ac   :  { %v5768_v55 = vpop.f32.mrf.mxu0 }
 0x2ad   :  { %v5806_v51 = vpop.permute.xlu1 %1189 }
 0x2ae   :  { %4625 = vmatpush3.bf16.msra.mxu1 %v2652_v59  ;;  %v5772_v61 = vpop.f32.mrf.mxu0 }
 0x2af   :  { %4626 = vmatprep.subr.bf16.mxu1 %v2651_v2  ;;  %v5808_v12 = vpop.permute.xlu0 %1194 }
 0x2b0   :  { %v5774_v15 = vpop.f32.mrf.mxu0 }
 0x2b1   :  { %4579 = vmatmul.mubr.bf16.gmra.mxu1 %v2070_v5  ;;  %v5810_v8 = vpop.permute.xlu1 %1199 }
 0x2b2   :  { %4627 = vmatpush3.bf16.msra.mxu1 %v2651_v2  ;;  %v5778_v10 = vpop.f32.mrf.mxu0  ;;  %4582 = vmatprep.mubr.bf16.mxu1 %v2071_v46  ;;  %v2474_v2 = vld [vmem:[#allocation6 + $0xb0] sm:$0xff]  ;;  %v2479_v46 = vunpack.c.h.s8.bf16 %v2473_v25  ;;  %v2882_v25 = vld [vmem:[#allocation6 + $0xc8] sm:$0xff] }
 0x2b3   :  { %4628 = vmatprep.subr.bf16.mxu1 %v2650_v23 }
 0x2b4   :  { %v5782_v16 = vpop.f32.mrf.mxu0 }
 0x2b6   :  { %4629 = vmatpush3.bf16.msra.mxu1 %v2650_v23  ;;  %v4677_v22 = vpop.f32.mrf.mxu0  ;;  %v2480_v23 = vunpack.c.l.s8.bf16 %v2474_v2 }
 0x2b7   :  { %4630 = vmatprep.subr.bf16.mxu1 %v2649_v39  ;;  %v3058_v19 = vpack.c.bf16 %v4677_v22, %v5778_v10  ;;  %v3056_v10 = vpack.c.bf16 %v5772_v61, %v5764_v7 }
 0x2b8   :  { %v5788_v32 = vpop.f32.mrf.mxu0 }
 0x2b9   :  { %4583 = vmatmul.mubr.bf16.gmra.mxu1 %v2072_v20 }
 0x2ba   :  { %4631 = vmatpush3.bf16.msra.mxu1 %v2649_v39  ;;  %v4680_v53 = vpop.f32.mrf.mxu0  ;;  %4586 = vmatprep.mubr.bf16.mxu1 %v2073_v27  ;;  %v5812_v39 = vpop.permute.xlu0 %1204  ;;  %v2475_v27 = vld [vmem:[#allocation6 + $0xb8] sm:$0xff] }
 0x2bb   :  { %4632 = vmatprep.subr.bf16.mxu1 %v2648_v37  ;;  %v2483_v22 = vunpack.c.h.s8.bf16 %v2475_v27 }
 0x2bc   :  { %v3024_v40 = vpop.f32.mrf.mxu0 }
 0x2be   :  { %4633 = vmatpush3.bf16.msra.mxu1 %v2648_v37  ;;  %v4681_v47 = vpop.f32.mrf.mxu0  ;;  %v5814_v37 = vpop.permute.xlu1 %1209 }
 0x2bf   :  { %4634 = vmatprep.subr.bf16.mxu1 %v2647_v18  ;;  %v3060_v5 = vpack.c.bf16 %v4681_v47, %v4680_v53  ;;  %v2482_v53 = vunpack.c.l.s8.bf16 %v2475_v27  ;;  %v3057_v47 = vpack.c.bf16 %v5788_v32, %v5782_v16  ;;  %v3055_v16 = vpack.c.bf16 %v5774_v15, %v5768_v55  ;;  %v2884_v27 = vld [vmem:[#allocation6 + $0xd8] sm:$0xff] }
 0x2c0   :  { %v3027_v38 = vpop.f32.mrf.mxu0 }
 0x2c1   :  { %4587 = vmatmul.mubr.bf16.gmra.mxu1 %v2074_v43  ;;  %v3059_v20 = vpack.c.bf16 %v3027_v38, %v3024_v40  ;;  %v5817_v43 = vpop.permute.xlu0 %1543 }
 0x2c2   :  { %4635 = vmatpush3.bf16.msra.mxu1 %v2647_v18  ;;  %v4684_v50 = vpop.f32.mrf.mxu0  ;;  %4638 = vmatprep.mubr.bf16.mxu1 %v2476_v21  ;;  %v2481_v18 = vunpack.c.h.s8.bf16 %v2474_v2  ;;  %v5821_v40 = vpop.permute.xlu1 %1548  ;;  %v2881_v21 = vld [vmem:[#allocation6 + $0xc0] sm:$0xff] }
 0x2c3   :  { %4636 = vmatprep.subr.bf16.mxu1 %v2646_v29  ;;  %6426 = vst [vmem:[#allocation9_spill] sm:$0xff] %v5821_v40 }
 0x2c4   :  { %v3040_v6 = vpop.f32.mrf.mxu0 }
 0x2c5   :  { %v5823_v38 = vpop.permute.xlu0 %1553 }
 0x2c6   :  { %4637 = vmatpush3.bf16.msra.mxu1 %v2646_v29  ;;  %v4685_v54 = vpop.f32.mrf.mxu0  ;;  %v2885_v29 = vunpack.c.l.s8.bf16 %v2881_v21 }
 0x2c7   :  { %v3062_v56 = vpack.c.bf16 %v4685_v54, %v4684_v50  ;;  %v5827_v50 = vpop.permute.xlu1 %1558 }
 0x2c8   :  { %v3043_v59 = vpop.f32.mrf.mxu0  ;;  %6427 = vst [vmem:[#allocation10_spill] sm:$0xff] %v5827_v50 }
 0x2c9   :  { %v3061_v0 = vpack.c.bf16 %v3043_v59, %v3040_v6  ;;  %4639 = vmatmul.mubr.bf16.vlgmr.msra.gmra.mxu1 %v2477_v28  ;;  %4686 = vmatprep.subr.bf16.mxu1 %v3062_v56  ;;  %v5831_v32 = vpop.permute.xlu0 %1563  ;;  %v2886_v6 = vunpack.c.h.s8.bf16 %v2881_v21  ;;  %v2887_v28 = vunpack.c.l.s8.bf16 %v2882_v25  ;;  %v2888_v59 = vunpack.c.h.s8.bf16 %v2882_v25 }
 0x2ca   :  { %4687 = vmatpush3.bf16.msra.mxu1 %v3062_v56  ;;  %4642 = vmatprep.mubr.bf16.mxu1 %v2478_v34  ;;  %6428 = vst [vmem:[#allocation11_spill] sm:$0xff] %v5831_v32  ;;  %v2883_v56 = vld [vmem:[#allocation6 + $0xd0] sm:$0xff] }
 0x2cb   :  { %4688 = vmatprep.subr.bf16.mxu1 %v3061_v0  ;;  %v5833_v7 = vpop.permute.xlu1 %1568 }
 0x2cc   :  { %6429 = vst [vmem:[#allocation12_spill] sm:$0xff] %v5833_v7 }
 0x2cd   :  { %v5835_v61 = vpop.permute.xlu0 %1573 }
 0x2ce   :  { %4689 = vmatpush3.bf16.msra.mxu1 %v3061_v0  ;;  %6430 = vst [vmem:[#allocation13_spill] sm:$0xff] %v5835_v61  ;;  %v2889_v0 = vunpack.c.l.s8.bf16 %v2883_v56 }
 0x2cf   :  { %4690 = vmatprep.subr.bf16.mxu1 %v3060_v5  ;;  %v5837_v55 = vpop.permute.xlu1 %1578 }
 0x2d0   :  { %6431 = vst [vmem:[#allocation14_spill] sm:$0xff] %v5837_v55 }
 0x2d1   :  { %4643 = vmatmul.mubr.bf16.gmra.mxu1 %v2479_v46  ;;  %v5839_v2 = vpop.permute.xlu0 %1583 }
 0x2d2   :  { %4691 = vmatpush3.bf16.msra.mxu1 %v3060_v5  ;;  %4646 = vmatprep.mubr.bf16.mxu1 %v2480_v23  ;;  %6432 = vst [vmem:[#allocation15_spill] sm:$0xff] %v5839_v2 }
 0x2d3   :  { %4692 = vmatprep.subr.bf16.mxu1 %v3059_v20  ;;  %v5841_v23 = vpop.permute.xlu1 %1588 }
 0x2d4   :  { %6433 = vst [vmem:[#allocation16_spill] sm:$0xff] %v5841_v23 }
 0x2d6   :  { %4693 = vmatpush3.bf16.msra.mxu1 %v3059_v20 }
 0x2d7   :  { %4694 = vmatprep.subr.bf16.mxu1 %v3058_v19 }
 0x2d9   :  { %4647 = vmatmul.mubr.bf16.gmra.mxu1 %v2481_v18 }
 0x2da   :  { %4695 = vmatpush3.bf16.msra.mxu1 %v3058_v19  ;;  %4650 = vmatprep.mubr.bf16.mxu1 %v2482_v53  ;;  %v5843_v19 = vpop.permute.xlu0 %1593  ;;  %v2890_v53 = vunpack.c.h.s8.bf16 %v2883_v56 }
 0x2db   :  { %4696 = vmatprep.subr.bf16.mxu1 %v3057_v47  ;;  %6434 = vst [vmem:[#allocation17_spill] sm:$0xff] %v5843_v19  ;;  %v365_v19 = vld [vmem:[#allocation2 + $0x30] sm:$0xff] }
 0x2de   :  { %4697 = vmatpush3.bf16.msra.mxu1 %v3057_v47  ;;  %v2891_v47 = vunpack.c.l.s8.bf16 %v2884_v27 }
 0x2df   :  { %4698 = vmatprep.subr.bf16.mxu1 %v3056_v10 }
 0x2e1   :  { %4651 = vmatmul.mubr.bf16.gmra.mxu1 %v2483_v22 }
 0x2e2   :  { %4699 = vmatpush3.bf16.msra.mxu1 %v3056_v10  ;;  %4702 = vmatprep.mubr.bf16.mxu1 %v2885_v29  ;;  %v5845_v10 = vpop.permute.xlu1 %1598  ;;  %v5847_v29 = vpop.permute.xlu0 %1603 }
 0x2e3   :  { %4700 = vmatprep.subr.bf16.mxu1 %v3055_v16  ;;  %6435 = vst [vmem:[#allocation18_spill] sm:$0xff] %v5845_v10  ;;  %6436 = vst [vmem:[#allocation19_spill] sm:$0xff] %v5847_v29 }
 0x2e6   :  { %4701 = vmatpush3.bf16.msra.mxu1 %v3055_v16 }
 0x2e9   :  { %v4320_v54 = vpop.f32.mrf.mxu1  ;;  %4703 = vmatmul.mubr.bf16.vlgmr.msra.gmra.mxu1 %v2886_v6  ;;  %v2892_v6 = vunpack.c.h.s8.bf16 %v2884_v27  ;;  %v367_v27 = vld [vmem:[#allocation2 + $0x58] sm:$0xff] }
 0x2ea   :  { %4706 = vmatprep.mubr.bf16.mxu1 %v2887_v28  ;;  %v5853_v28 = vpop.permute.xlu1 %1608  ;;  %v805_v29 = vmul.f32 %v4320_v54, %v5568_v35 }
 0x2eb   :  { %v644_v34 = vpop.f32.mrf.mxu1  ;;  %6437 = vst [vmem:[#allocation20_spill] sm:$0xff] %v5853_v28 }
 0x2ec   :  { %v803_v28 = vmul.f32 %v5570_v36, %v644_v34  ;;  %v821_v7 = vadd.f32 %v805_v29, %v367_v27  ;;  %v366_v36 = vld [vmem:[#allocation2] sm:$0xff] }
 0x2ed   :  { %v4321_v15 = vpop.f32.mrf.mxu1 }
 0x2ee   :  { %v819_v40 = vadd.f32 %v803_v28, %v365_v19 }
 0x2ef   :  { %v647_v5 = vpop.f32.mrf.mxu1 }
 0x2f0   :  { %v804_v35 = vmul.f32 %v5594_v44, %v647_v5 }
 0x2f1   :  { %v4324_v46 = vpop.f32.mrf.mxu1  ;;  %4707 = vmatmul.mubr.bf16.gmra.mxu1 %v2888_v59 }
 0x2f2   :  { %4710 = vmatprep.mubr.bf16.mxu1 %v2889_v0  ;;  %v5857_v0 = vpop.permute.xlu0 %1613  ;;  %v820_v19 = vadd.f32 %v804_v35, %v366_v36  ;;  %v370_v35 = vld [vmem:[#allocation2 + $0x68] sm:$0xff] }
 0x2f3   :  { %v660_v20 = vpop.f32.mrf.mxu1  ;;  %6438 = vst [vmem:[#allocation21_spill] sm:$0xff] %v5857_v0 }
 0x2f4   :  { %v807_v44 = vmul.f32 %v5610_v1, %v660_v20 }
 0x2f5   :  { %v4325_v18 = vpop.f32.mrf.mxu1 }
 0x2f6   :  { %v5868_v10 = vpop.permute.xlu0 %1952 }
 0x2f7   :  { %v663_v21 = vpop.f32.mrf.mxu1  ;;  %6440 = vst [vmem:[#allocation23_spill] sm:$0xff] %v5868_v10 }
 0x2f8   :  { %v808_v20 = vmul.f32 %v5608_v49, %v663_v21 }
 0x2f9   :  { %v4328_v22 = vpop.f32.mrf.mxu1  ;;  %4711 = vmatmul.mubr.bf16.gmra.mxu1 %v2890_v53  ;;  %v5863_v53 = vpop.permute.xlu1 %1618 }
 0x2fa   :  { %4714 = vmatprep.mubr.bf16.mxu1 %v2891_v47  ;;  %6439 = vst [vmem:[#allocation22_spill] sm:$0xff] %v5863_v53  ;;  %v368_v53 = vld [vmem:[#allocation2 + $0x18] sm:$0xff]  ;;  %v5881_v50 = vpop.permute.xlu0 %1962 }
 0x2fb   :  { %v5849_v16 = vpop.f32.mrf.mxu1 }
 0x2fc   :  { %v811_v49 = vmul.f32 %v5639_v4, %v5849_v16 }
 0x2fd   :  { %v5851_v25 = vpop.f32.mrf.mxu1  ;;  %v5875_v32 = vpop.permute.xlu1 %1957 }
 0x2ff   :  { %v5855_v59 = vpop.f32.mrf.mxu1 }
 0x300   :  { %v812_v4 = vmul.f32 %v5637_v3, %v5855_v59 }
 0x301   :  { %v5859_v56 = vpop.f32.mrf.mxu1  ;;  %4715 = vmatmul.mubr.bf16.gmra.mxu1 %v2892_v6  ;;  %v806_v6 = vmul.f32 %v4321_v15, %v5588_v42  ;;  %v809_v42 = vmul.f32 %v4324_v46, %v5628_v58  ;;  %v810_v58 = vmul.f32 %v4325_v18, %v5623_v57  ;;  %v5897_v46 = vpop.permute.xlu0 %1972  ;;  %v813_v57 = vmul.f32 %v4328_v22, %v5657_v17 }
 0x303   :  { %v5861_v23 = vpop.f32.mrf.mxu1  ;;  %v822_v29 = vadd.f32 %v806_v6, %v368_v53 }
 0x305   :  { %v5865_v47 = vpop.f32.mrf.mxu1 }
 0x307   :  { %v5870_v2 = vpop.f32.mrf.mxu1 }
 0x309   :  { %v4384_v0 = vpop.f32.mrf.mxu1 }
 0x30a   :  { %v1214_v55 = vmul.f32 %v4384_v0, %v5770_v62  ;;  %v371_v0 = vld [vmem:[#allocation2 + $0x8] sm:$0xff] }
 0x30b   :  { %v1052_v61 = vpop.f32.mrf.mxu1  ;;  %v825_v28 = vadd.f32 %v809_v42, %v371_v0  ;;  %v375_v42 = vld [vmem:[#allocation2 + $0x10] sm:$0xff]  ;;  %v824_v0 = vadd.f32 %v808_v20, %v370_v35  ;;  %v379_v20 = vld [vmem:[#allocation2 + $0x78] sm:$0xff] }
 0x30c   :  { %v5878_v54 = vadd.f32 %v1214_v55, %v821_v7  ;;  %v1212_v10 = vmul.f32 %v5762_v48, %v1052_v61  ;;  %v5891_v61 = vpop.permute.xlu1 %1967  ;;  %v369_v55 = vld [vmem:[#allocation2 + $0x50] sm:$0xff]  ;;  %v829_v22 = vadd.f32 %v813_v57, %v375_v42  ;;  %v380_v42 = vld [vmem:[#allocation2 + $0x28] sm:$0xff] }
 0x30d   :  { %v4385_v34 = vpop.f32.mrf.mxu1  ;;  %v823_v1 = vadd.f32 %v807_v44, %v369_v55  ;;  %v376_v55 = vld [vmem:[#allocation2 + $0x38] sm:$0xff] }
 0x30e   :  { %v5884_v15 = vadd.f32 %v1212_v10, %v819_v40  ;;  %v1215_v62 = vmul.f32 %v4385_v34, %v5776_v9  ;;  %v372_v10 = vld [vmem:[#allocation2 + $0x48] sm:$0xff] }
 0x30f   :  { %v1055_v27 = vpop.f32.mrf.mxu1  ;;  %v826_v34 = vadd.f32 %v810_v58, %v372_v10 }
 0x310   :  { %v5888_v7 = vadd.f32 %v1215_v62, %v822_v29  ;;  %v1213_v48 = vmul.f32 %v5766_v31, %v1055_v27  ;;  %v5907_v29 = vpop.permute.xlu1 %1977  ;;  %v5914_v27 = vpop.permute.xlu0 %1982 }
 0x311   :  { %v4388_v5 = vpop.f32.mrf.mxu1 }
 0x312   :  { %v5894_v40 = vadd.f32 %v1213_v48, %v820_v19  ;;  %v1218_v9 = vmul.f32 %v4388_v5, %v5790_v13  ;;  %v373_v19 = vld [vmem:[#allocation2 + $0x40] sm:$0xff] }
 0x313   :  { %v1068_v53 = vpop.f32.mrf.mxu1 }
 0x314   :  { %v5900_v6 = vadd.f32 %v1218_v9, %v825_v28  ;;  %v1216_v31 = vmul.f32 %v5780_v11, %v1068_v53  ;;  %v827_v28 = vadd.f32 %v811_v49, %v373_v19  ;;  %v5926_v58 = vpop.permute.xlu1 %1987  ;;  %v374_v9 = vld [vmem:[#allocation2 + $0x20] sm:$0xff] }
 0x315   :  { %v4389_v36 = vpop.f32.mrf.mxu1  ;;  %v828_v59 = vadd.f32 %v812_v4, %v374_v9 }
 0x316   :  { %v5904_v18 = vadd.f32 %v1216_v31, %v823_v1  ;;  %v1219_v13 = vmul.f32 %v4389_v36, %v5794_v60  ;;  %v814_v60 = vmul.f32 %v5851_v25, %v5652_v14  ;;  %v817_v14 = vmul.f32 %v5859_v56, %v5756_v45  ;;  %v5933_v1 = vpop.permute.xlu0 %1992  ;;  %v377_v36 = vld [vmem:[#allocation2 + $0x60] sm:$0xff] }
 0x317   :  { %v1071_v62 = vpop.f32.mrf.mxu1  ;;  %v818_v45 = vmul.f32 %v5865_v47, %v5760_v33 }
 0x318   :  { %v5911_v21 = vadd.f32 %v1219_v13, %v826_v34  ;;  %v1217_v11 = vmul.f32 %v5786_v30, %v1071_v62  ;;  %v830_v53 = vadd.f32 %v814_v60, %v376_v55  ;;  %v833_v57 = vadd.f32 %v817_v14, %v379_v20  ;;  %v5945_v13 = vpop.permute.xlu1 %1997  ;;  %v6442_v20 = vld [vmem:[#allocation9_spill] sm:$0xff] }
 0x319   :  { %v4392_v17 = vpop.f32.mrf.mxu1  ;;  %v834_v33 = vadd.f32 %v818_v45, %v380_v42 }
 0x31a   :  { %v5918_v44 = vadd.f32 %v1217_v11, %v824_v0  ;;  %v1222_v48 = vmul.f32 %v4392_v17, %v5804_v63  ;;  %v5950_v49 = vpop.permute.xlu0 %2002  ;;  %v378_v11 = vld [vmem:[#allocation2 + $0x70] sm:$0xff] }
 0x31b   :  { %v1084_v5 = vpop.f32.mrf.mxu1 }
 0x31c   :  { %v5923_v16 = vadd.f32 %v1222_v48, %v829_v22  ;;  %v1220_v30 = vmul.f32 %v5798_v41, %v1084_v5  ;;  %v815_v41 = vmul.f32 %v5673_v26, %v5861_v23  ;;  %v816_v26 = vmul.f32 %v5671_v24, %v5870_v2  ;;  %v5954_v55 = vpop.permute.xlu1 %2007 }
 0x31d   :  { %v4393_v10 = vpop.f32.mrf.mxu1 }
 0x31e   :  { %v5930_v25 = vadd.f32 %v1220_v30, %v827_v28  ;;  %v1223_v63 = vmul.f32 %v4393_v10, %v5806_v51  ;;  %v831_v0 = vadd.f32 %v815_v41, %v377_v36  ;;  %v832_v22 = vadd.f32 %v816_v26, %v378_v11  ;;  %v6441_v10 = vld [vmem:[#allocation10_spill] sm:$0xff] }
 0x31f   :  { %v1087_v3 = vpop.f32.mrf.mxu1 }
 0x320   :  { %v5937_v31 = vadd.f32 %v1223_v63, %v830_v53  ;;  %v1221_v35 = vmul.f32 %v5802_v52, %v1087_v3  ;;  %v5963_v14 = vpop.permute.xlu1 %2017 }
 0x321   :  { %v4396_v34 = vpop.f32.mrf.mxu1 }
 0x322   :  { %v5942_v56 = vadd.f32 %v1221_v35, %v828_v59  ;;  %v1226_v51 = vmul.f32 %v4396_v34, %v5812_v39 }
 0x323   :  { %v1100_v62 = vpop.f32.mrf.mxu1 }
 0x324   :  { %v1242_v23 = vadd.f32 %v1226_v51, %v833_v57  ;;  %v1224_v52 = vmul.f32 %v5808_v12, %v1100_v62  ;;  %v5957_v12 = vpop.permute.xlu0 %2012  ;;  %v5973_v57 = vpop.permute.xlu1 %2027 }
 0x325   :  { %v4397_v19 = vpop.f32.mrf.mxu1 }
 0x326   :  { %v1240_v47 = vadd.f32 %v1224_v52, %v831_v0  ;;  %v1227_v17 = vmul.f32 %v4397_v19, %v5814_v37 }
 0x327   :  { %v1103_v39 = vpop.f32.mrf.mxu1 }
 0x328   :  { %v1243_v60 = vadd.f32 %v1227_v17, %v834_v33  ;;  %v1225_v48 = vmul.f32 %v5810_v8, %v1103_v39  ;;  %v5983_v17 = vpop.permute.xlu1 %2366 }
 0x329   :  { %v4448_v5 = vpop.f32.mrf.mxu1 }
 0x32a   :  { %v1241_v24 = vadd.f32 %v1225_v48, %v832_v22  ;;  %v1623_v2 = vmul.f32 %v4448_v5, %v5823_v38  ;;  %v5967_v38 = vpop.permute.xlu0 %2022 }
 0x32b   :  { %v1461_v28 = vpop.f32.mrf.mxu1 }
 0x32c   :  { %v1639_v4 = vadd.f32 %v1623_v2, %v5878_v54  ;;  %v1621_v30 = vmul.f32 %v5817_v43, %v1461_v28  ;;  %v6443_v54 = vld [vmem:[#allocation13_spill] sm:$0xff] }
 0x32d   :  { %v4449_v9 = vpop.f32.mrf.mxu1 }
 0x32e   :  { %v1637_v37 = vadd.f32 %v1621_v30, %v5884_v15  ;;  %v1624_v53 = vmul.f32 %v4449_v9, %v6441_v10  ;;  %v6444_v15 = vld [vmem:[#allocation11_spill] sm:$0xff]  ;;  %v5977_v62 = vpop.permute.xlu0 %2361 }
 0x32f   :  { %v1464_v8 = vpop.f32.mrf.mxu1 }
 0x330   :  { %v1640_v63 = vadd.f32 %v1624_v53, %v5888_v7  ;;  %v1622_v3 = vmul.f32 %v6442_v20, %v1464_v8  ;;  %v6445_v7 = vld [vmem:[#allocation14_spill] sm:$0xff]  ;;  %v5993_v8 = vpop.permute.xlu1 %2376 }
 0x331   :  { %v4452_v59 = vpop.f32.mrf.mxu1 }
 0x332   :  { %v1638_v41 = vadd.f32 %v1622_v3, %v5894_v40  ;;  %v1627_v35 = vmul.f32 %v4452_v59, %v6443_v54  ;;  %v6446_v40 = vld [vmem:[#allocation12_spill] sm:$0xff]  ;;  %v5987_v5 = vpop.permute.xlu0 %2371 }
 0x333   :  { %v1477_v43 = vpop.f32.mrf.mxu1 }
 0x334   :  { %v1643_v36 = vadd.f32 %v1627_v35, %v5900_v6  ;;  %v1625_v34 = vmul.f32 %v6444_v15, %v1477_v43  ;;  %v6447_v6 = vld [vmem:[#allocation17_spill] sm:$0xff]  ;;  %v6452_v15 = vld [vmem:[#allocation19_spill] sm:$0xff] }
 0x335   :  { %v4453_v45 = vpop.f32.mrf.mxu1 }
 0x336   :  { %v1641_v51 = vadd.f32 %v1625_v34, %v5904_v18  ;;  %v1628_v42 = vmul.f32 %v4453_v45, %v6445_v7  ;;  %v6448_v18 = vld [vmem:[#allocation15_spill] sm:$0xff]  ;;  %v5997_v54 = vpop.permute.xlu0 %2381  ;;  %v6453_v7 = vld [vmem:[#allocation22_spill] sm:$0xff] }
 0x337   :  { %v1480_v0 = vpop.f32.mrf.mxu1 }
 0x338   :  { %v1644_v26 = vadd.f32 %v1628_v42, %v5911_v21  ;;  %v1626_v52 = vmul.f32 %v6446_v40, %v1480_v0  ;;  %v6449_v21 = vld [vmem:[#allocation18_spill] sm:$0xff] }
 0x339   :  { %v4456_v11 = vpop.f32.mrf.mxu1 }
 0x33a   :  { %v1642_v19 = vadd.f32 %v1626_v52, %v5918_v44  ;;  %v1631_v33 = vmul.f32 %v4456_v11, %v6447_v6  ;;  %v6450_v44 = vld [vmem:[#allocation16_spill] sm:$0xff]  ;;  %v6004_v6 = vpop.permute.xlu0 %2391 }
 0x33b   :  { %v1493_v39 = vpop.f32.mrf.mxu1  ;;  %v6454_v52 = vld [vmem:[#allocation20_spill] sm:$0xff] }
 0x33c   :  { %v1647_v22 = vadd.f32 %v1631_v33, %v5923_v16  ;;  %v1629_v48 = vmul.f32 %v6448_v18, %v1493_v39  ;;  %v6451_v16 = vld [vmem:[#allocation21_spill] sm:$0xff] }
 0x33d   :  { %v4457_v2 = vpop.f32.mrf.mxu1 }
 0x33e   :  { %v1645_v28 = vadd.f32 %v1629_v48, %v5930_v25  ;;  %v1632_v30 = vmul.f32 %v4457_v2, %v6449_v21  ;;  %v6455_v48 = vld [vmem:[#allocation23_spill] sm:$0xff] }
 0x33f   :  { %v1496_v9 = vpop.f32.mrf.mxu1 }
 0x340   :  { %v1648_v10 = vadd.f32 %v1632_v30, %v5937_v31  ;;  %v1630_v53 = vmul.f32 %v6450_v44, %v1496_v9  ;;  %v6001_v31 = vpop.permute.xlu1 %2386 }
 0x341   :  { %v4460_v20 = vpop.f32.mrf.mxu1 }
 0x342   :  { %v1646_v3 = vadd.f32 %v1630_v53, %v5942_v56  ;;  %v1635_v59 = vmul.f32 %v4460_v20, %v6451_v16 }
 0x343   :  { %v1509_v35 = vpop.f32.mrf.mxu1 }
 0x344   :  { %v1651_v43 = vadd.f32 %v1635_v59, %v1242_v23  ;;  %v1633_v25 = vmul.f32 %v6452_v15, %v1509_v35 }
 0x345   :  { %v4461_v34 = vpop.f32.mrf.mxu1 }
 0x346   :  { %v1649_v45 = vadd.f32 %v1633_v25, %v1240_v47  ;;  %v1636_v42 = vmul.f32 %v4461_v34, %v6453_v7  ;;  %v6010_v47 = vpop.permute.xlu1 %2396 }
 0x347   :  { %v1512_v0 = vpop.f32.mrf.mxu1 }
 0x348   :  { %v1652_v40 = vadd.f32 %v1636_v42, %v1243_v60  ;;  %v1634_v11 = vmul.f32 %v6454_v52, %v1512_v0  ;;  %v6013_v60 = vpop.permute.xlu0 %2401 }
 0x349   :  { %v4512_v56 = vpop.f32.mrf.mxu1 }
 0x34a   :  { %v1650_v33 = vadd.f32 %v1634_v11, %v1241_v24  ;;  %v2032_v39 = vmul.f32 %v4512_v56, %v5881_v50  ;;  %v6019_v16 = vpop.permute.xlu1 %2406 }
 0x34b   :  { %v1870_v18 = vpop.f32.mrf.mxu1 }
 0x34c   :  { %v6007_v23 = vadd.f32 %v2032_v39, %v1639_v4  ;;  %v2030_v2 = vmul.f32 %v6455_v48, %v1870_v18  ;;  %v6024_v15 = vpop.permute.xlu0 %2411 }
 0x34d   :  { %v4513_v21 = vpop.f32.mrf.mxu1 }
 0x34e   :  { %v2046_v30 = vadd.f32 %v2030_v2, %v1637_v37  ;;  %v2033_v9 = vmul.f32 %v4513_v21, %v5891_v61 }
 0x34f   :  { %v1873_v44 = vpop.f32.mrf.mxu1 }
 0x350   :  { %v6015_v53 = vadd.f32 %v2033_v9, %v1640_v63  ;;  %v2031_v24 = vmul.f32 %v5875_v32, %v1873_v44  ;;  %v2422_v0 = vpop.permute.xlu0 %2421 }
 0x351   :  { %v4516_v20 = vpop.f32.mrf.mxu1 }
 0x352   :  { %v2047_v50 = vadd.f32 %v2031_v24, %v1638_v41  ;;  %v2036_v4 = vmul.f32 %v4516_v20, %v5914_v27  ;;  %v6030_v41 = vpop.permute.xlu1 %2416 }
 0x353   :  { %v1886_v59 = vpop.f32.mrf.mxu1 }
 0x354   :  { %v6021_v35 = vadd.f32 %v2036_v4, %v1643_v36  ;;  %v2034_v37 = vmul.f32 %v5897_v46, %v1886_v59  ;;  %v6040_v48 = vpop.permute.xlu0 %2431 }
 0x355   :  { %v4517_v61 = vpop.f32.mrf.mxu1 }
 0x356   :  { %v2050_v25 = vadd.f32 %v2034_v37, %v1641_v51  ;;  %v2037_v63 = vmul.f32 %v4517_v61, %v5926_v58 }
 0x357   :  { %v1889_v34 = vpop.f32.mrf.mxu1 }
 0x358   :  { %v6027_v7 = vadd.f32 %v2037_v63, %v1644_v26  ;;  %v2035_v32 = vmul.f32 %v5907_v29, %v1889_v34  ;;  %v2427_v26 = vpop.permute.xlu1 %2426  ;;  %v6049_v44 = vpop.permute.xlu0 %2770 }
 0x359   :  { %v4520_v27 = vpop.f32.mrf.mxu1 }
 0x35a   :  { %v2051_v42 = vadd.f32 %v2035_v32, %v1642_v19  ;;  %v2040_v36 = vmul.f32 %v4520_v27, %v5950_v49 }
 0x35b   :  { %v1902_v52 = vpop.f32.mrf.mxu1 }
 0x35c   :  { %v6033_v46 = vadd.f32 %v2040_v36, %v1647_v22  ;;  %v2038_v11 = vmul.f32 %v5933_v1, %v1902_v52  ;;  %v6059_v59 = vpop.permute.xlu0 %2780 }
 0x35d   :  { %v4521_v51 = vpop.f32.mrf.mxu1 }
 0x35e   :  { %v2054_v56 = vadd.f32 %v2038_v11, %v1645_v28  ;;  %v2041_v58 = vmul.f32 %v4521_v51, %v5954_v55  ;;  %v6046_v28 = vpop.permute.xlu1 %2436 }
 0x35f   :  { %v1905_v39 = vpop.f32.mrf.mxu1  ;;  %6457 = vst [vmem:[#allocation9_spill] sm:$0xff] %v6046_v28 }
 0x360   :  { %v6037_v18 = vadd.f32 %v2041_v58, %v1648_v10  ;;  %v2039_v29 = vmul.f32 %v5945_v13, %v1905_v39 }
 0x361   :  { %v4524_v19 = vpop.f32.mrf.mxu1 }
 0x362   :  { %v2055_v49 = vadd.f32 %v2039_v29, %v1646_v3  ;;  %v2044_v2 = vmul.f32 %v4524_v19, %v5967_v38 }
 0x363   :  { %v1918_v22 = vpop.f32.mrf.mxu1 }
 0x364   :  { %v6043_v21 = vadd.f32 %v2044_v2, %v1651_v43  ;;  %v2042_v1 = vmul.f32 %v5957_v12, %v1918_v22  ;;  %v6056_v43 = vpop.permute.xlu1 %2775 }
 0x365   :  { %v4525_v55 = vpop.f32.mrf.mxu1 }
 0x366   :  { %6456 = vst [vmem:[#allocation10_spill] sm:$0xff] %v6043_v21  ;;  %v2058_v9 = vadd.f32 %v2042_v1, %v1649_v45  ;;  %v2045_v10 = vmul.f32 %v4525_v55, %v5973_v57 }
 0x367   :  { %v1921_v13 = vpop.f32.mrf.mxu1 }
 0x368   :  { %v6051_v24 = vadd.f32 %v2045_v10, %v1652_v40  ;;  %v2043_v3 = vmul.f32 %v5963_v14, %v1921_v13  ;;  %v6066_v61 = vpop.permute.xlu1 %2785 }
 0x369   :  { %v6054_v20 = vpop.f32.mrf.mxu1 }
 0x36a   :  { %6458 = vst [vmem:[#allocation13_spill] sm:$0xff] %v6051_v24  ;;  %v2059_v38 = vadd.f32 %v2043_v3, %v1650_v33  ;;  %v6072_v33 = vpop.permute.xlu0 %2790  ;;  %v2441_v24 = vmul.f32 %v6054_v20, %v5987_v5 }
 0x36b   :  { %v2279_v4 = vpop.f32.mrf.mxu1 }
 0x36c   :  { %v2439_v12 = vmul.f32 %v5977_v62, %v2279_v4  ;;  %v2457_v21 = vadd.f32 %v2441_v24, %v6007_v23 }
 0x36d   :  { %v6061_v45 = vpop.f32.mrf.mxu1 }
 0x36e   :  { %v6063_v57 = vadd.f32 %v2439_v12, %v2046_v30  ;;  %v6079_v30 = vpop.permute.xlu1 %2795  ;;  %v6082_v52 = vpop.permute.xlu0 %2800 }
 0x36f   :  { %v2282_v37 = vpop.f32.mrf.mxu1 }
 0x370   :  { %v2440_v40 = vmul.f32 %v5983_v17, %v2282_v37 }
 0x371   :  { %v6068_v14 = vpop.f32.mrf.mxu1 }
 0x372   :  { %v6070_v63 = vadd.f32 %v2440_v40, %v2047_v50  ;;  %v6089_v39 = vpop.permute.xlu1 %2805  ;;  %v6095_v29 = vpop.permute.xlu0 %2810 }
 0x373   :  { %v2295_v34 = vpop.f32.mrf.mxu1 }
 0x374   :  { %v2443_v62 = vmul.f32 %v5997_v54, %v2295_v34 }
 0x375   :  { %v6075_v32 = vpop.f32.mrf.mxu1 }
 0x376   :  { %v6077_v27 = vadd.f32 %v2443_v62, %v2050_v25 }
 0x377   :  { %v2298_v36 = vpop.f32.mrf.mxu1 }
 0x378   :  { %v2444_v17 = vmul.f32 %v6001_v31, %v2298_v36 }
 0x379   :  { %v6084_v11 = vpop.f32.mrf.mxu1 }
 0x37a   :  { %v6086_v50 = vadd.f32 %v2444_v17, %v2051_v42  ;;  %v6102_v42 = vpop.permute.xlu1 %2815 }
 0x37b   :  { %v2311_v51 = vpop.f32.mrf.mxu1  ;;  %6460 = vst [vmem:[#allocation14_spill] sm:$0xff] %v6102_v42 }
 0x37c   :  { %v2447_v58 = vmul.f32 %v6013_v60, %v2311_v51  ;;  %v6104_v60 = vpop.permute.xlu0 %2820 }
 0x37d   :  { %v6091_v54 = vpop.f32.mrf.mxu1 }
 0x37e   :  { %v6093_v25 = vadd.f32 %v2447_v58, %v2054_v56  ;;  %v6110_v4 = vpop.permute.xlu1 %2825 }
 0x37f   :  { %v2314_v19 = vpop.f32.mrf.mxu1 }
 0x380   :  { %v2448_v31 = vmul.f32 %v6019_v16, %v2314_v19  ;;  %v6114_v37 = vpop.permute.xlu0 %2830 }
 0x381   :  { %v6098_v2 = vpop.f32.mrf.mxu1  ;;  %6464 = vst [vmem:[#allocation18_spill] sm:$0xff] %v6114_v37 }
 0x382   :  { %v6100_v22 = vadd.f32 %v2448_v31, %v2055_v49  ;;  %v6116_v34 = vpop.permute.xlu1 %2835 }
 0x383   :  { %v2327_v1 = vpop.f32.mrf.mxu1  ;;  %6465 = vst [vmem:[#allocation16_spill] sm:$0xff] %v6116_v34 }
 0x384   :  { %6459 = vst [vmem:[#allocation11_spill] sm:$0xff] %v6100_v22  ;;  %v2451_v55 = vmul.f32 %v2422_v0, %v2327_v1  ;;  %v6118_v62 = vpop.permute.xlu0 %2840 }
 0x385   :  { %v6106_v10 = vpop.f32.mrf.mxu1  ;;  %6466 = vst [vmem:[#allocation21_spill] sm:$0xff] %v6118_v62 }
 0x386   :  { %6461 = vst [vmem:[#allocation12_spill] sm:$0xff] %v6106_v10  ;;  %v6108_v13 = vadd.f32 %v2451_v55, %v2058_v9  ;;  %v6120_v9 = vpop.permute.xlu1 %2845  ;;  %v2442_v10 = vmul.f32 %v6061_v45, %v5993_v8 }
 0x387   :  { %v2330_v56 = vpop.f32.mrf.mxu1  ;;  %6467 = vst [vmem:[#allocation19_spill] sm:$0xff] %v6120_v9 }
 0x388   :  { %6462 = vst [vmem:[#allocation17_spill] sm:$0xff] %v6108_v13  ;;  %v2452_v3 = vmul.f32 %v2427_v26, %v2330_v56  ;;  %v3180_v26 = vpop.permute.xlu0 %3179  ;;  %v2458_v20 = vadd.f32 %v2442_v10, %v6015_v53 }
 0x389   :  { %v4640_v12 = vpop.f32.mrf.mxu1 }
 0x38a   :  { %v6112_v16 = vadd.f32 %v2452_v3, %v2059_v38  ;;  %v3185_v38 = vpop.permute.xlu1 %3184  ;;  %v2850_v37 = vmul.f32 %v4640_v12, %v6059_v59  ;;  %v2445_v59 = vmul.f32 %v6068_v14, %v6004_v6  ;;  %v2446_v6 = vmul.f32 %v6075_v32, %v6010_v47 }
 0x38b   :  { %v2688_v49 = vpop.f32.mrf.mxu1  ;;  %v2449_v47 = vmul.f32 %v6084_v11, %v6024_v15  ;;  %v2450_v15 = vmul.f32 %v6091_v54, %v6030_v41 }
 0x38c   :  { %6463 = vst [vmem:[#allocation15_spill] sm:$0xff] %v6112_v16  ;;  %v3190_v1 = vpop.permute.xlu0 %3189  ;;  %v2461_v53 = vadd.f32 %v2445_v59, %v6021_v35  ;;  %v2462_v35 = vadd.f32 %v2446_v6, %v6027_v7  ;;  %v6479_v6 = vld [vmem:[#allocation11_spill] sm:$0xff] }
 0x38d   :  { %v4641_v40 = vpop.f32.mrf.mxu1  ;;  %v2466_v41 = vadd.f32 %v2450_v15, %v6037_v18 }
 0x38e   :  { %v3195_v3 = vpop.permute.xlu1 %3194 }
 0x38f   :  { %v2691_v0 = vpop.f32.mrf.mxu1 }
 0x390   :  { %v3200_v34 = vpop.permute.xlu0 %3199  ;;  %v2849_v45 = vmul.f32 %v6056_v43, %v2691_v0 }
 0x391   :  { %v4644_v36 = vpop.f32.mrf.mxu1 }
 0x392   :  { %v3205_v22 = vpop.permute.xlu1 %3204 }
 0x393   :  { %v2704_v17 = vpop.f32.mrf.mxu1 }
 0x394   :  { %v3210_v62 = vpop.permute.xlu0 %3209  ;;  %v2852_v43 = vmul.f32 %v6072_v33, %v2704_v17 }
 0x395   :  { %v4645_v51 = vpop.f32.mrf.mxu1 }
 0x396   :  { %v3215_v24 = vpop.permute.xlu1 %3214 }
 0x397   :  { %v2707_v58 = vpop.f32.mrf.mxu1 }
 0x398   :  { %v2853_v33 = vmul.f32 %v6079_v30, %v2707_v58 }
 0x399   :  { %v6122_v19 = vpop.f32.mrf.mxu1 }
 0x39a   :  { %v2869_v30 = vadd.f32 %v2853_v33, %v6086_v50  ;;  %v2453_v50 = vmul.f32 %v6098_v2, %v6040_v48  ;;  %v6477_v2 = vld [vmem:[#allocation9_spill] sm:$0xff] }
 0x39b   :  { %v6124_v31 = vpop.f32.mrf.mxu1 }
 0x39c   :  { %v2856_v11 = vmul.f32 %v6095_v29, %v6124_v31 }
 0x39d   :  { %v6126_v55 = vpop.f32.mrf.mxu1 }
 0x39e   :  { %v2872_v29 = vadd.f32 %v2856_v11, %v6093_v25 }
 0x39f   :  { %v6128_v56 = vpop.f32.mrf.mxu1 }
 0x3a0   :  { %6468 = vst [vmem:[#allocation22_spill] sm:$0xff] %v6128_v56  ;;  %v2851_v56 = vmul.f32 %v4641_v40, %v6066_v61 }
 0x3a1   :  { %v6130_v16 = vpop.f32.mrf.mxu1 }
 0x3a2   :  { %6469 = vst [vmem:[#allocation20_spill] sm:$0xff] %v6130_v16  ;;  %v2848_v16 = vmul.f32 %v6049_v44, %v2688_v49  ;;  %v2867_v49 = vadd.f32 %v2851_v56, %v2458_v20  ;;  %v2465_v56 = vadd.f32 %v2449_v47, %v6033_v46 }
 0x3a3   :  { %v6132_v13 = vpop.f32.mrf.mxu1 }
 0x3a4   :  { %6470 = vst [vmem:[#allocation23_spill] sm:$0xff] %v6132_v13  ;;  %v2866_v13 = vadd.f32 %v2850_v37, %v2457_v21  ;;  %v2864_v8 = vadd.f32 %v2848_v16, %v6063_v57  ;;  %v2854_v21 = vmul.f32 %v4644_v36, %v6082_v52  ;;  %v3220_v37 = vpop.permute.xlu0 %3219  ;;  %v2865_v57 = vadd.f32 %v2849_v45, %v6070_v63  ;;  %v3225_v36 = vpop.permute.xlu1 %3224 }
 0x3a5   :  { %v6136_v9 = vpop.f32.mrf.mxu1  ;;  %v2868_v63 = vadd.f32 %v2852_v43, %v6077_v27  ;;  %v6481_v43 = vld [vmem:[#allocation18_spill] sm:$0xff] }
 0x3a6   :  { %v2870_v40 = vadd.f32 %v2854_v21, %v2461_v53 }
 0x3a7   :  { %v6141_v28 = vpop.f32.mrf.mxu1  ;;  %v6472_v31 = vld [vmem:[#allocation22_spill] sm:$0xff] }
 0x3a8   :  { %6471 = vst [vmem:[#allocation24_spill] sm:$0xff] %v6141_v28 }
 0x3a9   :  { %v4704_v42 = vpop.f32.mrf.mxu1 }
 0x3aa   :  { %v3259_v5 = vmul.f32 %v4704_v42, %v3190_v1 }
 0x3ab   :  { %v3097_v12 = vpop.f32.mrf.mxu1 }
 0x3ac   :  { %v3275_v28 = vadd.f32 %v3259_v5, %v2866_v13  ;;  %v3257_v23 = vmul.f32 %v3180_v26, %v3097_v12 }
 0x3ad   :  { %v4705_v44 = vpop.f32.mrf.mxu1 }
 0x3ae   :  { %3291 = vst [vmem:[#allocation2 + $0x58] sm:$0xff] %v3275_v28  ;;  %v3273_v61 = vadd.f32 %v3257_v23, %v2864_v8  ;;  %v3260_v42 = vmul.f32 %v4705_v44, %v3195_v3  ;;  %v2855_v28 = vmul.f32 %v4645_v51, %v6089_v39  ;;  %v3235_v3 = vpop.permute.xlu1 %3234 }
 0x3af   :  { %v3100_v14 = vpop.f32.mrf.mxu1 }
 0x3b0   :  { %3289 = vst [vmem:[#allocation2 + $0x30] sm:$0xff] %v3273_v61  ;;  %v3276_v10 = vadd.f32 %v3260_v42, %v2867_v49  ;;  %v3258_v13 = vmul.f32 %v3185_v38, %v3100_v14  ;;  %v3230_v38 = vpop.permute.xlu0 %3229  ;;  %v2871_v39 = vadd.f32 %v2855_v28, %v2462_v35  ;;  %v6476_v61 = vld [vmem:[#allocation10_spill] sm:$0xff]  ;;  %v6478_v42 = vld [vmem:[#allocation12_spill] sm:$0xff] }
 0x3b1   :  { %v4708_v16 = vpop.f32.mrf.mxu1  ;;  %v2469_v48 = vadd.f32 %v2453_v50, %v6476_v61  ;;  %v2454_v25 = vmul.f32 %v6478_v42, %v6477_v2 }
 0x3b2   :  { %3292 = vst [vmem:[#allocation2 + $0x18] sm:$0xff] %v3276_v10  ;;  %v3274_v52 = vadd.f32 %v3258_v13, %v2865_v57  ;;  %v3263_v0 = vmul.f32 %v4708_v16, %v3210_v62  ;;  %v2858_v62 = vmul.f32 %v6122_v19, %v6104_v60  ;;  %v2859_v19 = vmul.f32 %v6126_v55, %v6110_v4  ;;  %v6474_v55 = vld [vmem:[#allocation21_spill] sm:$0xff]  ;;  %v3245_v21 = vpop.permute.xlu1 %3244  ;;  %v6480_v57 = vld [vmem:[#allocation23_spill] sm:$0xff] }
 0x3b3   :  { %v3113_v32 = vpop.f32.mrf.mxu1 }
 0x3b4   :  { %3290 = vst [vmem:[#allocation2] sm:$0xff] %v3274_v52  ;;  %v3279_v17 = vadd.f32 %v3263_v0, %v2870_v40  ;;  %v3261_v26 = vmul.f32 %v3200_v34, %v3113_v32  ;;  %v2874_v60 = vadd.f32 %v2858_v62, %v2465_v56  ;;  %v3240_v59 = vpop.permute.xlu0 %3239  ;;  %v2875_v4 = vadd.f32 %v2859_v19, %v2466_v41  ;;  %v6482_v52 = vld [vmem:[#allocation19_spill] sm:$0xff]  ;;  %v6483_v32 = vld [vmem:[#allocation13_spill] sm:$0xff] }
 0x3b5   :  { %v4709_v1 = vpop.f32.mrf.mxu1  ;;  %v2863_v0 = vmul.f32 %v6136_v9, %v6482_v52 }
 0x3b6   :  { %3295 = vst [vmem:[#allocation2 + $0x8] sm:$0xff] %v3279_v17  ;;  %v3277_v51 = vadd.f32 %v3261_v26, %v2868_v63  ;;  %v3264_v7 = vmul.f32 %v4709_v1, %v3215_v24  ;;  %v6475_v24 = vld [vmem:[#allocation20_spill] sm:$0xff]  ;;  %v2470_v63 = vadd.f32 %v2454_v25, %v6483_v32  ;;  %v6484_v17 = vld [vmem:[#allocation17_spill] sm:$0xff] }
 0x3b7   :  { %v3116_v27 = vpop.f32.mrf.mxu1  ;;  %v2862_v44 = vmul.f32 %v6475_v24, %v6474_v55  ;;  %v6486_v1 = vld [vmem:[#allocation16_spill] sm:$0xff] }
 0x3b8   :  { %3293 = vst [vmem:[#allocation2 + $0x50] sm:$0xff] %v3277_v51  ;;  %v3280_v34 = vadd.f32 %v3264_v7, %v2871_v39  ;;  %v3262_v58 = vmul.f32 %v3205_v22, %v3116_v27  ;;  %v6473_v22 = vld [vmem:[#allocation14_spill] sm:$0xff]  ;;  %v3250_v16 = vpop.permute.xlu0 %3249  ;;  %v3255_v51 = vpop.permute.xlu1 %3254  ;;  %v2879_v56 = vadd.f32 %v2863_v0, %v2470_v63 }
 0x3b9   :  { %v4712_v5 = vpop.f32.mrf.mxu1  ;;  %v2857_v12 = vmul.f32 %v6473_v22, %v6472_v31  ;;  %v2878_v28 = vadd.f32 %v2862_v44, %v2469_v48 }
 0x3ba   :  { %3296 = vst [vmem:[#allocation2 + $0x48] sm:$0xff] %v3280_v34  ;;  %v3278_v46 = vadd.f32 %v3262_v58, %v2869_v30  ;;  %v3267_v20 = vmul.f32 %v4712_v5, %v3230_v38  ;;  %v6485_v38 = vld [vmem:[#allocation24_spill] sm:$0xff]  ;;  %v6487_v30 = vld [vmem:[#allocation15_spill] sm:$0xff] }
 0x3bb   :  { %v3129_v54 = vpop.f32.mrf.mxu1  ;;  %v2873_v14 = vadd.f32 %v2857_v12, %v6479_v6  ;;  %v2861_v39 = vmul.f32 %v6486_v1, %v6485_v38 }
 0x3bc   :  { %3294 = vst [vmem:[#allocation2 + $0x68] sm:$0xff] %v3278_v46  ;;  %v3283_v8 = vadd.f32 %v3267_v20, %v2874_v60  ;;  %v3265_v45 = vmul.f32 %v3220_v37, %v3129_v54  ;;  %v2860_v37 = vmul.f32 %v6481_v43, %v6480_v57 }
 0x3bd   :  { %v4713_v23 = vpop.f32.mrf.mxu1  ;;  %v2877_v11 = vadd.f32 %v2861_v39, %v6487_v30 }
 0x3be   :  { %3299 = vst [vmem:[#allocation2 + $0x10] sm:$0xff] %v3283_v8  ;;  %v3281_v49 = vadd.f32 %v3265_v45, %v2872_v29  ;;  %v3268_v18 = vmul.f32 %v4713_v23, %v3235_v3  ;;  %v2876_v26 = vadd.f32 %v2860_v37, %v6484_v17 }
 0x3bf   :  { %v3132_v53 = vpop.f32.mrf.mxu1 }
 0x3c0   :  { %3297 = vst [vmem:[#allocation2 + $0x40] sm:$0xff] %v3281_v49  ;;  %v3284_v10 = vadd.f32 %v3268_v18, %v2875_v4  ;;  %v3266_v13 = vmul.f32 %v3225_v36, %v3132_v53 }
 0x3c1   :  { %v4716_v40 = vpop.f32.mrf.mxu1 }
 0x3c2   :  { %3300 = vst [vmem:[#allocation2 + $0x38] sm:$0xff] %v3284_v10  ;;  %v3282_v35 = vadd.f32 %v3266_v13, %v2873_v14  ;;  %v3271_v47 = vmul.f32 %v4716_v40, %v3250_v16 }
 0x3c3   :  { %v3145_v33 = vpop.f32.mrf.mxu1 }
 0x3c4   :  { %3298 = vst [vmem:[#allocation2 + $0x20] sm:$0xff] %v3282_v35  ;;  %v3287_v62 = vadd.f32 %v3271_v47, %v2878_v28  ;;  %v3269_v36 = vmul.f32 %v3240_v59, %v3145_v33 }
 0x3c5   :  { %v4717_v7 = vpop.f32.mrf.mxu1 }
 0x3c6   :  { %3303 = vst [vmem:[#allocation2 + $0x78] sm:$0xff] %v3287_v62  ;;  %v3285_v15 = vadd.f32 %v3269_v36, %v2876_v26  ;;  %v3272_v9 = vmul.f32 %v4717_v7, %v3255_v51 }
 0x3c7   :  { %v3148_v27 = vpop.f32.mrf.mxu1 }
 0x3c8   :  { %3301 = vst [vmem:[#allocation2 + $0x60] sm:$0xff] %v3285_v15  ;;  %v3288_v34 = vadd.f32 %v3272_v9, %v2879_v56  ;;  %v3270_v58 = vmul.f32 %v3245_v21, %v3148_v27 }
 0x3ca   :  { %3304 = vst [vmem:[#allocation2 + $0x28] sm:$0xff] %v3288_v34  ;;  %v3286_v3 = vadd.f32 %v3270_v58, %v2877_v11 }
 0x3cc   :  { %3302 = vst [vmem:[#allocation2 + $0x70] sm:$0xff] %v3286_v3 }
 0x3cd PF:  { %v3310_v5 = vld [vmem:[#allocation2 + $0x58] sm:$0xff]  ;;  %v3308_v60 = vld [vmem:[#allocation2 + $0x30] sm:$0xff]  ;;  %v3309_v41 = vld [vmem:[#allocation2] sm:$0xff] }
 0x3ce   :  { %v3311_v19 = vld [vmem:[#allocation2 + $0x18] sm:$0xff]  ;;  %v6194_v46 = vmax.f32 %v3310_v5, 0.0  ;;  %v6196_v20 = vmax.f32 %v3308_v60, 0.0  ;;  %v6200_v50 = vmax.f32 %v3309_v41, 0.0  ;;  %v3314_v55 = vld [vmem:[#allocation2 + $0x8] sm:$0xff]  ;;  %v3317_v21 = vld [vmem:[#allocation2 + $0x20] sm:$0xff] }
 0x3cf   :  { %v6198_v59 = vmax.f32 %v3311_v19, 0.0  ;;  %v3312_v29 = vld [vmem:[#allocation2 + $0x50] sm:$0xff]  ;;  %v6220_v18 = vmax.f32 %v3314_v55, 0.0  ;;  %v3316_v61 = vld [vmem:[#allocation2 + $0x40] sm:$0xff]  ;;  %v6226_v42 = vmax.f32 %v3317_v21, 0.0  ;;  %v3319_v53 = vld [vmem:[#allocation2 + $0x38] sm:$0xff] }
 0x3d0   :  { %v3342_v31 = vmul.f32 %v6194_v46, %v6194_v46  ;;  %v3340_v22 = vmul.f32 %v6196_v20, %v6196_v20  ;;  %v3341_v8 = vmul.f32 %v6200_v50, %v6200_v50  ;;  %v6212_v23 = vmax.f32 %v3312_v29, 0.0  ;;  %v3318_v6 = vld [vmem:[#allocation2 + $0x10] sm:$0xff]  ;;  %v3320_v13 = vld [vmem:[#allocation2 + $0x60] sm:$0xff]  ;;  %v3322_v35 = vld [vmem:[#allocation2 + $0x78] sm:$0xff] }
 0x3d1   :  { %v3343_v12 = vmul.f32 %v6198_v59, %v6198_v59  ;;  %v3315_v4 = vld [vmem:[#allocation2 + $0x48] sm:$0xff]  ;;  %v3346_v2 = vmul.f32 %v6220_v18, %v6220_v18  ;;  %v6228_v25 = vmax.f32 %v3316_v61, 0.0  ;;  %v3349_v14 = vmul.f32 %v6226_v42, %v6226_v42 }
 0x3d2   :  { %3360 = vadd.xlane.f32.xlu1 %v3342_v31  ;;  %3356 = vadd.xlane.f32.xlu0 %v3340_v22  ;;  %v3344_v44 = vmul.f32 %v6212_v23, %v6212_v23  ;;  %v6218_v49 = vmax.f32 %v3315_v4, 0.0  ;;  %v6234_v43 = vmax.f32 %v3319_v53, 0.0  ;;  %v6236_v37 = vmax.f32 %v3318_v6, 0.0  ;;  %v3323_v0 = vld [vmem:[#allocation2 + $0x28] sm:$0xff] }
 0x3d3   :  { %v3313_v54 = vld [vmem:[#allocation2 + $0x68] sm:$0xff]  ;;  %v3348_v57 = vmul.f32 %v6228_v25, %v6228_v25  ;;  %v3321_v10 = vld [vmem:[#allocation2 + $0x70] sm:$0xff]  ;;  %v6244_v52 = vmax.f32 %v3320_v13, 0.0  ;;  %v6250_v63 = vmax.f32 %v3323_v0, 0.0  ;;  %v6252_v33 = vmax.f32 %v3322_v35, 0.0 }
 0x3d4   :  { %v6210_v45 = vmax.f32 %v3313_v54, 0.0  ;;  %v3347_v48 = vmul.f32 %v6218_v49, %v6218_v49  ;;  %v3351_v16 = vmul.f32 %v6234_v43, %v6234_v43  ;;  %v3350_v40 = vmul.f32 %v6236_v37, %v6236_v37 }
 0x3d5   :  { %v6242_v28 = vmax.f32 %v3321_v10, 0.0  ;;  %v3352_v32 = vmul.f32 %v6244_v52, %v6244_v52  ;;  %v3355_v17 = vmul.f32 %v6250_v63, %v6250_v63  ;;  %v3354_v26 = vmul.f32 %v6252_v33, %v6252_v33 }
 0x3d6   :  { %3362 = vadd.xlane.f32.xlu1 %v3343_v12  ;;  %3358 = vadd.xlane.f32.xlu0 %v3341_v8  ;;  %v3345_v24 = vmul.f32 %v6210_v45, %v6210_v45 }
 0x3d7   :  { %v3353_v47 = vmul.f32 %v6242_v28, %v6242_v28 }
 0x3da   :  { %3366 = vadd.xlane.f32.xlu1 %v3345_v24  ;;  %3364 = vadd.xlane.f32.xlu0 %v3344_v44 }
 0x3de   :  { %3370 = vadd.xlane.f32.xlu1 %v3347_v48  ;;  %3368 = vadd.xlane.f32.xlu0 %v3346_v2 }
 0x3e2   :  { %3374 = vadd.xlane.f32.xlu1 %v3349_v14  ;;  %3372 = vadd.xlane.f32.xlu0 %v3348_v57 }
 0x3e6   :  { %3378 = vadd.xlane.f32.xlu1 %v3351_v16  ;;  %3376 = vadd.xlane.f32.xlu0 %v3350_v40 }
 0x3ea   :  { %3382 = vadd.xlane.f32.xlu1 %v3353_v47  ;;  %3380 = vadd.xlane.f32.xlu0 %v3352_v32 }
 0x3ee   :  { %3386 = vadd.xlane.f32.xlu1 %v3355_v17  ;;  %3384 = vadd.xlane.f32.xlu0 %v3354_v26 }
 0x45b   :  { %v3361_v38 = vpop.xlane.xlu1 %3360  ;;  %v3357_v1 = vpop.xlane.xlu0 %3356 }
 0x45c   :  { %4820 = vrsqrt.f32 %v3361_v38  ;;  %vm3404_vm0 = vcmp.eq.f32.partialorder %v3361_v38, inf  ;;  %vm3406_vm1 = vcmp.eq.f32.partialorder %v3361_v38, 0.0  ;;  %v3407_v30 = vand.u32 2147483648, %v3361_v38 }
 0x45d   :  { %4822 = vrsqrt.f32 %v3357_v1  ;;  %vm3390_vm2 = vcmp.eq.f32.partialorder %v3357_v1, inf  ;;  %vm3392_vm3 = vcmp.eq.f32.partialorder %v3357_v1, 0.0  ;;  %v3393_v34 = vand.u32 2147483648, %v3357_v1 }
 0x45f   :  { %v3363_v39 = vpop.xlane.xlu1 %3362  ;;  %v3359_v62 = vpop.xlane.xlu0 %3358 }
 0x460   :  { %4824 = vrsqrt.f32 %v3363_v39  ;;  %vm3411_vm4 = vcmp.eq.f32.partialorder %v3363_v39, inf  ;;  %vm3413_vm5 = vcmp.eq.f32.partialorder %v3363_v39, 0.0  ;;  %v3414_v60 = vand.u32 2147483648, %v3363_v39 }
 0x461   :  { %4826 = vrsqrt.f32 %v3359_v62  ;;  %vm3397_vm6 = vcmp.eq.f32.partialorder %v3359_v62, inf  ;;  %vm3399_vm7 = vcmp.eq.f32.partialorder %v3359_v62, 0.0  ;;  %v3400_v8 = vand.u32 2147483648, %v3359_v62 }
 0x463   :  { %v6258_v36 = vpop.xlane.xlu1 %3366  ;;  %v6260_v51 = vpop.xlane.xlu0 %3364 }
 0x464   :  { %4828 = vrsqrt.f32 %v6258_v36  ;;  %vm3425_vm8 = vcmp.eq.f32.partialorder %v6258_v36, inf  ;;  %vm3427_vm9 = vcmp.eq.f32.partialorder %v6258_v36, 0.0  ;;  %v3428_v61 = vand.u32 2147483648, %v6258_v36 }
 0x465   :  { %4830 = vrsqrt.f32 %v6260_v51  ;;  %vm3418_vm10 = vcmp.eq.f32.partialorder %v6260_v51, inf  ;;  %vm3420_vm11 = vcmp.eq.f32.partialorder %v6260_v51, 0.0  ;;  %v3421_v40 = vand.u32 2147483648, %v6260_v51 }
 0x467   :  { %v6264_v7 = vpop.xlane.xlu1 %3370  ;;  %v6266_v56 = vpop.xlane.xlu0 %3368 }
 0x468   :  { %4832 = vrsqrt.f32 %v6264_v7  ;;  %vm3439_vm12 = vcmp.eq.f32.partialorder %v6264_v7, inf  ;;  %vm3441_vm13 = vcmp.eq.f32.partialorder %v6264_v7, 0.0  ;;  %v3442_v26 = vand.u32 2147483648, %v6264_v7 }
 0x469   :  { %v4821_v15 = vpop.eup %4820  ;;  %4834 = vrsqrt.f32 %v6266_v56  ;;  %vm3432_vm14 = vcmp.eq.f32.partialorder %v6266_v56, inf  ;;  %vm3434_vm15 = vcmp.eq.f32.partialorder %v6266_v56, 0.0 }
 0x46a   :  { %v4823_v9 = vpop.eup %4822  ;;  %v3403_v27 = vmul.f32 %v4821_v15, %v3361_v38 }
 0x46b   :  { %v3389_v11 = vmul.f32 %v4823_v9, %v3357_v1  ;;  %v6270_v58 = vpop.xlane.xlu1 %3374  ;;  %v6272_v3 = vpop.xlane.xlu0 %3372 }
 0x46c   :  { %v3405_v5 = vsel %vm3404_vm0, %v3361_v38, %v3403_v27  ;;  %4836 = vrsqrt.f32 %v6270_v58  ;;  %vm3453_vm0 = vcmp.eq.f32.partialorder %v6270_v58, inf }
 0x46d   :  { %v4825_v19 = vpop.eup %4824  ;;  %v3408_v41 = vsel %vm3406_vm1, %v3407_v30, %v3405_v5  ;;  %v3391_v54 = vsel %vm3390_vm2, %v3357_v1, %v3389_v11  ;;  %4838 = vrsqrt.f32 %v6272_v3  ;;  %v3435_v30 = vand.u32 2147483648, %v6266_v56 }
 0x46e   :  { %v4827_v29 = vpop.eup %4826  ;;  %v3502_v31 = vmax.f32 %v3408_v41, 1e-12  ;;  %v3394_v22 = vsel %vm3392_vm3, %v3393_v34, %v3391_v54  ;;  %v3410_v12 = vmul.f32 %v4825_v19, %v3363_v39  ;;  %vm3455_vm1 = vcmp.eq.f32.partialorder %v6270_v58, 0.0 }
 0x46f   :  { %v3500_v4 = vmax.f32 %v3394_v22, 1e-12  ;;  %v3396_v55 = vmul.f32 %v4827_v29, %v3359_v62  ;;  %v6280_v24 = vpop.xlane.xlu1 %3378  ;;  %v6282_v44 = vpop.xlane.xlu0 %3376  ;;  %vm3446_vm2 = vcmp.eq.f32.partialorder %v6272_v3, inf  ;;  %vm3448_vm3 = vcmp.eq.f32.partialorder %v6272_v3, 0.0 }
 0x470   :  { %4840 = vrcp.f32 %v3502_v31  ;;  %v3412_v21 = vsel %vm3411_vm4, %v3363_v39, %v3410_v12  ;;  %v3456_v31 = vand.u32 2147483648, %v6270_v58  ;;  %v3449_v12 = vand.u32 2147483648, %v6272_v3 }
 0x471   :  { %v4829_v48 = vpop.eup %4828  ;;  %4842 = vrcp.f32 %v3500_v4  ;;  %v3415_v2 = vsel %vm3413_vm5, %v3414_v60, %v3412_v21  ;;  %v3398_v53 = vsel %vm3397_vm6, %v3359_v62, %v3396_v55  ;;  %vm3467_vm4 = vcmp.eq.f32.partialorder %v6280_v24, inf }
 0x472   :  { %v4831_v6 = vpop.eup %4830  ;;  %v3503_v14 = vmax.f32 %v3415_v2, 1e-12  ;;  %v3401_v57 = vsel %vm3399_vm7, %v3400_v8, %v3398_v53  ;;  %v3424_v10 = vmul.f32 %v4829_v48, %v6258_v36  ;;  %4844 = vrsqrt.f32 %v6280_v24 }
 0x473   :  { %v3501_v13 = vmax.f32 %v3401_v57, 1e-12  ;;  %v3417_v16 = vmul.f32 %v4831_v6, %v6260_v51  ;;  %4846 = vrsqrt.f32 %v6282_v44  ;;  %v6296_v0 = vpop.xlane.xlu1 %3382  ;;  %v6309_v38 = vpop.xlane.xlu0 %3380  ;;  %vm3469_vm5 = vcmp.eq.f32.partialorder %v6280_v24, 0.0 }
 0x474   :  { %4848 = vrcp.f32 %v3503_v14  ;;  %v3426_v35 = vsel %vm3425_vm8, %v6258_v36, %v3424_v10  ;;  %vm3460_vm6 = vcmp.eq.f32.partialorder %v6282_v44, inf  ;;  %vm3462_vm7 = vcmp.eq.f32.partialorder %v6282_v44, 0.0 }
 0x475   :  { %v4833_v47 = vpop.eup %4832  ;;  %4850 = vrcp.f32 %v3501_v13  ;;  %v3429_v32 = vsel %vm3427_vm9, %v3428_v61, %v3426_v35  ;;  %v3419_v17 = vsel %vm3418_vm10, %v6260_v51, %v3417_v16  ;;  %v3463_v35 = vand.u32 2147483648, %v6282_v44 }
 0x476   :  { %v4835_v1 = vpop.eup %4834  ;;  %v3505_v39 = vmax.f32 %v3429_v32, 1e-12  ;;  %v3422_v62 = vsel %vm3420_vm11, %v3421_v40, %v3419_v17  ;;  %v3438_v15 = vmul.f32 %v4833_v47, %v6264_v7  ;;  %4852 = vrsqrt.f32 %v6296_v0 }
 0x477   :  { %v3504_v9 = vmax.f32 %v3422_v62, 1e-12  ;;  %v3431_v36 = vmul.f32 %v4835_v1, %v6266_v56  ;;  %v6323_v51 = vpop.xlane.xlu1 %3386  ;;  %vm3481_vm8 = vcmp.eq.f32.partialorder %v6296_v0, inf  ;;  %vm3483_vm9 = vcmp.eq.f32.partialorder %v6296_v0, 0.0 }
 0x478   :  { %4854 = vrcp.f32 %v3505_v39  ;;  %v3440_v27 = vsel %vm3439_vm12, %v6264_v7, %v3438_v15  ;;  %v6334_v7 = vpop.xlane.xlu0 %3384  ;;  %vm3474_vm10 = vcmp.eq.f32.partialorder %v6309_v38, inf  ;;  %vm3476_vm11 = vcmp.eq.f32.partialorder %v6309_v38, 0.0 }
 0x479   :  { %v4837_v11 = vpop.eup %4836  ;;  %4856 = vrcp.f32 %v3504_v9  ;;  %v3443_v34 = vsel %vm3441_vm13, %v3442_v26, %v3440_v27  ;;  %v3433_v5 = vsel %vm3432_vm14, %v6266_v56, %v3431_v36  ;;  %vm3495_vm12 = vcmp.eq.f32.partialorder %v6323_v51, inf }
 0x47a   :  { %v4839_v60 = vpop.eup %4838  ;;  %v3507_v19 = vmax.f32 %v3443_v34, 1e-12  ;;  %v3436_v41 = vsel %vm3434_vm15, %v3435_v30, %v3433_v5  ;;  %v3452_v54 = vmul.f32 %v4837_v11, %v6270_v58  ;;  %4858 = vrsqrt.f32 %v6309_v38 }
 0x47b   :  { %v3506_v29 = vmax.f32 %v3436_v41, 1e-12  ;;  %v3445_v22 = vmul.f32 %v4839_v60, %v6272_v3  ;;  %4860 = vrsqrt.f32 %v6323_v51  ;;  %vm3497_vm13 = vcmp.eq.f32.partialorder %v6323_v51, 0.0 }
 0x47c   :  { %4862 = vrcp.f32 %v3507_v19  ;;  %v3454_v56 = vsel %vm3453_vm0, %v6270_v58, %v3452_v54  ;;  %v3470_v58 = vand.u32 2147483648, %v6280_v24  ;;  %vm3488_vm14 = vcmp.eq.f32.partialorder %v6334_v7, inf }
 0x47d   :  { %v4841_v8 = vpop.eup %4840  ;;  %4864 = vrcp.f32 %v3506_v29  ;;  %v3457_v4 = vsel %vm3455_vm1, %v3456_v31, %v3454_v56  ;;  %v3447_v55 = vsel %vm3446_vm2, %v6272_v3, %v3445_v22  ;;  %v3498_v31 = vand.u32 2147483648, %v6323_v51 }
 0x47e   :  { %v4843_v21 = vpop.eup %4842  ;;  %v3509_v61 = vmax.f32 %v3457_v4, 1e-12  ;;  %v3450_v48 = vsel %vm3448_vm3, %v3449_v12, %v3447_v55  ;;  %4866 = vrsqrt.f32 %v6334_v7  ;;  %v3521_v13 = vmul.f32 %v4841_v8, %v6194_v46 }
 0x47f   :  { %v4845_v2 = vpop.eup %4844  ;;  %v3508_v53 = vmax.f32 %v3450_v48, 1e-12  ;;  %v3517_v32 = vmul.f32 %v4843_v21, %v6196_v20  ;;  %v3491_v48 = vand.u32 2147483648, %v6334_v7  ;;  %vm3490_vm15 = vcmp.eq.f32.partialorder %v6334_v7, 0.0 }
 0x480   :  { %v4847_v6 = vpop.eup %4846  ;;  %4868 = vrcp.f32 %v3509_v61  ;;  %v3466_v14 = vmul.f32 %v4845_v2, %v6280_v24 }
 0x481   :  { %v4849_v57 = vpop.eup %4848  ;;  %4870 = vrcp.f32 %v3508_v53  ;;  %v3459_v3 = vmul.f32 %v4847_v6, %v6282_v44 }
 0x482   :  { %v4851_v10 = vpop.eup %4850  ;;  %v3523_v16 = vmul.f32 %v4849_v57, %v6198_v59  ;;  %v3468_v40 = vsel %vm3467_vm4, %v6280_v24, %v3466_v14  ;;  %v3484_v24 = vand.u32 2147483648, %v6296_v0 }
 0x483   :  { %v4853_v47 = vpop.eup %4852  ;;  %v3519_v17 = vmul.f32 %v4851_v10, %v6200_v50  ;;  %v3471_v26 = vsel %vm3469_vm5, %v3470_v58, %v3468_v40  ;;  %v3461_v1 = vsel %vm3460_vm6, %v6282_v44, %v3459_v3 }
 0x484   :  { %v3959_v39 = vpack.c.bf16 %v3523_v16, %v3521_v13  ;;  %v3511_v62 = vmax.f32 %v3471_v26, 1e-12  ;;  %v3464_v15 = vsel %vm3462_vm7, %v3463_v35, %v3461_v1  ;;  %v3480_v9 = vmul.f32 %v4853_v47, %v6296_v0 }
 0x485   :  { %v4855_v46 = vpop.eup %4854  ;;  %v3954_v36 = vpack.c.bf16 %v3519_v17, %v3517_v32  ;;  %v3510_v59 = vmax.f32 %v3464_v15, 1e-12 }
 0x486   :  { %v4857_v27 = vpop.eup %4856  ;;  %3991 = vst [vmem:[%s6425_s9 + $0x8] sm:$0xff] %v3959_v39   ;;  %v3527_v20 = vmul.f32 %v4855_v46, %v6210_v45  ;;  %4872 = vrcp.f32 %v3511_v62  ;;  %v3482_v50 = vsel %vm3481_vm8, %v6296_v0, %v3480_v9  ;;  %v3477_v0 = vand.u32 2147483648, %v6309_v38 }
 0x487   :  { %v4859_v44 = vpop.eup %4858  ;;  %3955 = vst [vmem:[%s6425_s9] sm:$0xff] %v3954_v36   ;;  %v3525_v30 = vmul.f32 %v4857_v27, %v6212_v23  ;;  %4874 = vrcp.f32 %v3510_v59  ;;  %v3485_v11 = vsel %vm3483_vm9, %v3484_v24, %v3482_v50 }
 0x488   :  { %v4861_v34 = vpop.eup %4860  ;;  %v3513_v5 = vmax.f32 %v3485_v11, 1e-12  ;;  %v3473_v60 = vmul.f32 %v4859_v44, %v6309_v38 }
 0x489   :  { %v4863_v45 = vpop.eup %4862  ;;  %v3964_v19 = vpack.c.bf16 %v3527_v20, %v3525_v30  ;;  %v3494_v41 = vmul.f32 %v4861_v34, %v6323_v51 }
 0x48a   :  { %v4865_v54 = vpop.eup %4864  ;;  %v3531_v23 = vmul.f32 %v4863_v45, %v6218_v49  ;;  %4876 = vrcp.f32 %v3513_v5  ;;  %v3475_v29 = vsel %vm3474_vm10, %v6309_v38, %v3473_v60 }
 0x48b   :  { %v4867_v22 = vpop.eup %4866  ;;  %3992 = vst [vmem:[%s6425_s9 + $0x10] sm:$0xff] %v3964_v19   ;;  %v3529_v56 = vmul.f32 %v4865_v54, %v6220_v18  ;;  %v3478_v12 = vsel %vm3476_vm11, %v3477_v0, %v3475_v29  ;;  %v3496_v8 = vsel %vm3495_vm12, %v6323_v51, %v3494_v41 }
 0x48c   :  { %v3512_v4 = vmax.f32 %v3478_v12, 1e-12  ;;  %v3499_v55 = vsel %vm3497_vm13, %v3498_v31, %v3496_v8  ;;  %v3487_v49 = vmul.f32 %v4867_v22, %v6334_v7 }
 0x48d   :  { %v4869_v21 = vpop.eup %4868  ;;  %v3969_v38 = vpack.c.bf16 %v3531_v23, %v3529_v56  ;;  %v3515_v61 = vmax.f32 %v3499_v55, 1e-12 }
 0x48e   :  { %v4871_v2 = vpop.eup %4870  ;;  %v3535_v53 = vmul.f32 %v4869_v21, %v6226_v42  ;;  %4878 = vrcp.f32 %v3512_v4  ;;  %v3489_v18 = vsel %vm3488_vm14, %v6334_v7, %v3487_v49 }
 0x48f   :  { %3993 = vst [vmem:[%s6425_s9 + $0x18] sm:$0xff] %v3969_v38   ;;  %v3533_v51 = vmul.f32 %v4871_v2, %v6228_v25  ;;  %4880 = vrcp.f32 %v3515_v61  ;;  %v3492_v6 = vsel %vm3490_vm15, %v3491_v48, %v3489_v18 }
 0x490   :  { %v3514_v14 = vmax.f32 %v3492_v6, 1e-12 }
 0x491   :  { %v3974_v58 = vpack.c.bf16 %v3535_v53, %v3533_v51 }
 0x492   :  { %4882 = vrcp.f32 %v3514_v14 }
 0x493   :  { %v4873_v57 = vpop.eup %4872  ;;  %3994 = vst [vmem:[%s6425_s9 + $0x20] sm:$0xff] %v3974_v58  }
 0x494   :  { %v4875_v42 = vpop.eup %4874  ;;  %v3539_v3 = vmul.f32 %v4873_v57, %v6234_v43 }
 0x495   :  { %v3537_v7 = vmul.f32 %v4875_v42, %v6236_v37 }
 0x497   :  { %v4877_v10 = vpop.eup %4876  ;;  %v3979_v13 = vpack.c.bf16 %v3539_v3, %v3537_v7 }
 0x498   :  { %v3543_v25 = vmul.f32 %v4877_v10, %v6242_v28 }
 0x499   :  { %3995 = vst [vmem:[%s6425_s9 + $0x28] sm:$0xff] %v3979_v13  }
 0x49b   :  { %v4879_v16 = vpop.eup %4878 }
 0x49c   :  { %v4881_v40 = vpop.eup %4880  ;;  %v3541_v35 = vmul.f32 %v4879_v16, %v6244_v52 }
 0x49d   :  { %v3547_v32 = vmul.f32 %v4881_v40, %v6250_v63 }
 0x49e   :  { %v3984_v47 = vpack.c.bf16 %v3543_v25, %v3541_v35 }
 0x49f   :  { %v4883_v17 = vpop.eup %4882 }
 0x4a0   :  { %3996 = vst [vmem:[%s6425_s9 + $0x30] sm:$0xff] %v3984_v47   ;;  %v3545_v43 = vmul.f32 %v4883_v17, %v6252_v33 }
 0x4a2   :  { %v3989_v37 = vpack.c.bf16 %v3547_v32, %v3545_v43 }
 0x4a4   :  { %3997 = vst [vmem:[%s6425_s9 + $0x38] sm:$0xff] %v3989_v37  }
 0x4a5   :  { %3632 = vsyncpa [#allocation7], 1 }

// kernel: _lambda_.5
= control target key start
LH: loop header
LB: loop body
LE: loop exit
PB: predicated region body
PF: predicated region fallthrough
CT: control target
= control target key end

     0   :  { %s5843_s0 = inlined_call_operand.<no memory space> [shape: s32[1,1], index: 0, kind: input, shape index: {}]   ;;  %s5844_s1 = inlined_call_operand.<no memory space> [shape: s32[1], index: 1, kind: input, shape index: {}]   ;;  %s5845_s5 = inlined_call_operand.vmem [shape: f32[7,128,1], index: 5, kind: input, shape index: {}]   ;;  %s5846_s6 = inlined_call_operand.vmem [shape: bf16[7,128,128], index: 6, kind: input, shape index: {}]   ;;  %s5847_s7 = inlined_call_operand.vmem [shape: bf16[128,128], index: 7, kind: input, shape index: {}]   ;;  %s5848_s9 = inlined_call_operand.vmem [shape: f32[128,128], index: 9, kind: output, shape index: {}]   ;;  %s5849_s4 = inlined_call_operand.vmem [shape: s8[7,128,128], index: 4, kind: input, shape index: {}]   ;;  %s5850_s3 = inlined_call_operand.vmem [shape: bf16[128,128], index: 3, kind: input, shape index: {}, may-alias: {2,3}]   ;;  %s5851_s2 = inlined_call_operand.vmem [shape: bf16[128,128], index: 2, kind: input, shape index: {}, may-alias: {2,3}]   ;;  %s5852_s8 = inlined_call_operand.vmem [shape: f32[1,128], index: 8, kind: input, shape index: {}]  }
   0x1   :  { %s3364_s11 = sshll.u32 %s5843_s0, 4  ;;  %p91_p0 = scmp.lt.s32.totalorder %s5843_s0, 0  ;;  %v4403_v0 = vld [vmem:[%s5847_s7 + $0x38] sm:$0xff]   ;;  %v4404_v1 = vld [vmem:[%s5847_s7 + $0x30] sm:$0xff]   ;;  %v4405_v2 = vld [vmem:[%s5847_s7 + $0x28] sm:$0xff]  }
   0x2   :  { %p78_p1 = scmp.lt.s32.totalorder %s3364_s11, 15  ;;  %3906 = vmatprep.subr.bf16.mxu0 %v4403_v0  ;;  %4386 = vmatprep.subr.bf16.mxu1 %v4403_v0  ;;  %v4406_v3 = vld [vmem:[%s5847_s7 + $0x20] sm:$0xff]   ;;  %v4407_v6 = vld [vmem:[%s5847_s7 + $0x18] sm:$0xff]   ;;  %v4408_v7 = vld [vmem:[%s5847_s7 + $0x10] sm:$0xff]   ;;  %p3385_p2 = scmp.le.s32.totalorder %s5844_s1, 0 }
   0x3   :  { %s5916_s0 = smov (!%p91_p0, %s5843_s0), 0  ;;  %3907 = vmatpush3.bf16.msra.mxu0 %v4403_v0  ;;  %4394 = vmatpush3.bf16.msra.mxu1 %v4403_v0  ;;  %v4411_v4 = vld [vmem:[%s5851_s2] sm:$0xff]   ;;  %v4409_v8 = vld [vmem:[%s5847_s7 + $0x8] sm:$0xff]   ;;  %v4415_v12 = vld [vmem:[%s5851_s2 + $0x10] sm:$0xff]  }
   0x4   :  { %s5918_s11 = smov (!%p78_p1, %s3364_s11), 15  ;;  %s3366_s20 = sshll.u32 %s5916_s0, 3  ;;  %3908 = vmatprep.subr.bf16.mxu0 %v4404_v1  ;;  %4387 = vmatprep.subr.bf16.mxu1 %v4404_v1  ;;  %v4412_v5 = vld [vmem:[%s5851_s2 + $0x20] sm:$0xff]   ;;  %v4413_v10 = vld [vmem:[%s5851_s2 + $0x8] sm:$0xff]   ;;  %v4416_v13 = vld [vmem:[%s5851_s2 + $0x30] sm:$0xff]  }
   0x5   :  { %s3365_s21 = sshll.u32 %s5918_s11, 2  ;;  %s4554_s24 = scalar_lea.vmem %s5849_s4, %s3366_s20  ;;  %3922 = vmatprep.mubr.bf16.mxu0 %v4411_v4  ;;  %3930 = vmatprep.mubr.bf16.mxu1 %v4412_v5  ;;  %v4410_v9 = vld [vmem:[%s5847_s7] sm:$0xff]   ;;  %v4414_v11 = vld [vmem:[%s5851_s2 + $0x28] sm:$0xff]   ;;  %v4417_v14 = vld [vmem:[%s5851_s2 + $0x18] sm:$0xff]  }
   0x6   :  { %s4562_s29 = scalar_lea.vmem %s5850_s3, %s3365_s21  ;;  %v4418_v15 = vld [vmem:[%s5851_s2 + $0x38] sm:$0xff]   ;;  %v3367_v16 = vld [vmem:[%s5852_s8] ss:$0 sm:$0xff] }
   0x7   :  { %3909 = vmatpush3.bf16.msra.mxu0 %v4404_v1  ;;  %4395 = vmatpush3.bf16.msra.mxu1 %v4404_v1 }
   0x8   :  { %3910 = vmatprep.subr.bf16.mxu0 %v4405_v2  ;;  %4388 = vmatprep.subr.bf16.mxu1 %v4405_v2 }
   0xb   :  { %3911 = vmatpush3.bf16.msra.mxu0 %v4405_v2  ;;  %4396 = vmatpush3.bf16.msra.mxu1 %v4405_v2 }
   0xc   :  { %3912 = vmatprep.subr.bf16.mxu0 %v4406_v3  ;;  %4389 = vmatprep.subr.bf16.mxu1 %v4406_v3 }
   0xf   :  { %3913 = vmatpush3.bf16.msra.mxu0 %v4406_v3  ;;  %4397 = vmatpush3.bf16.msra.mxu1 %v4406_v3 }
  0x10   :  { %3914 = vmatprep.subr.bf16.mxu0 %v4407_v6  ;;  %4390 = vmatprep.subr.bf16.mxu1 %v4407_v6 }
  0x13   :  { %3915 = vmatpush3.bf16.msra.mxu0 %v4407_v6  ;;  %4398 = vmatpush3.bf16.msra.mxu1 %v4407_v6 }
  0x14   :  { %3916 = vmatprep.subr.bf16.mxu0 %v4408_v7  ;;  %4391 = vmatprep.subr.bf16.mxu1 %v4408_v7 }
  0x17   :  { %3917 = vmatpush3.bf16.msra.mxu0 %v4408_v7  ;;  %4399 = vmatpush3.bf16.msra.mxu1 %v4408_v7 }
  0x18   :  { %3918 = vmatprep.subr.bf16.mxu0 %v4409_v8  ;;  %4392 = vmatprep.subr.bf16.mxu1 %v4409_v8 }
  0x1b   :  { %3919 = vmatpush3.bf16.msra.mxu0 %v4409_v8  ;;  %4400 = vmatpush3.bf16.msra.mxu1 %v4409_v8 }
  0x1c   :  { %3920 = vmatprep.subr.bf16.mxu0 %v4410_v9  ;;  %4393 = vmatprep.subr.bf16.mxu1 %v4410_v9 }
  0x1f   :  { %3921 = vmatpush3.bf16.msra.mxu0 %v4410_v9  ;;  %4401 = vmatpush3.bf16.msra.mxu1 %v4410_v9 }
  0x22   :  { %3923 = vmatmul.mubr.bf16.vlgmr.msra.gmra.mxu0 %v4413_v10  ;;  %3931 = vmatmul.mubr.bf16.vlgmr.msra.gmra.mxu1 %v4414_v11 }
  0x23   :  { %3926 = vmatprep.mubr.bf16.mxu0 %v4415_v12  ;;  %3934 = vmatprep.mubr.bf16.mxu1 %v4416_v13 }
  0x2a   :  { %3927 = vmatmul.mubr.bf16.gmra.mxu0 %v4417_v14  ;;  %3935 = vmatmul.mubr.bf16.gmra.mxu1 %v4418_v15 }
  0xe2   :  { %v3924_v17 = vpop.f32.mrf.mxu0  ;;  %v3932_v18 = vpop.f32.mrf.mxu1 }
  0xe3   :  { %v282_v19 = vadd.f32 %v3924_v17, %v3367_v16  ;;  %v314_v20 = vadd.f32 %v3932_v18, %v3367_v16 }
  0xe4   :  { %v273_v21 = vpop.f32.mrf.mxu0  ;;  %v305_v22 = vpop.f32.mrf.mxu1 }
  0xe5   :  { %338 = vst [vmem:[#allocation2 + $0x58] sm:$0xff] %v282_v19  ;;  %346 = vst [vmem:[#allocation2 + $0x10] sm:$0xff] %v314_v20  ;;  %v274_v23 = vadd.f32 %v3367_v16, %v273_v21  ;;  %v306_v24 = vadd.f32 %v3367_v16, %v305_v22 }
  0xe6   :  { %v3925_v25 = vpop.f32.mrf.mxu0  ;;  %v3933_v26 = vpop.f32.mrf.mxu1 }
  0xe7   :  { %336 = vst [vmem:[#allocation2 + $0x30] sm:$0xff] %v274_v23  ;;  %344 = vst [vmem:[#allocation2 + $0x40] sm:$0xff] %v306_v24  ;;  %v285_v27 = vadd.f32 %v3925_v25, %v3367_v16  ;;  %v317_v28 = vadd.f32 %v3933_v26, %v3367_v16 }
  0xe8   :  { %v276_v29 = vpop.f32.mrf.mxu0  ;;  %v308_v30 = vpop.f32.mrf.mxu1 }
  0xe9   :  { %339 = vst [vmem:[#allocation2 + $0x18] sm:$0xff] %v285_v27  ;;  %347 = vst [vmem:[#allocation2 + $0x38] sm:$0xff] %v317_v28  ;;  %v277_v31 = vadd.f32 %v3367_v16, %v276_v29  ;;  %v309_v32 = vadd.f32 %v3367_v16, %v308_v30 }
  0xea   :  { %v3928_v33 = vpop.f32.mrf.mxu0  ;;  %v3936_v34 = vpop.f32.mrf.mxu1 }
  0xeb   :  { %337 = vst [vmem:[#allocation2] sm:$0xff] %v277_v31  ;;  %345 = vst [vmem:[#allocation2 + $0x20] sm:$0xff] %v309_v32  ;;  %v298_v35 = vadd.f32 %v3928_v33, %v3367_v16  ;;  %v330_v36 = vadd.f32 %v3936_v34, %v3367_v16 }
  0xec   :  { %v289_v37 = vpop.f32.mrf.mxu0  ;;  %v321_v38 = vpop.f32.mrf.mxu1 }
  0xed   :  { %342 = vst [vmem:[#allocation2 + $0x8] sm:$0xff] %v298_v35  ;;  %350 = vst [vmem:[#allocation2 + $0x78] sm:$0xff] %v330_v36  ;;  %v290_v39 = vadd.f32 %v3367_v16, %v289_v37  ;;  %v322_v40 = vadd.f32 %v3367_v16, %v321_v38 }
  0xee   :  { %v3929_v41 = vpop.f32.mrf.mxu0  ;;  %v3937_v42 = vpop.f32.mrf.mxu1 }
  0xef   :  { %340 = vst [vmem:[#allocation2 + $0x50] sm:$0xff] %v290_v39  ;;  %348 = vst [vmem:[#allocation2 + $0x60] sm:$0xff] %v322_v40  ;;  %v301_v43 = vadd.f32 %v3929_v41, %v3367_v16  ;;  %v333_v44 = vadd.f32 %v3937_v42, %v3367_v16  ;;  %356 = sbr.rel (%p3385_p2) target bundleno = 952 (0x3b8), region = 37 }
  0xf0   :  { %v292_v45 = vpop.f32.mrf.mxu0  ;;  %v324_v46 = vpop.f32.mrf.mxu1 }
  0xf1   :  { %343 = vst [vmem:[#allocation2 + $0x48] sm:$0xff] %v301_v43  ;;  %351 = vst [vmem:[#allocation2 + $0x28] sm:$0xff] %v333_v44  ;;  %v293_v47 = vadd.f32 %v3367_v16, %v292_v45  ;;  %v325_v48 = vadd.f32 %v3367_v16, %v324_v46 }
  0xf3   :  { %341 = vst [vmem:[#allocation2 + $0x68] sm:$0xff] %v293_v47  ;;  %349 = vst [vmem:[#allocation2 + $0x70] sm:$0xff] %v325_v48 }
  0xf4   :  { %v4421_v49 = vld [vmem:[%s5846_s6 + $0x38] sm:$0xff]   ;;  %v4422_v50 = vld [vmem:[%s5846_s6 + $0x30] sm:$0xff]   ;;  %v4423_v51 = vld [vmem:[%s5846_s6 + $0x28] sm:$0xff]   ;;  %v4485_v54 = vmov 0  }
  0xf5   :  { %3938 = vmatprep.subr.bf16.mxu0 %v4421_v49  ;;  %v4424_v52 = vld [vmem:[%s5846_s6 + $0x20] sm:$0xff]   ;;  %4420 = vset.pattern.permute.xlu1 %v4485_v54  ;;  %v4425_v55 = vld [vmem:[%s5846_s6 + $0x18] sm:$0xff]   ;;  %v4426_v56 = vld [vmem:[%s5846_s6 + $0x10] sm:$0xff]  }
  0xf6   :  { %3939 = vmatpush3.bf16.msra.mxu0 %v4421_v49  ;;  %v4622_v53 = vld [vmem:[%s4562_s29] sm:$0xff]   ;;  %4419 = vset.pattern.permute.xlu0 %v4485_v54  ;;  %v4427_v57 = vld [vmem:[%s5846_s6 + $0x8] sm:$0xff]   ;;  %v4431_v59 = vld [vmem:[%s5846_s6 + $0x78] sm:$0xff]  }
  0xf7   :  { %3940 = vmatprep.subr.bf16.mxu0 %v4422_v50  ;;  %3954 = vmatprep.mubr.bf16.mxu0 %v4622_v53  ;;  %v4428_v58 = vld [vmem:[%s5846_s6] sm:$0xff]   ;;  %v4641_v60 = vld [vmem:[%s4562_s29 + $0x8] sm:$0xff]   ;;  %v4644_v61 = vld [vmem:[%s4562_s29 + $0x10] sm:$0xff]  }
  0xf8   :  { %v4432_v62 = vld [vmem:[%s5846_s6 + $0x70] sm:$0xff]   ;;  %v4435_v63 = vld [vmem:[%s5846_s6 + $0x68] sm:$0xff]   ;;  %v4655_v0 = vld [vmem:[%s4562_s29 + $0x18] sm:$0xff]  }
  0xf9   :  { %v4658_v1 = vld [vmem:[%s4562_s29 + $0x20] sm:$0xff]   ;;  %v717_v3 = vld [vmem:[%s5845_s5 + $0x10] sm:$0xff]  ;;  %v4439_v5 = vld [vmem:[%s5846_s6 + $0x58] sm:$0xff]  }
  0xfa   :  { %3941 = vmatpush3.bf16.msra.mxu0 %v4422_v50  ;;  %v4436_v2 = vld [vmem:[%s5846_s6 + $0x60] sm:$0xff]   ;;  %743 = vperm.xlu1 %4420, %v717_v3   ;;  %v718_v6 = vld [vmem:[%s5845_s5 + $0x18] sm:$0xff]  ;;  %v4678_v7 = vld [vmem:[%s4562_s29 + $0x28] sm:$0xff]  }
  0xfb   :  { %3942 = vmatprep.subr.bf16.mxu0 %v4423_v51  ;;  %v715_v4 = vld [vmem:[%s5845_s5] sm:$0xff]  ;;  %v716_v8 = vld [vmem:[%s5845_s5 + $0x8] sm:$0xff]  ;;  %v4684_v9 = vld [vmem:[%s4562_s29 + $0x30] sm:$0xff]  }
  0xfc   :  { %733 = vperm.xlu0 %4419, %v715_v4   ;;  %v4440_v10 = vld [vmem:[%s5846_s6 + $0x50] sm:$0xff]   ;;  %v720_v11 = vld [vmem:[%s5845_s5 + $0x28] sm:$0xff]  ;;  %v719_v12 = vld [vmem:[%s5845_s5 + $0x20] sm:$0xff] }
  0xfd   :  { %v4443_v13 = vld [vmem:[%s5846_s6 + $0x48] sm:$0xff]   ;;  %v722_v14 = vld [vmem:[%s5845_s5 + $0x38] sm:$0xff]  ;;  %v721_v16 = vld [vmem:[%s5845_s5 + $0x30] sm:$0xff] }
  0xfe   :  { %3943 = vmatpush3.bf16.msra.mxu0 %v4423_v51  ;;  %748 = vperm.xlu1 %4420, %v718_v6   ;;  %v4704_v15 = vld [vmem:[%s4562_s29 + $0x38] sm:$0xff]   ;;  %v4444_v17 = vld [vmem:[%s5846_s6 + $0x40] sm:$0xff]   ;;  %v724_v18 = vld [vmem:[%s5845_s5 + $0x48] sm:$0xff] }
  0xff   :  { %3944 = vmatprep.subr.bf16.mxu0 %v4424_v52  ;;  %v723_v19 = vld [vmem:[%s5845_s5 + $0x40] sm:$0xff]  ;;  %v4445_v20 = vld [vmem:[%s5846_s6 + $0xb8] sm:$0xff]   ;;  %v725_v22 = vld [vmem:[%s5845_s5 + $0x50] sm:$0xff] }
 0x100   :  { %738 = vperm.xlu0 %4419, %v716_v8   ;;  %v726_v21 = vld [vmem:[%s5845_s5 + $0x58] sm:$0xff]  ;;  %v4446_v23 = vld [vmem:[%s5846_s6 + $0xb0] sm:$0xff]   ;;  %v728_v24 = vld [vmem:[%s5845_s5 + $0x68] sm:$0xff] }
 0x101   :  { %v727_v25 = vld [vmem:[%s5845_s5 + $0x60] sm:$0xff]  ;;  %v4447_v26 = vld [vmem:[%s5846_s6 + $0xa8] sm:$0xff]   ;;  %v730_v27 = vld [vmem:[%s5845_s5 + $0x78] sm:$0xff] }
 0x102   :  { %3945 = vmatpush3.bf16.msra.mxu0 %v4424_v52  ;;  %758 = vperm.xlu1 %4420, %v720_v11   ;;  %v729_v28 = vld [vmem:[%s5845_s5 + $0x70] sm:$0xff]  ;;  %v4448_v29 = vld [vmem:[%s5846_s6 + $0xa0] sm:$0xff]   ;;  %v3431_v30 = vld [vmem:[%s5845_s5 + $0x88] sm:$0xff] }
 0x103   :  { %3946 = vmatprep.subr.bf16.mxu0 %v4425_v55  ;;  %v3430_v31 = vld [vmem:[%s5845_s5 + $0x80] sm:$0xff]  ;;  %v4449_v32 = vld [vmem:[%s5846_s6 + $0x98] sm:$0xff]   ;;  %v3432_v34 = vld [vmem:[%s5845_s5 + $0x90] sm:$0xff] }
 0x104   :  { %753 = vperm.xlu0 %4419, %v719_v12   ;;  %v3433_v33 = vld [vmem:[%s5845_s5 + $0x98] sm:$0xff]  ;;  %v4450_v35 = vld [vmem:[%s5846_s6 + $0x90] sm:$0xff]   ;;  %v3435_v36 = vld [vmem:[%s5845_s5 + $0xa8] sm:$0xff] }
 0x105   :  { %v3434_v37 = vld [vmem:[%s5845_s5 + $0xa0] sm:$0xff]  ;;  %v4451_v38 = vld [vmem:[%s5846_s6 + $0x88] sm:$0xff]   ;;  %v3437_v39 = vld [vmem:[%s5845_s5 + $0xb8] sm:$0xff] }
 0x106   :  { %3947 = vmatpush3.bf16.msra.mxu0 %v4425_v55  ;;  %768 = vperm.xlu1 %4420, %v722_v14   ;;  %v3436_v40 = vld [vmem:[%s5845_s5 + $0xb0] sm:$0xff]  ;;  %v4452_v41 = vld [vmem:[%s5846_s6 + $0x80] sm:$0xff]   ;;  %v3439_v42 = vld [vmem:[%s5845_s5 + $0xc8] sm:$0xff] }
 0x107   :  { %3948 = vmatprep.subr.bf16.mxu0 %v4426_v56  ;;  %v3438_v43 = vld [vmem:[%s5845_s5 + $0xc0] sm:$0xff]  ;;  %v4453_v44 = vld [vmem:[%s5846_s6 + $0xf8] sm:$0xff]   ;;  %v3440_v46 = vld [vmem:[%s5845_s5 + $0xd0] sm:$0xff] }
 0x108   :  { %763 = vperm.xlu0 %4419, %v721_v16   ;;  %v3441_v45 = vld [vmem:[%s5845_s5 + $0xd8] sm:$0xff]  ;;  %v4454_v47 = vld [vmem:[%s5846_s6 + $0xf0] sm:$0xff]   ;;  %v3443_v48 = vld [vmem:[%s5845_s5 + $0xe8] sm:$0xff] }
 0x109   :  { %v3442_v49 = vld [vmem:[%s5845_s5 + $0xe0] sm:$0xff]  ;;  %v4455_v50 = vld [vmem:[%s5846_s6 + $0xe8] sm:$0xff]   ;;  %v3445_v51 = vld [vmem:[%s5845_s5 + $0xf8] sm:$0xff] }
 0x10a   :  { %3949 = vmatpush3.bf16.msra.mxu0 %v4426_v56  ;;  %778 = vperm.xlu1 %4420, %v724_v18   ;;  %v3444_v52 = vld [vmem:[%s5845_s5 + $0xf0] sm:$0xff]  ;;  %v4456_v54 = vld [vmem:[%s5846_s6 + $0xe0] sm:$0xff]   ;;  %v3475_v55 = vld [vmem:[%s5845_s5 + $0x108] sm:$0xff] }
 0x10b   :  { %3950 = vmatprep.subr.bf16.mxu0 %v4427_v57  ;;  %v3474_v56 = vld [vmem:[%s5845_s5 + $0x100] sm:$0xff]  ;;  %v4459_v3 = vld [vmem:[%s5846_s6 + $0xc8] sm:$0xff]   ;;  %v3481_v4 = vld [vmem:[%s5845_s5 + $0x138] sm:$0xff] }
 0x10c   :  { %773 = vperm.xlu0 %4419, %v723_v19   ;;  %v4460_v6 = vld [vmem:[%s5846_s6 + $0xc0] sm:$0xff]   ;;  %v3483_v8 = vld [vmem:[%s5845_s5 + $0x148] sm:$0xff]  ;;  %v4461_v11 = vld [vmem:[%s5846_s6 + $0x138] sm:$0xff]  }
 0x10d   :  { %v3485_v12 = vld [vmem:[%s5845_s5 + $0x158] sm:$0xff]  ;;  %v4462_v14 = vld [vmem:[%s5846_s6 + $0x130] sm:$0xff]   ;;  %v3487_v16 = vld [vmem:[%s5845_s5 + $0x168] sm:$0xff] }
 0x10e   :  { %3951 = vmatpush3.bf16.msra.mxu0 %v4427_v57  ;;  %788 = vperm.xlu1 %4420, %v726_v21   ;;  %v4457_v57 = vld [vmem:[%s5846_s6 + $0xd8] sm:$0xff]   ;;  %v4463_v18 = vld [vmem:[%s5846_s6 + $0x128] sm:$0xff]   ;;  %v4464_v21 = vld [vmem:[%s5846_s6 + $0x120] sm:$0xff]  }
 0x10f   :  { %3952 = vmatprep.subr.bf16.mxu0 %v4428_v58  ;;  %v3489_v19 = vld [vmem:[%s5845_s5 + $0x178] sm:$0xff] }
 0x110   :  { %783 = vperm.xlu0 %4419, %v725_v22   ;;  %v3519_v22 = vld [vmem:[%s5845_s5 + $0x188] sm:$0xff] }
 0x112   :  { %3953 = vmatpush3.bf16.msra.mxu0 %v4428_v58  ;;  %798 = vperm.xlu1 %4420, %v728_v24   ;;  %v3477_v58 = vld [vmem:[%s5845_s5 + $0x118] sm:$0xff] }
 0x113   :  { %4002 = vmatprep.subr.bf16.mxu0 %v4431_v59  ;;  %v4465_v24 = vld [vmem:[%s5846_s6 + $0x118] sm:$0xff]  }
 0x114   :  { %793 = vperm.xlu0 %4419, %v727_v25   ;;  %v3521_v25 = vld [vmem:[%s5845_s5 + $0x198] sm:$0xff] }
 0x115   :  { %3955 = vmatmul.mubr.bf16.vlgmr.msra.gmra.mxu0 %v4641_v60 }
 0x116   :  { %4003 = vmatpush3.bf16.msra.mxu0 %v4431_v59  ;;  %3958 = vmatprep.mubr.bf16.mxu0 %v4644_v61  ;;  %v3476_v59 = vld [vmem:[%s5845_s5 + $0x110] sm:$0xff] }
 0x117   :  { %4004 = vmatprep.subr.bf16.mxu0 %v4432_v62  ;;  %808 = vperm.xlu1 %4420, %v730_v27   ;;  %v4466_v27 = vld [vmem:[%s5846_s6 + $0x110] sm:$0xff]  }
 0x118   :  { %803 = vperm.xlu0 %4419, %v729_v28   ;;  %v3523_v28 = vld [vmem:[%s5845_s5 + $0x1a8] sm:$0xff] }
 0x11a   :  { %4005 = vmatpush3.bf16.msra.mxu0 %v4432_v62  ;;  %v4458_v62 = vld [vmem:[%s5846_s6 + $0xd0] sm:$0xff]  }
 0x11b   :  { %4006 = vmatprep.subr.bf16.mxu0 %v4435_v63  ;;  %1147 = vperm.xlu1 %4420, %v3431_v30   ;;  %v4467_v30 = vld [vmem:[%s5846_s6 + $0x108] sm:$0xff]  }
 0x11c   :  { %1142 = vperm.xlu0 %4419, %v3430_v31   ;;  %v3525_v31 = vld [vmem:[%s5845_s5 + $0x1b8] sm:$0xff] }
 0x11d   :  { %3959 = vmatmul.mubr.bf16.gmra.mxu0 %v4655_v0 }
 0x11e   :  { %4007 = vmatpush3.bf16.msra.mxu0 %v4435_v63  ;;  %3962 = vmatprep.mubr.bf16.mxu0 %v4658_v1  ;;  %v3479_v63 = vld [vmem:[%s5845_s5 + $0x128] sm:$0xff] }
 0x11f   :  { %4008 = vmatprep.subr.bf16.mxu0 %v4436_v2  ;;  %1157 = vperm.xlu1 %4420, %v3433_v33   ;;  %v4468_v33 = vld [vmem:[%s5846_s6 + $0x100] sm:$0xff]  }
 0x120   :  { %1152 = vperm.xlu0 %4419, %v3432_v34   ;;  %v3527_v34 = vld [vmem:[%s5845_s5 + $0x1c8] sm:$0xff] }
 0x122   :  { %4009 = vmatpush3.bf16.msra.mxu0 %v4436_v2  ;;  %v3478_v2 = vld [vmem:[%s5845_s5 + $0x120] sm:$0xff] }
 0x123   :  { %4010 = vmatprep.subr.bf16.mxu0 %v4439_v5  ;;  %1167 = vperm.xlu1 %4420, %v3435_v36   ;;  %v4469_v36 = vld [vmem:[%s5846_s6 + $0x178] sm:$0xff]  }
 0x124   :  { %1162 = vperm.xlu0 %4419, %v3434_v37   ;;  %v3529_v37 = vld [vmem:[%s5845_s5 + $0x1d8] sm:$0xff] }
 0x125   :  { %3963 = vmatmul.mubr.bf16.gmra.mxu0 %v4678_v7 }
 0x126   :  { %4011 = vmatpush3.bf16.msra.mxu0 %v4439_v5  ;;  %3966 = vmatprep.mubr.bf16.mxu0 %v4684_v9  ;;  %v3480_v5 = vld [vmem:[%s5845_s5 + $0x130] sm:$0xff] }
 0x127   :  { %4012 = vmatprep.subr.bf16.mxu0 %v4440_v10  ;;  %1177 = vperm.xlu1 %4420, %v3437_v39   ;;  %v3528_v39 = vld [vmem:[%s5845_s5 + $0x1d0] sm:$0xff] }
 0x128   :  { %1172 = vperm.xlu0 %4419, %v3436_v40  }
 0x12a   :  { %4013 = vmatpush3.bf16.msra.mxu0 %v4440_v10  ;;  %v3482_v10 = vld [vmem:[%s5845_s5 + $0x140] sm:$0xff] }
 0x12b   :  { %4014 = vmatprep.subr.bf16.mxu0 %v4443_v13  ;;  %1187 = vperm.xlu1 %4420, %v3439_v42   ;;  %v3531_v42 = vld [vmem:[%s5845_s5 + $0x1e8] sm:$0xff] }
 0x12c   :  { %1182 = vperm.xlu0 %4419, %v3438_v43   ;;  %v3530_v43 = vld [vmem:[%s5845_s5 + $0x1e0] sm:$0xff] }
 0x12d   :  { %3967 = vmatmul.mubr.bf16.gmra.mxu0 %v4704_v15 }
 0x12e   :  { %4015 = vmatpush3.bf16.msra.mxu0 %v4443_v13  ;;  %4018 = vmatprep.mubr.bf16.mxu0 %v4622_v53  ;;  %v3484_v13 = vld [vmem:[%s5845_s5 + $0x150] sm:$0xff] }
 0x12f   :  { %4016 = vmatprep.subr.bf16.mxu0 %v4444_v17  ;;  %1197 = vperm.xlu1 %4420, %v3441_v45   ;;  %v3533_v45 = vld [vmem:[%s5845_s5 + $0x1f8] sm:$0xff] }
 0x130   :  { %1192 = vperm.xlu0 %4419, %v3440_v46   ;;  %v3532_v46 = vld [vmem:[%s5845_s5 + $0x1f0] sm:$0xff] }
 0x132   :  { %4017 = vmatpush3.bf16.msra.mxu0 %v4444_v17  ;;  %v3486_v17 = vld [vmem:[%s5845_s5 + $0x160] sm:$0xff] }
 0x133   :  { %4066 = vmatprep.subr.bf16.mxu0 %v4445_v20  ;;  %1207 = vperm.xlu1 %4420, %v3443_v48   ;;  %v3563_v48 = vld [vmem:[%s5845_s5 + $0x208] sm:$0xff] }
 0x134   :  { %1202 = vperm.xlu0 %4419, %v3442_v49   ;;  %v3562_v49 = vld [vmem:[%s5845_s5 + $0x200] sm:$0xff] }
 0x135   :  { %4019 = vmatmul.mubr.bf16.vlgmr.msra.gmra.mxu0 %v4641_v60 }
 0x136   :  { %4067 = vmatpush3.bf16.msra.mxu0 %v4445_v20  ;;  %4022 = vmatprep.mubr.bf16.mxu0 %v4644_v61  ;;  %v3488_v20 = vld [vmem:[%s5845_s5 + $0x170] sm:$0xff] }
 0x137   :  { %4068 = vmatprep.subr.bf16.mxu0 %v4446_v23  ;;  %1217 = vperm.xlu1 %4420, %v3445_v51   ;;  %v3565_v51 = vld [vmem:[%s5845_s5 + $0x218] sm:$0xff] }
 0x138   :  { %1212 = vperm.xlu0 %4419, %v3444_v52   ;;  %v3564_v52 = vld [vmem:[%s5845_s5 + $0x210] sm:$0xff] }
 0x13a   :  { %4069 = vmatpush3.bf16.msra.mxu0 %v4446_v23  ;;  %v3518_v23 = vld [vmem:[%s5845_s5 + $0x180] sm:$0xff] }
 0x13b   :  { %4070 = vmatprep.subr.bf16.mxu0 %v4447_v26  ;;  %1556 = vperm.xlu1 %4420, %v3475_v55   ;;  %v3567_v55 = vld [vmem:[%s5845_s5 + $0x228] sm:$0xff] }
 0x13c   :  { %1551 = vperm.xlu0 %4419, %v3474_v56   ;;  %v3566_v56 = vld [vmem:[%s5845_s5 + $0x220] sm:$0xff] }
 0x13d   :  { %4023 = vmatmul.mubr.bf16.gmra.mxu0 %v4655_v0 }
 0x13e   :  { %4071 = vmatpush3.bf16.msra.mxu0 %v4447_v26  ;;  %4026 = vmatprep.mubr.bf16.mxu0 %v4658_v1  ;;  %v3520_v26 = vld [vmem:[%s5845_s5 + $0x190] sm:$0xff] }
 0x13f   :  { %4072 = vmatprep.subr.bf16.mxu0 %v4448_v29  ;;  %1566 = vperm.xlu1 %4420, %v3477_v58   ;;  %v3569_v58 = vld [vmem:[%s5845_s5 + $0x238] sm:$0xff] }
 0x140   :  { %1561 = vperm.xlu0 %4419, %v3476_v59   ;;  %v3568_v59 = vld [vmem:[%s5845_s5 + $0x230] sm:$0xff] }
 0x142   :  { %4073 = vmatpush3.bf16.msra.mxu0 %v4448_v29  ;;  %v3522_v29 = vld [vmem:[%s5845_s5 + $0x1a0] sm:$0xff] }
 0x143   :  { %4074 = vmatprep.subr.bf16.mxu0 %v4449_v32  ;;  %1576 = vperm.xlu1 %4420, %v3479_v63   ;;  %v3571_v63 = vld [vmem:[%s5845_s5 + $0x248] sm:$0xff] }
 0x144   :  { %1571 = vperm.xlu0 %4419, %v3478_v2   ;;  %v3570_v2 = vld [vmem:[%s5845_s5 + $0x240] sm:$0xff] }
 0x145   :  { %4027 = vmatmul.mubr.bf16.gmra.mxu0 %v4678_v7 }
 0x146   :  { %4075 = vmatpush3.bf16.msra.mxu0 %v4449_v32  ;;  %4030 = vmatprep.mubr.bf16.mxu0 %v4684_v9  ;;  %v3524_v32 = vld [vmem:[%s5845_s5 + $0x1b0] sm:$0xff] }
 0x147   :  { %4076 = vmatprep.subr.bf16.mxu0 %v4450_v35  ;;  %1586 = vperm.xlu1 %4420, %v3481_v4   ;;  %v3573_v4 = vld [vmem:[%s5845_s5 + $0x258] sm:$0xff] }
 0x148   :  { %1581 = vperm.xlu0 %4419, %v3480_v5   ;;  %v3572_v5 = vld [vmem:[%s5845_s5 + $0x250] sm:$0xff] }
 0x14a   :  { %4077 = vmatpush3.bf16.msra.mxu0 %v4450_v35  ;;  %v3526_v35 = vld [vmem:[%s5845_s5 + $0x1c0] sm:$0xff] }
 0x14b   :  { %4078 = vmatprep.subr.bf16.mxu0 %v4451_v38  ;;  %1596 = vperm.xlu1 %4420, %v3483_v8   ;;  %v3575_v8 = vld [vmem:[%s5845_s5 + $0x268] sm:$0xff] }
 0x14c   :  { %1591 = vperm.xlu0 %4419, %v3482_v10   ;;  %v3574_v10 = vld [vmem:[%s5845_s5 + $0x260] sm:$0xff] }
 0x14d   :  { %4031 = vmatmul.mubr.bf16.gmra.mxu0 %v4704_v15 }
 0x14e   :  { %4079 = vmatpush3.bf16.msra.mxu0 %v4451_v38  ;;  %4082 = vmatprep.mubr.bf16.mxu0 %v4622_v53  ;;  %v4967_v38 = vld [vmem:[%s4554_s24] sm:$0xff] }
 0x14f   :  { %4080 = vmatprep.subr.bf16.mxu0 %v4452_v41  ;;  %1606 = vperm.xlu1 %4420, %v3485_v12   ;;  %v393_v40 = vunpack.c.l.s8.bf16 %v4967_v38  ;;  %v3577_v12 = vld [vmem:[%s5845_s5 + $0x278] sm:$0xff] }
 0x150   :  { %1601 = vperm.xlu0 %4419, %v3484_v13   ;;  %v3576_v13 = vld [vmem:[%s5845_s5 + $0x270] sm:$0xff] }
 0x151   :  { %3986 = vmatprep.mubr.bf16.mxu1 %v393_v40 }
 0x152   :  { %4081 = vmatpush3.bf16.msra.mxu0 %v4452_v41  ;;  %v4470_v41 = vld [vmem:[%s5846_s6 + $0x170] sm:$0xff]  }
 0x153   :  { %4130 = vmatprep.subr.bf16.mxu0 %v4453_v44  ;;  %1616 = vperm.xlu1 %4420, %v3487_v16   ;;  %v3607_v16 = vld [vmem:[%s5845_s5 + $0x288] sm:$0xff] }
 0x154   :  { %1611 = vperm.xlu0 %4419, %v3486_v17   ;;  %v3606_v17 = vld [vmem:[%s5845_s5 + $0x280] sm:$0xff] }
 0x155   :  { %4083 = vmatmul.mubr.bf16.vlgmr.msra.gmra.mxu0 %v4641_v60 }
 0x156   :  { %4131 = vmatpush3.bf16.msra.mxu0 %v4453_v44  ;;  %4086 = vmatprep.mubr.bf16.mxu0 %v4644_v61  ;;  %v4471_v44 = vld [vmem:[%s5846_s6 + $0x168] sm:$0xff]  }
 0x157   :  { %4132 = vmatprep.subr.bf16.mxu0 %v4454_v47  ;;  %1626 = vperm.xlu1 %4420, %v3489_v19   ;;  %v3609_v19 = vld [vmem:[%s5845_s5 + $0x298] sm:$0xff] }
 0x158   :  { %1621 = vperm.xlu0 %4419, %v3488_v20   ;;  %v3608_v20 = vld [vmem:[%s5845_s5 + $0x290] sm:$0xff] }
 0x15a   :  { %4133 = vmatpush3.bf16.msra.mxu0 %v4454_v47  ;;  %v4472_v47 = vld [vmem:[%s5846_s6 + $0x160] sm:$0xff]  }
 0x15b   :  { %4134 = vmatprep.subr.bf16.mxu0 %v4455_v50  ;;  %1965 = vperm.xlu1 %4420, %v3519_v22   ;;  %v3611_v22 = vld [vmem:[%s5845_s5 + $0x2a8] sm:$0xff] }
 0x15c   :  { %1960 = vperm.xlu0 %4419, %v3518_v23   ;;  %v3610_v23 = vld [vmem:[%s5845_s5 + $0x2a0] sm:$0xff] }
 0x15d   :  { %4087 = vmatmul.mubr.bf16.gmra.mxu0 %v4655_v0 }
 0x15e   :  { %4135 = vmatpush3.bf16.msra.mxu0 %v4455_v50  ;;  %4090 = vmatprep.mubr.bf16.mxu0 %v4658_v1  ;;  %v4473_v50 = vld [vmem:[%s5846_s6 + $0x158] sm:$0xff]  }
 0x15f   :  { %4136 = vmatprep.subr.bf16.mxu0 %v4456_v54  ;;  %1975 = vperm.xlu1 %4420, %v3521_v25   ;;  %v3613_v25 = vld [vmem:[%s5845_s5 + $0x2b8] sm:$0xff] }
 0x160   :  { %1970 = vperm.xlu0 %4419, %v3520_v26   ;;  %v3612_v26 = vld [vmem:[%s5845_s5 + $0x2b0] sm:$0xff] }
 0x162   :  { %4137 = vmatpush3.bf16.msra.mxu0 %v4456_v54  ;;  %v4474_v54 = vld [vmem:[%s5846_s6 + $0x150] sm:$0xff]  }
 0x163   :  { %4138 = vmatprep.subr.bf16.mxu0 %v4457_v57  ;;  %1985 = vperm.xlu1 %4420, %v3523_v28   ;;  %v3615_v28 = vld [vmem:[%s5845_s5 + $0x2c8] sm:$0xff] }
 0x164   :  { %1980 = vperm.xlu0 %4419, %v3522_v29   ;;  %v3614_v29 = vld [vmem:[%s5845_s5 + $0x2c0] sm:$0xff] }
 0x165   :  { %4091 = vmatmul.mubr.bf16.gmra.mxu0 %v4678_v7 }
 0x166   :  { %4139 = vmatpush3.bf16.msra.mxu0 %v4457_v57  ;;  %4094 = vmatprep.mubr.bf16.mxu0 %v4684_v9  ;;  %v4475_v57 = vld [vmem:[%s5846_s6 + $0x148] sm:$0xff]  }
 0x167   :  { %4140 = vmatprep.subr.bf16.mxu0 %v4458_v62  ;;  %1995 = vperm.xlu1 %4420, %v3525_v31   ;;  %v3616_v31 = vld [vmem:[%s5845_s5 + $0x2d0] sm:$0xff] }
 0x168   :  { %1990 = vperm.xlu0 %4419, %v3524_v32   ;;  %v3619_v32 = vld [vmem:[%s5845_s5 + $0x2e8] sm:$0xff] }
 0x16a   :  { %4141 = vmatpush3.bf16.msra.mxu0 %v4458_v62  ;;  %v4476_v62 = vld [vmem:[%s5846_s6 + $0x140] sm:$0xff]  }
 0x16b   :  { %4142 = vmatprep.subr.bf16.mxu0 %v4459_v3  ;;  %2005 = vperm.xlu1 %4420, %v3527_v34  }
 0x16c   :  { %2000 = vperm.xlu0 %4419, %v3526_v35  }
 0x16d   :  { %4095 = vmatmul.mubr.bf16.gmra.mxu0 %v4704_v15 }
 0x16e   :  { %4143 = vmatpush3.bf16.msra.mxu0 %v4459_v3  ;;  %4146 = vmatprep.mubr.bf16.mxu0 %v4622_v53  ;;  %v4477_v3 = vld [vmem:[%s5846_s6 + $0x1b8] sm:$0xff]  }
 0x16f   :  { %4144 = vmatprep.subr.bf16.mxu0 %v4460_v6  ;;  %2015 = vperm.xlu1 %4420, %v3529_v37   ;;  %v3621_v37 = vld [vmem:[%s5845_s5 + $0x2f8] sm:$0xff] }
 0x170   :  { %2010 = vperm.xlu0 %4419, %v3528_v39  }
 0x172   :  { %4145 = vmatpush3.bf16.msra.mxu0 %v4460_v6  ;;  %v4478_v6 = vld [vmem:[%s5846_s6 + $0x1b0] sm:$0xff]  }
 0x173   :  { %4194 = vmatprep.subr.bf16.mxu0 %v4461_v11  ;;  %2025 = vperm.xlu1 %4420, %v3531_v42  }
 0x174   :  { %2020 = vperm.xlu0 %4419, %v3530_v43   ;;  %v3650_v43 = vld [vmem:[%s5845_s5 + $0x300] sm:$0xff] }
 0x175   :  { %4147 = vmatmul.mubr.bf16.vlgmr.msra.gmra.mxu0 %v4641_v60  ;;  %v5142_v35 = vpop.permute.xlu1 %743 }
 0x176   :  { %4195 = vmatpush3.bf16.msra.mxu0 %v4461_v11  ;;  %4150 = vmatprep.mubr.bf16.mxu0 %v4644_v61  ;;  %v4479_v11 = vld [vmem:[%s5846_s6 + $0x1a8] sm:$0xff]  }
 0x177   :  { %4196 = vmatprep.subr.bf16.mxu0 %v4462_v14  ;;  %2035 = vperm.xlu1 %4420, %v3533_v45  }
 0x178   :  { %2030 = vperm.xlu0 %4419, %v3532_v46   ;;  %v3653_v46 = vld [vmem:[%s5845_s5 + $0x318] sm:$0xff] }
 0x179   :  { %v5162_v42 = vpop.permute.xlu1 %748 }
 0x17a   :  { %4197 = vmatpush3.bf16.msra.mxu0 %v4462_v14  ;;  %v4480_v14 = vld [vmem:[%s5846_s6 + $0x1a0] sm:$0xff]  }
 0x17b   :  { %4198 = vmatprep.subr.bf16.mxu0 %v4463_v18  ;;  %2374 = vperm.xlu1 %4420, %v3563_v48  }
 0x17c   :  { %2369 = vperm.xlu0 %4419, %v3562_v49  }
 0x17d   :  { %4151 = vmatmul.mubr.bf16.gmra.mxu0 %v4655_v0  ;;  %v5182_v49 = vpop.permute.xlu1 %758 }
 0x17e   :  { %4199 = vmatpush3.bf16.msra.mxu0 %v4463_v18  ;;  %4154 = vmatprep.mubr.bf16.mxu0 %v4658_v1  ;;  %v4481_v18 = vld [vmem:[%s5846_s6 + $0x198] sm:$0xff]  }
 0x17f   :  { %4200 = vmatprep.subr.bf16.mxu0 %v4464_v21  ;;  %2384 = vperm.xlu1 %4420, %v3565_v51  }
 0x180   :  { %2379 = vperm.xlu0 %4419, %v3564_v52   ;;  %v3654_v52 = vld [vmem:[%s5845_s5 + $0x320] sm:$0xff] }
 0x182   :  { %4201 = vmatpush3.bf16.msra.mxu0 %v4464_v21  ;;  %v4482_v21 = vld [vmem:[%s5846_s6 + $0x190] sm:$0xff]  }
 0x183   :  { %4202 = vmatprep.subr.bf16.mxu0 %v4465_v24  ;;  %2394 = vperm.xlu1 %4420, %v3567_v55   ;;  %v3657_v55 = vld [vmem:[%s5845_s5 + $0x338] sm:$0xff] }
 0x184   :  { %2389 = vperm.xlu0 %4419, %v3566_v56  }
 0x185   :  { %4155 = vmatmul.mubr.bf16.gmra.mxu0 %v4678_v7 }
 0x186   :  { %4203 = vmatpush3.bf16.msra.mxu0 %v4465_v24  ;;  %4158 = vmatprep.mubr.bf16.mxu0 %v4684_v9  ;;  %v4483_v24 = vld [vmem:[%s5846_s6 + $0x188] sm:$0xff]  }
 0x187   :  { %4204 = vmatprep.subr.bf16.mxu0 %v4466_v27  ;;  %2404 = vperm.xlu1 %4420, %v3569_v58  }
 0x188   :  { %2399 = vperm.xlu0 %4419, %v3568_v59  }
 0x18a   :  { %4205 = vmatpush3.bf16.msra.mxu0 %v4466_v27  ;;  %v4484_v27 = vld [vmem:[%s5846_s6 + $0x180] sm:$0xff]  }
 0x18b   :  { %4206 = vmatprep.subr.bf16.mxu0 %v4467_v30  ;;  %2414 = vperm.xlu1 %4420, %v3571_v63   ;;  %v3658_v63 = vld [vmem:[%s5845_s5 + $0x340] sm:$0xff] }
 0x18c   :  { %2409 = vperm.xlu0 %4419, %v3570_v2  }
 0x18d   :  { %4159 = vmatmul.mubr.bf16.gmra.mxu0 %v4704_v15 }
 0x18e   :  { %4207 = vmatpush3.bf16.msra.mxu0 %v4467_v30  ;;  %4210 = vmatprep.mubr.bf16.mxu0 %v4622_v53  ;;  %v3617_v30 = vld [vmem:[%s5845_s5 + $0x2d8] sm:$0xff] }
 0x18f   :  { %4208 = vmatprep.subr.bf16.mxu0 %v4468_v33  ;;  %2424 = vperm.xlu1 %4420, %v3573_v4  }
 0x190   :  { %2419 = vperm.xlu0 %4419, %v3572_v5   ;;  %v3661_v5 = vld [vmem:[%s5845_s5 + $0x358] sm:$0xff] }
 0x192   :  { %4209 = vmatpush3.bf16.msra.mxu0 %v4468_v33 }
 0x193   :  { %4258 = vmatprep.subr.bf16.mxu0 %v4469_v36  ;;  %2434 = vperm.xlu1 %4420, %v3575_v8  }
 0x194   :  { %2429 = vperm.xlu0 %4419, %v3574_v10  }
 0x195   :  { %4211 = vmatmul.mubr.bf16.vlgmr.msra.gmra.mxu0 %v4641_v60 }
 0x196   :  { %4259 = vmatpush3.bf16.msra.mxu0 %v4469_v36  ;;  %4214 = vmatprep.mubr.bf16.mxu0 %v4644_v61  ;;  %v5144_v36 = vpop.permute.xlu0 %733 }
 0x197   :  { %4260 = vmatprep.subr.bf16.mxu0 %v4470_v41  ;;  %2444 = vperm.xlu1 %4420, %v3577_v12   ;;  %v3663_v12 = vld [vmem:[%s5845_s5 + $0x368] sm:$0xff] }
 0x198   :  { %2439 = vperm.xlu0 %4419, %v3576_v13  }
 0x19a   :  { %4261 = vmatpush3.bf16.msra.mxu0 %v4470_v41 }
 0x19b   :  { %4262 = vmatprep.subr.bf16.mxu0 %v4471_v44  ;;  %2783 = vperm.xlu1 %4420, %v3607_v16   ;;  %v3662_v16 = vld [vmem:[%s5845_s5 + $0x360] sm:$0xff] }
 0x19c   :  { %2778 = vperm.xlu0 %4419, %v3606_v17  }
 0x19d   :  { %4215 = vmatmul.mubr.bf16.gmra.mxu0 %v4655_v0 }
 0x19e   :  { %4263 = vmatpush3.bf16.msra.mxu0 %v4471_v44  ;;  %4218 = vmatprep.mubr.bf16.mxu0 %v4658_v1  ;;  %v5168_v44 = vpop.permute.xlu0 %738 }
 0x19f   :  { %4264 = vmatprep.subr.bf16.mxu0 %v4472_v47  ;;  %2793 = vperm.xlu1 %4420, %v3609_v19  }
 0x1a0   :  { %2788 = vperm.xlu0 %4419, %v3608_v20   ;;  %v3665_v20 = vld [vmem:[%s5845_s5 + $0x378] sm:$0xff] }
 0x1a2   :  { %4265 = vmatpush3.bf16.msra.mxu0 %v4472_v47 }
 0x1a3   :  { %4266 = vmatprep.subr.bf16.mxu0 %v4473_v50  ;;  %2803 = vperm.xlu1 %4420, %v3611_v22   ;;  %v3664_v22 = vld [vmem:[%s5845_s5 + $0x370] sm:$0xff] }
 0x1a4   :  { %2798 = vperm.xlu0 %4419, %v3610_v23  }
 0x1a5   :  { %4219 = vmatmul.mubr.bf16.gmra.mxu0 %v4678_v7 }
 0x1a6   :  { %4267 = vmatpush3.bf16.msra.mxu0 %v4473_v50  ;;  %4222 = vmatprep.mubr.bf16.mxu0 %v4684_v9  ;;  %v3655_v50 = vld [vmem:[%s5845_s5 + $0x328] sm:$0xff] }
 0x1a7   :  { %4268 = vmatprep.subr.bf16.mxu0 %v4474_v54  ;;  %2813 = vperm.xlu1 %4420, %v3613_v25  }
 0x1a8   :  { %2808 = vperm.xlu0 %4419, %v3612_v26  }
 0x1aa   :  { %4269 = vmatpush3.bf16.msra.mxu0 %v4474_v54 }
 0x1ab   :  { %4270 = vmatprep.subr.bf16.mxu0 %v4475_v57  ;;  %2823 = vperm.xlu1 %4420, %v3615_v28  }
 0x1ac   :  { %2818 = vperm.xlu0 %4419, %v3614_v29  }
 0x1ad   :  { %4223 = vmatmul.mubr.bf16.gmra.mxu0 %v4704_v15 }
 0x1ae   :  { %4271 = vmatpush3.bf16.msra.mxu0 %v4475_v57  ;;  %4274 = vmatprep.mubr.bf16.mxu0 %v4622_v53  ;;  %v5197_v57 = vpop.permute.xlu1 %768 }
 0x1af   :  { %4272 = vmatprep.subr.bf16.mxu0 %v4476_v62  ;;  %2833 = vperm.xlu1 %4420, %v3617_v30  }
 0x1b0   :  { %2828 = vperm.xlu0 %4419, %v3616_v31  }
 0x1b2   :  { %4273 = vmatpush3.bf16.msra.mxu0 %v4476_v62 }
 0x1b3   :  { %4322 = vmatprep.subr.bf16.mxu0 %v4477_v3  ;;  %2843 = vperm.xlu1 %4420, %v3619_v32  }
 0x1b5   :  { %4275 = vmatmul.mubr.bf16.vlgmr.msra.gmra.mxu0 %v4641_v60 }
 0x1b6   :  { %4323 = vmatpush3.bf16.msra.mxu0 %v4477_v3  ;;  %4278 = vmatprep.mubr.bf16.mxu0 %v4644_v61  ;;  %v5211_v3 = vpop.permute.xlu1 %778 }
 0x1b7   :  { %4324 = vmatprep.subr.bf16.mxu0 %v4478_v6  ;;  %2853 = vperm.xlu1 %4420, %v3621_v37  }
 0x1ba   :  { %4325 = vmatpush3.bf16.msra.mxu0 %v4478_v6 }
 0x1bb   :  { %4326 = vmatprep.subr.bf16.mxu0 %v4479_v11 }
 0x1bd   :  { %4279 = vmatmul.mubr.bf16.gmra.mxu0 %v4655_v0 }
 0x1be   :  { %4327 = vmatpush3.bf16.msra.mxu0 %v4479_v11  ;;  %4282 = vmatprep.mubr.bf16.mxu0 %v4658_v1 }
 0x1bf   :  { %4328 = vmatprep.subr.bf16.mxu0 %v4480_v14 }
 0x1c2   :  { %4329 = vmatpush3.bf16.msra.mxu0 %v4480_v14  ;;  %v5226_v14 = vpop.permute.xlu1 %788 }
 0x1c3   :  { %4330 = vmatprep.subr.bf16.mxu0 %v4481_v18 }
 0x1c5   :  { %4283 = vmatmul.mubr.bf16.gmra.mxu0 %v4678_v7 }
 0x1c6   :  { %4331 = vmatpush3.bf16.msra.mxu0 %v4481_v18  ;;  %4286 = vmatprep.mubr.bf16.mxu0 %v4684_v9 }
 0x1c7   :  { %4332 = vmatprep.subr.bf16.mxu0 %v4482_v21 }
 0x1ca   :  { %4333 = vmatpush3.bf16.msra.mxu0 %v4482_v21 }
 0x1cb   :  { %4334 = vmatprep.subr.bf16.mxu0 %v4483_v24 }
 0x1cd   :  { %4287 = vmatmul.mubr.bf16.gmra.mxu0 %v4704_v15 }
 0x1ce   :  { %4335 = vmatpush3.bf16.msra.mxu0 %v4483_v24  ;;  %4338 = vmatprep.mubr.bf16.mxu0 %v4622_v53  ;;  %v3618_v53 = vld [vmem:[%s5845_s5 + $0x2e0] sm:$0xff]  ;;  %v5245_v24 = vpop.permute.xlu1 %798 }
 0x1cf   :  { %4336 = vmatprep.subr.bf16.mxu0 %v4484_v27  ;;  %2838 = vperm.xlu0 %4419, %v3618_v53  }
 0x1d2   :  { %4337 = vmatpush3.bf16.msra.mxu0 %v4484_v27 }
 0x1d5   :  { %v5133_v33 = vpop.f32.mrf.mxu0  ;;  %4339 = vmatmul.mubr.bf16.vlgmr.msra.gmra.mxu0 %v4641_v60  ;;  %v3620_v60 = vld [vmem:[%s5845_s5 + $0x2f0] sm:$0xff] }
 0x1d6   :  { %4342 = vmatprep.mubr.bf16.mxu0 %v4644_v61  ;;  %2848 = vperm.xlu0 %4419, %v3620_v60   ;;  %v3651_v61 = vld [vmem:[%s5845_s5 + $0x308] sm:$0xff] }
 0x1d7   :  { %v5140_v34 = vpop.f32.mrf.mxu0  ;;  %3192 = vperm.xlu1 %4420, %v3651_v61  }
 0x1d9   :  { %v5149_v39 = vpop.f32.mrf.mxu0 }
 0x1da   :  { %3187 = vperm.xlu0 %4419, %v3650_v43   ;;  %v611_v60 = vpack.c.bf16 %v5149_v39, %v5133_v33 }
 0x1db   :  { %v5154_v40 = vpop.f32.mrf.mxu0  ;;  %3202 = vperm.xlu1 %4420, %v3653_v46  }
 0x1dd   :  { %v5159_v41 = vpop.f32.mrf.mxu0  ;;  %4343 = vmatmul.mubr.bf16.gmra.mxu0 %v4655_v0  ;;  %v3652_v0 = vld [vmem:[%s5845_s5 + $0x310] sm:$0xff] }
 0x1de   :  { %4346 = vmatprep.mubr.bf16.mxu0 %v4658_v1  ;;  %v5184_v1 = vpop.permute.xlu0 %753  ;;  %3197 = vperm.xlu0 %4419, %v3652_v0   ;;  %v394_v0 = vunpack.c.h.s8.bf16 %v4967_v38 }
 0x1df   :  { %v5170_v45 = vpop.f32.mrf.mxu0  ;;  %3212 = vperm.xlu1 %4420, %v3655_v50  }
 0x1e1   :  { %v5175_v47 = vpop.f32.mrf.mxu0 }
 0x1e2   :  { %3207 = vperm.xlu0 %4419, %v3654_v52   ;;  %v5202_v58 = vpop.permute.xlu0 %763  ;;  %v613_v29 = vpack.c.bf16 %v5175_v47, %v5159_v41  ;;  %v610_v41 = vpack.c.bf16 %v5154_v40, %v5140_v34  ;;  %v390_v47 = vld [vmem:[%s4554_s24 + $0x8] sm:$0xff]  ;;  %v391_v34 = vld [vmem:[%s4554_s24 + $0x10] sm:$0xff] }
 0x1e3   :  { %v5180_v48 = vpop.f32.mrf.mxu0  ;;  %3222 = vperm.xlu1 %4420, %v3657_v55   ;;  %v395_v50 = vunpack.c.l.s8.bf16 %v390_v47  ;;  %v396_v55 = vunpack.c.h.s8.bf16 %v390_v47 }
 0x1e4   :  { %v612_v32 = vpack.c.bf16 %v5180_v48, %v5170_v45 }
 0x1e5   :  { %v3964_v51 = vpop.f32.mrf.mxu0  ;;  %4347 = vmatmul.mubr.bf16.gmra.mxu0 %v4678_v7  ;;  %v3656_v7 = vld [vmem:[%s5845_s5 + $0x330] sm:$0xff] }
 0x1e6   :  { %4350 = vmatprep.mubr.bf16.mxu0 %v4684_v9  ;;  %3217 = vperm.xlu0 %4419, %v3656_v7   ;;  %v3659_v9 = vld [vmem:[%s5845_s5 + $0x348] sm:$0xff]  ;;  %v5213_v4 = vpop.permute.xlu0 %773 }
 0x1e7   :  { %v579_v54 = vpop.f32.mrf.mxu0  ;;  %3232 = vperm.xlu1 %4420, %v3659_v9  }
 0x1e9   :  { %v3965_v56 = vpop.f32.mrf.mxu0 }
 0x1ea   :  { %3227 = vperm.xlu0 %4419, %v3658_v63   ;;  %v5231_v17 = vpop.permute.xlu0 %783  ;;  %v615_v19 = vpack.c.bf16 %v3965_v56, %v3964_v51  ;;  %v397_v56 = vunpack.c.l.s8.bf16 %v391_v34 }
 0x1eb   :  { %v582_v59 = vpop.f32.mrf.mxu0  ;;  %3242 = vperm.xlu1 %4420, %v3661_v5   ;;  %v398_v5 = vunpack.c.h.s8.bf16 %v391_v34 }
 0x1ec   :  { %v614_v25 = vpack.c.bf16 %v582_v59, %v579_v54 }
 0x1ed   :  { %v3968_v62 = vpop.f32.mrf.mxu0  ;;  %4351 = vmatmul.mubr.bf16.gmra.mxu0 %v4704_v15  ;;  %v3660_v15 = vld [vmem:[%s5845_s5 + $0x350] sm:$0xff] }
 0x1ee   :  { %3237 = vperm.xlu0 %4419, %v3660_v15   ;;  %v5247_v26 = vpop.permute.xlu0 %793 }
 0x1ef   :  { %v595_v2 = vpop.f32.mrf.mxu0  ;;  %3252 = vperm.xlu1 %4420, %v3663_v12   ;;  %v3402_v12 = vld [vmem:[%s4554_s24 + $0x20] sm:$0xff] }
 0x1f1   :  { %v3969_v6 = vpop.f32.mrf.mxu0 }
 0x1f2   :  { %v617_v8 = vpack.c.bf16 %v3969_v6, %v3968_v62  ;;  %3247 = vperm.xlu0 %4419, %v3662_v16   ;;  %v392_v62 = vld [vmem:[%s4554_s24 + $0x18] sm:$0xff] }
 0x1f3   :  { %v598_v10 = vpop.f32.mrf.mxu0  ;;  %3262 = vperm.xlu1 %4420, %v3665_v20   ;;  %v399_v15 = vunpack.c.l.s8.bf16 %v392_v62  ;;  %v400_v20 = vunpack.c.h.s8.bf16 %v392_v62  ;;  %v3446_v62 = vld [vmem:[%s4554_s24 + $0x40] sm:$0xff] }
 0x1f4   :  { %v616_v11 = vpack.c.bf16 %v598_v10, %v595_v2  ;;  %3970 = vmatprep.subr.bf16.mxu1 %v617_v8 }
 0x1f5   :  { %3971 = vmatpush3.bf16.msra.mxu1 %v617_v8  ;;  %v5224_v13 = vpop.f32.mrf.mxu0 }
 0x1f6   :  { %3972 = vmatprep.subr.bf16.mxu1 %v616_v11  ;;  %3257 = vperm.xlu0 %4419, %v3664_v22  }
 0x1f7   :  { %v5233_v18 = vpop.f32.mrf.mxu0 }
 0x1f9   :  { %3973 = vmatpush3.bf16.msra.mxu1 %v616_v11  ;;  %v5238_v21 = vpop.f32.mrf.mxu0 }
 0x1fa   :  { %3974 = vmatprep.subr.bf16.mxu1 %v615_v19 }
 0x1fb   :  { %v5243_v23 = vpop.f32.mrf.mxu0 }
 0x1fd   :  { %3975 = vmatpush3.bf16.msra.mxu1 %v615_v19  ;;  %v4024_v27 = vpop.f32.mrf.mxu0  ;;  %v1019_v19 = vpack.c.bf16 %v5238_v21, %v5224_v13 }
 0x1fe   :  { %3976 = vmatprep.subr.bf16.mxu1 %v614_v25 }
 0x1ff   :  { %v971_v28 = vpop.f32.mrf.mxu0 }
 0x201   :  { %3977 = vmatpush3.bf16.msra.mxu1 %v614_v25  ;;  %v4025_v30 = vpop.f32.mrf.mxu0  ;;  %v848_v25 = vunpack.c.l.s8.bf16 %v3402_v12 }
 0x202   :  { %3978 = vmatprep.subr.bf16.mxu1 %v613_v29  ;;  %v1021_v2 = vpack.c.bf16 %v4025_v30, %v4024_v27  ;;  %v3403_v30 = vld [vmem:[%s4554_s24 + $0x28] sm:$0xff] }
 0x203   :  { %v974_v31 = vpop.f32.mrf.mxu0  ;;  %v850_v21 = vunpack.c.l.s8.bf16 %v3403_v30 }
 0x204   :  { %v1020_v10 = vpack.c.bf16 %v974_v31, %v971_v28  ;;  %v1018_v28 = vpack.c.bf16 %v5243_v23, %v5233_v18  ;;  %v3404_v18 = vld [vmem:[%s4554_s24 + $0x30] sm:$0xff] }
 0x205   :  { %3979 = vmatpush3.bf16.msra.mxu1 %v613_v29  ;;  %v4028_v53 = vpop.f32.mrf.mxu0  ;;  %v852_v47 = vunpack.c.l.s8.bf16 %v3404_v18 }
 0x206   :  { %3980 = vmatprep.subr.bf16.mxu1 %v612_v32 }
 0x207   :  { %v987_v37 = vpop.f32.mrf.mxu0 }
 0x209   :  { %3981 = vmatpush3.bf16.msra.mxu1 %v612_v32  ;;  %v4029_v61 = vpop.f32.mrf.mxu0  ;;  %v849_v32 = vunpack.c.h.s8.bf16 %v3402_v12 }
 0x20a   :  { %3982 = vmatprep.subr.bf16.mxu1 %v611_v60  ;;  %v1023_v54 = vpack.c.bf16 %v4029_v61, %v4028_v53 }
 0x20b   :  { %v990_v43 = vpop.f32.mrf.mxu0 }
 0x20c   :  { %v1022_v59 = vpack.c.bf16 %v990_v43, %v987_v37 }
 0x20d   :  { %3983 = vmatpush3.bf16.msra.mxu1 %v611_v60  ;;  %v4032_v46 = vpop.f32.mrf.mxu0 }
 0x20e   :  { %3984 = vmatprep.subr.bf16.mxu1 %v610_v41 }
 0x20f   :  { %v1003_v45 = vpop.f32.mrf.mxu0 }
 0x211   :  { %3985 = vmatpush3.bf16.msra.mxu1 %v610_v41  ;;  %v4033_v48 = vpop.f32.mrf.mxu0  ;;  %v851_v41 = vunpack.c.h.s8.bf16 %v3403_v30 }
 0x212   :  { %v1025_v51 = vpack.c.bf16 %v4033_v48, %v4032_v46 }
 0x213   :  { %v1006_v33 = vpop.f32.mrf.mxu0 }
 0x214   :  { %v1024_v39 = vpack.c.bf16 %v1006_v33, %v1003_v45  ;;  %3987 = vmatmul.mubr.bf16.vlgmr.msra.gmra.mxu1 %v394_v0  ;;  %4034 = vmatprep.subr.bf16.mxu1 %v1025_v51 }
 0x215   :  { %4035 = vmatpush3.bf16.msra.mxu1 %v1025_v51  ;;  %v5259_v52 = vpop.f32.mrf.mxu0  ;;  %3990 = vmatprep.mubr.bf16.mxu1 %v395_v50  ;;  %v3405_v50 = vld [vmem:[%s4554_s24 + $0x38] sm:$0xff] }
 0x216   :  { %4036 = vmatprep.subr.bf16.mxu1 %v1024_v39 }
 0x217   :  { %v5262_v40 = vpop.f32.mrf.mxu0 }
 0x219   :  { %4037 = vmatpush3.bf16.msra.mxu1 %v1024_v39  ;;  %v5264_v38 = vpop.f32.mrf.mxu0  ;;  %v853_v39 = vunpack.c.h.s8.bf16 %v3404_v18 }
 0x21a   :  { %4038 = vmatprep.subr.bf16.mxu1 %v1023_v54 }
 0x21b   :  { %v5266_v7 = vpop.f32.mrf.mxu0 }
 0x21c   :  { %3991 = vmatmul.mubr.bf16.gmra.mxu1 %v396_v55 }
 0x21d   :  { %4039 = vmatpush3.bf16.msra.mxu1 %v1023_v54  ;;  %v5268_v9 = vpop.f32.mrf.mxu0  ;;  %3994 = vmatprep.mubr.bf16.mxu1 %v397_v56  ;;  %v854_v54 = vunpack.c.l.s8.bf16 %v3405_v50 }
 0x21e   :  { %4040 = vmatprep.subr.bf16.mxu1 %v1022_v59 }
 0x21f   :  { %v5271_v63 = vpop.f32.mrf.mxu0 }
 0x221   :  { %4041 = vmatpush3.bf16.msra.mxu1 %v1022_v59  ;;  %v4089_v6 = vpop.f32.mrf.mxu0 }
 0x222   :  { %4042 = vmatprep.subr.bf16.mxu1 %v1021_v2  ;;  %v1430_v33 = vpack.c.bf16 %v4089_v6, %v5268_v9  ;;  %v855_v9 = vunpack.c.h.s8.bf16 %v3405_v50  ;;  %v3490_v50 = vld [vmem:[%s4554_s24 + $0x60] sm:$0xff] }
 0x223   :  { %v1383_v8 = vpop.f32.mrf.mxu0 }
 0x224   :  { %3995 = vmatmul.mubr.bf16.gmra.mxu1 %v398_v5  ;;  %v1429_v56 = vpack.c.bf16 %v1383_v8, %v5271_v63  ;;  %v1428_v5 = vpack.c.bf16 %v5264_v38, %v5259_v52  ;;  %v1427_v63 = vpack.c.bf16 %v5266_v7, %v5262_v40  ;;  %v3448_v40 = vld [vmem:[%s4554_s24 + $0x50] sm:$0xff] }
 0x225   :  { %4043 = vmatpush3.bf16.msra.mxu1 %v1021_v2  ;;  %v4092_v11 = vpop.f32.mrf.mxu0  ;;  %3998 = vmatprep.mubr.bf16.mxu1 %v399_v15  ;;  %v1257_v15 = vunpack.c.l.s8.bf16 %v3446_v62  ;;  %v1261_v30 = vunpack.c.l.s8.bf16 %v3448_v40 }
 0x226   :  { %4044 = vmatprep.subr.bf16.mxu1 %v1020_v10 }
 0x227   :  { %v1396_v16 = vpop.f32.mrf.mxu0 }
 0x229   :  { %4045 = vmatpush3.bf16.msra.mxu1 %v1020_v10  ;;  %v4093_v22 = vpop.f32.mrf.mxu0 }
 0x22a   :  { %4046 = vmatprep.subr.bf16.mxu1 %v1019_v19  ;;  %v1432_v43 = vpack.c.bf16 %v4093_v22, %v4092_v11  ;;  %v3447_v11 = vld [vmem:[%s4554_s24 + $0x48] sm:$0xff] }
 0x22b   :  { %v1399_v27 = vpop.f32.mrf.mxu0  ;;  %v1259_v38 = vunpack.c.l.s8.bf16 %v3447_v11 }
 0x22c   :  { %3999 = vmatmul.mubr.bf16.gmra.mxu1 %v400_v20  ;;  %v1431_v0 = vpack.c.bf16 %v1399_v27, %v1396_v16  ;;  %v1258_v16 = vunpack.c.h.s8.bf16 %v3446_v62 }
 0x22d   :  { %4047 = vmatpush3.bf16.msra.mxu1 %v1019_v19  ;;  %v4096_v29 = vpop.f32.mrf.mxu0  ;;  %4050 = vmatprep.mubr.bf16.mxu1 %v848_v25 }
 0x22e   :  { %4048 = vmatprep.subr.bf16.mxu1 %v1018_v28 }
 0x22f   :  { %v1412_v31 = vpop.f32.mrf.mxu0 }
 0x231   :  { %4049 = vmatpush3.bf16.msra.mxu1 %v1018_v28  ;;  %v4097_v13 = vpop.f32.mrf.mxu0  ;;  %v1260_v28 = vunpack.c.h.s8.bf16 %v3447_v11 }
 0x232   :  { %v1434_v53 = vpack.c.bf16 %v4097_v13, %v4096_v29 }
 0x233   :  { %v1415_v37 = vpop.f32.mrf.mxu0 }
 0x234   :  { %v1433_v60 = vpack.c.bf16 %v1415_v37, %v1412_v31  ;;  %4051 = vmatmul.mubr.bf16.vlgmr.msra.gmra.mxu1 %v849_v32  ;;  %4098 = vmatprep.subr.bf16.mxu1 %v1434_v53 }
 0x235   :  { %4099 = vmatpush3.bf16.msra.mxu1 %v1434_v53  ;;  %v5279_v61 = vpop.f32.mrf.mxu0  ;;  %4054 = vmatprep.mubr.bf16.mxu1 %v850_v21  ;;  %v3449_v21 = vld [vmem:[%s4554_s24 + $0x58] sm:$0xff] }
 0x236   :  { %4100 = vmatprep.subr.bf16.mxu1 %v1433_v60 }
 0x237   :  { %v5282_v23 = vpop.f32.mrf.mxu0 }
 0x239   :  { %4101 = vmatpush3.bf16.msra.mxu1 %v1433_v60  ;;  %v5284_v46 = vpop.f32.mrf.mxu0  ;;  %v1262_v60 = vunpack.c.h.s8.bf16 %v3448_v40 }
 0x23a   :  { %4102 = vmatprep.subr.bf16.mxu1 %v1432_v43 }
 0x23b   :  { %v5286_v45 = vpop.f32.mrf.mxu0 }
 0x23c   :  { %4055 = vmatmul.mubr.bf16.gmra.mxu1 %v851_v41 }
 0x23d   :  { %4103 = vmatpush3.bf16.msra.mxu1 %v1432_v43  ;;  %v5288_v48 = vpop.f32.mrf.mxu0  ;;  %4058 = vmatprep.mubr.bf16.mxu1 %v852_v47  ;;  %v1263_v43 = vunpack.c.l.s8.bf16 %v3449_v21 }
 0x23e   :  { %4104 = vmatprep.subr.bf16.mxu1 %v1431_v0 }
 0x23f   :  { %v5291_v51 = vpop.f32.mrf.mxu0 }
 0x241   :  { %4105 = vmatpush3.bf16.msra.mxu1 %v1431_v0  ;;  %v4153_v34 = vpop.f32.mrf.mxu0 }
 0x242   :  { %4106 = vmatprep.subr.bf16.mxu1 %v1430_v33  ;;  %v1839_v37 = vpack.c.bf16 %v4153_v34, %v5288_v48  ;;  %v1264_v48 = vunpack.c.h.s8.bf16 %v3449_v21  ;;  %v3534_v21 = vld [vmem:[%s4554_s24 + $0x80] sm:$0xff] }
 0x243   :  { %v1792_v55 = vpop.f32.mrf.mxu0 }
 0x244   :  { %4059 = vmatmul.mubr.bf16.gmra.mxu1 %v853_v39  ;;  %v1838_v47 = vpack.c.bf16 %v1792_v55, %v5291_v51  ;;  %v1837_v39 = vpack.c.bf16 %v5284_v46, %v5279_v61  ;;  %v1836_v51 = vpack.c.bf16 %v5286_v45, %v5282_v23  ;;  %v3492_v23 = vld [vmem:[%s4554_s24 + $0x70] sm:$0xff] }
 0x245   :  { %4107 = vmatpush3.bf16.msra.mxu1 %v1430_v33  ;;  %v4156_v59 = vpop.f32.mrf.mxu0  ;;  %4062 = vmatprep.mubr.bf16.mxu1 %v854_v54  ;;  %v1666_v54 = vunpack.c.l.s8.bf16 %v3490_v50  ;;  %v1670_v11 = vunpack.c.l.s8.bf16 %v3492_v23 }
 0x246   :  { %4108 = vmatprep.subr.bf16.mxu1 %v1429_v56 }
 0x247   :  { %v1805_v2 = vpop.f32.mrf.mxu0 }
 0x249   :  { %4109 = vmatpush3.bf16.msra.mxu1 %v1429_v56  ;;  %v4157_v6 = vpop.f32.mrf.mxu0 }
 0x24a   :  { %4110 = vmatprep.subr.bf16.mxu1 %v1428_v5  ;;  %v1841_v27 = vpack.c.bf16 %v4157_v6, %v4156_v59  ;;  %v3491_v59 = vld [vmem:[%s4554_s24 + $0x68] sm:$0xff] }
 0x24b   :  { %v1808_v10 = vpop.f32.mrf.mxu0  ;;  %v1668_v46 = vunpack.c.l.s8.bf16 %v3491_v59 }
 0x24c   :  { %4063 = vmatmul.mubr.bf16.gmra.mxu1 %v855_v9  ;;  %v1840_v32 = vpack.c.bf16 %v1808_v10, %v1805_v2  ;;  %v1667_v2 = vunpack.c.h.s8.bf16 %v3490_v50  ;;  %v3535_v50 = vld [vmem:[%s4554_s24 + $0x88] sm:$0xff] }
 0x24d   :  { %4111 = vmatpush3.bf16.msra.mxu1 %v1428_v5  ;;  %v4160_v8 = vpop.f32.mrf.mxu0  ;;  %4114 = vmatprep.mubr.bf16.mxu1 %v1257_v15 }
 0x24e   :  { %4112 = vmatprep.subr.bf16.mxu1 %v1427_v63 }
 0x24f   :  { %v1821_v12 = vpop.f32.mrf.mxu0 }
 0x251   :  { %4113 = vmatpush3.bf16.msra.mxu1 %v1427_v63  ;;  %v4161_v52 = vpop.f32.mrf.mxu0  ;;  %v1669_v63 = vunpack.c.h.s8.bf16 %v3491_v59 }
 0x252   :  { %v1843_v19 = vpack.c.bf16 %v4161_v52, %v4160_v8 }
 0x253   :  { %v1824_v20 = vpop.f32.mrf.mxu0 }
 0x254   :  { %v1842_v22 = vpack.c.bf16 %v1824_v20, %v1821_v12  ;;  %4115 = vmatmul.mubr.bf16.vlgmr.msra.gmra.mxu1 %v1258_v16  ;;  %4162 = vmatprep.subr.bf16.mxu1 %v1843_v19 }
 0x255   :  { %4163 = vmatpush3.bf16.msra.mxu1 %v1843_v19  ;;  %v5301_v25 = vpop.f32.mrf.mxu0  ;;  %4118 = vmatprep.mubr.bf16.mxu1 %v1259_v38  ;;  %v3493_v38 = vld [vmem:[%s4554_s24 + $0x78] sm:$0xff] }
 0x256   :  { %4164 = vmatprep.subr.bf16.mxu1 %v1842_v22 }
 0x257   :  { %v5304_v7 = vpop.f32.mrf.mxu0 }
 0x259   :  { %4165 = vmatpush3.bf16.msra.mxu1 %v1842_v22  ;;  %v5306_v29 = vpop.f32.mrf.mxu0  ;;  %v1671_v22 = vunpack.c.h.s8.bf16 %v3492_v23 }
 0x25a   :  { %4166 = vmatprep.subr.bf16.mxu1 %v1841_v27 }
 0x25b   :  { %v5308_v31 = vpop.f32.mrf.mxu0 }
 0x25c   :  { %4119 = vmatmul.mubr.bf16.gmra.mxu1 %v1260_v28 }
 0x25d   :  { %4167 = vmatpush3.bf16.msra.mxu1 %v1841_v27  ;;  %v5310_v13 = vpop.f32.mrf.mxu0  ;;  %4122 = vmatprep.mubr.bf16.mxu1 %v1261_v30  ;;  %v1672_v27 = vunpack.c.l.s8.bf16 %v3493_v38 }
 0x25e   :  { %4168 = vmatprep.subr.bf16.mxu1 %v1840_v32 }
 0x25f   :  { %v5313_v53 = vpop.f32.mrf.mxu0 }
 0x261   :  { %4169 = vmatpush3.bf16.msra.mxu1 %v1840_v32  ;;  %v4217_v18 = vpop.f32.mrf.mxu0 }
 0x262   :  { %4170 = vmatprep.subr.bf16.mxu1 %v1839_v37  ;;  %v2248_v20 = vpack.c.bf16 %v4217_v18, %v5310_v13  ;;  %v2246_v13 = vpack.c.bf16 %v5306_v29, %v5301_v25  ;;  %v2076_v25 = vunpack.c.h.s8.bf16 %v3534_v21 }
 0x263   :  { %v2201_v41 = vpop.f32.mrf.mxu0 }
 0x264   :  { %4123 = vmatmul.mubr.bf16.gmra.mxu1 %v1262_v60  ;;  %v2247_v30 = vpack.c.bf16 %v2201_v41, %v5313_v53  ;;  %v1673_v60 = vunpack.c.h.s8.bf16 %v3493_v38  ;;  %v2245_v53 = vpack.c.bf16 %v5308_v31, %v5304_v7 }
 0x265   :  { %4171 = vmatpush3.bf16.msra.mxu1 %v1839_v37  ;;  %v4220_v0 = vpop.f32.mrf.mxu0  ;;  %4126 = vmatprep.mubr.bf16.mxu1 %v1263_v43  ;;  %v2075_v43 = vunpack.c.l.s8.bf16 %v3534_v21 }
 0x266   :  { %4172 = vmatprep.subr.bf16.mxu1 %v1838_v47 }
 0x267   :  { %v2214_v33 = vpop.f32.mrf.mxu0 }
 0x269   :  { %4173 = vmatpush3.bf16.msra.mxu1 %v1838_v47  ;;  %v4221_v34 = vpop.f32.mrf.mxu0 }
 0x26a   :  { %4174 = vmatprep.subr.bf16.mxu1 %v1837_v39  ;;  %v2250_v10 = vpack.c.bf16 %v4221_v34, %v4220_v0  ;;  %v5346_v0 = vpop.permute.xlu0 %803 }
 0x26b   :  { %v2217_v56 = vpop.f32.mrf.mxu0 }
 0x26c   :  { %4127 = vmatmul.mubr.bf16.gmra.mxu1 %v1264_v48  ;;  %v2249_v16 = vpack.c.bf16 %v2217_v56, %v2214_v33  ;;  %v2077_v48 = vunpack.c.l.s8.bf16 %v3535_v50 }
 0x26d   :  { %4175 = vmatpush3.bf16.msra.mxu1 %v1837_v39  ;;  %v4224_v55 = vpop.f32.mrf.mxu0  ;;  %4178 = vmatprep.mubr.bf16.mxu1 %v1666_v54  ;;  %v5351_v39 = vpop.permute.xlu1 %808 }
 0x26e   :  { %4176 = vmatprep.subr.bf16.mxu1 %v1836_v51  ;;  %v5353_v34 = vpop.permute.xlu0 %1142 }
 0x26f   :  { %v2230_v62 = vpop.f32.mrf.mxu0 }
 0x271   :  { %4177 = vmatpush3.bf16.msra.mxu1 %v1836_v51  ;;  %v4225_v61 = vpop.f32.mrf.mxu0  ;;  %v5357_v31 = vpop.permute.xlu1 %1147 }
 0x272   :  { %v2252_v5 = vpack.c.bf16 %v4225_v61, %v4224_v55  ;;  %v3536_v55 = vld [vmem:[%s4554_s24 + $0x90] sm:$0xff]  ;;  %v2078_v61 = vunpack.c.h.s8.bf16 %v3535_v50 }
 0x273   :  { %v2233_v9 = vpop.f32.mrf.mxu0 }
 0x274   :  { %v2251_v6 = vpack.c.bf16 %v2233_v9, %v2230_v62  ;;  %4179 = vmatmul.mubr.bf16.vlgmr.msra.gmra.mxu1 %v1667_v2  ;;  %4226 = vmatprep.subr.bf16.mxu1 %v2252_v5  ;;  %v5362_v62 = vpop.permute.xlu0 %1152 }
 0x275   :  { %4227 = vmatpush3.bf16.msra.mxu1 %v2252_v5  ;;  %v5323_v15 = vpop.f32.mrf.mxu0  ;;  %4182 = vmatprep.mubr.bf16.mxu1 %v1668_v46  ;;  %v2079_v5 = vunpack.c.l.s8.bf16 %v3536_v55 }
 0x276   :  { %4228 = vmatprep.subr.bf16.mxu1 %v2251_v6 }
 0x277   :  { %v5326_v45 = vpop.f32.mrf.mxu0 }
 0x279   :  { %4229 = vmatpush3.bf16.msra.mxu1 %v2251_v6  ;;  %v5328_v8 = vpop.f32.mrf.mxu0  ;;  %v5368_v6 = vpop.permute.xlu1 %1157 }
 0x27a   :  { %4230 = vmatprep.subr.bf16.mxu1 %v2250_v10 }
 0x27b   :  { %v5330_v12 = vpop.f32.mrf.mxu0 }
 0x27c   :  { %4183 = vmatmul.mubr.bf16.gmra.mxu1 %v1669_v63  ;;  %v5372_v63 = vpop.permute.xlu0 %1162 }
 0x27d   :  { %4231 = vmatpush3.bf16.msra.mxu1 %v2250_v10  ;;  %v5332_v52 = vpop.f32.mrf.mxu0  ;;  %4186 = vmatprep.mubr.bf16.mxu1 %v1670_v11  ;;  %v3537_v11 = vld [vmem:[%s4554_s24 + $0x98] sm:$0xff] }
 0x27e   :  { %4232 = vmatprep.subr.bf16.mxu1 %v2249_v16 }
 0x27f   :  { %v5335_v19 = vpop.f32.mrf.mxu0 }
 0x280   :  { %v5383_v21 = vpop.permute.xlu0 %1172 }
 0x281   :  { %4233 = vmatpush3.bf16.msra.mxu1 %v2249_v16  ;;  %v5338_v40 = vpop.f32.mrf.mxu0 }
 0x282   :  { %4234 = vmatprep.subr.bf16.mxu1 %v2248_v20  ;;  %v2657_v38 = vpack.c.bf16 %v5338_v40, %v5332_v52  ;;  %v3578_v52 = vld [vmem:[%s4554_s24 + $0xa0] sm:$0xff] }
 0x283   :  { %v5340_v28 = vpop.f32.mrf.mxu0 }
 0x284   :  { %4187 = vmatmul.mubr.bf16.gmra.mxu1 %v1671_v22 }
 0x285   :  { %4235 = vmatpush3.bf16.msra.mxu1 %v2248_v20  ;;  %v4284_v32 = vpop.f32.mrf.mxu0  ;;  %4190 = vmatprep.mubr.bf16.mxu1 %v1672_v27  ;;  %v2080_v20 = vunpack.c.h.s8.bf16 %v3536_v55  ;;  %v2081_v27 = vunpack.c.l.s8.bf16 %v3537_v11 }
 0x286   :  { %4236 = vmatprep.subr.bf16.mxu1 %v2247_v30 }
 0x287   :  { %v2623_v37 = vpop.f32.mrf.mxu0 }
 0x289   :  { %4237 = vmatpush3.bf16.msra.mxu1 %v2247_v30  ;;  %v4285_v18 = vpop.f32.mrf.mxu0  ;;  %v5379_v30 = vpop.permute.xlu1 %1167 }
 0x28a   :  { %4238 = vmatprep.subr.bf16.mxu1 %v2246_v13  ;;  %v2659_v2 = vpack.c.bf16 %v4285_v18, %v4284_v32  ;;  %v2655_v18 = vpack.c.bf16 %v5328_v8, %v5323_v15 }
 0x28b   :  { %v2626_v47 = vpop.f32.mrf.mxu0 }
 0x28c   :  { %4191 = vmatmul.mubr.bf16.gmra.mxu1 %v1673_v60  ;;  %v2658_v23 = vpack.c.bf16 %v2626_v47, %v2623_v37  ;;  %v2656_v37 = vpack.c.bf16 %v5340_v28, %v5335_v19  ;;  %v2654_v28 = vpack.c.bf16 %v5330_v12, %v5326_v45 }
 0x28d   :  { %4239 = vmatpush3.bf16.msra.mxu1 %v2246_v13  ;;  %v4288_v41 = vpop.f32.mrf.mxu0  ;;  %4242 = vmatprep.mubr.bf16.mxu1 %v2075_v43  ;;  %v5388_v60 = vpop.permute.xlu1 %1177  ;;  %v2082_v43 = vunpack.c.h.s8.bf16 %v3537_v11 }
 0x28e   :  { %4240 = vmatprep.subr.bf16.mxu1 %v2245_v53 }
 0x28f   :  { %v2639_v33 = vpop.f32.mrf.mxu0 }
 0x291   :  { %4241 = vmatpush3.bf16.msra.mxu1 %v2245_v53  ;;  %v4289_v29 = vpop.f32.mrf.mxu0  ;;  %v2484_v53 = vunpack.c.l.s8.bf16 %v3578_v52 }
 0x292   :  { %v2661_v54 = vpack.c.bf16 %v4289_v29, %v4288_v41  ;;  %v5392_v41 = vpop.permute.xlu0 %1182  ;;  %v2485_v29 = vunpack.c.h.s8.bf16 %v3578_v52 }
 0x293   :  { %v2642_v56 = vpop.f32.mrf.mxu0 }
 0x294   :  { %v2660_v51 = vpack.c.bf16 %v2642_v56, %v2639_v33  ;;  %4243 = vmatmul.mubr.bf16.vlgmr.msra.gmra.mxu1 %v2076_v25  ;;  %4290 = vmatprep.subr.bf16.mxu1 %v2661_v54  ;;  %v5396_v33 = vpop.permute.xlu1 %1187  ;;  %v3579_v25 = vld [vmem:[%s4554_s24 + $0xa8] sm:$0xff] }
 0x295   :  { %4291 = vmatpush3.bf16.msra.mxu1 %v2661_v54  ;;  %v5355_v7 = vpop.f32.mrf.mxu0  ;;  %4246 = vmatprep.mubr.bf16.mxu1 %v2077_v48  ;;  %v2486_v54 = vunpack.c.l.s8.bf16 %v3579_v25 }
 0x296   :  { %4292 = vmatprep.subr.bf16.mxu1 %v2660_v51  ;;  %v5399_v8 = vpop.permute.xlu0 %1192 }
 0x297   :  { %v5360_v59 = vpop.f32.mrf.mxu0 }
 0x298   :  { %v5401_v55 = vpop.permute.xlu1 %1197 }
 0x299   :  { %4293 = vmatpush3.bf16.msra.mxu1 %v2660_v51  ;;  %v5364_v46 = vpop.f32.mrf.mxu0 }
 0x29a   :  { %4294 = vmatprep.subr.bf16.mxu1 %v2659_v2  ;;  %v5403_v12 = vpop.permute.xlu0 %1202 }
 0x29b   :  { %v5366_v9 = vpop.f32.mrf.mxu0 }
 0x29c   :  { %4247 = vmatmul.mubr.bf16.gmra.mxu1 %v2078_v61  ;;  %v5406_v11 = vpop.permute.xlu1 %1207 }
 0x29d   :  { %4295 = vmatpush3.bf16.msra.mxu1 %v2659_v2  ;;  %v5370_v10 = vpop.f32.mrf.mxu0  ;;  %4250 = vmatprep.mubr.bf16.mxu1 %v2079_v5  ;;  %v3580_v2 = vld [vmem:[%s4554_s24 + $0xb0] sm:$0xff]  ;;  %v2487_v5 = vunpack.c.h.s8.bf16 %v3579_v25  ;;  %v3623_v25 = vld [vmem:[%s4554_s24 + $0xc8] sm:$0xff] }
 0x29e   :  { %4296 = vmatprep.subr.bf16.mxu1 %v2658_v23 }
 0x29f   :  { %v5375_v16 = vpop.f32.mrf.mxu0 }
 0x2a1   :  { %4297 = vmatpush3.bf16.msra.mxu1 %v2658_v23  ;;  %v4345_v22 = vpop.f32.mrf.mxu0  ;;  %v2488_v23 = vunpack.c.l.s8.bf16 %v3580_v2 }
 0x2a2   :  { %4298 = vmatprep.subr.bf16.mxu1 %v2657_v38  ;;  %v3066_v52 = vpack.c.bf16 %v4345_v22, %v5370_v10  ;;  %v3064_v10 = vpack.c.bf16 %v5364_v46, %v5355_v7  ;;  %v2895_v7 = vunpack.c.l.s8.bf16 %v3623_v25 }
 0x2a3   :  { %v5381_v32 = vpop.f32.mrf.mxu0 }
 0x2a4   :  { %4251 = vmatmul.mubr.bf16.gmra.mxu1 %v2080_v20 }
 0x2a5   :  { %4299 = vmatpush3.bf16.msra.mxu1 %v2657_v38  ;;  %v4348_v13 = vpop.f32.mrf.mxu0  ;;  %4254 = vmatprep.mubr.bf16.mxu1 %v2081_v27  ;;  %v5408_v38 = vpop.permute.xlu0 %1212  ;;  %v3581_v27 = vld [vmem:[%s4554_s24 + $0xb8] sm:$0xff] }
 0x2a6   :  { %4300 = vmatprep.subr.bf16.mxu1 %v2656_v37  ;;  %v2491_v22 = vunpack.c.h.s8.bf16 %v3581_v27 }
 0x2a7   :  { %v3032_v40 = vpop.f32.mrf.mxu0 }
 0x2a9   :  { %4301 = vmatpush3.bf16.msra.mxu1 %v2656_v37  ;;  %v4349_v47 = vpop.f32.mrf.mxu0  ;;  %v5411_v37 = vpop.permute.xlu1 %1217 }
 0x2aa   :  { %4302 = vmatprep.subr.bf16.mxu1 %v2655_v18  ;;  %v3068_v61 = vpack.c.bf16 %v4349_v47, %v4348_v13  ;;  %v2489_v13 = vunpack.c.h.s8.bf16 %v3580_v2  ;;  %v3065_v47 = vpack.c.bf16 %v5381_v32, %v5375_v16  ;;  %v3063_v16 = vpack.c.bf16 %v5366_v9, %v5360_v59  ;;  %v3624_v9 = vld [vmem:[%s4554_s24 + $0xd0] sm:$0xff] }
 0x2ab   :  { %v3035_v19 = vpop.f32.mrf.mxu0 }
 0x2ac   :  { %4255 = vmatmul.mubr.bf16.gmra.mxu1 %v2082_v43  ;;  %v3067_v20 = vpack.c.bf16 %v3035_v19, %v3032_v40  ;;  %v5414_v43 = vpop.permute.xlu0 %1551 }
 0x2ad   :  { %4303 = vmatpush3.bf16.msra.mxu1 %v2655_v18  ;;  %v4352_v50 = vpop.f32.mrf.mxu0  ;;  %4306 = vmatprep.mubr.bf16.mxu1 %v2484_v53  ;;  %v2490_v18 = vunpack.c.l.s8.bf16 %v3581_v27  ;;  %v5418_v40 = vpop.permute.xlu1 %1556  ;;  %v3622_v53 = vld [vmem:[%s4554_s24 + $0xc0] sm:$0xff]  ;;  %v3625_v27 = vld [vmem:[%s4554_s24 + $0xd8] sm:$0xff] }
 0x2ae   :  { %4304 = vmatprep.subr.bf16.mxu1 %v2654_v28  ;;  %5853 = vst [vmem:[#allocation6_spill] sm:$0xff] %v5418_v40 }
 0x2af   :  { %v3048_v15 = vpop.f32.mrf.mxu0 }
 0x2b0   :  { %v5421_v19 = vpop.permute.xlu0 %1561 }
 0x2b1   :  { %4305 = vmatpush3.bf16.msra.mxu1 %v2654_v28  ;;  %v4353_v48 = vpop.f32.mrf.mxu0  ;;  %v2893_v28 = vunpack.c.l.s8.bf16 %v3622_v53 }
 0x2b2   :  { %v3070_v56 = vpack.c.bf16 %v4353_v48, %v4352_v50  ;;  %v5425_v50 = vpop.permute.xlu1 %1566 }
 0x2b3   :  { %v3051_v51 = vpop.f32.mrf.mxu0  ;;  %5854 = vst [vmem:[#allocation7_spill] sm:$0xff] %v5425_v50 }
 0x2b4   :  { %v3069_v45 = vpack.c.bf16 %v3051_v51, %v3048_v15  ;;  %4307 = vmatmul.mubr.bf16.vlgmr.msra.gmra.mxu1 %v2485_v29  ;;  %4354 = vmatprep.subr.bf16.mxu1 %v3070_v56  ;;  %v5429_v32 = vpop.permute.xlu0 %1571  ;;  %v2894_v15 = vunpack.c.h.s8.bf16 %v3622_v53  ;;  %v2896_v51 = vunpack.c.h.s8.bf16 %v3623_v25 }
 0x2b5   :  { %4355 = vmatpush3.bf16.msra.mxu1 %v3070_v56  ;;  %4310 = vmatprep.mubr.bf16.mxu1 %v2486_v54  ;;  %5855 = vst [vmem:[#allocation8_spill] sm:$0xff] %v5429_v32 }
 0x2b6   :  { %4356 = vmatprep.subr.bf16.mxu1 %v3069_v45  ;;  %v5432_v46 = vpop.permute.xlu1 %1576 }
 0x2b7   :  { %5856 = vst [vmem:[#allocation9_spill] sm:$0xff] %v5432_v46 }
 0x2b8   :  { %v5434_v29 = vpop.permute.xlu0 %1581 }
 0x2b9   :  { %4357 = vmatpush3.bf16.msra.mxu1 %v3069_v45  ;;  %5857 = vst [vmem:[#allocation10_spill] sm:$0xff] %v5434_v29  ;;  %v2897_v45 = vunpack.c.l.s8.bf16 %v3624_v9 }
 0x2ba   :  { %4358 = vmatprep.subr.bf16.mxu1 %v3068_v61  ;;  %v5437_v54 = vpop.permute.xlu1 %1586 }
 0x2bb   :  { %5858 = vst [vmem:[#allocation11_spill] sm:$0xff] %v5437_v54 }
 0x2bc   :  { %4311 = vmatmul.mubr.bf16.gmra.mxu1 %v2487_v5  ;;  %v5439_v2 = vpop.permute.xlu0 %1591 }
 0x2bd   :  { %4359 = vmatpush3.bf16.msra.mxu1 %v3068_v61  ;;  %4314 = vmatprep.mubr.bf16.mxu1 %v2488_v23  ;;  %5859 = vst [vmem:[#allocation12_spill] sm:$0xff] %v5439_v2 }
 0x2be   :  { %4360 = vmatprep.subr.bf16.mxu1 %v3067_v20  ;;  %v5441_v23 = vpop.permute.xlu1 %1596 }
 0x2bf   :  { %5860 = vst [vmem:[#allocation13_spill] sm:$0xff] %v5441_v23 }
 0x2c1   :  { %4361 = vmatpush3.bf16.msra.mxu1 %v3067_v20 }
 0x2c2   :  { %4362 = vmatprep.subr.bf16.mxu1 %v3066_v52 }
 0x2c4   :  { %4315 = vmatmul.mubr.bf16.gmra.mxu1 %v2489_v13 }
 0x2c5   :  { %4363 = vmatpush3.bf16.msra.mxu1 %v3066_v52  ;;  %4318 = vmatprep.mubr.bf16.mxu1 %v2490_v18  ;;  %v5444_v52 = vpop.permute.xlu0 %1601  ;;  %v2898_v18 = vunpack.c.h.s8.bf16 %v3624_v9 }
 0x2c6   :  { %4364 = vmatprep.subr.bf16.mxu1 %v3065_v47  ;;  %5861 = vst [vmem:[#allocation14_spill] sm:$0xff] %v5444_v52  ;;  %v373_v52 = vld [vmem:[#allocation2 + $0x30] sm:$0xff] }
 0x2c9   :  { %4365 = vmatpush3.bf16.msra.mxu1 %v3065_v47  ;;  %v2899_v47 = vunpack.c.l.s8.bf16 %v3625_v27 }
 0x2ca   :  { %4366 = vmatprep.subr.bf16.mxu1 %v3064_v10 }
 0x2cc   :  { %4319 = vmatmul.mubr.bf16.gmra.mxu1 %v2491_v22 }
 0x2cd   :  { %4367 = vmatpush3.bf16.msra.mxu1 %v3064_v10  ;;  %4370 = vmatprep.mubr.bf16.mxu1 %v2893_v28  ;;  %v5446_v10 = vpop.permute.xlu1 %1606  ;;  %v5448_v28 = vpop.permute.xlu0 %1611 }
 0x2ce   :  { %4368 = vmatprep.subr.bf16.mxu1 %v3063_v16  ;;  %5862 = vst [vmem:[#allocation15_spill] sm:$0xff] %v5446_v10  ;;  %5863 = vst [vmem:[#allocation16_spill] sm:$0xff] %v5448_v28 }
 0x2d1   :  { %4369 = vmatpush3.bf16.msra.mxu1 %v3063_v16 }
 0x2d4   :  { %v3988_v48 = vpop.f32.mrf.mxu1  ;;  %4371 = vmatmul.mubr.bf16.vlgmr.msra.gmra.mxu1 %v2894_v15  ;;  %v2900_v15 = vunpack.c.h.s8.bf16 %v3625_v27  ;;  %v375_v27 = vld [vmem:[#allocation2 + $0x58] sm:$0xff] }
 0x2d5   :  { %4374 = vmatprep.mubr.bf16.mxu1 %v2895_v7  ;;  %v5454_v7 = vpop.permute.xlu1 %1616  ;;  %v813_v28 = vmul.f32 %v3988_v48, %v5142_v35 }
 0x2d6   :  { %v652_v59 = vpop.f32.mrf.mxu1  ;;  %5864 = vst [vmem:[#allocation17_spill] sm:$0xff] %v5454_v7 }
 0x2d7   :  { %v811_v7 = vmul.f32 %v5144_v36, %v652_v59  ;;  %v829_v46 = vadd.f32 %v813_v28, %v375_v27  ;;  %v374_v36 = vld [vmem:[#allocation2] sm:$0xff] }
 0x2d8   :  { %v3989_v56 = vpop.f32.mrf.mxu1 }
 0x2d9   :  { %v827_v40 = vadd.f32 %v811_v7, %v373_v52 }
 0x2da   :  { %v655_v61 = vpop.f32.mrf.mxu1 }
 0x2db   :  { %v812_v35 = vmul.f32 %v5168_v44, %v655_v61 }
 0x2dc   :  { %v3992_v5 = vpop.f32.mrf.mxu1  ;;  %4375 = vmatmul.mubr.bf16.gmra.mxu1 %v2896_v51 }
 0x2dd   :  { %4378 = vmatprep.mubr.bf16.mxu1 %v2897_v45  ;;  %v5458_v45 = vpop.permute.xlu0 %1621  ;;  %v828_v52 = vadd.f32 %v812_v35, %v374_v36  ;;  %v378_v35 = vld [vmem:[#allocation2 + $0x68] sm:$0xff] }
 0x2de   :  { %v668_v20 = vpop.f32.mrf.mxu1  ;;  %5865 = vst [vmem:[#allocation18_spill] sm:$0xff] %v5458_v45 }
 0x2df   :  { %v815_v44 = vmul.f32 %v5184_v1, %v668_v20 }
 0x2e0   :  { %v3993_v13 = vpop.f32.mrf.mxu1 }
 0x2e1   :  { %v5469_v10 = vpop.permute.xlu0 %1960 }
 0x2e2   :  { %v671_v53 = vpop.f32.mrf.mxu1  ;;  %5867 = vst [vmem:[#allocation20_spill] sm:$0xff] %v5469_v10 }
 0x2e3   :  { %v816_v20 = vmul.f32 %v5182_v49, %v671_v53 }
 0x2e4   :  { %v3996_v22 = vpop.f32.mrf.mxu1  ;;  %4379 = vmatmul.mubr.bf16.gmra.mxu1 %v2898_v18  ;;  %v5464_v18 = vpop.permute.xlu1 %1626 }
 0x2e5   :  { %4382 = vmatprep.mubr.bf16.mxu1 %v2899_v47  ;;  %5866 = vst [vmem:[#allocation19_spill] sm:$0xff] %v5464_v18  ;;  %v376_v18 = vld [vmem:[#allocation2 + $0x18] sm:$0xff]  ;;  %v5482_v50 = vpop.permute.xlu0 %1970 }
 0x2e6   :  { %v5450_v16 = vpop.f32.mrf.mxu1 }
 0x2e7   :  { %v819_v49 = vmul.f32 %v5213_v4, %v5450_v16 }
 0x2e8   :  { %v5452_v25 = vpop.f32.mrf.mxu1  ;;  %v5476_v32 = vpop.permute.xlu1 %1965 }
 0x2ea   :  { %v5456_v51 = vpop.f32.mrf.mxu1 }
 0x2eb   :  { %v820_v4 = vmul.f32 %v5211_v3, %v5456_v51 }
 0x2ec   :  { %v5460_v9 = vpop.f32.mrf.mxu1  ;;  %4383 = vmatmul.mubr.bf16.gmra.mxu1 %v2900_v15  ;;  %v814_v15 = vmul.f32 %v3989_v56, %v5162_v42  ;;  %v817_v42 = vmul.f32 %v3992_v5, %v5202_v58  ;;  %v818_v58 = vmul.f32 %v3993_v13, %v5197_v57  ;;  %v5498_v5 = vpop.permute.xlu0 %1980  ;;  %v821_v57 = vmul.f32 %v3996_v22, %v5231_v17 }
 0x2ee   :  { %v5462_v23 = vpop.f32.mrf.mxu1  ;;  %v830_v28 = vadd.f32 %v814_v15, %v376_v18 }
 0x2f0   :  { %v5466_v47 = vpop.f32.mrf.mxu1 }
 0x2f2   :  { %v5471_v2 = vpop.f32.mrf.mxu1 }
 0x2f4   :  { %v4052_v45 = vpop.f32.mrf.mxu1 }
 0x2f5   :  { %v1222_v54 = vmul.f32 %v4052_v45, %v5362_v62  ;;  %v379_v45 = vld [vmem:[#allocation2 + $0x8] sm:$0xff] }
 0x2f6   :  { %v1060_v29 = vpop.f32.mrf.mxu1  ;;  %v833_v7 = vadd.f32 %v817_v42, %v379_v45  ;;  %v383_v42 = vld [vmem:[#allocation2 + $0x10] sm:$0xff]  ;;  %v832_v45 = vadd.f32 %v816_v20, %v378_v35  ;;  %v387_v20 = vld [vmem:[#allocation2 + $0x78] sm:$0xff] }
 0x2f7   :  { %v5479_v48 = vadd.f32 %v1222_v54, %v829_v46  ;;  %v1220_v10 = vmul.f32 %v5353_v34, %v1060_v29  ;;  %v5492_v29 = vpop.permute.xlu1 %1975  ;;  %v377_v54 = vld [vmem:[#allocation2 + $0x50] sm:$0xff]  ;;  %v837_v22 = vadd.f32 %v821_v57, %v383_v42  ;;  %v388_v42 = vld [vmem:[#allocation2 + $0x28] sm:$0xff] }
 0x2f8   :  { %v4053_v59 = vpop.f32.mrf.mxu1  ;;  %v831_v1 = vadd.f32 %v815_v44, %v377_v54  ;;  %v384_v54 = vld [vmem:[#allocation2 + $0x38] sm:$0xff] }
 0x2f9   :  { %v5485_v56 = vadd.f32 %v1220_v10, %v827_v40  ;;  %v1223_v62 = vmul.f32 %v4053_v59, %v5368_v6  ;;  %v380_v10 = vld [vmem:[#allocation2 + $0x48] sm:$0xff] }
 0x2fa   :  { %v1063_v27 = vpop.f32.mrf.mxu1  ;;  %v834_v59 = vadd.f32 %v818_v58, %v380_v10 }
 0x2fb   :  { %v5489_v46 = vadd.f32 %v1223_v62, %v830_v28  ;;  %v1221_v34 = vmul.f32 %v5357_v31, %v1063_v27  ;;  %v5508_v28 = vpop.permute.xlu1 %1985  ;;  %v5515_v27 = vpop.permute.xlu0 %1990 }
 0x2fc   :  { %v4056_v61 = vpop.f32.mrf.mxu1 }
 0x2fd   :  { %v5495_v40 = vadd.f32 %v1221_v34, %v828_v52  ;;  %v1226_v6 = vmul.f32 %v4056_v61, %v5383_v21  ;;  %v381_v52 = vld [vmem:[#allocation2 + $0x40] sm:$0xff] }
 0x2fe   :  { %v1076_v18 = vpop.f32.mrf.mxu1 }
 0x2ff   :  { %v5501_v15 = vadd.f32 %v1226_v6, %v833_v7  ;;  %v1224_v31 = vmul.f32 %v5372_v63, %v1076_v18  ;;  %v835_v7 = vadd.f32 %v819_v49, %v381_v52  ;;  %v5527_v58 = vpop.permute.xlu1 %1995  ;;  %v382_v6 = vld [vmem:[#allocation2 + $0x20] sm:$0xff] }
 0x300   :  { %v4057_v36 = vpop.f32.mrf.mxu1  ;;  %v836_v51 = vadd.f32 %v820_v4, %v382_v6 }
 0x301   :  { %v5505_v13 = vadd.f32 %v1224_v31, %v831_v1  ;;  %v1227_v21 = vmul.f32 %v4057_v36, %v5388_v60  ;;  %v822_v60 = vmul.f32 %v5452_v25, %v5226_v14  ;;  %v825_v14 = vmul.f32 %v5460_v9, %v5346_v0  ;;  %v5534_v1 = vpop.permute.xlu0 %2000  ;;  %v385_v36 = vld [vmem:[#allocation2 + $0x60] sm:$0xff] }
 0x302   :  { %v1079_v62 = vpop.f32.mrf.mxu1  ;;  %v826_v0 = vmul.f32 %v5466_v47, %v5351_v39 }
 0x303   :  { %v5512_v53 = vadd.f32 %v1227_v21, %v834_v59  ;;  %v1225_v63 = vmul.f32 %v5379_v30, %v1079_v62  ;;  %v838_v18 = vadd.f32 %v822_v60, %v384_v54  ;;  %v841_v57 = vadd.f32 %v825_v14, %v387_v20  ;;  %v5546_v21 = vpop.permute.xlu1 %2005  ;;  %v5869_v20 = vld [vmem:[#allocation6_spill] sm:$0xff] }
 0x304   :  { %v4060_v17 = vpop.f32.mrf.mxu1  ;;  %v842_v39 = vadd.f32 %v826_v0, %v388_v42 }
 0x305   :  { %v5519_v44 = vadd.f32 %v1225_v63, %v832_v45  ;;  %v1230_v34 = vmul.f32 %v4060_v17, %v5399_v8  ;;  %v5551_v49 = vpop.permute.xlu0 %2010  ;;  %v386_v63 = vld [vmem:[#allocation2 + $0x70] sm:$0xff] }
 0x306   :  { %v1092_v61 = vpop.f32.mrf.mxu1 }
 0x307   :  { %v5524_v16 = vadd.f32 %v1230_v34, %v837_v22  ;;  %v1228_v30 = vmul.f32 %v5392_v41, %v1092_v61  ;;  %v823_v41 = vmul.f32 %v5247_v26, %v5462_v23  ;;  %v824_v26 = vmul.f32 %v5245_v24, %v5471_v2  ;;  %v5555_v54 = vpop.permute.xlu1 %2015 }
 0x308   :  { %v4061_v10 = vpop.f32.mrf.mxu1 }
 0x309   :  { %v5531_v25 = vadd.f32 %v1228_v30, %v835_v7  ;;  %v1231_v8 = vmul.f32 %v4061_v10, %v5401_v55  ;;  %v839_v45 = vadd.f32 %v823_v41, %v385_v36  ;;  %v840_v22 = vadd.f32 %v824_v26, %v386_v63  ;;  %v5868_v10 = vld [vmem:[#allocation7_spill] sm:$0xff] }
 0x30a   :  { %v1095_v3 = vpop.f32.mrf.mxu1 }
 0x30b   :  { %v5538_v31 = vadd.f32 %v1231_v8, %v838_v18  ;;  %v1229_v35 = vmul.f32 %v5396_v33, %v1095_v3  ;;  %v5564_v14 = vpop.permute.xlu1 %2025 }
 0x30c   :  { %v4064_v59 = vpop.f32.mrf.mxu1 }
 0x30d   :  { %v5543_v9 = vadd.f32 %v1229_v35, %v836_v51  ;;  %v1234_v55 = vmul.f32 %v4064_v59, %v5408_v38 }
 0x30e   :  { %v1108_v62 = vpop.f32.mrf.mxu1 }
 0x30f   :  { %v1250_v23 = vadd.f32 %v1234_v55, %v841_v57  ;;  %v1232_v33 = vmul.f32 %v5403_v12, %v1108_v62  ;;  %v5558_v12 = vpop.permute.xlu0 %2020  ;;  %v5574_v57 = vpop.permute.xlu1 %2035 }
 0x310   :  { %v4065_v52 = vpop.f32.mrf.mxu1 }
 0x311   :  { %v1248_v47 = vadd.f32 %v1232_v33, %v839_v45  ;;  %v1235_v17 = vmul.f32 %v4065_v52, %v5411_v37 }
 0x312   :  { %v1111_v38 = vpop.f32.mrf.mxu1 }
 0x313   :  { %v1251_v60 = vadd.f32 %v1235_v17, %v842_v39  ;;  %v1233_v34 = vmul.f32 %v5406_v11, %v1111_v38  ;;  %v5584_v17 = vpop.permute.xlu1 %2374 }
 0x314   :  { %v4116_v61 = vpop.f32.mrf.mxu1 }
 0x315   :  { %v1249_v24 = vadd.f32 %v1233_v34, %v840_v22  ;;  %v1631_v2 = vmul.f32 %v4116_v61, %v5421_v19  ;;  %v5568_v19 = vpop.permute.xlu0 %2030 }
 0x316   :  { %v1469_v7 = vpop.f32.mrf.mxu1 }
 0x317   :  { %v1647_v4 = vadd.f32 %v1631_v2, %v5479_v48  ;;  %v1629_v30 = vmul.f32 %v5414_v43, %v1469_v7  ;;  %v5870_v48 = vld [vmem:[#allocation10_spill] sm:$0xff] }
 0x318   :  { %v4117_v6 = vpop.f32.mrf.mxu1 }
 0x319   :  { %v1645_v37 = vadd.f32 %v1629_v30, %v5485_v56  ;;  %v1632_v18 = vmul.f32 %v4117_v6, %v5868_v10  ;;  %v5871_v56 = vld [vmem:[#allocation8_spill] sm:$0xff]  ;;  %v5578_v62 = vpop.permute.xlu0 %2369 }
 0x31a   :  { %v1472_v11 = vpop.f32.mrf.mxu1 }
 0x31b   :  { %v1648_v8 = vadd.f32 %v1632_v18, %v5489_v46  ;;  %v1630_v3 = vmul.f32 %v5869_v20, %v1472_v11  ;;  %v5872_v46 = vld [vmem:[#allocation11_spill] sm:$0xff]  ;;  %v5594_v11 = vpop.permute.xlu1 %2384 }
 0x31c   :  { %v4120_v51 = vpop.f32.mrf.mxu1 }
 0x31d   :  { %v1646_v41 = vadd.f32 %v1630_v3, %v5495_v40  ;;  %v1635_v35 = vmul.f32 %v4120_v51, %v5870_v48  ;;  %v5873_v40 = vld [vmem:[#allocation9_spill] sm:$0xff]  ;;  %v5588_v61 = vpop.permute.xlu0 %2379 }
 0x31e   :  { %v1485_v43 = vpop.f32.mrf.mxu1 }
 0x31f   :  { %v1651_v36 = vadd.f32 %v1635_v35, %v5501_v15  ;;  %v1633_v59 = vmul.f32 %v5871_v56, %v1485_v43  ;;  %v5874_v15 = vld [vmem:[#allocation14_spill] sm:$0xff]  ;;  %v5879_v56 = vld [vmem:[#allocation16_spill] sm:$0xff] }
 0x320   :  { %v4121_v0 = vpop.f32.mrf.mxu1 }
 0x321   :  { %v1649_v55 = vadd.f32 %v1633_v59, %v5505_v13  ;;  %v1636_v42 = vmul.f32 %v4121_v0, %v5872_v46  ;;  %v5875_v13 = vld [vmem:[#allocation12_spill] sm:$0xff]  ;;  %v5598_v48 = vpop.permute.xlu0 %2389  ;;  %v5880_v46 = vld [vmem:[#allocation19_spill] sm:$0xff] }
 0x322   :  { %v1488_v45 = vpop.f32.mrf.mxu1 }
 0x323   :  { %v1652_v26 = vadd.f32 %v1636_v42, %v5512_v53  ;;  %v1634_v33 = vmul.f32 %v5873_v40, %v1488_v45  ;;  %v5876_v53 = vld [vmem:[#allocation15_spill] sm:$0xff] }
 0x324   :  { %v4124_v63 = vpop.f32.mrf.mxu1 }
 0x325   :  { %v1650_v52 = vadd.f32 %v1634_v33, %v5519_v44  ;;  %v1639_v39 = vmul.f32 %v4124_v63, %v5874_v15  ;;  %v5877_v44 = vld [vmem:[#allocation13_spill] sm:$0xff]  ;;  %v5605_v15 = vpop.permute.xlu0 %2399 }
 0x326   :  { %v1501_v38 = vpop.f32.mrf.mxu1  ;;  %v5881_v33 = vld [vmem:[#allocation17_spill] sm:$0xff] }
 0x327   :  { %v1655_v22 = vadd.f32 %v1639_v39, %v5524_v16  ;;  %v1637_v34 = vmul.f32 %v5875_v13, %v1501_v38  ;;  %v5878_v16 = vld [vmem:[#allocation18_spill] sm:$0xff] }
 0x328   :  { %v4125_v2 = vpop.f32.mrf.mxu1 }
 0x329   :  { %v1653_v7 = vadd.f32 %v1637_v34, %v5531_v25  ;;  %v1640_v30 = vmul.f32 %v4125_v2, %v5876_v53  ;;  %v5882_v34 = vld [vmem:[#allocation20_spill] sm:$0xff] }
 0x32a   :  { %v1504_v6 = vpop.f32.mrf.mxu1 }
 0x32b   :  { %v1656_v10 = vadd.f32 %v1640_v30, %v5538_v31  ;;  %v1638_v18 = vmul.f32 %v5877_v44, %v1504_v6  ;;  %v5602_v31 = vpop.permute.xlu1 %2394 }
 0x32c   :  { %v4128_v20 = vpop.f32.mrf.mxu1 }
 0x32d   :  { %v1654_v3 = vadd.f32 %v1638_v18, %v5543_v9  ;;  %v1643_v51 = vmul.f32 %v4128_v20, %v5878_v16 }
 0x32e   :  { %v1517_v35 = vpop.f32.mrf.mxu1 }
 0x32f   :  { %v1659_v43 = vadd.f32 %v1643_v51, %v1250_v23  ;;  %v1641_v25 = vmul.f32 %v5879_v56, %v1517_v35 }
 0x330   :  { %v4129_v59 = vpop.f32.mrf.mxu1 }
 0x331   :  { %v1657_v0 = vadd.f32 %v1641_v25, %v1248_v47  ;;  %v1644_v42 = vmul.f32 %v4129_v59, %v5880_v46  ;;  %v5611_v47 = vpop.permute.xlu1 %2404 }
 0x332   :  { %v1520_v45 = vpop.f32.mrf.mxu1 }
 0x333   :  { %v1660_v40 = vadd.f32 %v1644_v42, %v1251_v60  ;;  %v1642_v63 = vmul.f32 %v5881_v33, %v1520_v45  ;;  %v5614_v60 = vpop.permute.xlu0 %2409 }
 0x334   :  { %v4180_v9 = vpop.f32.mrf.mxu1 }
 0x335   :  { %v1658_v39 = vadd.f32 %v1642_v63, %v1249_v24  ;;  %v2040_v38 = vmul.f32 %v4180_v9, %v5482_v50  ;;  %v5620_v16 = vpop.permute.xlu1 %2414 }
 0x336   :  { %v1878_v13 = vpop.f32.mrf.mxu1 }
 0x337   :  { %v5608_v23 = vadd.f32 %v2040_v38, %v1647_v4  ;;  %v2038_v2 = vmul.f32 %v5882_v34, %v1878_v13  ;;  %v5625_v56 = vpop.permute.xlu0 %2419 }
 0x338   :  { %v4181_v53 = vpop.f32.mrf.mxu1 }
 0x339   :  { %v2054_v30 = vadd.f32 %v2038_v2, %v1645_v37  ;;  %v2041_v6 = vmul.f32 %v4181_v53, %v5492_v29 }
 0x33a   :  { %v1881_v44 = vpop.f32.mrf.mxu1 }
 0x33b   :  { %v5616_v18 = vadd.f32 %v2041_v6, %v1648_v8  ;;  %v2039_v24 = vmul.f32 %v5476_v32, %v1881_v44  ;;  %v2430_v45 = vpop.permute.xlu0 %2429 }
 0x33c   :  { %v4184_v20 = vpop.f32.mrf.mxu1 }
 0x33d   :  { %v2055_v50 = vadd.f32 %v2039_v24, %v1646_v41  ;;  %v2044_v4 = vmul.f32 %v4184_v20, %v5515_v27  ;;  %v5631_v41 = vpop.permute.xlu1 %2424 }
 0x33e   :  { %v1894_v51 = vpop.f32.mrf.mxu1 }
 0x33f   :  { %v5622_v35 = vadd.f32 %v2044_v4, %v1651_v36  ;;  %v2042_v37 = vmul.f32 %v5498_v5, %v1894_v51  ;;  %v5641_v34 = vpop.permute.xlu0 %2439 }
 0x340   :  { %v4185_v29 = vpop.f32.mrf.mxu1 }
 0x341   :  { %v2058_v25 = vadd.f32 %v2042_v37, %v1649_v55  ;;  %v2045_v8 = vmul.f32 %v4185_v29, %v5527_v58 }
 0x342   :  { %v1897_v59 = vpop.f32.mrf.mxu1 }
 0x343   :  { %v5628_v46 = vadd.f32 %v2045_v8, %v1652_v26  ;;  %v2043_v32 = vmul.f32 %v5508_v28, %v1897_v59  ;;  %v2435_v26 = vpop.permute.xlu1 %2434  ;;  %v5650_v44 = vpop.permute.xlu0 %2778 }
 0x344   :  { %v4188_v27 = vpop.f32.mrf.mxu1 }
 0x345   :  { %v2059_v42 = vadd.f32 %v2043_v32, %v1650_v52  ;;  %v2048_v36 = vmul.f32 %v4188_v27, %v5551_v49 }
 0x346   :  { %v1910_v33 = vpop.f32.mrf.mxu1 }
 0x347   :  { %v5634_v5 = vadd.f32 %v2048_v36, %v1655_v22  ;;  %v2046_v63 = vmul.f32 %v5534_v1, %v1910_v33  ;;  %v5660_v51 = vpop.permute.xlu0 %2788 }
 0x348   :  { %v4189_v55 = vpop.f32.mrf.mxu1 }
 0x349   :  { %v2062_v9 = vadd.f32 %v2046_v63, %v1653_v7  ;;  %v2049_v58 = vmul.f32 %v4189_v55, %v5555_v54  ;;  %v5647_v7 = vpop.permute.xlu1 %2444 }
 0x34a   :  { %v1913_v38 = vpop.f32.mrf.mxu1  ;;  %5884 = vst [vmem:[#allocation6_spill] sm:$0xff] %v5647_v7 }
 0x34b   :  { %v5638_v13 = vadd.f32 %v2049_v58, %v1656_v10  ;;  %v2047_v28 = vmul.f32 %v5546_v21, %v1913_v38 }
 0x34c   :  { %v4192_v52 = vpop.f32.mrf.mxu1 }
 0x34d   :  { %v2063_v49 = vadd.f32 %v2047_v28, %v1654_v3  ;;  %v2052_v2 = vmul.f32 %v4192_v52, %v5568_v19 }
 0x34e   :  { %v1926_v22 = vpop.f32.mrf.mxu1 }
 0x34f   :  { %v5644_v53 = vadd.f32 %v2052_v2, %v1659_v43  ;;  %v2050_v1 = vmul.f32 %v5558_v12, %v1926_v22  ;;  %v5657_v43 = vpop.permute.xlu1 %2783 }
 0x350   :  { %v4193_v54 = vpop.f32.mrf.mxu1 }
 0x351   :  { %5883 = vst [vmem:[#allocation7_spill] sm:$0xff] %v5644_v53  ;;  %v2066_v6 = vadd.f32 %v2050_v1, %v1657_v0  ;;  %v2053_v10 = vmul.f32 %v4193_v54, %v5574_v57 }
 0x352   :  { %v1929_v21 = vpop.f32.mrf.mxu1 }
 0x353   :  { %v5652_v24 = vadd.f32 %v2053_v10, %v1660_v40  ;;  %v2051_v3 = vmul.f32 %v5564_v14, %v1929_v21  ;;  %v5667_v29 = vpop.permute.xlu1 %2793 }
 0x354   :  { %v5655_v20 = vpop.f32.mrf.mxu1 }
 0x355   :  { %5885 = vst [vmem:[#allocation10_spill] sm:$0xff] %v5652_v24  ;;  %v2067_v19 = vadd.f32 %v2051_v3, %v1658_v39  ;;  %v5673_v39 = vpop.permute.xlu0 %2798  ;;  %v2449_v24 = vmul.f32 %v5655_v20, %v5588_v61 }
 0x356   :  { %v2287_v4 = vpop.f32.mrf.mxu1 }
 0x357   :  { %v2447_v12 = vmul.f32 %v5578_v62, %v2287_v4  ;;  %v2465_v53 = vadd.f32 %v2449_v24, %v5608_v23 }
 0x358   :  { %v5662_v0 = vpop.f32.mrf.mxu1 }
 0x359   :  { %v5664_v57 = vadd.f32 %v2447_v12, %v2054_v30  ;;  %v5680_v30 = vpop.permute.xlu1 %2803  ;;  %v5683_v33 = vpop.permute.xlu0 %2808 }
 0x35a   :  { %v2290_v37 = vpop.f32.mrf.mxu1 }
 0x35b   :  { %v2448_v40 = vmul.f32 %v5584_v17, %v2290_v37 }
 0x35c   :  { %v5669_v14 = vpop.f32.mrf.mxu1 }
 0x35d   :  { %v5671_v8 = vadd.f32 %v2448_v40, %v2055_v50  ;;  %v5690_v38 = vpop.permute.xlu1 %2813  ;;  %v5696_v28 = vpop.permute.xlu0 %2818 }
 0x35e   :  { %v2303_v59 = vpop.f32.mrf.mxu1 }
 0x35f   :  { %v2451_v62 = vmul.f32 %v5598_v48, %v2303_v59 }
 0x360   :  { %v5676_v32 = vpop.f32.mrf.mxu1 }
 0x361   :  { %v5678_v27 = vadd.f32 %v2451_v62, %v2058_v25 }
 0x362   :  { %v2306_v36 = vpop.f32.mrf.mxu1 }
 0x363   :  { %v2452_v17 = vmul.f32 %v5602_v31, %v2306_v36 }
 0x364   :  { %v5685_v63 = vpop.f32.mrf.mxu1 }
 0x365   :  { %v5687_v50 = vadd.f32 %v2452_v17, %v2059_v42  ;;  %v5703_v42 = vpop.permute.xlu1 %2823 }
 0x366   :  { %v2319_v55 = vpop.f32.mrf.mxu1  ;;  %5887 = vst [vmem:[#allocation11_spill] sm:$0xff] %v5703_v42 }
 0x367   :  { %v2455_v58 = vmul.f32 %v5614_v60, %v2319_v55  ;;  %v5705_v60 = vpop.permute.xlu0 %2828 }
 0x368   :  { %v5692_v48 = vpop.f32.mrf.mxu1 }
 0x369   :  { %v5694_v25 = vadd.f32 %v2455_v58, %v2062_v9  ;;  %v5711_v4 = vpop.permute.xlu1 %2833 }
 0x36a   :  { %v2322_v52 = vpop.f32.mrf.mxu1 }
 0x36b   :  { %v2456_v31 = vmul.f32 %v5620_v16, %v2322_v52  ;;  %v5715_v37 = vpop.permute.xlu0 %2838 }
 0x36c   :  { %v5699_v2 = vpop.f32.mrf.mxu1  ;;  %5891 = vst [vmem:[#allocation15_spill] sm:$0xff] %v5715_v37 }
 0x36d   :  { %v5701_v22 = vadd.f32 %v2456_v31, %v2063_v49  ;;  %v5717_v59 = vpop.permute.xlu1 %2843 }
 0x36e   :  { %v2335_v1 = vpop.f32.mrf.mxu1  ;;  %5892 = vst [vmem:[#allocation13_spill] sm:$0xff] %v5717_v59 }
 0x36f   :  { %5886 = vst [vmem:[#allocation8_spill] sm:$0xff] %v5701_v22  ;;  %v2459_v54 = vmul.f32 %v2430_v45, %v2335_v1  ;;  %v5719_v62 = vpop.permute.xlu0 %2848 }
 0x370   :  { %v5707_v10 = vpop.f32.mrf.mxu1  ;;  %5893 = vst [vmem:[#allocation18_spill] sm:$0xff] %v5719_v62 }
 0x371   :  { %5888 = vst [vmem:[#allocation9_spill] sm:$0xff] %v5707_v10  ;;  %v5709_v21 = vadd.f32 %v2459_v54, %v2066_v6  ;;  %v5721_v6 = vpop.permute.xlu1 %2853  ;;  %v2450_v10 = vmul.f32 %v5662_v0, %v5594_v11 }
 0x372   :  { %v2338_v9 = vpop.f32.mrf.mxu1  ;;  %5894 = vst [vmem:[#allocation16_spill] sm:$0xff] %v5721_v6 }
 0x373   :  { %5889 = vst [vmem:[#allocation14_spill] sm:$0xff] %v5709_v21  ;;  %v2460_v3 = vmul.f32 %v2435_v26, %v2338_v9  ;;  %v3188_v26 = vpop.permute.xlu0 %3187  ;;  %v2466_v20 = vadd.f32 %v2450_v10, %v5616_v18 }
 0x374   :  { %v4308_v12 = vpop.f32.mrf.mxu1 }
 0x375   :  { %v5713_v16 = vadd.f32 %v2460_v3, %v2067_v19  ;;  %v3193_v19 = vpop.permute.xlu1 %3192  ;;  %v2858_v37 = vmul.f32 %v4308_v12, %v5660_v51  ;;  %v2453_v51 = vmul.f32 %v5669_v14, %v5605_v15  ;;  %v2454_v15 = vmul.f32 %v5676_v32, %v5611_v47 }
 0x376   :  { %v2696_v49 = vpop.f32.mrf.mxu1  ;;  %v2457_v47 = vmul.f32 %v5685_v63, %v5625_v56  ;;  %v2458_v56 = vmul.f32 %v5692_v48, %v5631_v41 }
 0x377   :  { %5890 = vst [vmem:[#allocation12_spill] sm:$0xff] %v5713_v16  ;;  %v3198_v1 = vpop.permute.xlu0 %3197  ;;  %v2469_v18 = vadd.f32 %v2453_v51, %v5622_v35  ;;  %v2470_v35 = vadd.f32 %v2454_v15, %v5628_v46  ;;  %v5906_v15 = vld [vmem:[#allocation8_spill] sm:$0xff] }
 0x378   :  { %v4309_v40 = vpop.f32.mrf.mxu1  ;;  %v2474_v41 = vadd.f32 %v2458_v56, %v5638_v13 }
 0x379   :  { %v3203_v3 = vpop.permute.xlu1 %3202 }
 0x37a   :  { %v2699_v45 = vpop.f32.mrf.mxu1 }
 0x37b   :  { %v3208_v59 = vpop.permute.xlu0 %3207  ;;  %v2857_v0 = vmul.f32 %v5657_v43, %v2699_v45 }
 0x37c   :  { %v4312_v36 = vpop.f32.mrf.mxu1 }
 0x37d   :  { %v3213_v22 = vpop.permute.xlu1 %3212 }
 0x37e   :  { %v2712_v17 = vpop.f32.mrf.mxu1 }
 0x37f   :  { %v3218_v62 = vpop.permute.xlu0 %3217  ;;  %v2860_v43 = vmul.f32 %v5673_v39, %v2712_v17 }
 0x380   :  { %v4313_v55 = vpop.f32.mrf.mxu1 }
 0x381   :  { %v3223_v24 = vpop.permute.xlu1 %3222 }
 0x382   :  { %v2715_v58 = vpop.f32.mrf.mxu1 }
 0x383   :  { %v2861_v39 = vmul.f32 %v5680_v30, %v2715_v58 }
 0x384   :  { %v5723_v52 = vpop.f32.mrf.mxu1 }
 0x385   :  { %v2877_v30 = vadd.f32 %v2861_v39, %v5687_v50  ;;  %v2461_v50 = vmul.f32 %v5699_v2, %v5641_v34  ;;  %v5904_v2 = vld [vmem:[#allocation6_spill] sm:$0xff] }
 0x386   :  { %v5725_v31 = vpop.f32.mrf.mxu1 }
 0x387   :  { %v2864_v63 = vmul.f32 %v5696_v28, %v5725_v31 }
 0x388   :  { %v5727_v54 = vpop.f32.mrf.mxu1 }
 0x389   :  { %v2880_v28 = vadd.f32 %v2864_v63, %v5694_v25 }
 0x38a   :  { %v5729_v9 = vpop.f32.mrf.mxu1 }
 0x38b   :  { %5895 = vst [vmem:[#allocation19_spill] sm:$0xff] %v5729_v9  ;;  %v2859_v9 = vmul.f32 %v4309_v40, %v5667_v29 }
 0x38c   :  { %v5731_v16 = vpop.f32.mrf.mxu1 }
 0x38d   :  { %5896 = vst [vmem:[#allocation17_spill] sm:$0xff] %v5731_v16  ;;  %v2856_v16 = vmul.f32 %v5650_v44, %v2696_v49  ;;  %v2875_v49 = vadd.f32 %v2859_v9, %v2466_v20  ;;  %v2473_v9 = vadd.f32 %v2457_v47, %v5634_v5 }
 0x38e   :  { %v5733_v21 = vpop.f32.mrf.mxu1 }
 0x38f   :  { %5897 = vst [vmem:[#allocation20_spill] sm:$0xff] %v5733_v21  ;;  %v2874_v21 = vadd.f32 %v2858_v37, %v2465_v53  ;;  %v2872_v11 = vadd.f32 %v2856_v16, %v5664_v57  ;;  %v2862_v53 = vmul.f32 %v4312_v36, %v5683_v33  ;;  %v3228_v37 = vpop.permute.xlu0 %3227  ;;  %v2873_v57 = vadd.f32 %v2857_v0, %v5671_v8  ;;  %v3233_v36 = vpop.permute.xlu1 %3232 }
 0x390   :  { %v5737_v6 = vpop.f32.mrf.mxu1  ;;  %v2876_v8 = vadd.f32 %v2860_v43, %v5678_v27  ;;  %v5908_v43 = vld [vmem:[#allocation15_spill] sm:$0xff] }
 0x391   :  { %v2878_v40 = vadd.f32 %v2862_v53, %v2469_v18 }
 0x392   :  { %v5742_v7 = vpop.f32.mrf.mxu1  ;;  %v5899_v31 = vld [vmem:[#allocation19_spill] sm:$0xff] }
 0x393   :  { %5898 = vst [vmem:[#allocation21_spill] sm:$0xff] %v5742_v7 }
 0x394   :  { %v4372_v42 = vpop.f32.mrf.mxu1 }
 0x395   :  { %v3267_v61 = vmul.f32 %v4372_v42, %v3198_v1 }
 0x396   :  { %v3105_v12 = vpop.f32.mrf.mxu1 }
 0x397   :  { %v3283_v7 = vadd.f32 %v3267_v61, %v2874_v21  ;;  %v3265_v23 = vmul.f32 %v3188_v26, %v3105_v12 }
 0x398   :  { %v4373_v44 = vpop.f32.mrf.mxu1 }
 0x399   :  { %3299 = vst [vmem:[#allocation2 + $0x58] sm:$0xff] %v3283_v7  ;;  %v3281_v29 = vadd.f32 %v3265_v23, %v2872_v11  ;;  %v3268_v42 = vmul.f32 %v4373_v44, %v3203_v3  ;;  %v2863_v7 = vmul.f32 %v4313_v55, %v5690_v38  ;;  %v3243_v3 = vpop.permute.xlu1 %3242 }
 0x39a   :  { %v3108_v14 = vpop.f32.mrf.mxu1 }
 0x39b   :  { %3297 = vst [vmem:[#allocation2 + $0x30] sm:$0xff] %v3281_v29  ;;  %v3284_v10 = vadd.f32 %v3268_v42, %v2875_v49  ;;  %v3266_v21 = vmul.f32 %v3193_v19, %v3108_v14  ;;  %v3238_v19 = vpop.permute.xlu0 %3237  ;;  %v2879_v38 = vadd.f32 %v2863_v7, %v2470_v35  ;;  %v5903_v29 = vld [vmem:[#allocation7_spill] sm:$0xff]  ;;  %v5905_v42 = vld [vmem:[#allocation9_spill] sm:$0xff] }
 0x39c   :  { %v4376_v16 = vpop.f32.mrf.mxu1  ;;  %v2477_v34 = vadd.f32 %v2461_v50, %v5903_v29  ;;  %v2462_v25 = vmul.f32 %v5905_v42, %v5904_v2 }
 0x39d   :  { %3300 = vst [vmem:[#allocation2 + $0x18] sm:$0xff] %v3284_v10  ;;  %v3282_v33 = vadd.f32 %v3266_v21, %v2873_v57  ;;  %v3271_v45 = vmul.f32 %v4376_v16, %v3218_v62  ;;  %v2866_v62 = vmul.f32 %v5723_v52, %v5705_v60  ;;  %v2867_v52 = vmul.f32 %v5727_v54, %v5711_v4  ;;  %v5901_v54 = vld [vmem:[#allocation18_spill] sm:$0xff]  ;;  %v3253_v53 = vpop.permute.xlu1 %3252  ;;  %v5907_v57 = vld [vmem:[#allocation20_spill] sm:$0xff] }
 0x39e   :  { %v3121_v32 = vpop.f32.mrf.mxu1 }
 0x39f   :  { %3298 = vst [vmem:[#allocation2] sm:$0xff] %v3282_v33  ;;  %v3287_v17 = vadd.f32 %v3271_v45, %v2878_v40  ;;  %v3269_v26 = vmul.f32 %v3208_v59, %v3121_v32  ;;  %v2882_v60 = vadd.f32 %v2866_v62, %v2473_v9  ;;  %v3248_v51 = vpop.permute.xlu0 %3247  ;;  %v2883_v4 = vadd.f32 %v2867_v52, %v2474_v41  ;;  %v5909_v33 = vld [vmem:[#allocation16_spill] sm:$0xff]  ;;  %v5910_v32 = vld [vmem:[#allocation10_spill] sm:$0xff] }
 0x3a0   :  { %v4377_v1 = vpop.f32.mrf.mxu1  ;;  %v2871_v45 = vmul.f32 %v5737_v6, %v5909_v33 }
 0x3a1   :  { %3303 = vst [vmem:[#allocation2 + $0x8] sm:$0xff] %v3287_v17  ;;  %v3285_v55 = vadd.f32 %v3269_v26, %v2876_v8  ;;  %v3272_v46 = vmul.f32 %v4377_v1, %v3223_v24  ;;  %v5902_v24 = vld [vmem:[#allocation17_spill] sm:$0xff]  ;;  %v2478_v8 = vadd.f32 %v2462_v25, %v5910_v32  ;;  %v5911_v17 = vld [vmem:[#allocation14_spill] sm:$0xff] }
 0x3a2   :  { %v3124_v27 = vpop.f32.mrf.mxu1  ;;  %v2870_v44 = vmul.f32 %v5902_v24, %v5901_v54  ;;  %v5913_v1 = vld [vmem:[#allocation13_spill] sm:$0xff] }
 0x3a3   :  { %3301 = vst [vmem:[#allocation2 + $0x50] sm:$0xff] %v3285_v55  ;;  %v3288_v59 = vadd.f32 %v3272_v46, %v2879_v38  ;;  %v3270_v58 = vmul.f32 %v3213_v22, %v3124_v27  ;;  %v5900_v22 = vld [vmem:[#allocation11_spill] sm:$0xff]  ;;  %v3258_v16 = vpop.permute.xlu0 %3257  ;;  %v3263_v55 = vpop.permute.xlu1 %3262  ;;  %v2887_v9 = vadd.f32 %v2871_v45, %v2478_v8 }
 0x3a4   :  { %v4380_v61 = vpop.f32.mrf.mxu1  ;;  %v2865_v12 = vmul.f32 %v5900_v22, %v5899_v31  ;;  %v2886_v7 = vadd.f32 %v2870_v44, %v2477_v34 }
 0x3a5   :  { %3304 = vst [vmem:[#allocation2 + $0x48] sm:$0xff] %v3288_v59  ;;  %v3286_v5 = vadd.f32 %v3270_v58, %v2877_v30  ;;  %v3275_v20 = vmul.f32 %v4380_v61, %v3238_v19  ;;  %v5912_v19 = vld [vmem:[#allocation21_spill] sm:$0xff]  ;;  %v5914_v30 = vld [vmem:[#allocation12_spill] sm:$0xff] }
 0x3a6   :  { %v3137_v48 = vpop.f32.mrf.mxu1  ;;  %v2881_v14 = vadd.f32 %v2865_v12, %v5906_v15  ;;  %v2869_v38 = vmul.f32 %v5913_v1, %v5912_v19 }
 0x3a7   :  { %3302 = vst [vmem:[#allocation2 + $0x68] sm:$0xff] %v3286_v5  ;;  %v3291_v11 = vadd.f32 %v3275_v20, %v2882_v60  ;;  %v3273_v0 = vmul.f32 %v3228_v37, %v3137_v48  ;;  %v2868_v37 = vmul.f32 %v5908_v43, %v5907_v57 }
 0x3a8   :  { %v4381_v23 = vpop.f32.mrf.mxu1  ;;  %v2885_v63 = vadd.f32 %v2869_v38, %v5914_v30 }
 0x3a9   :  { %3307 = vst [vmem:[#allocation2 + $0x10] sm:$0xff] %v3291_v11  ;;  %v3289_v49 = vadd.f32 %v3273_v0, %v2880_v28  ;;  %v3276_v13 = vmul.f32 %v4381_v23, %v3243_v3  ;;  %v2884_v26 = vadd.f32 %v2868_v37, %v5911_v17 }
 0x3aa   :  { %v3140_v18 = vpop.f32.mrf.mxu1 }
 0x3ab   :  { %3305 = vst [vmem:[#allocation2 + $0x40] sm:$0xff] %v3289_v49  ;;  %v3292_v10 = vadd.f32 %v3276_v13, %v2883_v4  ;;  %v3274_v21 = vmul.f32 %v3233_v36, %v3140_v18 }
 0x3ac   :  { %v4384_v40 = vpop.f32.mrf.mxu1 }
 0x3ad   :  { %3308 = vst [vmem:[#allocation2 + $0x38] sm:$0xff] %v3292_v10  ;;  %v3290_v35 = vadd.f32 %v3274_v21, %v2881_v14  ;;  %v3279_v47 = vmul.f32 %v4384_v40, %v3258_v16 }
 0x3ae   :  { %v3153_v39 = vpop.f32.mrf.mxu1 }
 0x3af   :  { %3306 = vst [vmem:[#allocation2 + $0x20] sm:$0xff] %v3290_v35  ;;  %v3295_v62 = vadd.f32 %v3279_v47, %v2886_v7  ;;  %v3277_v36 = vmul.f32 %v3248_v51, %v3153_v39 }
 0x3b0   :  { %v4385_v46 = vpop.f32.mrf.mxu1 }
 0x3b1   :  { %3311 = vst [vmem:[#allocation2 + $0x78] sm:$0xff] %v3295_v62  ;;  %v3293_v56 = vadd.f32 %v3277_v36, %v2884_v26  ;;  %v3280_v6 = vmul.f32 %v4385_v46, %v3263_v55 }
 0x3b2   :  { %v3156_v27 = vpop.f32.mrf.mxu1 }
 0x3b3   :  { %3309 = vst [vmem:[#allocation2 + $0x60] sm:$0xff] %v3293_v56  ;;  %v3296_v59 = vadd.f32 %v3280_v6, %v2887_v9  ;;  %v3278_v58 = vmul.f32 %v3253_v53, %v3156_v27 }
 0x3b5   :  { %3312 = vst [vmem:[#allocation2 + $0x28] sm:$0xff] %v3296_v59  ;;  %v3294_v3 = vadd.f32 %v3278_v58, %v2885_v63 }
 0x3b7   :  { %3310 = vst [vmem:[#allocation2 + $0x70] sm:$0xff] %v3294_v3 }
 0x3b8 PF:  { %v3316_v61 = vld [vmem:[#allocation2 + $0x30] sm:$0xff]  ;;  %v3317_v60 = vld [vmem:[#allocation2] sm:$0xff]  ;;  %v3318_v52 = vld [vmem:[#allocation2 + $0x58] sm:$0xff] }
 0x3b9   :  { %3332 = vst [vmem:[%s5848_s9] sm:$0xff] %v3316_v61  ;;  %3333 = vst [vmem:[%s5848_s9 + $0x8] sm:$0xff] %v3317_v60  ;;  %v3319_v5 = vld [vmem:[#allocation2 + $0x18] sm:$0xff]  ;;  %v3322_v41 = vld [vmem:[#allocation2 + $0x8] sm:$0xff] }
 0x3ba   :  { %3334 = vst [vmem:[%s5848_s9 + $0x10] sm:$0xff] %v3318_v52  ;;  %v3320_v20 = vld [vmem:[#allocation2 + $0x50] sm:$0xff]  ;;  %3335 = vst [vmem:[%s5848_s9 + $0x18] sm:$0xff] %v3319_v5  ;;  %v3324_v48 = vld [vmem:[#allocation2 + $0x40] sm:$0xff] }
 0x3bb   :  { %3336 = vst [vmem:[%s5848_s9 + $0x20] sm:$0xff] %v3320_v20  ;;  %3338 = vst [vmem:[%s5848_s9 + $0x30] sm:$0xff] %v3322_v41  ;;  %v3325_v28 = vld [vmem:[#allocation2 + $0x20] sm:$0xff]  ;;  %v3326_v31 = vld [vmem:[#allocation2 + $0x10] sm:$0xff] }
 0x3bc   :  { %v3323_v50 = vld [vmem:[#allocation2 + $0x48] sm:$0xff]  ;;  %3340 = vst [vmem:[%s5848_s9 + $0x40] sm:$0xff] %v3324_v48  ;;  %v3327_v22 = vld [vmem:[#allocation2 + $0x38] sm:$0xff]  ;;  %3341 = vst [vmem:[%s5848_s9 + $0x48] sm:$0xff] %v3325_v28 }
 0x3bd   :  { %3339 = vst [vmem:[%s5848_s9 + $0x38] sm:$0xff] %v3323_v50  ;;  %3342 = vst [vmem:[%s5848_s9 + $0x50] sm:$0xff] %v3326_v31  ;;  %v3328_v12 = vld [vmem:[#allocation2 + $0x60] sm:$0xff]  ;;  %v3330_v0 = vld [vmem:[#allocation2 + $0x78] sm:$0xff] }
 0x3be   :  { %v3321_v51 = vld [vmem:[#allocation2 + $0x68] sm:$0xff]  ;;  %3343 = vst [vmem:[%s5848_s9 + $0x58] sm:$0xff] %v3327_v22  ;;  %v3329_v11 = vld [vmem:[#allocation2 + $0x70] sm:$0xff]  ;;  %3344 = vst [vmem:[%s5848_s9 + $0x60] sm:$0xff] %v3328_v12 }
 0x3bf   :  { %3337 = vst [vmem:[%s5848_s9 + $0x28] sm:$0xff] %v3321_v51  ;;  %3345 = vst [vmem:[%s5848_s9 + $0x68] sm:$0xff] %v3329_v11  ;;  %v3331_v23 = vld [vmem:[#allocation2 + $0x28] sm:$0xff] }
 0x3c0   :  { %3346 = vst [vmem:[%s5848_s9 + $0x70] sm:$0xff] %v3330_v0  ;;  %3347 = vst [vmem:[%s5848_s9 + $0x78] sm:$0xff] %v3331_v23 }

</bundles_post_ra>
